<compile_context>
chip_gen: v6e
topology: v6e:2x2x1
jax: 0.10.0
libtpu: 0.0.40
codegen_flags: <defaults>
</compile_context>

<pallas_src>
import jax
import jax.numpy as jnp
from jax.experimental import pallas as pl
from jax.experimental.pallas import tpu as pltpu


def _down_conv_kernel(x_ref, w1_ref, b1_ref, w2_ref, b2_ref,
                      c2_ref, p_ref, xpad_ref, c1pad_ref):
    # x_ref   : (nb, H, W, Cin)        bf16 input tile (unpadded)
    # w1_ref  : (3, 3, Cin, Cout)      bf16 HWIO weights, conv1
    # b1_ref  : (1, Cout)              f32 bias, conv1
    # w2_ref  : (3, 3, Cout, Cout)     bf16 HWIO weights, conv2
    # b2_ref  : (1, Cout)              f32 bias, conv2
    # c2_ref  : (nb, H, W, Cout)       f32 out: relu(conv2)
    # p_ref   : (nb, H//2, W//2, Cout) f32 out: 2x2 maxpool of relu(conv2)
    # xpad_ref  : (nb, H+2, W+2, Cin)  bf16 VMEM scratch (zero halo for conv1)
    # c1pad_ref : (nb, H+2, W+2, Cout) bf16 VMEM scratch (zero halo for conv2)
    nb, H, W, cin = x_ref.shape
    cout = c2_ref.shape[-1]
    M = nb * H * W

    def fill_padded(dst_ref, interior, c):
        # Zero only the 1-pixel halo; the interior is fully overwritten below.
        zrow = jnp.zeros((nb, 1, W + 2, c), dst_ref.dtype)
        zcol = jnp.zeros((nb, H + 2, 1, c), dst_ref.dtype)
        dst_ref[:, 0:1, :, :] = zrow
        dst_ref[:, H + 1:H + 2, :, :] = zrow
        dst_ref[:, :, 0:1, :] = zcol
        dst_ref[:, :, W + 1:W + 2, :] = zcol
        dst_ref[:, 1:H + 1, 1:W + 1, :] = interior

    def conv3x3_relu(src_ref, w_ref, b_ref, c_in):
        # 3x3 "SAME" conv over a zero-padded NHWC scratch as 9 (M, c_in)@(c_in, cout)
        # bf16 MXU matmuls into a shared f32 accumulator.  The three kw-shifted
        # (sublane-offset) views are built once (already bf16); the kh slice is a
        # cheap major-dim slice.
        shifted = [src_ref[:, :, kw:kw + W, :] for kw in range(3)]  # 3 x (nb,H+2,W,c_in)
        acc = jnp.zeros((M, cout), jnp.float32)
        for kh in range(3):
            for kw in range(3):
                patch = shifted[kw][:, kh:kh + H, :, :].reshape(M, c_in)
                acc = acc + jnp.dot(patch, w_ref[kh, kw],
                                    preferred_element_type=jnp.float32)
        return jnp.maximum(acc + b_ref[...], 0.0)                   # (M, cout) f32

    # ---- conv1: zero-halo the input tile in VMEM (bf16), conv + ReLU ----
    fill_padded(xpad_ref, x_ref[...], cin)
    c1 = conv3x3_relu(xpad_ref, w1_ref, b1_ref, cin)

    # ---- conv1 activation stays in VMEM (bf16), with its own zero halo ----
    fill_padded(c1pad_ref, c1.reshape(nb, H, W, cout).astype(jnp.bfloat16), cout)

    # ---- conv2 + ReLU ----
    c2 = conv3x3_relu(c1pad_ref, w2_ref, b2_ref, cout).reshape(nb, H, W, cout)
    c2_ref[...] = c2

    # ---- 2x2 maxpool, stride 2 (rows, then columns) ----
    t = c2.reshape(nb, H // 2, 2, W, cout).max(axis=2)
    p_ref[...] = t.reshape(nb, H // 2, W // 2, 2, cout).max(axis=3)


def _pick_batch_block(N, H, W, Cin, Cout, budget_bytes=8 << 20):
    """Largest batch fold that fits a modest VMEM budget, keeping >=2 grid steps."""
    per = ((H + 2) * (W + 2) * (Cin + Cout) * 2      # bf16 padded scratch
           + 2 * H * W * Cin * 2                     # input block (double-buffered)
           + 2 * H * W * Cout * 4                    # conv2 output block (double-buffered)
           + 2 * (H // 2) * (W // 2) * Cout * 4      # pool output block (double-buffered)
           + 2 * H * W * Cout * 4)                   # f32 accumulator live values
    cap = max(1, budget_bytes // max(per, 1))
    if N > 1:
        cap = min(cap, max(1, N // 2))               # leave >=2 steps for megacore
    nb = 1
    for cand in range(1, min(N, cap) + 1):
        if N % cand == 0:
            nb = cand
    return nb


def down_conv_nhwc(x_nhwc, w1_hwio, b1, w2_hwio, b2, *, batch_block=None):
    """Fused DownConv on an NHWC input. Returns (relu(conv2), 2x2 maxpool) in NHWC."""
    N, H, W, Cin = x_nhwc.shape
    Cout = w1_hwio.shape[-1]
    # PyTorch MaxPool2d(2) floors odd spatial dims; this kernel requires even H, W.
    assert H % 2 == 0 and W % 2 == 0, "even spatial dims required"
    if batch_block is None:
        nb = _pick_batch_block(N, H, W, Cin, Cout)
    else:
        nb = batch_block if (batch_block >= 1 and N % batch_block == 0) else 1
    grid = (N // nb,)

    x_b = x_nhwc.astype(jnp.bfloat16)        # fuses with any producing transpose
    w1_b = w1_hwio.astype(jnp.bfloat16)
    w2_b = w2_hwio.astype(jnp.bfloat16)
    b1_r = b1.reshape(1, Cout).astype(jnp.float32)
    b2_r = b2.reshape(1, Cout).astype(jnp.float32)

    conv2, pool = pl.pallas_call(
        _down_conv_kernel,
        out_shape=(jax.ShapeDtypeStruct((N, H, W, Cout), jnp.float32),
                   jax.ShapeDtypeStruct((N, H // 2, W // 2, Cout), jnp.float32)),
        grid=grid,
        in_specs=[
            pl.BlockSpec((nb, H, W, Cin), lambda n: (n, 0, 0, 0)),
            pl.BlockSpec((3, 3, Cin, Cout), lambda n: (0, 0, 0, 0)),
            pl.BlockSpec((1, Cout), lambda n: (0, 0)),
            pl.BlockSpec((3, 3, Cout, Cout), lambda n: (0, 0, 0, 0)),
            pl.BlockSpec((1, Cout), lambda n: (0, 0)),
        ],
        out_specs=(pl.BlockSpec((nb, H, W, Cout), lambda n: (n, 0, 0, 0)),
                   pl.BlockSpec((nb, H // 2, W // 2, Cout),
                                lambda n: (n, 0, 0, 0))),
        scratch_shapes=[pltpu.VMEM((nb, H + 2, W + 2, Cin), jnp.bfloat16),
                        pltpu.VMEM((nb, H + 2, W + 2, Cout), jnp.bfloat16)],
        compiler_params=pltpu.CompilerParams(
            dimension_semantics=("parallel",)),   # independent batch -> megacore
    )(x_b, w1_b, b1_r, w2_b, b2_r)
    return conv2, pool


def down_conv(x_nchw, w1, b1, w2, b2, *, batch_block=None):
    """PyTorch-parity entry point: NCHW input, OIHW conv weights, NCHW outputs."""
    x = jnp.transpose(x_nchw, (0, 2, 3, 1))             # NHWC
    w1_hwio = jnp.transpose(w1, (2, 3, 1, 0))            # (3, 3, Cin, Cout)
    w2_hwio = jnp.transpose(w2, (2, 3, 1, 0))            # (3, 3, Cout, Cout)
    conv2, pool = down_conv_nhwc(x, w1_hwio, b1, w2_hwio, b2,
                                 batch_block=batch_block)
    return jnp.transpose(conv2, (0, 3, 1, 2)), jnp.transpose(pool, (0, 3, 1, 2))


def _ref_forward(x, w1, b1, w2, b2):
    """Pure-JAX reference with the kernel's numerics (bf16 matmuls, f32 accumulate)."""
    dn = ('NCHW', 'OIHW', 'NCHW')

    def conv(inp, w):
        return jax.lax.conv_general_dilated(
            inp.astype(jnp.bfloat16), w.astype(jnp.bfloat16), (1, 1), 'SAME',
            dimension_numbers=dn, preferred_element_type=jnp.float32)

    c1 = jnp.maximum(conv(x, w1) + b1[None, :, None, None], 0.0)
    c2 = jnp.maximum(conv(c1, w2) + b2[None, :, None, None], 0.0)
    pool = jax.lax.reduce_window(c2, -jnp.inf, jax.lax.max,
                                 (1, 1, 2, 2), (1, 1, 2, 2), 'VALID')
    return c2, pool


def _ref_forward_f32(x, w1, b1, w2, b2):
    """Full-f32 PyTorch-equivalent forward (for a loose sanity check)."""
    dn = ('NCHW', 'OIHW', 'NCHW')
    c1 = jax.lax.conv_general_dilated(x, w1, (1, 1), 'SAME', dimension_numbers=dn)
    c1 = jnp.maximum(c1 + b1[None, :, None, None], 0.0)
    c2 = jax.lax.conv_general_dilated(c1, w2, (1, 1), 'SAME', dimension_numbers=dn)
    c2 = jnp.maximum(c2 + b2[None, :, None, None], 0.0)
    pool = jax.lax.reduce_window(c2, -jnp.inf, jax.lax.max,
                                 (1, 1, 2, 2), (1, 1, 2, 2), 'VALID')
    return c2, pool


if __name__ == "__main__":
    key = jax.random.PRNGKey(0)
    k_x, k_w1, k_b1, k_w2, k_b2 = jax.random.split(key, 5)

    N, Cin, Cout, H, W = 2, 4, 8, 16, 16   # small shapes consistent with the module
    x = jax.random.normal(k_x, (N, Cin, H, W), dtype=jnp.float32)        # NCHW
    # nn.Conv2d weight layout: (out_channels, in_channels, 3, 3)
    w1 = jax.random.normal(k_w1, (Cout, Cin, 3, 3), dtype=jnp.float32) * 0.1
    b1 = jax.random.normal(k_b1, (Cout,), dtype=jnp.float32) * 0.1
    w2 = jax.random.normal(k_w2, (Cout, Cout, 3, 3), dtype=jnp.float32) * 0.1
    b2 = jax.random.normal(k_b2, (Cout,), dtype=jnp.float32) * 0.1

    conv2, pool = down_conv(x, w1, b1, w2, b2)
    jax.block_until_ready((conv2, pool))

    assert conv2.shape == (N, Cout, H, W)
    assert pool.shape == (N, Cout, H // 2, W // 2)

    # Tight check vs. a reference with identical numerics (bf16 in, f32 accumulate).
    c2_ref, p_ref = _ref_forward(x, w1, b1, w2, b2)
    assert jnp.allclose(conv2, c2_ref, rtol=2e-3, atol=2e-3)
    assert jnp.allclose(pool, p_ref, rtol=2e-3, atol=2e-3)

    # Loose sanity check vs. the full-f32 PyTorch-equivalent forward (bf16 tolerance).
    c2_f32, p_f32 = _ref_forward_f32(x, w1, b1, w2, b2)
    assert jnp.allclose(conv2, c2_f32, rtol=5e-2, atol=5e-2)
    assert jnp.allclose(pool, p_f32, rtol=5e-2, atol=5e-2)

    print("KERNEL_OK")
</pallas_src>

<mosaic_0001>
module attributes {stable_mosaic.version = 11 : i64} {
  func.func @_down_conv_kernel(%arg0: i32, %arg1: memref<1x16x16x4xbf16, #tpu.memory_space<vmem>>, %arg2: memref<3x3x4x8xbf16, #tpu.memory_space<vmem>>, %arg3: memref<1x8xf32, #tpu.memory_space<vmem>>, %arg4: memref<3x3x8x8xbf16, #tpu.memory_space<vmem>>, %arg5: memref<1x8xf32, #tpu.memory_space<vmem>>, %arg6: memref<1x16x16x8xf32, #tpu.memory_space<vmem>>, %arg7: memref<1x8x8x8xf32, #tpu.memory_space<vmem>>, %arg8: memref<1x18x18x4xbf16, #tpu.memory_space<vmem>>, %arg9: memref<1x18x18x8xbf16, #tpu.memory_space<vmem>>) attributes {dimension_semantics = [#tpu.dimension_semantics<parallel>], iteration_bounds = array<i64: 2>, scalar_prefetch = 0 : i64, scratch_operands = 2 : i64, tpu.core_type = #tpu.core_type<tc>, window_params = [{transform_indices = @transform_0, window_bounds = array<i64: 1, 16, 16, 4>}, {pipeline_mode = #tpu.pipeline_mode<synchronous>, transform_indices = @transform_1, window_bounds = array<i64: 3, 3, 4, 8>}, {pipeline_mode = #tpu.pipeline_mode<synchronous>, transform_indices = @transform_2, window_bounds = array<i64: 1, 8>}, {pipeline_mode = #tpu.pipeline_mode<synchronous>, transform_indices = @transform_3, window_bounds = array<i64: 3, 3, 8, 8>}, {pipeline_mode = #tpu.pipeline_mode<synchronous>, transform_indices = @transform_4, window_bounds = array<i64: 1, 8>}, {transform_indices = @transform_5, window_bounds = array<i64: 1, 16, 16, 8>}, {transform_indices = @transform_6, window_bounds = array<i64: 1, 8, 8, 8>}]} {
    %c0 = arith.constant 0 : index
    %c0_0 = arith.constant 0 : index
    %c0_1 = arith.constant 0 : index
    %c0_2 = arith.constant 0 : index
    %0 = vector.load %arg1[%c0, %c0_0, %c0_1, %c0_2] : memref<1x16x16x4xbf16, #tpu.memory_space<vmem>>, vector<1x16x16x4xbf16>
    %cst = arith.constant 0.000000e+00 : bf16
    %1 = vector.broadcast %cst : bf16 to vector<1x1x18x4xbf16>
    %cst_3 = arith.constant 0.000000e+00 : bf16
    %2 = vector.broadcast %cst_3 : bf16 to vector<1x18x1x4xbf16>
    %c0_4 = arith.constant 0 : index
    %c0_5 = arith.constant 0 : index
    %c0_6 = arith.constant 0 : index
    %c0_7 = arith.constant 0 : index
    %3 = vector.load %arg8[%c0_4, %c0_5, %c0_6, %c0_7] : memref<1x18x18x4xbf16, #tpu.memory_space<vmem>>, vector<1x1x18x4xbf16>
    tpu.vector_store %arg8[%c0_4, %c0_5, %c0_6, %c0_7], %1 {strides = array<i32>} : memref<1x18x18x4xbf16, #tpu.memory_space<vmem>>, vector<1x1x18x4xbf16>,
    %c0_8 = arith.constant 0 : index
    %c17 = arith.constant 17 : index
    %c0_9 = arith.constant 0 : index
    %c0_10 = arith.constant 0 : index
    %4 = vector.load %arg8[%c0_8, %c17, %c0_9, %c0_10] : memref<1x18x18x4xbf16, #tpu.memory_space<vmem>>, vector<1x1x18x4xbf16>
    tpu.vector_store %arg8[%c0_8, %c17, %c0_9, %c0_10], %1 {strides = array<i32>} : memref<1x18x18x4xbf16, #tpu.memory_space<vmem>>, vector<1x1x18x4xbf16>,
    %c0_11 = arith.constant 0 : index
    %c0_12 = arith.constant 0 : index
    %c0_13 = arith.constant 0 : index
    %c0_14 = arith.constant 0 : index
    %5 = vector.load %arg8[%c0_11, %c0_12, %c0_13, %c0_14] : memref<1x18x18x4xbf16, #tpu.memory_space<vmem>>, vector<1x18x1x4xbf16>
    tpu.vector_store %arg8[%c0_11, %c0_12, %c0_13, %c0_14], %2 {strides = array<i32>} : memref<1x18x18x4xbf16, #tpu.memory_space<vmem>>, vector<1x18x1x4xbf16>,
    %c0_15 = arith.constant 0 : index
    %c0_16 = arith.constant 0 : index
    %c17_17 = arith.constant 17 : index
    %c0_18 = arith.constant 0 : index
    %6 = vector.load %arg8[%c0_15, %c0_16, %c17_17, %c0_18] : memref<1x18x18x4xbf16, #tpu.memory_space<vmem>>, vector<1x18x1x4xbf16>
    tpu.vector_store %arg8[%c0_15, %c0_16, %c17_17, %c0_18], %2 {strides = array<i32>} : memref<1x18x18x4xbf16, #tpu.memory_space<vmem>>, vector<1x18x1x4xbf16>,
    %c0_19 = arith.constant 0 : index
    %c1 = arith.constant 1 : index
    %c1_20 = arith.constant 1 : index
    %c0_21 = arith.constant 0 : index
    %7 = vector.load %arg8[%c0_19, %c1, %c1_20, %c0_21] : memref<1x18x18x4xbf16, #tpu.memory_space<vmem>>, vector<1x16x16x4xbf16>
    tpu.vector_store %arg8[%c0_19, %c1, %c1_20, %c0_21], %0 {strides = array<i32>} : memref<1x18x18x4xbf16, #tpu.memory_space<vmem>>, vector<1x16x16x4xbf16>,
    %c0_22 = arith.constant 0 : index
    %c0_23 = arith.constant 0 : index
    %c0_24 = arith.constant 0 : index
    %c0_25 = arith.constant 0 : index
    %8 = vector.load %arg8[%c0_22, %c0_23, %c0_24, %c0_25] : memref<1x18x18x4xbf16, #tpu.memory_space<vmem>>, vector<1x18x16x4xbf16>
    %c0_26 = arith.constant 0 : index
    %c0_27 = arith.constant 0 : index
    %c1_28 = arith.constant 1 : index
    %c0_29 = arith.constant 0 : index
    %9 = vector.load %arg8[%c0_26, %c0_27, %c1_28, %c0_29] : memref<1x18x18x4xbf16, #tpu.memory_space<vmem>>, vector<1x18x16x4xbf16>
    %c0_30 = arith.constant 0 : index
    %c0_31 = arith.constant 0 : index
    %c2 = arith.constant 2 : index
    %c0_32 = arith.constant 0 : index
    %10 = vector.load %arg8[%c0_30, %c0_31, %c2, %c0_32] : memref<1x18x18x4xbf16, #tpu.memory_space<vmem>>, vector<1x18x16x4xbf16>
    %cst_33 = arith.constant 0.000000e+00 : f32
    %11 = vector.broadcast %cst_33 : f32 to vector<256x8xf32>
    %12 = vector.extract_strided_slice %8 {offsets = [0, 0, 0, 0], sizes = [1, 16, 16, 4], strides = [1, 1, 1, 1]} : vector<1x18x16x4xbf16> to vector<1x16x16x4xbf16>
    %13 = vector.shape_cast %12 : vector<1x16x16x4xbf16> to vector<256x4xbf16>
    %c0_34 = arith.constant 0 : index
    %c0_35 = arith.constant 0 : index
    %c0_36 = arith.constant 0 : index
    %c0_37 = arith.constant 0 : index
    %14 = vector.load %arg2[%c0_34, %c0_35, %c0_36, %c0_37] : memref<3x3x4x8xbf16, #tpu.memory_space<vmem>>, vector<1x1x4x8xbf16>
    %15 = vector.shape_cast %14 : vector<1x1x4x8xbf16> to vector<4x8xbf16>
    %cst_38 = arith.constant dense<0.000000e+00> : vector<256x8xf32>
    %16 = tpu.matmul %13, %15, %cst_38 {dimension_numbers = #tpu.dot_dimension_numbers<[1], [0], [0], [1], [0, 0, 1, 1], [], []>} : vector<256x4xbf16>, vector<4x8xbf16>, vector<256x8xf32> -> vector<256x8xf32>
    %17 = arith.addf %11, %16 : vector<256x8xf32>
    %18 = vector.extract_strided_slice %9 {offsets = [0, 0, 0, 0], sizes = [1, 16, 16, 4], strides = [1, 1, 1, 1]} : vector<1x18x16x4xbf16> to vector<1x16x16x4xbf16>
    %19 = vector.shape_cast %18 : vector<1x16x16x4xbf16> to vector<256x4xbf16>
    %c0_39 = arith.constant 0 : index
    %c1_40 = arith.constant 1 : index
    %c0_41 = arith.constant 0 : index
    %c0_42 = arith.constant 0 : index
    %20 = vector.load %arg2[%c0_39, %c1_40, %c0_41, %c0_42] : memref<3x3x4x8xbf16, #tpu.memory_space<vmem>>, vector<1x1x4x8xbf16>
    %21 = vector.shape_cast %20 : vector<1x1x4x8xbf16> to vector<4x8xbf16>
    %cst_43 = arith.constant dense<0.000000e+00> : vector<256x8xf32>
    %22 = tpu.matmul %19, %21, %cst_43 {dimension_numbers = #tpu.dot_dimension_numbers<[1], [0], [0], [1], [0, 0, 1, 1], [], []>} : vector<256x4xbf16>, vector<4x8xbf16>, vector<256x8xf32> -> vector<256x8xf32>
    %23 = arith.addf %17, %22 : vector<256x8xf32>
    %24 = vector.extract_strided_slice %10 {offsets = [0, 0, 0, 0], sizes = [1, 16, 16, 4], strides = [1, 1, 1, 1]} : vector<1x18x16x4xbf16> to vector<1x16x16x4xbf16>
    %25 = vector.shape_cast %24 : vector<1x16x16x4xbf16> to vector<256x4xbf16>
    %c0_44 = arith.constant 0 : index
    %c2_45 = arith.constant 2 : index
    %c0_46 = arith.constant 0 : index
    %c0_47 = arith.constant 0 : index
    %26 = vector.load %arg2[%c0_44, %c2_45, %c0_46, %c0_47] : memref<3x3x4x8xbf16, #tpu.memory_space<vmem>>, vector<1x1x4x8xbf16>
    %27 = vector.shape_cast %26 : vector<1x1x4x8xbf16> to vector<4x8xbf16>
    %cst_48 = arith.constant dense<0.000000e+00> : vector<256x8xf32>
    %28 = tpu.matmul %25, %27, %cst_48 {dimension_numbers = #tpu.dot_dimension_numbers<[1], [0], [0], [1], [0, 0, 1, 1], [], []>} : vector<256x4xbf16>, vector<4x8xbf16>, vector<256x8xf32> -> vector<256x8xf32>
    %29 = arith.addf %23, %28 : vector<256x8xf32>
    %30 = vector.extract_strided_slice %8 {offsets = [0, 1, 0, 0], sizes = [1, 16, 16, 4], strides = [1, 1, 1, 1]} : vector<1x18x16x4xbf16> to vector<1x16x16x4xbf16>
    %31 = vector.shape_cast %30 : vector<1x16x16x4xbf16> to vector<256x4xbf16>
    %c1_49 = arith.constant 1 : index
    %c0_50 = arith.constant 0 : index
    %c0_51 = arith.constant 0 : index
    %c0_52 = arith.constant 0 : index
    %32 = vector.load %arg2[%c1_49, %c0_50, %c0_51, %c0_52] : memref<3x3x4x8xbf16, #tpu.memory_space<vmem>>, vector<1x1x4x8xbf16>
    %33 = vector.shape_cast %32 : vector<1x1x4x8xbf16> to vector<4x8xbf16>
    %cst_53 = arith.constant dense<0.000000e+00> : vector<256x8xf32>
    %34 = tpu.matmul %31, %33, %cst_53 {dimension_numbers = #tpu.dot_dimension_numbers<[1], [0], [0], [1], [0, 0, 1, 1], [], []>} : vector<256x4xbf16>, vector<4x8xbf16>, vector<256x8xf32> -> vector<256x8xf32>
    %35 = arith.addf %29, %34 : vector<256x8xf32>
    %36 = vector.extract_strided_slice %9 {offsets = [0, 1, 0, 0], sizes = [1, 16, 16, 4], strides = [1, 1, 1, 1]} : vector<1x18x16x4xbf16> to vector<1x16x16x4xbf16>
    %37 = vector.shape_cast %36 : vector<1x16x16x4xbf16> to vector<256x4xbf16>
    %c1_54 = arith.constant 1 : index
    %c1_55 = arith.constant 1 : index
    %c0_56 = arith.constant 0 : index
    %c0_57 = arith.constant 0 : index
    %38 = vector.load %arg2[%c1_54, %c1_55, %c0_56, %c0_57] : memref<3x3x4x8xbf16, #tpu.memory_space<vmem>>, vector<1x1x4x8xbf16>
    %39 = vector.shape_cast %38 : vector<1x1x4x8xbf16> to vector<4x8xbf16>
    %cst_58 = arith.constant dense<0.000000e+00> : vector<256x8xf32>
    %40 = tpu.matmul %37, %39, %cst_58 {dimension_numbers = #tpu.dot_dimension_numbers<[1], [0], [0], [1], [0, 0, 1, 1], [], []>} : vector<256x4xbf16>, vector<4x8xbf16>, vector<256x8xf32> -> vector<256x8xf32>
    %41 = arith.addf %35, %40 : vector<256x8xf32>
    %42 = vector.extract_strided_slice %10 {offsets = [0, 1, 0, 0], sizes = [1, 16, 16, 4], strides = [1, 1, 1, 1]} : vector<1x18x16x4xbf16> to vector<1x16x16x4xbf16>
    %43 = vector.shape_cast %42 : vector<1x16x16x4xbf16> to vector<256x4xbf16>
    %c1_59 = arith.constant 1 : index
    %c2_60 = arith.constant 2 : index
    %c0_61 = arith.constant 0 : index
    %c0_62 = arith.constant 0 : index
    %44 = vector.load %arg2[%c1_59, %c2_60, %c0_61, %c0_62] : memref<3x3x4x8xbf16, #tpu.memory_space<vmem>>, vector<1x1x4x8xbf16>
    %45 = vector.shape_cast %44 : vector<1x1x4x8xbf16> to vector<4x8xbf16>
    %cst_63 = arith.constant dense<0.000000e+00> : vector<256x8xf32>
    %46 = tpu.matmul %43, %45, %cst_63 {dimension_numbers = #tpu.dot_dimension_numbers<[1], [0], [0], [1], [0, 0, 1, 1], [], []>} : vector<256x4xbf16>, vector<4x8xbf16>, vector<256x8xf32> -> vector<256x8xf32>
    %47 = arith.addf %41, %46 : vector<256x8xf32>
    %48 = vector.extract_strided_slice %8 {offsets = [0, 2, 0, 0], sizes = [1, 16, 16, 4], strides = [1, 1, 1, 1]} : vector<1x18x16x4xbf16> to vector<1x16x16x4xbf16>
    %49 = vector.shape_cast %48 : vector<1x16x16x4xbf16> to vector<256x4xbf16>
    %c2_64 = arith.constant 2 : index
    %c0_65 = arith.constant 0 : index
    %c0_66 = arith.constant 0 : index
    %c0_67 = arith.constant 0 : index
    %50 = vector.load %arg2[%c2_64, %c0_65, %c0_66, %c0_67] : memref<3x3x4x8xbf16, #tpu.memory_space<vmem>>, vector<1x1x4x8xbf16>
    %51 = vector.shape_cast %50 : vector<1x1x4x8xbf16> to vector<4x8xbf16>
    %cst_68 = arith.constant dense<0.000000e+00> : vector<256x8xf32>
    %52 = tpu.matmul %49, %51, %cst_68 {dimension_numbers = #tpu.dot_dimension_numbers<[1], [0], [0], [1], [0, 0, 1, 1], [], []>} : vector<256x4xbf16>, vector<4x8xbf16>, vector<256x8xf32> -> vector<256x8xf32>
    %53 = arith.addf %47, %52 : vector<256x8xf32>
    %54 = vector.extract_strided_slice %9 {offsets = [0, 2, 0, 0], sizes = [1, 16, 16, 4], strides = [1, 1, 1, 1]} : vector<1x18x16x4xbf16> to vector<1x16x16x4xbf16>
    %55 = vector.shape_cast %54 : vector<1x16x16x4xbf16> to vector<256x4xbf16>
    %c2_69 = arith.constant 2 : index
    %c1_70 = arith.constant 1 : index
    %c0_71 = arith.constant 0 : index
    %c0_72 = arith.constant 0 : index
    %56 = vector.load %arg2[%c2_69, %c1_70, %c0_71, %c0_72] : memref<3x3x4x8xbf16, #tpu.memory_space<vmem>>, vector<1x1x4x8xbf16>
    %57 = vector.shape_cast %56 : vector<1x1x4x8xbf16> to vector<4x8xbf16>
    %cst_73 = arith.constant dense<0.000000e+00> : vector<256x8xf32>
    %58 = tpu.matmul %55, %57, %cst_73 {dimension_numbers = #tpu.dot_dimension_numbers<[1], [0], [0], [1], [0, 0, 1, 1], [], []>} : vector<256x4xbf16>, vector<4x8xbf16>, vector<256x8xf32> -> vector<256x8xf32>
    %59 = arith.addf %53, %58 : vector<256x8xf32>
    %60 = vector.extract_strided_slice %10 {offsets = [0, 2, 0, 0], sizes = [1, 16, 16, 4], strides = [1, 1, 1, 1]} : vector<1x18x16x4xbf16> to vector<1x16x16x4xbf16>
    %61 = vector.shape_cast %60 : vector<1x16x16x4xbf16> to vector<256x4xbf16>
    %c2_74 = arith.constant 2 : index
    %c2_75 = arith.constant 2 : index
    %c0_76 = arith.constant 0 : index
    %c0_77 = arith.constant 0 : index
    %62 = vector.load %arg2[%c2_74, %c2_75, %c0_76, %c0_77] : memref<3x3x4x8xbf16, #tpu.memory_space<vmem>>, vector<1x1x4x8xbf16>
    %63 = vector.shape_cast %62 : vector<1x1x4x8xbf16> to vector<4x8xbf16>
    %cst_78 = arith.constant dense<0.000000e+00> : vector<256x8xf32>
    %64 = tpu.matmul %61, %63, %cst_78 {dimension_numbers = #tpu.dot_dimension_numbers<[1], [0], [0], [1], [0, 0, 1, 1], [], []>} : vector<256x4xbf16>, vector<4x8xbf16>, vector<256x8xf32> -> vector<256x8xf32>
    %65 = arith.addf %59, %64 : vector<256x8xf32>
    %c0_79 = arith.constant 0 : index
    %c0_80 = arith.constant 0 : index
    %66 = vector.load %arg3[%c0_79, %c0_80] : memref<1x8xf32, #tpu.memory_space<vmem>>, vector<1x8xf32>
    %67 = vector.broadcast %66 : vector<1x8xf32> to vector<256x8xf32>
    %68 = arith.addf %65, %67 : vector<256x8xf32>
    %cst_81 = arith.constant 0.000000e+00 : f32
    %69 = vector.broadcast %cst_81 : f32 to vector<256x8xf32>
    %70 = arith.maximumf %68, %69 : vector<256x8xf32>
    %71 = vector.shape_cast %70 : vector<256x8xf32> to vector<1x16x16x8xf32>
    %72 = arith.truncf %71 : vector<1x16x16x8xf32> to vector<1x16x16x8xbf16>
    %cst_82 = arith.constant 0.000000e+00 : bf16
    %73 = vector.broadcast %cst_82 : bf16 to vector<1x1x18x8xbf16>
    %cst_83 = arith.constant 0.000000e+00 : bf16
    %74 = vector.broadcast %cst_83 : bf16 to vector<1x18x1x8xbf16>
    %c0_84 = arith.constant 0 : index
    %c0_85 = arith.constant 0 : index
    %c0_86 = arith.constant 0 : index
    %c0_87 = arith.constant 0 : index
    %75 = vector.load %arg9[%c0_84, %c0_85, %c0_86, %c0_87] : memref<1x18x18x8xbf16, #tpu.memory_space<vmem>>, vector<1x1x18x8xbf16>
    tpu.vector_store %arg9[%c0_84, %c0_85, %c0_86, %c0_87], %73 {strides = array<i32>} : memref<1x18x18x8xbf16, #tpu.memory_space<vmem>>, vector<1x1x18x8xbf16>,
    %c0_88 = arith.constant 0 : index
    %c17_89 = arith.constant 17 : index
    %c0_90 = arith.constant 0 : index
    %c0_91 = arith.constant 0 : index
    %76 = vector.load %arg9[%c0_88, %c17_89, %c0_90, %c0_91] : memref<1x18x18x8xbf16, #tpu.memory_space<vmem>>, vector<1x1x18x8xbf16>
    tpu.vector_store %arg9[%c0_88, %c17_89, %c0_90, %c0_91], %73 {strides = array<i32>} : memref<1x18x18x8xbf16, #tpu.memory_space<vmem>>, vector<1x1x18x8xbf16>,
    %c0_92 = arith.constant 0 : index
    %c0_93 = arith.constant 0 : index
    %c0_94 = arith.constant 0 : index
    %c0_95 = arith.constant 0 : index
    %77 = vector.load %arg9[%c0_92, %c0_93, %c0_94, %c0_95] : memref<1x18x18x8xbf16, #tpu.memory_space<vmem>>, vector<1x18x1x8xbf16>
    tpu.vector_store %arg9[%c0_92, %c0_93, %c0_94, %c0_95], %74 {strides = array<i32>} : memref<1x18x18x8xbf16, #tpu.memory_space<vmem>>, vector<1x18x1x8xbf16>,
    %c0_96 = arith.constant 0 : index
    %c0_97 = arith.constant 0 : index
    %c17_98 = arith.constant 17 : index
    %c0_99 = arith.constant 0 : index
    %78 = vector.load %arg9[%c0_96, %c0_97, %c17_98, %c0_99] : memref<1x18x18x8xbf16, #tpu.memory_space<vmem>>, vector<1x18x1x8xbf16>
    tpu.vector_store %arg9[%c0_96, %c0_97, %c17_98, %c0_99], %74 {strides = array<i32>} : memref<1x18x18x8xbf16, #tpu.memory_space<vmem>>, vector<1x18x1x8xbf16>,
    %c0_100 = arith.constant 0 : index
    %c1_101 = arith.constant 1 : index
    %c1_102 = arith.constant 1 : index
    %c0_103 = arith.constant 0 : index
    %79 = vector.load %arg9[%c0_100, %c1_101, %c1_102, %c0_103] : memref<1x18x18x8xbf16, #tpu.memory_space<vmem>>, vector<1x16x16x8xbf16>
    tpu.vector_store %arg9[%c0_100, %c1_101, %c1_102, %c0_103], %72 {strides = array<i32>} : memref<1x18x18x8xbf16, #tpu.memory_space<vmem>>, vector<1x16x16x8xbf16>,
    %c0_104 = arith.constant 0 : index
    %c0_105 = arith.constant 0 : index
    %c0_106 = arith.constant 0 : index
    %c0_107 = arith.constant 0 : index
    %80 = vector.load %arg9[%c0_104, %c0_105, %c0_106, %c0_107] : memref<1x18x18x8xbf16, #tpu.memory_space<vmem>>, vector<1x18x16x8xbf16>
    %c0_108 = arith.constant 0 : index
    %c0_109 = arith.constant 0 : index
    %c1_110 = arith.constant 1 : index
    %c0_111 = arith.constant 0 : index
    %81 = vector.load %arg9[%c0_108, %c0_109, %c1_110, %c0_111] : memref<1x18x18x8xbf16, #tpu.memory_space<vmem>>, vector<1x18x16x8xbf16>
    %c0_112 = arith.constant 0 : index
    %c0_113 = arith.constant 0 : index
    %c2_114 = arith.constant 2 : index
    %c0_115 = arith.constant 0 : index
    %82 = vector.load %arg9[%c0_112, %c0_113, %c2_114, %c0_115] : memref<1x18x18x8xbf16, #tpu.memory_space<vmem>>, vector<1x18x16x8xbf16>
    %cst_116 = arith.constant 0.000000e+00 : f32
    %83 = vector.broadcast %cst_116 : f32 to vector<256x8xf32>
    %84 = vector.extract_strided_slice %80 {offsets = [0, 0, 0, 0], sizes = [1, 16, 16, 8], strides = [1, 1, 1, 1]} : vector<1x18x16x8xbf16> to vector<1x16x16x8xbf16>
    %85 = vector.shape_cast %84 : vector<1x16x16x8xbf16> to vector<256x8xbf16>
    %c0_117 = arith.constant 0 : index
    %c0_118 = arith.constant 0 : index
    %c0_119 = arith.constant 0 : index
    %c0_120 = arith.constant 0 : index
    %86 = vector.load %arg4[%c0_117, %c0_118, %c0_119, %c0_120] : memref<3x3x8x8xbf16, #tpu.memory_space<vmem>>, vector<1x1x8x8xbf16>
    %87 = vector.shape_cast %86 : vector<1x1x8x8xbf16> to vector<8x8xbf16>
    %cst_121 = arith.constant dense<0.000000e+00> : vector<256x8xf32>
    %88 = tpu.matmul %85, %87, %cst_121 {dimension_numbers = #tpu.dot_dimension_numbers<[1], [0], [0], [1], [0, 0, 1, 1], [], []>} : vector<256x8xbf16>, vector<8x8xbf16>, vector<256x8xf32> -> vector<256x8xf32>
    %89 = arith.addf %83, %88 : vector<256x8xf32>
    %90 = vector.extract_strided_slice %81 {offsets = [0, 0, 0, 0], sizes = [1, 16, 16, 8], strides = [1, 1, 1, 1]} : vector<1x18x16x8xbf16> to vector<1x16x16x8xbf16>
    %91 = vector.shape_cast %90 : vector<1x16x16x8xbf16> to vector<256x8xbf16>
    %c0_122 = arith.constant 0 : index
    %c1_123 = arith.constant 1 : index
    %c0_124 = arith.constant 0 : index
    %c0_125 = arith.constant 0 : index
    %92 = vector.load %arg4[%c0_122, %c1_123, %c0_124, %c0_125] : memref<3x3x8x8xbf16, #tpu.memory_space<vmem>>, vector<1x1x8x8xbf16>
    %93 = vector.shape_cast %92 : vector<1x1x8x8xbf16> to vector<8x8xbf16>
    %cst_126 = arith.constant dense<0.000000e+00> : vector<256x8xf32>
    %94 = tpu.matmul %91, %93, %cst_126 {dimension_numbers = #tpu.dot_dimension_numbers<[1], [0], [0], [1], [0, 0, 1, 1], [], []>} : vector<256x8xbf16>, vector<8x8xbf16>, vector<256x8xf32> -> vector<256x8xf32>
    %95 = arith.addf %89, %94 : vector<256x8xf32>
    %96 = vector.extract_strided_slice %82 {offsets = [0, 0, 0, 0], sizes = [1, 16, 16, 8], strides = [1, 1, 1, 1]} : vector<1x18x16x8xbf16> to vector<1x16x16x8xbf16>
    %97 = vector.shape_cast %96 : vector<1x16x16x8xbf16> to vector<256x8xbf16>
    %c0_127 = arith.constant 0 : index
    %c2_128 = arith.constant 2 : index
    %c0_129 = arith.constant 0 : index
    %c0_130 = arith.constant 0 : index
    %98 = vector.load %arg4[%c0_127, %c2_128, %c0_129, %c0_130] : memref<3x3x8x8xbf16, #tpu.memory_space<vmem>>, vector<1x1x8x8xbf16>
    %99 = vector.shape_cast %98 : vector<1x1x8x8xbf16> to vector<8x8xbf16>
    %cst_131 = arith.constant dense<0.000000e+00> : vector<256x8xf32>
    %100 = tpu.matmul %97, %99, %cst_131 {dimension_numbers = #tpu.dot_dimension_numbers<[1], [0], [0], [1], [0, 0, 1, 1], [], []>} : vector<256x8xbf16>, vector<8x8xbf16>, vector<256x8xf32> -> vector<256x8xf32>
    %101 = arith.addf %95, %100 : vector<256x8xf32>
    %102 = vector.extract_strided_slice %80 {offsets = [0, 1, 0, 0], sizes = [1, 16, 16, 8], strides = [1, 1, 1, 1]} : vector<1x18x16x8xbf16> to vector<1x16x16x8xbf16>
    %103 = vector.shape_cast %102 : vector<1x16x16x8xbf16> to vector<256x8xbf16>
    %c1_132 = arith.constant 1 : index
    %c0_133 = arith.constant 0 : index
    %c0_134 = arith.constant 0 : index
    %c0_135 = arith.constant 0 : index
    %104 = vector.load %arg4[%c1_132, %c0_133, %c0_134, %c0_135] : memref<3x3x8x8xbf16, #tpu.memory_space<vmem>>, vector<1x1x8x8xbf16>
    %105 = vector.shape_cast %104 : vector<1x1x8x8xbf16> to vector<8x8xbf16>
    %cst_136 = arith.constant dense<0.000000e+00> : vector<256x8xf32>
    %106 = tpu.matmul %103, %105, %cst_136 {dimension_numbers = #tpu.dot_dimension_numbers<[1], [0], [0], [1], [0, 0, 1, 1], [], []>} : vector<256x8xbf16>, vector<8x8xbf16>, vector<256x8xf32> -> vector<256x8xf32>
    %107 = arith.addf %101, %106 : vector<256x8xf32>
    %108 = vector.extract_strided_slice %81 {offsets = [0, 1, 0, 0], sizes = [1, 16, 16, 8], strides = [1, 1, 1, 1]} : vector<1x18x16x8xbf16> to vector<1x16x16x8xbf16>
    %109 = vector.shape_cast %108 : vector<1x16x16x8xbf16> to vector<256x8xbf16>
    %c1_137 = arith.constant 1 : index
    %c1_138 = arith.constant 1 : index
    %c0_139 = arith.constant 0 : index
    %c0_140 = arith.constant 0 : index
    %110 = vector.load %arg4[%c1_137, %c1_138, %c0_139, %c0_140] : memref<3x3x8x8xbf16, #tpu.memory_space<vmem>>, vector<1x1x8x8xbf16>
    %111 = vector.shape_cast %110 : vector<1x1x8x8xbf16> to vector<8x8xbf16>
    %cst_141 = arith.constant dense<0.000000e+00> : vector<256x8xf32>
    %112 = tpu.matmul %109, %111, %cst_141 {dimension_numbers = #tpu.dot_dimension_numbers<[1], [0], [0], [1], [0, 0, 1, 1], [], []>} : vector<256x8xbf16>, vector<8x8xbf16>, vector<256x8xf32> -> vector<256x8xf32>
    %113 = arith.addf %107, %112 : vector<256x8xf32>
    %114 = vector.extract_strided_slice %82 {offsets = [0, 1, 0, 0], sizes = [1, 16, 16, 8], strides = [1, 1, 1, 1]} : vector<1x18x16x8xbf16> to vector<1x16x16x8xbf16>
    %115 = vector.shape_cast %114 : vector<1x16x16x8xbf16> to vector<256x8xbf16>
    %c1_142 = arith.constant 1 : index
    %c2_143 = arith.constant 2 : index
    %c0_144 = arith.constant 0 : index
    %c0_145 = arith.constant 0 : index
    %116 = vector.load %arg4[%c1_142, %c2_143, %c0_144, %c0_145] : memref<3x3x8x8xbf16, #tpu.memory_space<vmem>>, vector<1x1x8x8xbf16>
    %117 = vector.shape_cast %116 : vector<1x1x8x8xbf16> to vector<8x8xbf16>
    %cst_146 = arith.constant dense<0.000000e+00> : vector<256x8xf32>
    %118 = tpu.matmul %115, %117, %cst_146 {dimension_numbers = #tpu.dot_dimension_numbers<[1], [0], [0], [1], [0, 0, 1, 1], [], []>} : vector<256x8xbf16>, vector<8x8xbf16>, vector<256x8xf32> -> vector<256x8xf32>
    %119 = arith.addf %113, %118 : vector<256x8xf32>
    %120 = vector.extract_strided_slice %80 {offsets = [0, 2, 0, 0], sizes = [1, 16, 16, 8], strides = [1, 1, 1, 1]} : vector<1x18x16x8xbf16> to vector<1x16x16x8xbf16>
    %121 = vector.shape_cast %120 : vector<1x16x16x8xbf16> to vector<256x8xbf16>
    %c2_147 = arith.constant 2 : index
    %c0_148 = arith.constant 0 : index
    %c0_149 = arith.constant 0 : index
    %c0_150 = arith.constant 0 : index
    %122 = vector.load %arg4[%c2_147, %c0_148, %c0_149, %c0_150] : memref<3x3x8x8xbf16, #tpu.memory_space<vmem>>, vector<1x1x8x8xbf16>
    %123 = vector.shape_cast %122 : vector<1x1x8x8xbf16> to vector<8x8xbf16>
    %cst_151 = arith.constant dense<0.000000e+00> : vector<256x8xf32>
    %124 = tpu.matmul %121, %123, %cst_151 {dimension_numbers = #tpu.dot_dimension_numbers<[1], [0], [0], [1], [0, 0, 1, 1], [], []>} : vector<256x8xbf16>, vector<8x8xbf16>, vector<256x8xf32> -> vector<256x8xf32>
    %125 = arith.addf %119, %124 : vector<256x8xf32>
    %126 = vector.extract_strided_slice %81 {offsets = [0, 2, 0, 0], sizes = [1, 16, 16, 8], strides = [1, 1, 1, 1]} : vector<1x18x16x8xbf16> to vector<1x16x16x8xbf16>
    %127 = vector.shape_cast %126 : vector<1x16x16x8xbf16> to vector<256x8xbf16>
    %c2_152 = arith.constant 2 : index
    %c1_153 = arith.constant 1 : index
    %c0_154 = arith.constant 0 : index
    %c0_155 = arith.constant 0 : index
    %128 = vector.load %arg4[%c2_152, %c1_153, %c0_154, %c0_155] : memref<3x3x8x8xbf16, #tpu.memory_space<vmem>>, vector<1x1x8x8xbf16>
    %129 = vector.shape_cast %128 : vector<1x1x8x8xbf16> to vector<8x8xbf16>
    %cst_156 = arith.constant dense<0.000000e+00> : vector<256x8xf32>
    %130 = tpu.matmul %127, %129, %cst_156 {dimension_numbers = #tpu.dot_dimension_numbers<[1], [0], [0], [1], [0, 0, 1, 1], [], []>} : vector<256x8xbf16>, vector<8x8xbf16>, vector<256x8xf32> -> vector<256x8xf32>
    %131 = arith.addf %125, %130 : vector<256x8xf32>
    %132 = vector.extract_strided_slice %82 {offsets = [0, 2, 0, 0], sizes = [1, 16, 16, 8], strides = [1, 1, 1, 1]} : vector<1x18x16x8xbf16> to vector<1x16x16x8xbf16>
    %133 = vector.shape_cast %132 : vector<1x16x16x8xbf16> to vector<256x8xbf16>
    %c2_157 = arith.constant 2 : index
    %c2_158 = arith.constant 2 : index
    %c0_159 = arith.constant 0 : index
    %c0_160 = arith.constant 0 : index
    %134 = vector.load %arg4[%c2_157, %c2_158, %c0_159, %c0_160] : memref<3x3x8x8xbf16, #tpu.memory_space<vmem>>, vector<1x1x8x8xbf16>
    %135 = vector.shape_cast %134 : vector<1x1x8x8xbf16> to vector<8x8xbf16>
    %cst_161 = arith.constant dense<0.000000e+00> : vector<256x8xf32>
    %136 = tpu.matmul %133, %135, %cst_161 {dimension_numbers = #tpu.dot_dimension_numbers<[1], [0], [0], [1], [0, 0, 1, 1], [], []>} : vector<256x8xbf16>, vector<8x8xbf16>, vector<256x8xf32> -> vector<256x8xf32>
    %137 = arith.addf %131, %136 : vector<256x8xf32>
    %c0_162 = arith.constant 0 : index
    %c0_163 = arith.constant 0 : index
    %138 = vector.load %arg5[%c0_162, %c0_163] : memref<1x8xf32, #tpu.memory_space<vmem>>, vector<1x8xf32>
    %139 = vector.broadcast %138 : vector<1x8xf32> to vector<256x8xf32>
    %140 = arith.addf %137, %139 : vector<256x8xf32>
    %cst_164 = arith.constant 0.000000e+00 : f32
    %141 = vector.broadcast %cst_164 : f32 to vector<256x8xf32>
    %142 = arith.maximumf %140, %141 : vector<256x8xf32>
    %143 = vector.shape_cast %142 : vector<256x8xf32> to vector<1x16x16x8xf32>
    %c0_165 = arith.constant 0 : index
    %c0_166 = arith.constant 0 : index
    %c0_167 = arith.constant 0 : index
    %c0_168 = arith.constant 0 : index
    %144 = vector.load %arg6[%c0_165, %c0_166, %c0_167, %c0_168] : memref<1x16x16x8xf32, #tpu.memory_space<vmem>>, vector<1x16x16x8xf32>
    tpu.vector_store %arg6[%c0_165, %c0_166, %c0_167, %c0_168], %143 {strides = array<i32>} : memref<1x16x16x8xf32, #tpu.memory_space<vmem>>, vector<1x16x16x8xf32>,
    %145 = vector.shape_cast %143 : vector<1x16x16x8xf32> to vector<1x8x2x16x8xf32>
    %cst_169 = arith.constant dense<0xFF800000> : vector<1x8x16x8xf32>
    %146 = vector.multi_reduction <maximumf>, %145, %cst_169 [2] : vector<1x8x2x16x8xf32> to vector<1x8x16x8xf32>
    %147 = vector.shape_cast %146 : vector<1x8x16x8xf32> to vector<1x8x8x2x8xf32>
    %cst_170 = arith.constant dense<0xFF800000> : vector<1x8x8x8xf32>
    %148 = vector.multi_reduction <maximumf>, %147, %cst_170 [3] : vector<1x8x8x2x8xf32> to vector<1x8x8x8xf32>
    %c0_171 = arith.constant 0 : index
    %c0_172 = arith.constant 0 : index
    %c0_173 = arith.constant 0 : index
    %c0_174 = arith.constant 0 : index
    %149 = vector.load %arg7[%c0_171, %c0_172, %c0_173, %c0_174] : memref<1x8x8x8xf32, #tpu.memory_space<vmem>>, vector<1x8x8x8xf32>
    tpu.vector_store %arg7[%c0_171, %c0_172, %c0_173, %c0_174], %148 {strides = array<i32>} : memref<1x8x8x8xf32, #tpu.memory_space<vmem>>, vector<1x8x8x8xf32>,
    return
  }
  func.func @transform_0(%arg0: i32) -> (i32, i32, i32, i32) {
    %c0_i32 = arith.constant 0 : i32
    %c0_i32_0 = arith.constant 0 : i32
    %c0_i32_1 = arith.constant 0 : i32
    %c0_i32_2 = arith.constant 0 : i32
    return %arg0, %c0_i32, %c0_i32_0, %c0_i32_1 : i32, i32, i32, i32
  }
  func.func @transform_1(%arg0: i32) -> (i32, i32, i32, i32) {
    %c0_i32 = arith.constant 0 : i32
    %c0_i32_0 = arith.constant 0 : i32
    %c0_i32_1 = arith.constant 0 : i32
    %c0_i32_2 = arith.constant 0 : i32
    %c0_i32_3 = arith.constant 0 : i32
    return %c0_i32, %c0_i32_0, %c0_i32_1, %c0_i32_2 : i32, i32, i32, i32
  }
  func.func @transform_2(%arg0: i32) -> (i32, i32) {
    %c0_i32 = arith.constant 0 : i32
    %c0_i32_0 = arith.constant 0 : i32
    %c0_i32_1 = arith.constant 0 : i32
    return %c0_i32, %c0_i32_0 : i32, i32
  }
  func.func @transform_3(%arg0: i32) -> (i32, i32, i32, i32) {
    %c0_i32 = arith.constant 0 : i32
    %c0_i32_0 = arith.constant 0 : i32
    %c0_i32_1 = arith.constant 0 : i32
    %c0_i32_2 = arith.constant 0 : i32
    %c0_i32_3 = arith.constant 0 : i32
    return %c0_i32, %c0_i32_0, %c0_i32_1, %c0_i32_2 : i32, i32, i32, i32
  }
  func.func @transform_4(%arg0: i32) -> (i32, i32) {
    %c0_i32 = arith.constant 0 : i32
    %c0_i32_0 = arith.constant 0 : i32
    %c0_i32_1 = arith.constant 0 : i32
    return %c0_i32, %c0_i32_0 : i32, i32
  }
  func.func @transform_5(%arg0: i32) -> (i32, i32, i32, i32) {
    %c0_i32 = arith.constant 0 : i32
    %c0_i32_0 = arith.constant 0 : i32
    %c0_i32_1 = arith.constant 0 : i32
    %c0_i32_2 = arith.constant 0 : i32
    return %arg0, %c0_i32, %c0_i32_0, %c0_i32_1 : i32, i32, i32, i32
  }
  func.func @transform_6(%arg0: i32) -> (i32, i32, i32, i32) {
    %c0_i32 = arith.constant 0 : i32
    %c0_i32_0 = arith.constant 0 : i32
    %c0_i32_1 = arith.constant 0 : i32
    %c0_i32_2 = arith.constant 0 : i32
    return %arg0, %c0_i32, %c0_i32_0, %c0_i32_1 : i32, i32, i32, i32
  }
}

</mosaic_0001>

<bundles_post_ra>
// kernel: tpu_custom_call.1
= control target key start
LH: loop header
LB: loop body
LE: loop exit
PB: predicated region body
PF: predicated region fallthrough
CT: control target
= control target key end

     0   :  { %12 = vsyncpa [#allocation5], 0  ;;  %s13771_s0 = inlined_call_operand.vmem [shape: bf16[2,16,16,4], index: 0, kind: input, shape index: {}]   ;;  %s13772_s1 = inlined_call_operand.vmem [shape: bf16[3,3,4,8], index: 1, kind: input, shape index: {}]   ;;  %s13773_s2 = inlined_call_operand.vmem [shape: f32[1,8], index: 2, kind: input, shape index: {}]   ;;  %s13774_s3 = inlined_call_operand.vmem [shape: bf16[3,3,8,8], index: 3, kind: input, shape index: {}]   ;;  %s13775_s4 = inlined_call_operand.vmem [shape: f32[1,8], index: 4, kind: input, shape index: {}]   ;;  %s13776_s5 = inlined_call_operand.vmem [shape: f32[2,16,16,8], index: 5, kind: output, shape index: {0}]   ;;  %s13777_s6 = inlined_call_operand.hbm [shape: f32[2,8,8,8], index: 6, kind: output, shape index: {1}]  }
   0x1   :  { %14 = vsyncpa [#allocation5 + $0x1], 0  ;;  %s9946_s21 = smov 0   ;;  %s9948_s22 = smov 0  }
   0x2   :  { %s9950_s23 = smov 0   ;;  %s9952_s24 = smov 0  }
   0x3 LB: > { %s9967_s25 = sadd.s32 4294967295, %s9904_s24   ;;  %s8277_s26 = sadd.s32 4294967294, %s9904_s24   ;;  %s9904_s24 = sphi %s9952_s24, %s14170_s24   ;;  %s9900_s23 = sphi %s9950_s23, %s14169_s23   ;;  %s9896_s22 = sphi %s9948_s22, %s14168_s22   ;;  %s9892_s21 = sphi %s9946_s21, %s14167_s21  }
   0x4   : > { %s9971_s27 = sadd.s32 1, %s9904_s24   ;;  %s163_s28 = sadd.s32 1, %s9900_s23 }
   0x5   : > { %s160_s29 = ssub.s32 %s9904_s24, %s9971_s27  ;;  %p173_p0 = scmp.ne.s32.totalorder %s9900_s23, %s9896_s22 }
   0x6   : > { %p161_p1 = scmp.eq.s32.totalorder %s160_s29, 0  ;;  %p174_p2 = scmp.eq.s32.totalorder %s9967_s25, 1 }
   0x7   : > { %p179_p3 = scmp.ne.s32.totalorder %s9896_s22, %s9892_s21  ;;  %p180_p4 = scmp.eq.s32.totalorder %s8277_s26, 1 }
   0x8   : > { %s9982_s30 = scalar_select %p161_p1, %s9900_s23, %s163_s28  }
   0x9   : > { %p9984_p5 = por %p174_p2, %p173_p0  ;;  %p9988_p6 = por %p180_p4, %p179_p3 }
   0xa   : > { %p8280_p7 = scmp.ge.s32.totalorder %s9904_s24, 1  ;;  %p218_p8 = scmp.lt.s32.totalorder %s9904_s24, 3 }
   0xc   : > { %p219_p9 = pnand %p8280_p7, %p218_p8 }
   0xe   : > { %222 = sbr.rel (%p219_p9) target bundleno = 1346 (0x542), region = 40 }
  0x13   : > { %v8286_v0 = vld [vmem:[%s13772_s1 + $0x2] sm:$0x3]  ;;  %vm1414_vm0 = vcmask 1041408   ;;  %v927_v1 = vld [vmem:[%s13772_s1] sm:$0x3]  ;;  %vm296_vm1 = vcmask 27648  }
  0x14   : > { %9726 = vmatprep.subr.msk.bf16.mxu0 %vm1414_vm0, %v8286_v0  ;;  %v1416_v2 = vsel %vm1414_vm0, %v8286_v0, 0  ;;  %9727 = vmatprep.subr.msk.bf16.mxu1 %vm1414_vm0, %v927_v1  ;;  %v1708_v3 = vsel %vm1414_vm0, %v927_v1, 0  ;;  %vm299_vm2 = vcmask 24576   ;;  %v10007_v4 = vld [vmem:[%s13772_s1 + $0x4] sm:$0x3]  ;;  %v9906_v5 = vmov 0  }
  0x15   : > { %9115 = vmatpush3.bf16.msra.mxu0 %v1416_v2  ;;  %9149 = vmatpush3.bf16.msra.mxu1 %v1708_v3  ;;  %297 = vst.msk [vmem:[#allocation2] sm:$0xf] %vm296_vm1, %v9906_v5  ;;  %298 = vst.msk [vmem:[#allocation2 + $0x4] sm:$0xf] %vm296_vm1, %v9906_v5  ;;  %vm306_vm3 = vsmask.f32 256 }
  0x16   : > { %300 = vst.msk [vmem:[#allocation2 + $0x8] sm:$0x1] %vm299_vm2, %v9906_v5  ;;  %304 = vst.msk [vmem:[#allocation2 + $0xd4] sm:$0x1] %vm299_vm2, %v9906_v5  ;;  %vm362_vm4 = vsmask.f32 7938  ;;  %9728 = vmatprep.subr.msk.bf16.mxu0 %vm1414_vm0, %v10007_v4 }
  0x17   : > { %302 = vst.msk [vmem:[#allocation2 + $0xcc] sm:$0xf] %vm296_vm1, %v9906_v5  ;;  %303 = vst.msk [vmem:[#allocation2 + $0xd0] sm:$0xf] %vm296_vm1, %v9906_v5  ;;  %vm3693_vm6 = vcmask 60416   ;;  %vm3696_vm7 = vcmask 57344  }
  0x18   : > { %vm10017_vm5 = vmand %vm299_vm2, %vm306_vm3  ;;  %p253_p10 = scmp.lt.s32.totalorder %s9967_s25, 1  ;;  %3694 = vst.msk [vmem:[#allocation3] sm:$0xf] %vm3693_vm6, %v9906_v5  ;;  %v311_v8 = vld [vmem:[#allocation2 + $0xc] sm:$0x1]  ;;  %v13878_v45 = vmov 0 }
  0x19   : > { %vm10026_vm8 = vmand %vm299_vm2, %vm362_vm4  ;;  %3695 = vst.msk [vmem:[#allocation3 + $0x4] sm:$0xf] %vm3693_vm6, %v9906_v5  ;;  %v367_v9 = vld [vmem:[#allocation2 + $0x14] sm:$0x1]  ;;  %v312_v10 = vsel %vm10017_vm5, 0, %v311_v8  ;;  %vm1365_vm14 = vcmask 31744  }
  0x1a   : > { %3697 = vst.msk [vmem:[#allocation3 + $0x8] sm:$0x1] %vm3696_vm7, %v9906_v5  ;;  %3701 = vst.msk [vmem:[#allocation3 + $0xd4] sm:$0x1] %vm3696_vm7, %v9906_v5  ;;  %s10037_s15 = scalar_select %p253_p10, %s9967_s25, 1  ;;  %v368_v11 = vsel %vm10026_vm8, 0, %v367_v9 }
  0x1b   : > { %3699 = vst.msk [vmem:[#allocation3 + $0xcc] sm:$0xf] %vm3693_vm6, %v9906_v5  ;;  %3700 = vst.msk [vmem:[#allocation3 + $0xd0] sm:$0xf] %vm3693_vm6, %v9906_v5  ;;  %v314_v12 = vld [vmem:[#allocation2 + $0x18] sm:$0x1] }
  0x1c   : > { %313 = vst [vmem:[#allocation2 + $0xc] sm:$0x1] %v312_v10  ;;  %369 = vst [vmem:[#allocation2 + $0x14] sm:$0x1] %v368_v11  ;;  %v315_v13 = vsel %vm10017_vm5, 0, %v314_v12  ;;  %s8773_s16 = sshll.u32 %s10037_s15, 7 }
  0x1d   : > { %v370_v14 = vld [vmem:[#allocation2 + $0x20] sm:$0x1]  ;;  %v317_v15 = vld [vmem:[#allocation2 + $0x24] sm:$0x1]  ;;  %316 = vst [vmem:[#allocation2 + $0x18] sm:$0x1] %v315_v13  ;;  %s10053_s19 = scalar_lea.vmem %s13771_s0, %s8773_s16  ;;  %vm10073_vm12 = vmand %vm296_vm1, %vm362_vm4 }
  0x1e   : > { %v371_v16 = vsel %vm10026_vm8, 0, %v370_v14  ;;  %v318_v17 = vsel %vm10017_vm5, 0, %v317_v15  ;;  %v373_v18 = vld [vmem:[#allocation2 + $0x2c] sm:$0x1]  ;;  %vm418_vm9 = vsmask.f32 4368 }
  0x1f   : > { %372 = vst [vmem:[#allocation2 + $0x20] sm:$0x1] %v371_v16  ;;  %319 = vst [vmem:[#allocation2 + $0x24] sm:$0x1] %v318_v17  ;;  %v374_v19 = vsel %vm10026_vm8, 0, %v373_v18  ;;  %v13881_v12 = vmov 0 }
  0x20   : > { %v308_v20 = vld [vmem:[#allocation2] sm:$0x1]  ;;  %v364_v21 = vld [vmem:[#allocation2 + $0x8] sm:$0x1]  ;;  %v10057_v22 = vld [vmem:[#allocation2 + $0x4] sm:$0xf] }
  0x21   : > { %375 = vst [vmem:[#allocation2 + $0x2c] sm:$0x1] %v374_v19  ;;  %v309_v23 = vsel %vm10017_vm5, 0, %v308_v20  ;;  %v365_v24 = vsel %vm10026_vm8, 0, %v364_v21  ;;  %v941_v25 = vshll.u32 %v10057_v22, 16  ;;  %v945_v26 = vshrl.u32 %v10057_v22, 16  ;;  %vm10080_vm13 = vmor %vm306_vm3, %vm418_vm9 }
  0x22   : > { %v264_v27 = vld [vmem:[%s10053_s19] sm:$0xf]  ;;  %310 = vst [vmem:[#allocation2] sm:$0x1] %v309_v23  ;;  %366 = vst [vmem:[#allocation2 + $0x8] sm:$0x1] %v365_v24 }
  0x23   : > { %v265_v28 = vld [vmem:[%s10053_s19 + $0x4] sm:$0xf]  ;;  %v421_v29 = vshrl.u32 %v264_v27, 16  ;;  %v424_v30 = vshll.u32 %v264_v27, 16  ;;  %v266_v31 = vld [vmem:[%s10053_s19 + $0x8] sm:$0xf] }
  0x24   : > { %v10068_v32 = vrot.slane %v941_v25, 5  ;;  %v947_v33 = vrot.slane %v945_v26, 4  ;;  %v429_v34 = vshrl.u32 %v265_v28, 16  ;;  %v432_v35 = vshll.u32 %v265_v28, 16  ;;  %v267_v36 = vld [vmem:[%s10053_s19 + $0xc] sm:$0xf] }
  0x25   : > { %vm928_vm10 = vsmask.f32 3328  ;;  %vm929_vm11 = vsmask.f32 7440  ;;  %v423_v37 = vrot.slane %v421_v29, 7  ;;  %v438_v38 = vshrl.u32 %v266_v31, 16 }
  0x26   : > { %v948_v40 = vor.u32 %v947_v33, %v10068_v32  ;;  %v431_v41 = vrot.slane %v429_v34, 7  ;;  %v743_v42 = vld [vmem:[#allocation2 + $0xc] sm:$0xf]  ;;  %v441_v43 = vshll.u32 %v266_v31, 16  ;;  %v446_v44 = vshrl.u32 %v267_v36, 16  ;;  %vm10095_vm15 = vmor %vm928_vm10, %vm929_vm11  ;;  %s8774_s16 = sshll.u32 %s10037_s15, 8 }
  0x27   : > { %v13879_v45 = vsel %vm10080_vm13, 4294967295, %v13878_v45  ;;  %v426_v46 = vor.u32 %v424_v30, %v423_v37  ;;  %v427_v47 = vrot.slane %v423_v37, 4  ;;  %v747_v48 = vld [vmem:[#allocation2 + $0x14] sm:$0x1]  ;;  %v440_v49 = vrot.slane %v438_v38, 7  ;;  %s13291_s18 = scalar_lea.vmem %s13776_s5, %s8774_s16  ;;  %s8807_s9 = sshll.u32 %s9967_s25, 10 }
  0x28   : > { %13880 = vst [vmem:[#allocation7_spill] sm:$0xff] %v13879_v45  ;;  %v449_v50 = vshll.u32 %v267_v36, 16  ;;  %v434_v51 = vor.u32 %v432_v35, %v431_v41  ;;  %v436_v52 = vrot.slane %v431_v41, 4  ;;  %v448_v53 = vrot.slane %v446_v44, 7  ;;  %v268_v54 = vld [vmem:[%s10053_s19 + $0x10] sm:$0xf]  ;;  %s13721_s13 = scalar_lea.hbm %s13777_s6, %s8807_s9 }
  0x29   : > { %v744_v55 = vsel %vm10073_vm12, %v426_v46, %v743_v42  ;;  %v443_v56 = vor.u32 %v441_v43, %v440_v49  ;;  %v444_v57 = vrot.slane %v440_v49, 4  ;;  %v750_v58 = vld [vmem:[#allocation2 + $0x18] sm:$0xf]  ;;  %v754_v59 = vld [vmem:[#allocation2 + $0x20] sm:$0x1]  ;;  %v455_v60 = vshrl.u32 %v268_v54, 16 }
  0x2a   : > { %v320_v61 = vld [vmem:[#allocation2 + $0x30] sm:$0x1]  ;;  %v855_v62 = vld [vmem:[#allocation2] sm:$0xf]  ;;  %v891_v63 = vld [vmem:[#allocation2 + $0x8] sm:$0x1]  ;;  %v435_v0 = vsel %vm10080_vm13, %v427_v47, %v434_v51  ;;  %v748_v1 = vsel %vm10017_vm5, %v436_v52, %v747_v48  ;;  %v451_v2 = vor.u32 %v449_v50, %v448_v53 }
  0x2b   : > { %745 = vst [vmem:[#allocation2 + $0xc] sm:$0xf] %v744_v55  ;;  %v453_v3 = vrot.slane %v448_v53, 4  ;;  %v932_v5 = vshrl.u32 %v855_v62, 16  ;;  %v935_v8 = vshll.u32 %v855_v62, 16  ;;  %v949_v9 = vrot.slane %v948_v40, 4 }
  0x2c   : > { %v951_v10 = vshll.u32 %v891_v63, 16  ;;  %746 = vst.msk [vmem:[#allocation2 + $0x10] sm:$0xf] %vm296_vm1, %v435_v0  ;;  %749 = vst [vmem:[#allocation2 + $0x14] sm:$0x1] %v748_v1  ;;  %v13882_v12 = vsel %vm10095_vm15, 4294967295, %v13881_v12  ;;  %v8319_v13 = vcombine.low %v855_v62, %v10057_v22  ;;  %v452_v14 = vsel %vm10080_vm13, %v444_v57, %v451_v2 }
  0x2d   : > { %v269_v11 = vld [vmem:[%s10053_s19 + $0x14] sm:$0xf]  ;;  %13883 = vst [vmem:[#allocation8_spill] sm:$0xff] %v13882_v12  ;;  %v751_v15 = vsel %vm10073_vm12, %v443_v56, %v750_v58  ;;  %v755_v16 = vsel %vm10017_vm5, %v453_v3, %v754_v59  ;;  %v10107_v17 = vld [vmem:[%s10053_s19 + $0x18] sm:$0xf]  ;;  %v934_v19 = vrot.slane %v932_v5, 4 }
  0x2e   : > { %v376_v18 = vld [vmem:[#allocation2 + $0x38] sm:$0x1]  ;;  %v937_v20 = vrot.slane %v935_v8, 5  ;;  %v953_v21 = vrot.slane %v951_v10, 5  ;;  %752 = vst [vmem:[#allocation2 + $0x18] sm:$0xf] %v751_v15  ;;  %9150 = vmatprep.mubr.msk.bf16.mxu1 %vm1365_vm14, %v8319_v13 }
  0x2f   : > { %753 = vst.msk [vmem:[#allocation2 + $0x1c] sm:$0xf] %vm296_vm1, %v452_v14  ;;  %756 = vst [vmem:[#allocation2 + $0x20] sm:$0x1] %v755_v16  ;;  %v10110_v22 = vrot.slane %v455_v60, 7  ;;  %v10118_v24 = vsel %vm1414_vm0, %v10007_v4, 0 }
  0x30   : > { %v10113_v23 = vld [vmem:[%s10053_s19 + $0x1c] sm:$0xf]  ;;  %v458_v25 = vshll.u32 %v268_v54, 16  ;;  %v463_v26 = vshrl.u32 %v269_v11, 16  ;;  %v321_v27 = vsel %vm10017_vm5, 0, %v320_v61  ;;  %v938_v29 = vor.u32 %v937_v20, %v934_v19  ;;  %s9908_s16 = smov [#allocation4]  }
  0x31   : > { %v323_v28 = vld [vmem:[#allocation2 + $0x3c] sm:$0x1]  ;;  %v954_v30 = vsel %vm10095_vm15, %v949_v9, %v953_v21  ;;  %v466_v31 = vshll.u32 %v269_v11, 16  ;;  %v757_v33 = vld [vmem:[#allocation2 + $0x24] sm:$0xf]  ;;  %v377_v34 = vsel %vm10026_vm8, 0, %v376_v18 }
  0x32   : > { %322 = vst [vmem:[#allocation2 + $0x30] sm:$0x1] %v321_v27  ;;  %v460_v35 = vor.u32 %v458_v25, %v10110_v22  ;;  %v461_v4 = vrot.slane %v10110_v22, 4  ;;  %v10128_v36 = vrot.slane %v463_v26, 7  ;;  %378 = vst [vmem:[#allocation2 + $0x38] sm:$0x1] %v377_v34 }
  0x33   : > { %v472_v37 = vshrl.u32 %v10107_v17, 16  ;;  %v939_v38 = vrot.slane %v938_v29, 4  ;;  %v857_v40 = vld [vmem:[#allocation2 + $0xc] sm:$0xf]  ;;  %v475_v41 = vshll.u32 %v10107_v17, 16  ;;  %v480_v42 = vshrl.u32 %v10113_v23, 16 }
  0x34   : > { %v324_v43 = vsel %vm10017_vm5, 0, %v323_v28  ;;  %v10135_v44 = vld [vmem:[#allocation2 + $0x10] sm:$0xf]  ;;  %v892_v46 = vld [vmem:[#allocation2 + $0x14] sm:$0x1]  ;;  %v956_v47 = vshrl.u32 %v857_v40, 16  ;;  %v758_v49 = vsel %vm10073_vm12, %v460_v35, %v757_v33  ;;  %v468_v63 = vor.u32 %v466_v31, %v10128_v36 }
  0x35   : > { %v959_v48 = vshll.u32 %v857_v40, 16  ;;  %325 = vst [vmem:[#allocation2 + $0x3c] sm:$0x1] %v324_v43  ;;  %v944_v50 = vsel %vm10095_vm15, %v939_v38, %v10068_v32  ;;  %v965_v51 = vshll.u32 %v10135_v44, 16  ;;  %v969_v52 = vshrl.u32 %v10135_v44, 16  ;;  %s9848_s15 = sshll.u32 %s9908_s16, 4  ;;  %s9849_s15 = int_to_ptr.vmem [resolvable:$false] %s9848_s15 }
  0x36   : > { %v975_v53 = vshll.u32 %v892_v46, 16  ;;  %759 = vst [vmem:[#allocation2 + $0x24] sm:$0xf] %v758_v49  ;;  %v8287_v54 = vcombine.low %v944_v50, %v954_v30  ;;  %v958_v55 = vrot.slane %v956_v47, 4  ;;  %v859_v57 = vld [vmem:[#allocation2 + $0x18] sm:$0xf]  ;;  %v10148_v0 = vcombine.low %v857_v40, %v10135_v44 }
  0x37   : > { %v961_v56 = vrot.slane %v959_v48, 5  ;;  %v483_v58 = vshll.u32 %v10113_v23, 16  ;;  %v967_v59 = vrot.slane %v965_v51, 5  ;;  %v971_v60 = vrot.slane %v969_v52, 4  ;;  %v860_v62 = vld [vmem:[#allocation2 + $0x1c] sm:$0xf] }
  0x38   : > { %v977_v61 = vrot.slane %v975_v53, 5  ;;  %9116 = vmatprep.mubr.msk.bf16.mxu0 %vm1365_vm14, %v8287_v54  ;;  %v893_v1 = vld [vmem:[#allocation2 + $0x20] sm:$0x1]  ;;  %v980_v2 = vshrl.u32 %v859_v57, 16  ;;  %v983_v3 = vshll.u32 %v859_v57, 16  ;;  %v989_v8 = vshll.u32 %v860_v62, 16  ;;  %9151 = vmatmul.mubr.msk.bf16.vlgmr.msra.gmra.mxu1 %vm1365_vm14, %v10148_v0 }
  0x39   : > { %v962_v32 = vor.u32 %v961_v56, %v958_v55  ;;  %v972_v5 = vor.u32 %v971_v60, %v967_v59  ;;  %v993_v9 = vshrl.u32 %v860_v62, 16  ;;  %v999_v10 = vshll.u32 %v893_v1, 16  ;;  %v761_v21 = vld [vmem:[#allocation2 + $0x2c] sm:$0x1]  ;;  %v379_v34 = vld [vmem:[#allocation2 + $0x44] sm:$0x1] }
  0x3a   : > { %v982_v13 = vrot.slane %v980_v2, 4  ;;  %v985_v14 = vrot.slane %v983_v3, 5  ;;  %v10152_v15 = vcombine.low %v859_v57, %v860_v62  ;;  %v991_v18 = vrot.slane %v989_v8, 5  ;;  %v764_v49 = vld [vmem:[#allocation2 + $0x30] sm:$0xf]  ;;  %s9850_s17 = scalar_lea.vmem %s9849_s15, 2048 }
  0x3b   : > { %v963_v11 = vrot.slane %v962_v32, 4  ;;  %v973_v16 = vrot.slane %v972_v5, 4  ;;  %v995_v19 = vrot.slane %v993_v9, 4  ;;  %v1001_v20 = vrot.slane %v999_v10, 5  ;;  %v273_v53 = vld [vmem:[%s10053_s19 + $0x24] sm:$0xf] }
  0x3c   : > { %v986_v25 = vor.u32 %v985_v14, %v982_v13  ;;  %9154 = vmatprep.mubr.msk.bf16.mxu1 %vm1365_vm14, %v10152_v15  ;;  %v469_v26 = vsel %vm10080_vm13, %v461_v4, %v468_v63  ;;  %v470_v27 = vrot.slane %v10128_v36, 4  ;;  %v474_v4 = vrot.slane %v472_v37, 7  ;;  %v272_v36 = vld [vmem:[%s10053_s19 + $0x20] sm:$0xf]  ;;  %v768_v37 = vld [vmem:[#allocation2 + $0x38] sm:$0x1] }
  0x3d   : > { %v968_v22 = vsel %vm10095_vm15, %v963_v11, %v967_v59  ;;  %v861_v28 = vld [vmem:[#allocation2 + $0x24] sm:$0xf]  ;;  %v978_v29 = vsel %vm10095_vm15, %v973_v16, %v977_v61  ;;  %v996_v30 = vor.u32 %v995_v19, %v991_v18  ;;  %760 = vst.msk [vmem:[#allocation2 + $0x28] sm:$0xf] %vm296_vm1, %v469_v26  ;;  %v482_v48 = vrot.slane %v480_v42, 7 }
  0x3e   : > { %v1004_v31 = vshrl.u32 %v861_v28, 16  ;;  %v1007_v33 = vshll.u32 %v861_v28, 16  ;;  %v10164_v35 = vcombine.low %v968_v22, %v978_v29  ;;  %v987_v38 = vrot.slane %v986_v25, 4  ;;  %v326_v57 = vld [vmem:[#allocation2 + $0x48] sm:$0x1] }
  0x3f   : > { %v762_v40 = vsel %vm10017_vm5, %v470_v27, %v761_v21  ;;  %v997_v43 = vrot.slane %v996_v30, 4  ;;  %v477_v51 = vor.u32 %v475_v41, %v474_v4  ;;  %v478_v52 = vrot.slane %v474_v4, 4  ;;  %v382_v17 = vld [vmem:[#allocation2 + $0x50] sm:$0x1]  ;;  %v274_v32 = vld [vmem:[%s10053_s19 + $0x28] sm:$0xf] }
  0x40   : > { %13884 = vst [vmem:[#allocation9_spill] sm:$0xff] %v10164_v35  ;;  %763 = vst [vmem:[#allocation2 + $0x2c] sm:$0x1] %v762_v40  ;;  %v1006_v46 = vrot.slane %v1004_v31, 4  ;;  %v1009_v47 = vrot.slane %v1007_v33, 5  ;;  %9117 = vmatmul.mubr.msk.bf16.vlgmr.msra.gmra.mxu0 %vm1365_vm14, %v10164_v35  ;;  %v992_v50 = vsel %vm10095_vm15, %v987_v38, %v991_v18  ;;  %v380_v54 = vsel %vm10026_vm8, 0, %v379_v34 }
  0x41   : > { %9183 = vmatpush3.bf16.msra.mxu0 %v10118_v24  ;;  %v1002_v23 = vsel %vm10095_vm15, %v997_v43, %v1001_v20  ;;  %v485_v55 = vor.u32 %v483_v58, %v482_v48  ;;  %v487_v56 = vrot.slane %v482_v48, 4  ;;  %381 = vst [vmem:[#allocation2 + $0x44] sm:$0x1] %v380_v54  ;;  %v765_v59 = vsel %vm10073_vm12, %v477_v51, %v764_v49  ;;  %v10197_v1 = vld [vmem:[%s10053_s19 + $0x2c] sm:$0xf] }
  0x42   : > { %v1010_v42 = vor.u32 %v1009_v47, %v1006_v46  ;;  %v10185_v41 = vcombine.low %v992_v50, %v1002_v23  ;;  %v489_v60 = vshrl.u32 %v272_v36, 16  ;;  %v492_v61 = vshll.u32 %v272_v36, 16  ;;  %766 = vst [vmem:[#allocation2 + $0x30] sm:$0xf] %v765_v59  ;;  %v771_v16 = vld [vmem:[#allocation2 + $0x3c] sm:$0xf] }
  0x43   : > { %v486_v24 = vsel %vm10080_vm13, %v478_v52, %v485_v55  ;;  %v769_v58 = vsel %vm10017_vm5, %v487_v56, %v768_v37  ;;  %v497_v63 = vshrl.u32 %v273_v53, 16  ;;  %v500_v5 = vshll.u32 %v273_v53, 16 }
  0x44   : > { %13885 = vst [vmem:[#allocation10_spill] sm:$0xff] %v10185_v41  ;;  %v10189_v62 = vrot.slane %v1010_v42, 4  ;;  %9120 = vmatprep.mubr.msk.bf16.mxu0 %vm1365_vm14, %v10185_v41  ;;  %v862_v2 = vld [vmem:[#allocation2 + $0x28] sm:$0xf]  ;;  %767 = vst.msk [vmem:[#allocation2 + $0x34] sm:$0xf] %vm296_vm1, %v486_v24 }
  0x45   : > { %770 = vst [vmem:[#allocation2 + $0x38] sm:$0x1] %v769_v58  ;;  %v491_v3 = vrot.slane %v489_v60, 7  ;;  %v327_v8 = vsel %vm10017_vm5, 0, %v326_v57  ;;  %v383_v9 = vsel %vm10026_vm8, 0, %v382_v17  ;;  %v1013_v10 = vshll.u32 %v862_v2, 16 }
  0x46   : > { %v1017_v11 = vshrl.u32 %v862_v2, 16  ;;  %v10206_v13 = vcombine.low %v861_v28, %v862_v2  ;;  %v499_v14 = vrot.slane %v497_v63, 7  ;;  %328 = vst [vmem:[#allocation2 + $0x48] sm:$0x1] %v327_v8  ;;  %384 = vst [vmem:[#allocation2 + $0x50] sm:$0x1] %v383_v9 }
  0x47   : > { %v894_v18 = vld [vmem:[#allocation2 + $0x2c] sm:$0x1]  ;;  %v494_v19 = vor.u32 %v492_v61, %v491_v3  ;;  %v495_v20 = vrot.slane %v491_v3, 4  ;;  %v506_v21 = vshrl.u32 %v274_v32, 16  ;;  %v509_v22 = vshll.u32 %v274_v32, 16 }
  0x48   : > { %v1015_v25 = vrot.slane %v1013_v10, 5  ;;  %v1019_v26 = vrot.slane %v1017_v11, 4  ;;  %v1023_v27 = vshll.u32 %v894_v18, 16  ;;  %9155 = vmatmul.mubr.msk.bf16.gmra.mxu1 %vm1365_vm14, %v10206_v13  ;;  %v502_v29 = vor.u32 %v500_v5, %v499_v14  ;;  %v775_v31 = vld [vmem:[#allocation2 + $0x44] sm:$0x1] }
  0x49   : > { %v504_v30 = vrot.slane %v499_v14, 4  ;;  %v772_v28 = vsel %vm10073_vm12, %v494_v19, %v771_v16  ;;  %v508_v33 = vrot.slane %v506_v21, 7  ;;  %v514_v34 = vshrl.u32 %v10197_v1, 16  ;;  %v863_v36 = vld [vmem:[#allocation2 + $0x30] sm:$0xf] }
  0x4a   : > { %v1020_v38 = vor.u32 %v1019_v26, %v1015_v25  ;;  %v1025_v40 = vrot.slane %v1023_v27, 5  ;;  %v503_v4 = vsel %vm10080_vm13, %v495_v20, %v502_v29  ;;  %773 = vst [vmem:[#allocation2 + $0x3c] sm:$0xf] %v772_v28  ;;  %v1016_v48 = vsel %vm10095_vm15, %v10189_v62, %v1015_v25  ;;  %v329_v60 = vld [vmem:[#allocation2 + $0x54] sm:$0x1] }
  0x4b   : > { %774 = vst.msk [vmem:[#allocation2 + $0x40] sm:$0xf] %vm296_vm1, %v503_v4  ;;  %v776_v43 = vsel %vm10017_vm5, %v504_v30, %v775_v31  ;;  %v512_v46 = vrot.slane %v508_v33, 4  ;;  %v516_v47 = vrot.slane %v514_v34, 7  ;;  %v864_v50 = vld [vmem:[#allocation2 + $0x34] sm:$0xf]  ;;  %v511_v37 = vor.u32 %v509_v22, %v508_v33 }
  0x4c   : > { %v1021_v49 = vrot.slane %v1020_v38, 4  ;;  %v895_v51 = vld [vmem:[#allocation2 + $0x38] sm:$0x1]  ;;  %v1028_v52 = vshrl.u32 %v863_v36, 16  ;;  %777 = vst [vmem:[#allocation2 + $0x44] sm:$0x1] %v776_v43  ;;  %v10223_v17 = vcombine.low %v863_v36, %v864_v50 }
  0x4d   : > { %v1031_v53 = vshll.u32 %v863_v36, 16  ;;  %v1037_v54 = vshll.u32 %v864_v50, 16  ;;  %v1041_v23 = vshrl.u32 %v864_v50, 16  ;;  %v1047_v42 = vshll.u32 %v895_v51, 16  ;;  %v778_v55 = vld [vmem:[#allocation2 + $0x48] sm:$0xf] }
  0x4e   : > { %v1026_v56 = vsel %vm10095_vm15, %v1021_v49, %v1025_v40  ;;  %v1030_v57 = vrot.slane %v1028_v52, 4  ;;  %v517_v59 = vshll.u32 %v10197_v1, 16  ;;  %v385_v61 = vld [vmem:[#allocation2 + $0x5c] sm:$0x1]  ;;  %v782_v32 = vld [vmem:[#allocation2 + $0x50] sm:$0x1]  ;;  %9158 = vmatprep.mubr.msk.bf16.mxu1 %vm1365_vm14, %v10223_v17  ;;  %v779_v8 = vsel %vm10073_vm12, %v511_v37, %v778_v55 }
  0x4f   : > { %v10226_v62 = vcombine.low %v1016_v48, %v1026_v56  ;;  %v1033_v24 = vrot.slane %v1031_v53, 5  ;;  %v1039_v58 = vrot.slane %v1037_v54, 5  ;;  %v1043_v63 = vrot.slane %v1041_v23, 4  ;;  %780 = vst [vmem:[#allocation2 + $0x48] sm:$0xf] %v779_v8 }
  0x50   : > { %v1049_v2 = vrot.slane %v1047_v42, 5  ;;  %v519_v3 = vor.u32 %v517_v59, %v516_v47  ;;  %v521_v5 = vrot.slane %v516_v47, 4  ;;  %v330_v11 = vsel %vm10017_vm5, 0, %v329_v60  ;;  %v276_v22 = vld [vmem:[%s10053_s19 + $0x30] sm:$0xf] }
  0x51   : > { %13886 = vst [vmem:[#allocation11_spill] sm:$0xff] %v10226_v62  ;;  %9121 = vmatmul.mubr.msk.bf16.gmra.mxu0 %vm1365_vm14, %v10226_v62  ;;  %v1034_v1 = vor.u32 %v1033_v24, %v1030_v57  ;;  %v1044_v9 = vor.u32 %v1043_v63, %v1039_v58  ;;  %v865_v10 = vld [vmem:[#allocation2 + $0x3c] sm:$0xf]  ;;  %v386_v14 = vsel %vm10026_vm8, 0, %v385_v61  ;;  %331 = vst [vmem:[#allocation2 + $0x54] sm:$0x1] %v330_v11 }
  0x52   : > { %v866_v16 = vld [vmem:[#allocation2 + $0x40] sm:$0xf]  ;;  %v1052_v18 = vshrl.u32 %v865_v10, 16  ;;  %v1055_v19 = vshll.u32 %v865_v10, 16  ;;  %v520_v20 = vsel %vm10080_vm13, %v512_v46, %v519_v3  ;;  %v783_v21 = vsel %vm10017_vm5, %v521_v5, %v782_v32  ;;  %387 = vst [vmem:[#allocation2 + $0x5c] sm:$0x1] %v386_v14 }
  0x53   : > { %v1035_v25 = vrot.slane %v1034_v1, 4  ;;  %v1045_v26 = vrot.slane %v1044_v9, 4  ;;  %v896_v27 = vld [vmem:[#allocation2 + $0x44] sm:$0x1]  ;;  %v1061_v29 = vshll.u32 %v866_v16, 16  ;;  %v1065_v30 = vshrl.u32 %v866_v16, 16 }
  0x54   : > { %781 = vst.msk [vmem:[#allocation2 + $0x4c] sm:$0xf] %vm296_vm1, %v520_v20  ;;  %784 = vst [vmem:[#allocation2 + $0x50] sm:$0x1] %v783_v21  ;;  %v1054_v28 = vrot.slane %v1052_v18, 4  ;;  %v1057_v31 = vrot.slane %v1055_v19, 5  ;;  %v10244_v34 = vcombine.low %v865_v10, %v866_v16 }
  0x55   : > { %v1071_v33 = vshll.u32 %v896_v27, 16  ;;  %v277_v38 = vld [vmem:[%s10053_s19 + $0x34] sm:$0xf]  ;;  %v1040_v40 = vsel %vm10095_vm15, %v1035_v25, %v1039_v58  ;;  %v1050_v4 = vsel %vm10095_vm15, %v1045_v26, %v1049_v2  ;;  %v1063_v36 = vrot.slane %v1061_v29, 5  ;;  %v332_v46 = vld [vmem:[#allocation2 + $0x60] sm:$0x1] }
  0x56   : > { %v1067_v43 = vrot.slane %v1065_v30, 4  ;;  %v388_v47 = vld [vmem:[#allocation2 + $0x68] sm:$0x1]  ;;  %v10251_v48 = vcombine.low %v1040_v40, %v1050_v4  ;;  %v1058_v49 = vor.u32 %v1057_v31, %v1054_v28  ;;  %9159 = vmatmul.mubr.msk.bf16.gmra.mxu1 %vm1365_vm14, %v10244_v34  ;;  %v523_v51 = vshrl.u32 %v276_v22, 16  ;;  %v278_v23 = vld [vmem:[%s10053_s19 + $0x38] sm:$0xf] }
  0x57   : > { %v1073_v50 = vrot.slane %v1071_v33, 5  ;;  %v526_v37 = vshll.u32 %v276_v22, 16  ;;  %v531_v53 = vshrl.u32 %v277_v38, 16  ;;  %v534_v54 = vshll.u32 %v277_v38, 16  ;;  %v867_v55 = vld [vmem:[#allocation2 + $0x48] sm:$0xf] }
  0x58   : > { %13887 = vst [vmem:[#allocation12_spill] sm:$0xff] %v10251_v48  ;;  %v1068_v52 = vor.u32 %v1067_v43, %v1063_v36  ;;  %9124 = vmatprep.mubr.msk.bf16.mxu0 %vm1365_vm14, %v10251_v48  ;;  %v1059_v42 = vrot.slane %v1058_v49, 4  ;;  %v525_v56 = vrot.slane %v523_v51, 7  ;;  %v333_v57 = vsel %vm10017_vm5, 0, %v332_v46  ;;  %v785_v14 = vld [vmem:[#allocation2 + $0x54] sm:$0xf] }
  0x59   : > { %v389_v59 = vsel %vm10026_vm8, 0, %v388_v47  ;;  %v1076_v61 = vshrl.u32 %v867_v55, 16  ;;  %v1079_v24 = vshll.u32 %v867_v55, 16  ;;  %v533_v58 = vrot.slane %v531_v53, 7  ;;  %334 = vst [vmem:[#allocation2 + $0x60] sm:$0x1] %v333_v57 }
  0x5a   : > { %v1069_v60 = vrot.slane %v1068_v52, 4  ;;  %390 = vst [vmem:[#allocation2 + $0x68] sm:$0x1] %v389_v59  ;;  %v1064_v63 = vsel %vm10095_vm15, %v1059_v42, %v1063_v36  ;;  %v528_v3 = vor.u32 %v526_v37, %v525_v56  ;;  %v529_v5 = vrot.slane %v525_v56, 4  ;;  %v789_v21 = vld [vmem:[#allocation2 + $0x5c] sm:$0x1] }
  0x5b   : > { %v10264_v32 = vld [vmem:[#allocation2 + $0x4c] sm:$0xf]  ;;  %v897_v2 = vld [vmem:[#allocation2 + $0x50] sm:$0x1]  ;;  %v540_v8 = vshrl.u32 %v278_v23, 16  ;;  %v1078_v9 = vrot.slane %v1076_v61, 4  ;;  %v536_v27 = vor.u32 %v534_v54, %v533_v58 }
  0x5c   : > { %v1074_v1 = vsel %vm10095_vm15, %v1069_v60, %v1073_v50  ;;  %v1081_v10 = vrot.slane %v1079_v24, 5  ;;  %v1085_v11 = vshll.u32 %v10264_v32, 16  ;;  %v1089_v18 = vshrl.u32 %v10264_v32, 16  ;;  %v279_v22 = vld [vmem:[%s10053_s19 + $0x3c] sm:$0xf] }
  0x5d   : > { %v10269_v16 = vcombine.low %v1064_v63, %v1074_v1  ;;  %v1095_v19 = vshll.u32 %v897_v2, 16  ;;  %v10273_v20 = vcombine.low %v867_v55, %v10264_v32  ;;  %v538_v29 = vrot.slane %v533_v58, 4  ;;  %v280_v30 = vld [vmem:[%s10053_s19 + $0x40] sm:$0xf]  ;;  %v335_v28 = vld [vmem:[#allocation2 + $0x6c] sm:$0x1] }
  0x5e   : > { %v1082_v25 = vor.u32 %v1081_v10, %v1078_v9  ;;  %v1087_v26 = vrot.slane %v1085_v11, 5  ;;  %v1091_v31 = vrot.slane %v1089_v18, 4  ;;  %v786_v38 = vsel %vm10073_vm12, %v528_v3, %v785_v14  ;;  %v281_v4 = vld [vmem:[%s10053_s19 + $0x44] sm:$0xf]  ;;  %v391_v36 = vld [vmem:[#allocation2 + $0x74] sm:$0x1] }
  0x5f   : > { %13888 = vst [vmem:[#allocation13_spill] sm:$0xff] %v10269_v16  ;;  %9125 = vmatmul.mubr.msk.bf16.gmra.mxu0 %vm1365_vm14, %v10269_v16  ;;  %v1097_v33 = vrot.slane %v1095_v19, 5  ;;  %9162 = vmatprep.mubr.msk.bf16.mxu1 %vm1365_vm14, %v10273_v20  ;;  %v542_v40 = vrot.slane %v540_v8, 7  ;;  %v537_v46 = vsel %vm10080_vm13, %v529_v5, %v536_v27  ;;  %787 = vst [vmem:[#allocation2 + $0x54] sm:$0xf] %v786_v38  ;;  %v543_v49 = vshll.u32 %v278_v23, 16 }
  0x60   : > { %v1083_v43 = vrot.slane %v1082_v25, 4  ;;  %v790_v47 = vsel %vm10017_vm5, %v538_v29, %v789_v21  ;;  %v338_v50 = vld [vmem:[#allocation2 + $0x78] sm:$0x1]  ;;  %v10291_v51 = vld [vmem:[%s13772_s1 + $0x6] sm:$0x3]  ;;  %v1092_v52 = vor.u32 %v1091_v31, %v1087_v26  ;;  %v548_v53 = vshrl.u32 %v279_v22, 16 }
  0x61   : > { %788 = vst.msk [vmem:[#allocation2 + $0x58] sm:$0xf] %vm296_vm1, %v537_v46  ;;  %791 = vst [vmem:[#allocation2 + $0x5c] sm:$0x1] %v790_v47  ;;  %v546_v37 = vrot.slane %v542_v40, 4  ;;  %v551_v54 = vshll.u32 %v279_v22, 16  ;;  %9729 = vmatprep.subr.msk.bf16.mxu1 %vm1414_vm0, %v10291_v51  ;;  %v545_v55 = vor.u32 %v543_v49, %v542_v40 }
  0x62   : > { %v792_v42 = vld [vmem:[#allocation2 + $0x60] sm:$0xf]  ;;  %v1088_v23 = vsel %vm10095_vm15, %v1083_v43, %v1087_v26  ;;  %v336_v56 = vsel %vm10017_vm5, 0, %v335_v28  ;;  %v392_v57 = vsel %vm10026_vm8, 0, %v391_v36  ;;  %v10303_v59 = vld [vmem:[%s10053_s19 + $0x48] sm:$0xf] }
  0x63   : > { %v10308_v60 = vld [vmem:[%s13772_s1 + $0x8] sm:$0x3]  ;;  %v1093_v61 = vrot.slane %v1092_v52, 4  ;;  %v550_v24 = vrot.slane %v548_v53, 7  ;;  %337 = vst [vmem:[#allocation2 + $0x6c] sm:$0x1] %v336_v56  ;;  %v793_v3 = vsel %vm10073_vm12, %v545_v55, %v792_v42 }
  0x64   : > { %393 = vst [vmem:[#allocation2 + $0x74] sm:$0x1] %v392_v57  ;;  %v557_v58 = vshrl.u32 %v280_v30, 16  ;;  %v560_v63 = vshll.u32 %v280_v30, 16  ;;  %v394_v2 = vld [vmem:[#allocation2 + $0x80] sm:$0x1]  ;;  %9730 = vmatprep.subr.msk.bf16.mxu0 %vm1414_vm0, %v10308_v60 }
  0x65   : > { %v796_v5 = vld [vmem:[#allocation2 + $0x68] sm:$0x1]  ;;  %v565_v8 = vshrl.u32 %v281_v4, 16  ;;  %v568_v1 = vshll.u32 %v281_v4, 16  ;;  %v339_v9 = vsel %vm10017_vm5, 0, %v338_v50  ;;  %v1098_v10 = vsel %vm10095_vm15, %v1093_v61, %v1097_v33 }
  0x66   : > { %v553_v11 = vor.u32 %v551_v54, %v550_v24  ;;  %v555_v14 = vrot.slane %v550_v24, 4  ;;  %794 = vst [vmem:[#allocation2 + $0x60] sm:$0xf] %v793_v3  ;;  %v559_v18 = vrot.slane %v557_v58, 7  ;;  %340 = vst [vmem:[#allocation2 + $0x78] sm:$0x1] %v339_v9  ;;  %v10318_v19 = vcombine.low %v1088_v23, %v1098_v10 }
  0x67   : > { %v567_v21 = vrot.slane %v565_v8, 7  ;;  %v395_v22 = vsel %vm10026_vm8, 0, %v394_v2  ;;  %v574_v25 = vshrl.u32 %v10303_v59, 16  ;;  %v869_v26 = vld [vmem:[#allocation2 + $0x54] sm:$0xf]  ;;  %v577_v2 = vshll.u32 %v10303_v59, 16 }
  0x68   : > { %13889 = vst [vmem:[#allocation14_spill] sm:$0xff] %v10318_v19  ;;  %v554_v27 = vsel %vm10080_vm13, %v546_v37, %v553_v11  ;;  %v797_v29 = vsel %vm10017_vm5, %v555_v14, %v796_v5  ;;  %v562_v30 = vor.u32 %v560_v63, %v559_v18  ;;  %v563_v28 = vrot.slane %v559_v18, 4  ;;  %396 = vst [vmem:[#allocation2 + $0x80] sm:$0x1] %v395_v22  ;;  %v10329_v31 = vld [vmem:[#allocation2 + $0x58] sm:$0xf] }
  0x69   : > { %9128 = vmatprep.mubr.msk.bf16.mxu0 %vm1365_vm14, %v10318_v19  ;;  %v898_v33 = vld [vmem:[#allocation2 + $0x5c] sm:$0x1]  ;;  %v1100_v38 = vshrl.u32 %v869_v26, 16  ;;  %v1103_v40 = vshll.u32 %v869_v26, 16  ;;  %795 = vst.msk [vmem:[#allocation2 + $0x64] sm:$0xf] %vm296_vm1, %v554_v27  ;;  %v570_v4 = vor.u32 %v568_v1, %v567_v21  ;;  %v10335_v47 = vcombine.low %v869_v26, %v10329_v31 }
  0x6a   : > { %798 = vst [vmem:[#allocation2 + $0x68] sm:$0x1] %v797_v29  ;;  %v1109_v36 = vshll.u32 %v10329_v31, 16  ;;  %v1113_v43 = vshrl.u32 %v10329_v31, 16  ;;  %v1119_v46 = vshll.u32 %v898_v33, 16  ;;  %v572_v53 = vrot.slane %v567_v21, 4 }
  0x6b   : > { %v283_v49 = vld [vmem:[%s10053_s19 + $0x4c] sm:$0xf]  ;;  %v1102_v50 = vrot.slane %v1100_v38, 4  ;;  %v1105_v52 = vrot.slane %v1103_v40, 5  ;;  %v571_v37 = vsel %vm10080_vm13, %v563_v28, %v570_v4  ;;  %9163 = vmatmul.mubr.msk.bf16.gmra.mxu1 %vm1365_vm14, %v10335_v47  ;;  %v803_v57 = vld [vmem:[#allocation2 + $0x74] sm:$0x1] }
  0x6c   : > { %v799_v54 = vld [vmem:[#allocation2 + $0x6c] sm:$0xf]  ;;  %v1111_v42 = vrot.slane %v1109_v36, 5  ;;  %v1115_v23 = vrot.slane %v1113_v43, 4  ;;  %v1121_v55 = vrot.slane %v1119_v46, 5  ;;  %v804_v58 = vsel %vm10017_vm5, %v572_v53, %v803_v57 }
  0x6d   : > { %v800_v56 = vsel %vm10073_vm12, %v562_v30, %v799_v54  ;;  %802 = vst.msk [vmem:[#allocation2 + $0x70] sm:$0xf] %vm296_vm1, %v571_v37  ;;  %v1106_v61 = vor.u32 %v1105_v52, %v1102_v50  ;;  %v871_v24 = vld [vmem:[#allocation2 + $0x60] sm:$0xf]  ;;  %v576_v63 = vrot.slane %v574_v25, 7  ;;  %v582_v1 = vshrl.u32 %v283_v49, 16 }
  0x6e   : > { %801 = vst [vmem:[#allocation2 + $0x6c] sm:$0xf] %v800_v56  ;;  %v1116_v3 = vor.u32 %v1115_v23, %v1111_v42  ;;  %v1124_v5 = vshrl.u32 %v871_v24, 16  ;;  %v1127_v8 = vshll.u32 %v871_v24, 16  ;;  %805 = vst [vmem:[#allocation2 + $0x74] sm:$0x1] %v804_v58 }
  0x6f   : > { %v1107_v9 = vrot.slane %v1106_v61, 4  ;;  %v580_v10 = vrot.slane %v576_v63, 4  ;;  %v585_v11 = vshll.u32 %v283_v49, 16  ;;  %v579_v26 = vor.u32 %v577_v2, %v576_v63  ;;  %v341_v54 = vld [vmem:[#allocation2 + $0x84] sm:$0x1] }
  0x70   : > { %v1117_v14 = vrot.slane %v1116_v3, 4  ;;  %v10348_v18 = vld [vmem:[#allocation2 + $0x64] sm:$0xf]  ;;  %v1126_v22 = vrot.slane %v1124_v5, 4  ;;  %v1129_v27 = vrot.slane %v1127_v8, 5  ;;  %v584_v38 = vrot.slane %v582_v1, 7 }
  0x71   : > { %v10350_v21 = vld [vmem:[#allocation2 + $0x68] sm:$0x1]  ;;  %v1112_v25 = vsel %vm10095_vm15, %v1107_v9, %v1111_v42  ;;  %v1133_v59 = vshll.u32 %v10348_v18, 16  ;;  %v1137_v29 = vshrl.u32 %v10348_v18, 16  ;;  %v10360_v33 = vcombine.low %v871_v24, %v10348_v18  ;;  %v397_v61 = vld [vmem:[#allocation2 + $0x8c] sm:$0x1] }
  0x72   : > { %v1122_v30 = vsel %vm10095_vm15, %v1117_v14, %v1121_v55  ;;  %v1143_v28 = vshll.u32 %v10350_v21, 16  ;;  %v1130_v4 = vor.u32 %v1129_v27, %v1126_v22  ;;  %v587_v53 = vor.u32 %v585_v11, %v584_v38  ;;  %v806_v3 = vld [vmem:[#allocation2 + $0x78] sm:$0xf]  ;;  %v810_v11 = vld [vmem:[#allocation2 + $0x80] sm:$0x1] }
  0x73   : > { %v10362_v40 = vcombine.low %v1112_v25, %v1122_v30  ;;  %v1135_v36 = vrot.slane %v1133_v59, 5  ;;  %v1139_v43 = vrot.slane %v1137_v29, 4  ;;  %9166 = vmatprep.mubr.msk.bf16.mxu1 %vm1365_vm14, %v10360_v33  ;;  %v589_v27 = vrot.slane %v584_v38, 4  ;;  %v284_v59 = vld [vmem:[%s10053_s19 + $0x50] sm:$0xf] }
  0x74   : > { %v10364_v46 = vld [vmem:[#allocation2 + $0x70] sm:$0xf]  ;;  %v1145_v49 = vrot.slane %v1143_v28, 5  ;;  %v1131_v42 = vrot.slane %v1130_v4, 4  ;;  %v588_v25 = vsel %vm10080_vm13, %v580_v10, %v587_v53  ;;  %v285_v29 = vld [vmem:[%s10053_s19 + $0x54] sm:$0xf]  ;;  %v807_v4 = vsel %vm10073_vm12, %v579_v26, %v806_v3 }
  0x75   : > { %13890 = vst [vmem:[#allocation15_spill] sm:$0xff] %v10362_v40  ;;  %v873_v50 = vld [vmem:[#allocation2 + $0x6c] sm:$0xf]  ;;  %v1157_v52 = vshll.u32 %v10364_v46, 16  ;;  %v1161_v37 = vshrl.u32 %v10364_v46, 16  ;;  %9129 = vmatmul.mubr.msk.bf16.gmra.mxu0 %vm1365_vm14, %v10362_v40  ;;  %v1140_v23 = vor.u32 %v1139_v43, %v1135_v36  ;;  %v591_v53 = vshrl.u32 %v284_v59, 16 }
  0x76   : > { %v10372_v55 = vld [vmem:[#allocation2 + $0x74] sm:$0x1]  ;;  %v1148_v56 = vshrl.u32 %v873_v50, 16  ;;  %v1151_v57 = vshll.u32 %v873_v50, 16  ;;  %v10376_v2 = vcombine.low %v873_v50, %v10364_v46  ;;  %v1136_v5 = vsel %vm10095_vm15, %v1131_v42, %v1135_v36  ;;  %809 = vst.msk [vmem:[#allocation2 + $0x7c] sm:$0xf] %vm296_vm1, %v588_v25 }
  0x77   : > { %v1159_v24 = vrot.slane %v1157_v52, 5  ;;  %v1163_v58 = vrot.slane %v1161_v37, 4  ;;  %v1167_v63 = vshll.u32 %v10372_v55, 16  ;;  %v1141_v8 = vrot.slane %v1140_v23, 4  ;;  %v344_v43 = vld [vmem:[#allocation2 + $0x90] sm:$0x1] }
  0x78   : > { %v1150_v1 = vrot.slane %v1148_v56, 4  ;;  %v1153_v9 = vrot.slane %v1151_v57, 5  ;;  %9167 = vmatmul.mubr.msk.bf16.gmra.mxu1 %vm1365_vm14, %v10376_v2  ;;  %v342_v36 = vsel %vm10017_vm5, 0, %v341_v54  ;;  %v400_v50 = vld [vmem:[#allocation2 + $0x98] sm:$0x1]  ;;  %v811_v52 = vsel %vm10017_vm5, %v589_v27, %v810_v11 }
  0x79   : > { %v1164_v14 = vor.u32 %v1163_v58, %v1159_v24  ;;  %v1169_v22 = vrot.slane %v1167_v63, 5  ;;  %v1146_v30 = vsel %vm10095_vm15, %v1141_v8, %v1145_v49  ;;  %808 = vst [vmem:[#allocation2 + $0x78] sm:$0xf] %v807_v4  ;;  %343 = vst [vmem:[#allocation2 + $0x84] sm:$0x1] %v342_v36  ;;  %v398_v49 = vsel %vm10026_vm8, 0, %v397_v61 }
  0x7a   : > { %v1154_v28 = vor.u32 %v1153_v9, %v1150_v1  ;;  %v10393_v10 = vcombine.low %v1136_v5, %v1146_v30  ;;  %v286_v26 = vld [vmem:[%s10053_s19 + $0x58] sm:$0xf]  ;;  %812 = vst [vmem:[#allocation2 + $0x80] sm:$0x1] %v811_v52  ;;  %399 = vst [vmem:[#allocation2 + $0x8c] sm:$0x1] %v398_v49 }
  0x7b   : > { %v1165_v38 = vrot.slane %v1164_v14, 4  ;;  %v594_v54 = vshll.u32 %v284_v59, 16  ;;  %v599_v42 = vshrl.u32 %v285_v29, 16  ;;  %v287_v23 = vld [vmem:[%s10053_s19 + $0x5c] sm:$0xf]  ;;  %v602_v57 = vshll.u32 %v285_v29, 16 }
  0x7c   : > { %13891 = vst [vmem:[#allocation16_spill] sm:$0xff] %v10393_v10  ;;  %v1155_v37 = vrot.slane %v1154_v28, 4  ;;  %9132 = vmatprep.mubr.msk.bf16.mxu0 %vm1365_vm14, %v10393_v10  ;;  %v345_v58 = vsel %vm10017_vm5, 0, %v344_v43  ;;  %v401_v61 = vsel %vm10026_vm8, 0, %v400_v50  ;;  %v347_v63 = vld [vmem:[#allocation2 + $0x9c] sm:$0x1] }
  0x7d   : > { %v1170_v56 = vsel %vm10095_vm15, %v1165_v38, %v1169_v22  ;;  %v593_v5 = vrot.slane %v591_v53, 7  ;;  %v601_v8 = vrot.slane %v599_v42, 7  ;;  %346 = vst [vmem:[#allocation2 + $0x90] sm:$0x1] %v345_v58  ;;  %402 = vst [vmem:[#allocation2 + $0x98] sm:$0x1] %v401_v61 }
  0x7e   : > { %v1160_v3 = vsel %vm10095_vm15, %v1155_v37, %v1159_v24  ;;  %v608_v1 = vshrl.u32 %v286_v26, 16  ;;  %v403_v9 = vld [vmem:[#allocation2 + $0xa4] sm:$0x1]  ;;  %v611_v14 = vshll.u32 %v286_v26, 16  ;;  %v616_v22 = vshrl.u32 %v287_v23, 16 }
  0x7f   : > { %v10411_v11 = vcombine.low %v1160_v3, %v1170_v56  ;;  %v619_v25 = vshll.u32 %v287_v23, 16  ;;  %v596_v27 = vor.u32 %v594_v54, %v593_v5  ;;  %v597_v59 = vrot.slane %v593_v5, 4  ;;  %v10415_v24 = vld [vmem:[#allocation2 + $0x7c] sm:$0xf]  ;;  %v288_v37 = vld [vmem:[%s10053_s19 + $0x60] sm:$0xf] }
  0x80   : > { %v604_v29 = vor.u32 %v602_v57, %v601_v8  ;;  %v606_v30 = vrot.slane %v601_v8, 4  ;;  %v610_v28 = vrot.slane %v608_v1, 7  ;;  %v618_v4 = vrot.slane %v616_v22, 7  ;;  %v875_v50 = vld [vmem:[#allocation2 + $0x78] sm:$0xf] }
  0x81   : > { %13892 = vst [vmem:[#allocation17_spill] sm:$0xff] %v10411_v11  ;;  %9133 = vmatmul.mubr.msk.bf16.gmra.mxu0 %vm1365_vm14, %v10411_v11  ;;  %v348_v36 = vsel %vm10017_vm5, 0, %v347_v63  ;;  %v404_v43 = vsel %vm10026_vm8, 0, %v403_v9  ;;  %v1181_v38 = vshll.u32 %v10415_v24, 16  ;;  %v1185_v52 = vshrl.u32 %v10415_v24, 16 }
  0x82   : > { %v605_v49 = vsel %vm10080_vm13, %v597_v59, %v604_v29  ;;  %v813_v26 = vld [vmem:[#allocation2 + $0x84] sm:$0xf]  ;;  %349 = vst [vmem:[#allocation2 + $0x9c] sm:$0x1] %v348_v36  ;;  %405 = vst [vmem:[#allocation2 + $0xa4] sm:$0x1] %v404_v43  ;;  %v10429_v23 = vcombine.low %v875_v50, %v10415_v24  ;;  %v613_v9 = vor.u32 %v611_v14, %v610_v28 }
  0x83   : > { %v10426_v53 = vld [vmem:[#allocation2 + $0x80] sm:$0x1]  ;;  %v1172_v54 = vshrl.u32 %v875_v50, 16  ;;  %v1175_v42 = vshll.u32 %v875_v50, 16  ;;  %v814_v56 = vsel %vm10073_vm12, %v596_v27, %v813_v26  ;;  %816 = vst.msk [vmem:[#allocation2 + $0x88] sm:$0xf] %vm296_vm1, %v605_v49  ;;  %v621_v36 = vor.u32 %v619_v25, %v618_v4 }
  0x84   : > { %13893 = vst [vmem:[#allocation18_spill] sm:$0xff] %v10429_v23  ;;  %v817_v57 = vld [vmem:[#allocation2 + $0x8c] sm:$0x1]  ;;  %v1183_v58 = vrot.slane %v1181_v38, 5  ;;  %v1187_v61 = vrot.slane %v1185_v52, 4  ;;  %v1191_v63 = vshll.u32 %v10426_v53, 16  ;;  %9170 = vmatprep.mubr.msk.bf16.mxu1 %vm1365_vm14, %v10429_v23 }
  0x85   : > { %815 = vst [vmem:[#allocation2 + $0x84] sm:$0xf] %v814_v56  ;;  %v818_v3 = vsel %vm10017_vm5, %v606_v30, %v817_v57  ;;  %v289_v5 = vld [vmem:[%s10053_s19 + $0x64] sm:$0xf]  ;;  %v1174_v8 = vrot.slane %v1172_v54, 4  ;;  %v1177_v1 = vrot.slane %v1175_v42, 5 }
  0x86   : > { %819 = vst [vmem:[#allocation2 + $0x8c] sm:$0x1] %v818_v3  ;;  %v614_v22 = vrot.slane %v610_v28, 4  ;;  %v820_v27 = vld [vmem:[#allocation2 + $0x90] sm:$0xf]  ;;  %v1188_v59 = vor.u32 %v1187_v61, %v1183_v58  ;;  %v1193_v29 = vrot.slane %v1191_v63, 5 }
  0x87   : > { %v623_v43 = vrot.slane %v618_v4, 4  ;;  %v824_v50 = vld [vmem:[#allocation2 + $0x98] sm:$0x1]  ;;  %v350_v38 = vld [vmem:[#allocation2 + $0xa8] sm:$0x1]  ;;  %v1178_v52 = vor.u32 %v1177_v1, %v1174_v8  ;;  %v821_v30 = vsel %vm10073_vm12, %v613_v9, %v820_v27  ;;  %v625_v49 = vshrl.u32 %v288_v37, 16 }
  0x88   : > { %v628_v26 = vshll.u32 %v288_v37, 16  ;;  %v406_v54 = vld [vmem:[#allocation2 + $0xb0] sm:$0x1]  ;;  %v1189_v42 = vrot.slane %v1188_v59, 4  ;;  %v622_v56 = vsel %vm10080_vm13, %v614_v22, %v621_v36  ;;  %822 = vst [vmem:[#allocation2 + $0x90] sm:$0xf] %v821_v30 }
  0x89   : > { %v825_v14 = vsel %vm10017_vm5, %v623_v43, %v824_v50  ;;  %v633_v28 = vshrl.u32 %v289_v5, 16  ;;  %v1179_v4 = vrot.slane %v1178_v52, 4  ;;  %823 = vst.msk [vmem:[#allocation2 + $0x94] sm:$0xf] %vm296_vm1, %v622_v56  ;;  %v627_v57 = vrot.slane %v625_v49, 7 }
  0x8a   : > { %826 = vst [vmem:[#allocation2 + $0x98] sm:$0x1] %v825_v14  ;;  %v351_v37 = vsel %vm10017_vm5, 0, %v350_v38  ;;  %v1194_v61 = vsel %vm10095_vm15, %v1189_v42, %v1193_v29  ;;  %v10452_v63 = vld [vmem:[#allocation2 + $0x88] sm:$0xf]  ;;  %v636_v8 = vshll.u32 %v289_v5, 16 }
  0x8b   : > { %v635_v3 = vrot.slane %v633_v28, 7  ;;  %352 = vst [vmem:[#allocation2 + $0xa8] sm:$0x1] %v351_v37  ;;  %v407_v1 = vsel %vm10026_vm8, 0, %v406_v54  ;;  %v1184_v9 = vsel %vm10095_vm15, %v1179_v4, %v1183_v58  ;;  %v1205_v27 = vshll.u32 %v10452_v63, 16 }
  0x8c   : > { %v877_v22 = vld [vmem:[#allocation2 + $0x84] sm:$0xf]  ;;  %v1209_v59 = vshrl.u32 %v10452_v63, 16  ;;  %v630_v36 = vor.u32 %v628_v26, %v627_v57  ;;  %v10461_v43 = vld [vmem:[%s10053_s19 + $0x68] sm:$0xf]  ;;  %v10463_v29 = vcombine.low %v1184_v9, %v1194_v61  ;;  %v631_v42 = vrot.slane %v627_v57, 4 }
  0x8d   : > { %408 = vst [vmem:[#allocation2 + $0xb0] sm:$0x1] %v407_v1  ;;  %v10465_v50 = vld [vmem:[#allocation2 + $0x8c] sm:$0x1]  ;;  %v1196_v5 = vshrl.u32 %v877_v22, 16  ;;  %v1199_v38 = vshll.u32 %v877_v22, 16  ;;  %v10468_v52 = vcombine.low %v877_v22, %v10452_v63  ;;  %v638_v14 = vor.u32 %v636_v8, %v635_v3 }
  0x8e   : > { %13894 = vst [vmem:[#allocation19_spill] sm:$0xff] %v10463_v29  ;;  %v827_v30 = vld [vmem:[#allocation2 + $0x9c] sm:$0xf]  ;;  %v1207_v58 = vrot.slane %v1205_v27, 5  ;;  %v1211_v49 = vrot.slane %v1209_v59, 4  ;;  %v1215_v54 = vshll.u32 %v10465_v50, 16  ;;  %9136 = vmatprep.mubr.msk.bf16.mxu0 %vm1365_vm14, %v10463_v29 }
  0x8f   : > { %13895 = vst [vmem:[#allocation20_spill] sm:$0xff] %v10468_v52  ;;  %v1198_v26 = vrot.slane %v1196_v5, 4  ;;  %v1201_v56 = vrot.slane %v1199_v38, 5  ;;  %9171 = vmatmul.mubr.msk.bf16.gmra.mxu1 %vm1365_vm14, %v10468_v52  ;;  %v640_v28 = vrot.slane %v635_v3, 4  ;;  %v879_v61 = vld [vmem:[#allocation2 + $0x90] sm:$0xf]  ;;  %v828_v1 = vsel %vm10073_vm12, %v630_v36, %v827_v30 }
  0x90   : > { %v1212_v4 = vor.u32 %v1211_v49, %v1207_v58  ;;  %v1217_v37 = vrot.slane %v1215_v54, 5  ;;  %v642_v9 = vshrl.u32 %v10461_v43, 16  ;;  %v10478_v57 = vld [vmem:[#allocation2 + $0x94] sm:$0xf]  ;;  %v1220_v59 = vshrl.u32 %v879_v61, 16 }
  0x91   : > { %v1202_v22 = vor.u32 %v1201_v56, %v1198_v26  ;;  %v10480_v27 = vld [vmem:[#allocation2 + $0x98] sm:$0x1]  ;;  %v1223_v5 = vshll.u32 %v879_v61, 16  ;;  %v639_v8 = vsel %vm10080_vm13, %v631_v42, %v638_v14  ;;  %829 = vst [vmem:[#allocation2 + $0x9c] sm:$0xf] %v828_v1  ;;  %v1229_v38 = vshll.u32 %v10478_v57, 16 }
  0x92   : > { %v1213_v3 = vrot.slane %v1212_v4, 4  ;;  %v1233_v49 = vshrl.u32 %v10478_v57, 16  ;;  %v1239_v36 = vshll.u32 %v10480_v27, 16  ;;  %830 = vst.msk [vmem:[#allocation2 + $0xa0] sm:$0xf] %vm296_vm1, %v639_v8  ;;  %v1222_v26 = vrot.slane %v1220_v59, 4 }
  0x93   : > { %v831_v30 = vld [vmem:[#allocation2 + $0xa4] sm:$0x1]  ;;  %v1203_v54 = vrot.slane %v1202_v22, 4  ;;  %v1225_v56 = vrot.slane %v1223_v5, 5  ;;  %v10489_v25 = vcombine.low %v879_v61, %v10478_v57  ;;  %v291_v29 = vld [vmem:[%s10053_s19 + $0x6c] sm:$0xf] }
  0x94   : > { %v1218_v42 = vsel %vm10095_vm15, %v1213_v3, %v1217_v37  ;;  %v1231_v14 = vrot.slane %v1229_v38, 5  ;;  %v1235_v4 = vrot.slane %v1233_v49, 4  ;;  %v1241_v1 = vrot.slane %v1239_v36, 5  ;;  %v353_v11 = vld [vmem:[#allocation2 + $0xb4] sm:$0x1] }
  0x95   : > { %13896 = vst [vmem:[#allocation21_spill] sm:$0xff] %v10489_v25  ;;  %v1208_v10 = vsel %vm10095_vm15, %v1203_v54, %v1207_v58  ;;  %v1226_v8 = vor.u32 %v1225_v56, %v1222_v26  ;;  %9174 = vmatprep.mubr.msk.bf16.mxu1 %vm1365_vm14, %v10489_v25  ;;  %v832_v61 = vsel %vm10017_vm5, %v640_v28, %v831_v30  ;;  %v644_v22 = vrot.slane %v642_v9, 7  ;;  %v409_v59 = vld [vmem:[#allocation2 + $0xbc] sm:$0x1]  ;;  %v292_v49 = vld [vmem:[%s10053_s19 + $0x70] sm:$0xf] }
  0x96   : > { %v10500_v5 = vcombine.low %v1208_v10, %v1218_v42  ;;  %v1236_v37 = vor.u32 %v1235_v4, %v1231_v14  ;;  %833 = vst [vmem:[#allocation2 + $0xa4] sm:$0x1] %v832_v61  ;;  %v645_v3 = vshll.u32 %v10461_v43, 16  ;;  %v650_v38 = vshrl.u32 %v291_v29, 16  ;;  %v834_v54 = vld [vmem:[#allocation2 + $0xa8] sm:$0xf] }
  0x97   : > { %v1227_v36 = vrot.slane %v1226_v8, 4  ;;  %v648_v40 = vrot.slane %v644_v22, 4  ;;  %v653_v58 = vshll.u32 %v291_v29, 16  ;;  %v354_v26 = vsel %vm10017_vm5, 0, %v353_v11  ;;  %v9824_v16 = vld [vmem:[#allocation2 + $0x8] sm:$0x1] }
  0x98   : > { %13897 = vst [vmem:[#allocation22_spill] sm:$0xff] %v10500_v5  ;;  %9137 = vmatmul.mubr.msk.bf16.gmra.mxu0 %vm1365_vm14, %v10500_v5  ;;  %v1237_v28 = vrot.slane %v1236_v37, 4  ;;  %v881_v9 = vld [vmem:[#allocation2 + $0x9c] sm:$0xf]  ;;  %v647_v10 = vor.u32 %v645_v3, %v644_v22  ;;  %v652_v30 = vrot.slane %v650_v38, 7  ;;  %v410_v43 = vsel %vm10026_vm8, 0, %v409_v59 }
  0x99   : > { %355 = vst [vmem:[#allocation2 + $0xb4] sm:$0x1] %v354_v26  ;;  %v1232_v56 = vsel %vm10095_vm15, %v1227_v36, %v1231_v14  ;;  %v10512_v29 = vld [vmem:[#allocation2 + $0xa0] sm:$0xf]  ;;  %v1244_v42 = vshrl.u32 %v881_v9, 16  ;;  %v1247_v4 = vshll.u32 %v881_v9, 16 }
  0x9a   : > { %411 = vst [vmem:[#allocation2 + $0xbc] sm:$0x1] %v410_v43  ;;  %v659_v11 = vshrl.u32 %v292_v49, 16  ;;  %v1242_v8 = vsel %vm10095_vm15, %v1237_v28, %v1241_v1  ;;  %v1253_v61 = vshll.u32 %v10512_v29, 16  ;;  %v1257_v22 = vshrl.u32 %v10512_v29, 16 }
  0x9b   : > { %v10519_v37 = vcombine.low %v881_v9, %v10512_v29  ;;  %v10521_v59 = vcombine.low %v1232_v56, %v1242_v8  ;;  %v1246_v3 = vrot.slane %v1244_v42, 4  ;;  %v1249_v14 = vrot.slane %v1247_v4, 5  ;;  %v838_v36 = vld [vmem:[#allocation2 + $0xb0] sm:$0x1]  ;;  %v293_v26 = vld [vmem:[%s10053_s19 + $0x74] sm:$0xf] }
  0x9c   : > { %v655_v38 = vor.u32 %v653_v58, %v652_v30  ;;  %v1255_v5 = vrot.slane %v1253_v61, 5  ;;  %v1259_v43 = vrot.slane %v1257_v22, 4  ;;  %v657_v1 = vrot.slane %v652_v30, 4  ;;  %v10541_v30 = vld [vmem:[%s13772_s1 + $0xa] sm:$0x3] }
  0x9d   : > { %13898 = vst [vmem:[#allocation23_spill] sm:$0xff] %v10519_v37  ;;  %13899 = vst [vmem:[#allocation24_spill] sm:$0xff] %v10521_v59  ;;  %9175 = vmatmul.mubr.msk.bf16.gmra.mxu1 %vm1365_vm14, %v10519_v37  ;;  %v835_v28 = vsel %vm10073_vm12, %v647_v10, %v834_v54  ;;  %9140 = vmatprep.mubr.msk.bf16.mxu0 %vm1365_vm14, %v10521_v59  ;;  %v10530_v9 = vld [vmem:[#allocation2 + $0xa4] sm:$0x1]  ;;  %v1250_v56 = vor.u32 %v1249_v14, %v1246_v3  ;;  %v661_v42 = vrot.slane %v659_v11, 7  ;;  %vm1903_vm2 = vcmask 1042432  }
  0x9e   : > { %v656_v58 = vsel %vm10080_vm13, %v648_v40, %v655_v38  ;;  %836 = vst [vmem:[#allocation2 + $0xa8] sm:$0xf] %v835_v28  ;;  %v662_v4 = vshll.u32 %v292_v49, 16  ;;  %v1260_v8 = vor.u32 %v1259_v43, %v1255_v5  ;;  %v1263_v61 = vshll.u32 %v10530_v9, 16 }
  0x9f   : > { %837 = vst.msk [vmem:[#allocation2 + $0xac] sm:$0xf] %vm296_vm1, %v656_v58  ;;  %v839_v54 = vsel %vm10017_vm5, %v657_v1, %v838_v36  ;;  %v667_v10 = vshrl.u32 %v293_v26, 16  ;;  %v1251_v22 = vrot.slane %v1250_v56, 4  ;;  %v665_v3 = vrot.slane %v661_v42, 4 }
  0xa0   : > { %840 = vst [vmem:[#allocation2 + $0xb0] sm:$0x1] %v839_v54  ;;  %v664_v40 = vor.u32 %v662_v4, %v661_v42  ;;  %v670_v11 = vshll.u32 %v293_v26, 16  ;;  %v841_v49 = vld [vmem:[#allocation2 + $0xb4] sm:$0xf]  ;;  %v1261_v14 = vrot.slane %v1260_v8, 4 }
  0xa1   : > { %v1265_v38 = vrot.slane %v1263_v61, 5  ;;  %v669_v43 = vrot.slane %v667_v10, 7  ;;  %v2323_v28 = vsel %vm1414_vm0, %v10291_v51, 0  ;;  %v910_v58 = vld [vmem:[#allocation2 + $0xc] sm:$0xe]  ;;  %v1256_v36 = vsel %vm10095_vm15, %v1251_v22, %v1255_v5 }
  0xa2   : > { %v842_v1 = vsel %vm10073_vm12, %v664_v40, %v841_v49  ;;  %v845_v59 = vld [vmem:[#allocation2 + $0xbc] sm:$0x1]  ;;  %9217 = vmatpush3.bf16.msra.mxu1 %v2323_v28  ;;  %vm1904_vm9 = vcmask 1046532   ;;  %v13901_v5 = vmov 0  ;;  %v8352_v4 = vrot.slane %v910_v58, 9 }
  0xa3   : > { %v1266_v26 = vsel %vm10095_vm15, %v1261_v14, %v1265_v38  ;;  %v672_v56 = vor.u32 %v670_v11, %v669_v43  ;;  %v674_v42 = vrot.slane %v669_v43, 4  ;;  %843 = vst [vmem:[#allocation2 + $0xb4] sm:$0xf] %v842_v1  ;;  %9731 = vmatprep.subr.msk.bf16.mxu1 %vm1414_vm0, %v10541_v30  ;;  %vm10555_vm10 = vmor %vm1903_vm2, %vm1904_vm9  ;;  %v9822_v8 = vld [vmem:[#allocation2 + $0x14] sm:$0x1]  ;;  %v13904_v40 = vrot.slane %v10135_v44, 5 }
  0xa4   : > { %v10553_v51 = vcombine.low %v1256_v36, %v1266_v26  ;;  %v13902_v5 = vsel %vm10555_vm10, 4294967295, %v13901_v5  ;;  %v1918_v61 = vrot.slane %v9822_v8, 5  ;;  %vm8093_vm11 = vcmask 1043459  }
  0xa5   : > { %13903 = vst [vmem:[#allocation26_spill] sm:$0xff] %v13902_v5  ;;  %v883_v54 = vld [vmem:[#allocation2 + $0xa8] sm:$0xf]  ;;  %v673_v10 = vsel %vm10080_vm13, %v665_v3, %v672_v56  ;;  %v846_v22 = vsel %vm10017_vm5, %v674_v42, %v845_v59  ;;  %v1917_v11 = vrot.slane %v13904_v40, 4  ;;  %v13906_v58 = vmov %v13904_v40 }
  0xa6   : > { %13900 = vst [vmem:[#allocation25_spill] sm:$0xff] %v10553_v51  ;;  %9141 = vmatmul.mubr.msk.bf16.gmra.mxu0 %vm1365_vm14, %v10553_v51  ;;  %v10567_v49 = vld [vmem:[#allocation2 + $0xac] sm:$0xf]  ;;  %v1268_v14 = vshrl.u32 %v883_v54, 16  ;;  %v1271_v38 = vshll.u32 %v883_v54, 16  ;;  %v1916_v36 = vsel %vm10555_vm10, %v8352_v4, %v13906_v58 }
  0xa7   : > { %844 = vst.msk [vmem:[#allocation2 + $0xb8] sm:$0xf] %vm296_vm1, %v673_v10  ;;  %847 = vst [vmem:[#allocation2 + $0xbc] sm:$0x1] %v846_v22  ;;  %v10570_v43 = vld [vmem:[#allocation2 + $0xb0] sm:$0x1]  ;;  %v10575_v59 = vcombine.low %v883_v54, %v10567_v49  ;;  %v1919_v22 = vsel %vm10555_vm10, %v1917_v11, %v1918_v61 }
  0xa8   : > { %v1277_v3 = vshll.u32 %v10567_v49, 16  ;;  %v1281_v28 = vshrl.u32 %v10567_v49, 16  ;;  %v1270_v1 = vrot.slane %v1268_v14, 4  ;;  %v1273_v26 = vrot.slane %v1271_v38, 5  ;;  %v909_v10 = vld [vmem:[#allocation2] sm:$0xe] }
  0xa9   : > { %13905 = vst [vmem:[#allocation27_spill] sm:$0xff] %v10575_v59  ;;  %v1287_v56 = vshll.u32 %v10570_v43, 16  ;;  %9178 = vmatprep.mubr.msk.bf16.mxu1 %vm1365_vm14, %v10575_v59  ;;  %v9823_v51 = vld [vmem:[#allocation2 + $0x4] sm:$0xf]  ;;  %v10586_v19 = vcombine.low %v1916_v36, %v1919_v22  ;;  %v8351_v48 = vrot.slane %v909_v10, 9 }
  0xaa   : > { %v1279_v42 = vrot.slane %v1277_v3, 5  ;;  %v1283_v8 = vrot.slane %v1281_v28, 4  ;;  %v1274_v54 = vor.u32 %v1273_v26, %v1270_v1  ;;  %v885_v40 = vld [vmem:[#allocation2 + $0xb4] sm:$0xf]  ;;  %v1908_v44 = vrot.slane %v9823_v51, 5 }
  0xab   : > { %v1289_v14 = vrot.slane %v1287_v56, 5  ;;  %v1292_v38 = vshrl.u32 %v885_v40, 16  ;;  %v1295_v58 = vshll.u32 %v885_v40, 16  ;;  %v1911_v3 = vrot.slane %v9824_v16, 5 }
  0xac   : > { %v1284_v4 = vor.u32 %v1283_v8, %v1279_v42  ;;  %v1275_v28 = vrot.slane %v1274_v54, 4  ;;  %v1910_v8 = vrot.slane %v1908_v44, 4 }
  0xad   : > { %v1294_v61 = vrot.slane %v1292_v38, 4  ;;  %v1297_v51 = vrot.slane %v1295_v58, 5  ;;  %v9825_v38 = vld [vmem:[#allocation2 + $0x1c] sm:$0xf] }
  0xae   : > { %v1285_v62 = vrot.slane %v1284_v4, 4  ;;  %v10588_v41 = vld [vmem:[#allocation2 + $0xb8] sm:$0xf]  ;;  %v10590_v35 = vld [vmem:[#allocation2 + $0xbc] sm:$0x1]  ;;  %v1280_v11 = vsel %vm10095_vm15, %v1275_v28, %v1279_v42  ;;  %v1922_v58 = vrot.slane %v9825_v38, 5 }
  0xaf   : > { %v1301_v36 = vshll.u32 %v10588_v41, 16  ;;  %v1305_v1 = vshrl.u32 %v10588_v41, 16  ;;  %v1311_v16 = vshll.u32 %v10590_v35, 16  ;;  %v10600_v56 = vcombine.low %v885_v40, %v10588_v41  ;;  %v911_v42 = vld [vmem:[#allocation2 + $0x18] sm:$0xe] }
  0xb0   : > { %v1290_v26 = vsel %vm10095_vm15, %v1285_v62, %v1289_v14  ;;  %v1298_v22 = vor.u32 %v1297_v51, %v1294_v61  ;;  %v912_v40 = vld [vmem:[#allocation2 + $0x24] sm:$0xe]  ;;  %v1909_v51 = vsel %vm10555_vm10, %v8351_v48, %v1908_v44  ;;  %v9829_v44 = vld [vmem:[#allocation2 + $0x2c] sm:$0x1] }
  0xb1   : > { %13907 = vst [vmem:[#allocation28_spill] sm:$0xff] %v10600_v56  ;;  %v10602_v10 = vcombine.low %v1280_v11, %v1290_v26  ;;  %v1303_v54 = vrot.slane %v1301_v36, 5  ;;  %v1307_v4 = vrot.slane %v1305_v1, 4  ;;  %9179 = vmatmul.mubr.msk.bf16.gmra.mxu1 %vm1365_vm14, %v10600_v56  ;;  %v1313_v28 = vrot.slane %v1311_v16, 5  ;;  %v9826_v11 = vld [vmem:[#allocation2 + $0x28] sm:$0xf] }
  0xb2   : > { %v1299_v62 = vrot.slane %v1298_v22, 4  ;;  %9218 = vmatprep.mubr.msk.bf16.mxu1 %vm1365_vm14, %v10148_v0  ;;  %v1929_v61 = vrot.slane %v9826_v11, 5  ;;  %v1912_v36 = vsel %vm10555_vm10, %v1910_v8, %v1911_v3  ;;  %v9827_v1 = vld [vmem:[#allocation2 + $0x34] sm:$0xf]  ;;  %v8353_v16 = vrot.slane %v911_v42, 9 }
  0xb3   : > { %13908 = vst [vmem:[#allocation29_spill] sm:$0xff] %v10602_v10  ;;  %9144 = vmatprep.mubr.msk.bf16.mxu0 %vm1365_vm14, %v10602_v10  ;;  %v1308_v14 = vor.u32 %v1307_v4, %v1303_v54  ;;  %v1936_v26 = vrot.slane %v9827_v1, 5  ;;  %v913_v4 = vld [vmem:[#allocation2 + $0x30] sm:$0xe]  ;;  %v1924_v10 = vrot.slane %v1922_v58, 4  ;;  %v8354_v59 = vrot.slane %v912_v40, 9 }
  0xb4   : > { %v1304_v38 = vsel %vm10095_vm15, %v1299_v62, %v1303_v54  ;;  %v9828_v56 = vld [vmem:[#allocation2 + $0x20] sm:$0x1]  ;;  %v8368_v37 = vcombine.low %v1909_v51, %v1912_v36  ;;  %v1931_v48 = vrot.slane %v1929_v61, 4  ;;  %v1932_v25 = vrot.slane %v9829_v44, 5  ;;  %v914_v3 = vld [vmem:[#allocation2 + $0x3c] sm:$0xe] }
  0xb5   : > { %v1309_v22 = vrot.slane %v1308_v14, 4  ;;  %v1925_v0 = vrot.slane %v9828_v56, 5  ;;  %v8355_v1 = vrot.slane %v913_v4, 9  ;;  %v1938_v52 = vrot.slane %v1936_v26, 4  ;;  %v9830_v54 = vld [vmem:[#allocation2 + $0x38] sm:$0x1] }
  0xb6   : > { %v1939_v62 = vrot.slane %v9830_v54, 5  ;;  %v915_v14 = vld [vmem:[#allocation2 + $0x48] sm:$0xe]  ;;  %v9831_v42 = vld [vmem:[#allocation2 + $0x40] sm:$0xf]  ;;  %v1923_v56 = vsel %vm10555_vm10, %v8353_v16, %v1922_v58  ;;  %v1930_v40 = vsel %vm10555_vm10, %v8354_v59, %v1929_v61  ;;  %v1933_v51 = vsel %vm10555_vm10, %v1931_v48, %v1932_v25 }
  0xb7   : > { %v1314_v11 = vsel %vm10095_vm15, %v1309_v22, %v1313_v28  ;;  %v1943_v23 = vrot.slane %v9831_v42, 5  ;;  %v1926_v28 = vsel %vm10555_vm10, %v1924_v10, %v1925_v0  ;;  %v8356_v36 = vrot.slane %v914_v3, 9  ;;  %v919_v4 = vld [vmem:[#allocation2 + $0x78] sm:$0xe]  ;;  %v9832_v61 = vld [vmem:[#allocation2 + $0x44] sm:$0x1] }
  0xb8   : > { %v10618_v8 = vcombine.low %v1304_v38, %v1314_v11  ;;  %v8357_v38 = vrot.slane %v915_v14, 9  ;;  %v1950_v22 = vrot.slane %v10264_v32, 5  ;;  %v1937_v58 = vsel %vm10555_vm10, %v8355_v1, %v1936_v26  ;;  %v920_v0 = vld [vmem:[#allocation2 + $0x84] sm:$0xe]  ;;  %v921_v26 = vld [vmem:[#allocation2 + $0x90] sm:$0xe] }
  0xb9   : > { %9219 = vmatmul.mubr.msk.bf16.vlgmr.msra.gmra.mxu1 %vm1365_vm14, %v10152_v15  ;;  %v1940_v10 = vsel %vm10555_vm10, %v1938_v52, %v1939_v62  ;;  %v10642_v59 = vcombine.low %v1923_v56, %v1926_v28  ;;  %v1945_v25 = vrot.slane %v1943_v23, 4  ;;  %v1946_v16 = vrot.slane %v9832_v61, 5  ;;  %v10660_v54 = vld [vmem:[#allocation2 + $0x50] sm:$0x1]  ;;  %v922_v42 = vld [vmem:[#allocation2 + $0x9c] sm:$0xe] }
  0xba   : > { %9145 = vmatmul.mubr.msk.bf16.gmra.mxu0 %vm1365_vm14, %v10618_v8  ;;  %9222 = vmatprep.mubr.msk.bf16.mxu1 %vm1365_vm14, %v10206_v13  ;;  %v10644_v11 = vcombine.low %v1930_v40, %v1933_v51  ;;  %v8361_v48 = vrot.slane %v919_v4, 9  ;;  %v1978_v32 = vrot.slane %v10415_v24, 5  ;;  %v1981_v44 = vrot.slane %v10426_v53, 5  ;;  %v10674_v51 = vld [vmem:[%s13772_s1 + $0xc] sm:$0x3] }
  0xbb   : > { %9184 = vmatprep.mubr.msk.bf16.mxu0 %vm1365_vm14, %v8368_v37  ;;  %v2551_v37 = vsel %vm1414_vm0, %v10308_v60, 0  ;;  %v10648_v3 = vcombine.low %v1937_v58, %v1940_v10  ;;  %v10652_v52 = vsel %vm10555_vm10, %v8356_v36, %v1943_v23  ;;  %v10656_v60 = vsel %vm10555_vm10, %v8357_v38, %v1950_v22 }
  0xbc   : > { %v10658_v1 = vrot.slane %v1950_v22, 4  ;;  %v1953_v62 = vrot.slane %v10660_v54, 5  ;;  %v1979_v24 = vsel %vm10555_vm10, %v8361_v48, %v1978_v32  ;;  %v1980_v53 = vrot.slane %v1978_v32, 4  ;;  %v923_v22 = vld [vmem:[#allocation2 + $0xa8] sm:$0xe] }
  0xbd   : > { %v8362_v14 = vrot.slane %v920_v0, 9  ;;  %v10667_v23 = vsel %vm10555_vm10, %v1945_v25, %v1946_v16  ;;  %v1985_v56 = vrot.slane %v10452_v63, 5  ;;  %v1988_v28 = vrot.slane %v10465_v50, 5  ;;  %v924_v16 = vld [vmem:[#allocation2 + $0xb4] sm:$0xe] }
  0xbe   : > { %v8363_v40 = vrot.slane %v921_v26, 9  ;;  %v1957_v36 = vrot.slane %v10329_v31, 5  ;;  %v1982_v38 = vsel %vm10555_vm10, %v1980_v53, %v1981_v44  ;;  %v1992_v63 = vrot.slane %v10478_v57, 5  ;;  %v356_v26 = vld [vmem:[#allocation2 + $0xc0] sm:$0x1] }
  0xbf   : > { %v1995_v50 = vrot.slane %v10480_v27, 5  ;;  %v10687_v4 = vcombine.low %v1979_v24, %v1982_v38  ;;  %v1986_v58 = vsel %vm10555_vm10, %v8362_v14, %v1985_v56  ;;  %v1987_v10 = vrot.slane %v1985_v56, 4  ;;  %v294_v14 = vld [vmem:[%s10053_s19 + $0x78] sm:$0xf] }
  0xc0   : > { %v8364_v25 = vrot.slane %v922_v42, 9  ;;  %v1993_v57 = vsel %vm10555_vm10, %v8363_v40, %v1992_v63  ;;  %v1994_v27 = vrot.slane %v1992_v63, 4  ;;  %v2002_v61 = vrot.slane %v10530_v9, 5  ;;  %v295_v40 = vld [vmem:[%s10053_s19 + $0x7c] sm:$0xf]  ;;  %s250_s19 = sand.u32 1, %s9896_s22  }
  0xc1   : > { %9223 = vmatmul.mubr.msk.bf16.gmra.mxu1 %vm1365_vm14, %v10223_v17  ;;  %13909 = vst [vmem:[#allocation30_spill] sm:$0xff] %v10687_v4  ;;  %v1989_v0 = vsel %vm10555_vm10, %v1987_v10, %v1988_v28  ;;  %v8365_v48 = vrot.slane %v923_v22, 9  ;;  %v2006_v32 = vrot.slane %v10567_v49, 5  ;;  %v2009_v44 = vrot.slane %v10570_v43, 5  ;;  %s8281_s20 = sshll.u32 %s250_s19, 6  ;;  %s13731_s25 = scalar_lea.sflag [#allocation5], %s250_s19 }
  0xc2   : > { %9185 = vmatmul.mubr.msk.bf16.vlgmr.msra.gmra.mxu0 %vm1365_vm14, %v10586_v19  ;;  %9226 = vmatprep.mubr.msk.bf16.mxu1 %vm1365_vm14, %v10244_v34  ;;  %v10703_v24 = vcombine.low %v1986_v58, %v1989_v0  ;;  %v8366_v49 = vrot.slane %v924_v16, 9  ;;  %v2013_v38 = vrot.slane %v10588_v41, 5  ;;  %v2016_v63 = vrot.slane %v10590_v35, 5  ;;  %s13425_s26 = scalar_lea.vmem [#allocation4], %s8281_s20 }
  0xc3   : > { %9251 = vmatpush3.bf16.msra.mxu0 %v2551_v37  ;;  %9188 = vmatprep.mubr.msk.bf16.mxu0 %vm1365_vm14, %v10642_v59  ;;  %v1999_v37 = vrot.slane %v10512_v29, 5  ;;  %v1996_v29 = vsel %vm10555_vm10, %v1994_v27, %v1995_v50  ;;  %v2007_v56 = vsel %vm10555_vm10, %v8365_v48, %v2006_v32  ;;  %v2008_v28 = vrot.slane %v2006_v32, 4  ;;  %s8190_s10 = sshll.u32 %s13425_s26, 4  ;;  %s13723_s10 = int_to_ptr.vmem [resolvable:$true] %s8190_s10 }
  0xc4   : > { %9732 = vmatprep.subr.msk.bf16.mxu0 %vm1414_vm0, %v10674_v51  ;;  %13910 = vst [vmem:[#allocation31_spill] sm:$0xff] %v10703_v24  ;;  %v10710_v42 = vcombine.low %v1993_v57, %v1996_v29  ;;  %v357_v50 = vsel %vm10017_vm5, 0, %v356_v26  ;;  %v676_v10 = vshrl.u32 %v294_v14, 16  ;;  %v412_v57 = vld [vmem:[#allocation2 + $0xc8] sm:$0x1]  ;;  %v2014_v35 = vsel %vm10555_vm10, %v8366_v49, %v2013_v38  ;;  %s9844_s14 = scalar_lea.vmem %s13723_s10, 1024  ;;  %p9851_p0 = scmp.lt.s32.totalorder %s13723_s10, %s9849_s15 }
  0xc5   : > { %v2000_v9 = vsel %vm10555_vm10, %v8364_v25, %v1999_v37  ;;  %v2001_v53 = vrot.slane %v1999_v37, 4  ;;  %v2010_v58 = vsel %vm10555_vm10, %v2008_v28, %v2009_v44  ;;  %358 = vst [vmem:[#allocation2 + $0xc0] sm:$0x1] %v357_v50  ;;  %v679_v25 = vshll.u32 %v294_v14, 16  ;;  %v916_v44 = vld [vmem:[#allocation2 + $0x54] sm:$0xe]  ;;  %p9845_p11 = scmp.ne.s32.totalorder %s13723_s10, %s9844_s14  ;;  %p9852_p1 = scmp.lt.s32.totalorder %s9850_s17, %s9844_s14 }
  0xc6   : > { %13911 = vst [vmem:[#allocation32_spill] sm:$0xff] %v10710_v42  ;;  %v10729_v41 = vcombine.low %v2007_v56, %v2010_v58  ;;  %v2015_v27 = vrot.slane %v2013_v38, 4  ;;  %v684_v37 = vshrl.u32 %v295_v40, 16  ;;  %v1954_v16 = vsel %vm10555_vm10, %v10658_v1, %v1953_v62  ;;  %v917_v1 = vld [vmem:[#allocation2 + $0x60] sm:$0xe] }
  0xc7   : > { %v2003_v43 = vsel %vm10555_vm10, %v2001_v53, %v2002_v61  ;;  %v10736_v61 = vld [vmem:[%s13772_s1 + $0xe] sm:$0x3]  ;;  %v678_v0 = vrot.slane %v676_v10, 7  ;;  %v687_v48 = vshll.u32 %v295_v40, 16  ;;  %v2764_v32 = vsel %vm1414_vm0, %v10541_v30, 0  ;;  %p9846_p12 = pnand %p9845_p11, %p9984_p5  ;;  %p9853_p2 = por %p9852_p1, %p9851_p0 }
  0xc8   : > { %v10721_v22 = vcombine.low %v2000_v9, %v2003_v43  ;;  %v1964_v26 = vrot.slane %v10348_v18, 5  ;;  %v2017_v29 = vsel %vm10555_vm10, %v2015_v27, %v2016_v63  ;;  %v686_v9 = vrot.slane %v684_v37, 7  ;;  %9285 = vmatpush3.bf16.msra.mxu1 %v2764_v32  ;;  %v9834_v40 = vld [vmem:[#allocation2 + $0x5c] sm:$0x1] }
  0xc9   : > { %9227 = vmatmul.mubr.msk.bf16.gmra.mxu1 %vm1365_vm14, %v10273_v20  ;;  %v413_v54 = vsel %vm10026_vm8, 0, %v412_v57  ;;  %v10754_v62 = vcombine.low %v2014_v35, %v2017_v29  ;;  %v681_v53 = vor.u32 %v679_v25, %v678_v0  ;;  %v682_v14 = vrot.slane %v678_v0, 4  ;;  %9733 = vmatprep.subr.msk.bf16.mxu1 %vm1414_vm0, %v10736_v61  ;;  %v918_v35 = vld [vmem:[#allocation2 + $0x6c] sm:$0xe]  ;;  %p9847_p13 = pneg %p9846_p12 }
  0xca   : > { %13912 = vst [vmem:[#allocation33_spill] sm:$0xff] %v10721_v22  ;;  %9189 = vmatmul.mubr.msk.bf16.gmra.mxu0 %vm1365_vm14, %v10644_v11  ;;  %9230 = vmatprep.mubr.msk.bf16.mxu1 %vm1365_vm14, %v10335_v47  ;;  %414 = vst [vmem:[#allocation2 + $0xc8] sm:$0x1] %v413_v54  ;;  %v10760_v18 = vcombine.low %v10652_v52, %v10667_v23  ;;  %v689_v30 = vor.u32 %v687_v48, %v686_v9  ;;  %v8358_v28 = vrot.slane %v916_v44, 9  ;;  %v13916_v48 = vld [vmem:[#allocation18_spill] sm:$0xff] }
  0xcb   : > { %9192 = vmatprep.mubr.msk.bf16.mxu0 %vm1365_vm14, %v10648_v3  ;;  %v10763_v56 = vcombine.low %v10656_v60, %v1954_v16  ;;  %v1959_v49 = vrot.slane %v1957_v36, 4  ;;  %v1960_v43 = vrot.slane %v9834_v40, 5  ;;  %v8359_v38 = vrot.slane %v917_v1, 9  ;;  %v359_v54 = vld [vmem:[#allocation2 + $0xcc] sm:$0x1]  ;;  %p9854_p3 = pnand %p9853_p2, %p9847_p13 }
  0xcc   : > { %v1966_v63 = vrot.slane %v1964_v26, 4  ;;  %v1967_v50 = vrot.slane %v10350_v21, 5  ;;  %v690_v58 = vsel %vm10080_vm13, %v682_v14, %v689_v30  ;;  %v848_v10 = vld [vmem:[#allocation2 + $0xc0] sm:$0xf]  ;;  %v691_v52 = vrot.slane %v686_v9, 4  ;;  %v13920_v9 = vld [vmem:[#allocation23_spill] sm:$0xff] }
  0xcd   : > { %13913 = vst [vmem:[#allocation34_spill] sm:$0xff] %v10763_v56  ;;  %v849_v23 = vsel %vm10073_vm12, %v681_v53, %v848_v10  ;;  %851 = vst.msk [vmem:[#allocation2 + $0xc4] sm:$0xf] %vm296_vm1, %v690_v58  ;;  %v1958_v21 = vsel %vm10555_vm10, %v8358_v28, %v1957_v36  ;;  %v1961_v39 = vsel %vm10555_vm10, %v1959_v49, %v1960_v43  ;;  %v1971_v60 = vrot.slane %v10364_v46, 5  ;;  %v13921_v53 = vld [vmem:[#allocation27_spill] sm:$0xff]  ;;  %v13922_v14 = vld [vmem:[#allocation28_spill] sm:$0xff] }
  0xce   : > { %850 = vst [vmem:[#allocation2 + $0xc0] sm:$0xf] %v849_v23  ;;  %v1965_v25 = vsel %vm10555_vm10, %v8359_v38, %v1964_v26  ;;  %v1968_v57 = vsel %vm10555_vm10, %v1966_v63, %v1967_v50  ;;  %v10794_v36 = vcombine.low %v1958_v21, %v1961_v39  ;;  %v8360_v46 = vrot.slane %v918_v35, 9  ;;  %v13917_v26 = vld [vmem:[#allocation20_spill] sm:$0xff]  ;;  %v415_v49 = vld [vmem:[#allocation2 + $0xd4] sm:$0x1]  ;;  %vm11267_vm1 = vmand %vm3696_vm7, %vm306_vm3 }
  0xcf   : > { %v10796_v37 = vcombine.low %v1965_v25, %v1968_v57  ;;  %v1973_v16 = vrot.slane %v1971_v60, 4  ;;  %v1974_v0 = vrot.slane %v10372_v55, 5  ;;  %v13919_v55 = vld [vmem:[#allocation21_spill] sm:$0xff]  ;;  %v360_v1 = vsel %vm10017_vm5, 0, %v359_v54  ;;  %v13924_v63 = vld [vmem:[#allocation10_spill] sm:$0xff]  ;;  %v13925_v50 = vld [vmem:[#allocation11_spill] sm:$0xff] }
  0xd0   : > { %13914 = vst [vmem:[#allocation35_spill] sm:$0xff] %v10794_v36  ;;  %v1972_v32 = vsel %vm10555_vm10, %v8360_v46, %v1971_v60  ;;  %361 = vst [vmem:[#allocation2 + $0xcc] sm:$0x1] %v360_v1  ;;  %v416_v6 = vsel %vm10026_vm8, 0, %v415_v49  ;;  %v3198_v7 = vsel %vm1414_vm0, %v10736_v61, 0  ;;  %v13923_v43 = vld [vmem:[#allocation9_spill] sm:$0xff] }
  0xd1   : > { %9231 = vmatmul.mubr.msk.bf16.gmra.mxu1 %vm1365_vm14, %v10360_v33  ;;  %v852_v27 = vld [vmem:[#allocation2 + $0xc8] sm:$0x1]  ;;  %13915 = vst [vmem:[#allocation36_spill] sm:$0xff] %v10796_v37  ;;  %v1975_v44 = vsel %vm10555_vm10, %v1973_v16, %v1974_v0  ;;  %417 = vst [vmem:[#allocation2 + $0xd4] sm:$0x1] %v416_v6  ;;  %v2970_v38 = vsel %vm1414_vm0, %v10674_v51, 0 }
  0xd2   : > { %9193 = vmatmul.mubr.msk.bf16.gmra.mxu0 %vm1365_vm14, %v10760_v18  ;;  %9234 = vmatprep.mubr.msk.bf16.mxu1 %vm1365_vm14, %v10376_v2  ;;  %v853_v31 = vsel %vm10017_vm5, %v691_v52, %v852_v27  ;;  %v10811_v29 = vcombine.low %v1972_v32, %v1975_v44  ;;  %v13926_v21 = vld [vmem:[#allocation12_spill] sm:$0xff]  ;;  %v13928_v25 = vld [vmem:[#allocation13_spill] sm:$0xff]  ;;  %v13930_v16 = vld [vmem:[#allocation15_spill] sm:$0xff]  ;;  %vm4835_vm3 = vcmask 64512   ;;  %vm8091_vm8 = vcmask 1042434  }
  0xd3   : > { %9196 = vmatprep.mubr.msk.bf16.mxu0 %vm1365_vm14, %v10763_v56  ;;  %854 = vst [vmem:[#allocation2 + $0xc8] sm:$0x1] %v853_v31  ;;  %v13929_v31 = vld [vmem:[#allocation14_spill] sm:$0xff]  ;;  %v13932_v49 = vld [vmem:[#allocation16_spill] sm:$0xff]  ;;  %vm11279_vm5 = vmand %vm3696_vm7, %vm362_vm4  ;;  %vm8095_vm12 = vcmask 1044484  }
  0xd4   : > { %13918 = vst [vmem:[#allocation18_spill] sm:$0xff] %v10811_v29  ;;  %v10833_v28 = vld [vmem:[#allocation2 + $0xc4] sm:$0xf]  ;;  %vm11783_vm7 = vmand %vm3693_vm6, %vm362_vm4  ;;  %vm7576_vm4 = vcmask 58368  }
  0xd5   : > { %v10831_v30 = vld [vmem:[#allocation2 + $0xc0] sm:$0xf] }
  0xd6   : > { %v10839_v40 = vcombine.low %v10831_v30, %v10833_v28 }
  0xd9   : > { %9235 = vmatmul.mubr.msk.bf16.gmra.mxu1 %vm1365_vm14, %v13916_v48 }
  0xda   : > { %9197 = vmatmul.mubr.msk.bf16.gmra.mxu0 %vm1365_vm14, %v10794_v36  ;;  %9238 = vmatprep.mubr.msk.bf16.mxu1 %vm1365_vm14, %v13917_v26 }
  0xdb   : > { %9200 = vmatprep.mubr.msk.bf16.mxu0 %vm1365_vm14, %v10796_v37 }
  0xe1   : > { %9239 = vmatmul.mubr.msk.bf16.gmra.mxu1 %vm1365_vm14, %v13919_v55 }
  0xe2   : > { %9201 = vmatmul.mubr.msk.bf16.gmra.mxu0 %vm1365_vm14, %v10811_v29  ;;  %9242 = vmatprep.mubr.msk.bf16.mxu1 %vm1365_vm14, %v13920_v9 }
  0xe3   : > { %9204 = vmatprep.mubr.msk.bf16.mxu0 %vm1365_vm14, %v10687_v4 }
  0xe9   : > { %9243 = vmatmul.mubr.msk.bf16.gmra.mxu1 %vm1365_vm14, %v13921_v53 }
  0xea   : > { %9205 = vmatmul.mubr.msk.bf16.gmra.mxu0 %vm1365_vm14, %v10703_v24  ;;  %9246 = vmatprep.mubr.msk.bf16.mxu1 %vm1365_vm14, %v13922_v14 }
  0xeb   : > { %9208 = vmatprep.mubr.msk.bf16.mxu0 %vm1365_vm14, %v10710_v42 }
  0xf1   : > { %9247 = vmatmul.mubr.msk.bf16.gmra.mxu1 %vm1365_vm14, %v10839_v40 }
  0xf2   : > { %9209 = vmatmul.mubr.msk.bf16.gmra.mxu0 %vm1365_vm14, %v10721_v22  ;;  %9286 = vmatprep.mubr.msk.bf16.mxu1 %vm1365_vm14, %v10586_v19  ;;  %v10864_v19 = vld [vmem:[%s13772_s1 + $0x10] sm:$0x3] }
  0xf3   : > { %9212 = vmatprep.mubr.msk.bf16.mxu0 %vm1365_vm14, %v10729_v41 }
  0xf8   : > { %v9152_v61 = vpop.f32.mrf.mxu1 }
  0xf9   : > { %9287 = vmatmul.mubr.msk.bf16.vlgmr.msra.gmra.mxu1 %vm1365_vm14, %v10642_v59 }
  0xfa   : > { %9213 = vmatmul.mubr.msk.bf16.gmra.mxu0 %vm1365_vm14, %v10754_v62  ;;  %9290 = vmatprep.mubr.msk.bf16.mxu1 %vm1365_vm14, %v10644_v11  ;;  %v1744_v58 = vpop.f32.mrf.mxu1 }
  0xfb   : > { %9252 = vmatprep.mubr.msk.bf16.mxu0 %vm1365_vm14, %v13923_v43  ;;  %9353 = vmatpush3.bf16.msra.mxu1 %v3198_v7  ;;  %v13935_v43 = vld [vmem:[#allocation17_spill] sm:$0xff] }
  0xfc   : > { %v9153_v51 = vpop.f32.mrf.mxu1 }
  0xfe   : > { %v10884_v60 = vpop.f32.mrf.mxu1 }
  0xff   : > { %13927 = vst [vmem:[#allocation20_spill] sm:$0xff] %v10884_v60  ;;  %v907_v60 = vld [vmem:[#allocation2 + $0xc8] sm:$0x1] }
 0x100   : > { %v9118_v10 = vpop.f32.mrf.mxu0 }
 0x101   : > { %9291 = vmatmul.mubr.msk.bf16.gmra.mxu1 %vm1365_vm14, %v10648_v3  ;;  %v10876_v52 = vadd.f32 %v9152_v61, %v9118_v10  ;;  %v2519_v10 = vshrl.u32 %v10831_v30, 16 }
 0x102   : > { %9253 = vmatmul.mubr.msk.bf16.vlgmr.msra.gmra.mxu0 %vm1365_vm14, %v13924_v63  ;;  %9294 = vmatprep.mubr.msk.bf16.mxu1 %vm1365_vm14, %v10760_v18  ;;  %v1452_v23 = vpop.f32.mrf.mxu0 }
 0x103   : > { %9319 = vmatpush3.bf16.msra.mxu0 %v2970_v38  ;;  %9256 = vmatprep.mubr.msk.bf16.mxu0 %vm1365_vm14, %v13925_v50  ;;  %v10882_v39 = vadd.f32 %v1744_v58, %v1452_v23  ;;  %v2532_v23 = vshrl.u32 %v10833_v28, 16 }
 0x104   : > { %9734 = vmatprep.subr.msk.bf16.mxu0 %vm1414_vm0, %v10864_v19  ;;  %v9119_v57 = vpop.f32.mrf.mxu0 }
 0x105   : > { %v10890_v35 = vadd.f32 %v9153_v51, %v9119_v57  ;;  %v13938_v57 = vld [vmem:[#allocation19_spill] sm:$0xff] }
 0x106   : > { %v10900_v0 = vpop.f32.mrf.mxu0 }
 0x107   : > { %13931 = vst [vmem:[#allocation21_spill] sm:$0xff] %v10900_v0 }
 0x108   : > { %v9156_v27 = vpop.f32.mrf.mxu1 }
 0x109   : > { %9295 = vmatmul.mubr.msk.bf16.gmra.mxu1 %vm1365_vm14, %v10763_v56  ;;  %v13940_v56 = vld [vmem:[#allocation24_spill] sm:$0xff] }
 0x10a   : > { %9257 = vmatmul.mubr.msk.bf16.gmra.mxu0 %vm1365_vm14, %v13926_v21  ;;  %9298 = vmatprep.mubr.msk.bf16.mxu1 %vm1365_vm14, %v10794_v36  ;;  %v1760_v46 = vpop.f32.mrf.mxu1  ;;  %v2753_v36 = vrot.slane %v907_v60, 5 }
 0x10b   : > { %9260 = vmatprep.mubr.msk.bf16.mxu0 %vm1365_vm14, %v13928_v25 }
 0x10c   : > { %v9157_v32 = vpop.f32.mrf.mxu1 }
 0x10e   : > { %v10910_v7 = vpop.f32.mrf.mxu1 }
 0x10f   : > { %13934 = vst [vmem:[#allocation27_spill] sm:$0xff] %v10910_v7 }
 0x111   : > { %9299 = vmatmul.mubr.msk.bf16.gmra.mxu1 %vm1365_vm14, %v10796_v37  ;;  %v9122_v44 = vpop.f32.mrf.mxu0 }
 0x112   : > { %9261 = vmatmul.mubr.msk.bf16.gmra.mxu0 %vm1365_vm14, %v13929_v31  ;;  %9302 = vmatprep.mubr.msk.bf16.mxu1 %vm1365_vm14, %v10811_v29  ;;  %v10902_v54 = vadd.f32 %v9156_v27, %v9122_v44  ;;  %v2528_v27 = vshll.u32 %v10833_v28, 16  ;;  %v2522_v44 = vshll.u32 %v10831_v30, 16 }
 0x113   : > { %9264 = vmatprep.mubr.msk.bf16.mxu0 %vm1365_vm14, %v13930_v16  ;;  %v1468_v1 = vpop.f32.mrf.mxu0 }
 0x114   : > { %v10908_v6 = vadd.f32 %v1760_v46, %v1468_v1  ;;  %v925_v1 = vld [vmem:[#allocation2 + $0xc0] sm:$0xe]  ;;  %v2530_v0 = vrot.slane %v2528_v27, 5  ;;  %v2524_v30 = vrot.slane %v2522_v44, 5 }
 0x115   : > { %v9123_v38 = vpop.f32.mrf.mxu0 }
 0x116   : > { %13933 = vst [vmem:[#allocation23_spill] sm:$0xff] %v10908_v6  ;;  %v10916_v61 = vadd.f32 %v9157_v32, %v9123_v38  ;;  %v9160_v58 = vpop.f32.mrf.mxu1  ;;  %v13939_v32 = vld [vmem:[#allocation22_spill] sm:$0xff]  ;;  %v2750_v38 = vrot.slane %v10833_v28, 5  ;;  %v13941_v28 = vld [vmem:[#allocation25_spill] sm:$0xff] }
 0x117   : > { %v10918_v51 = vpop.f32.mrf.mxu0 }
 0x118   : > { %13936 = vst [vmem:[#allocation28_spill] sm:$0xff] %v10916_v61  ;;  %13937 = vst [vmem:[#allocation9_spill] sm:$0xff] %v10918_v51  ;;  %v1776_v46 = vpop.f32.mrf.mxu1  ;;  %v2521_v51 = vrot.slane %v2519_v10, 4  ;;  %v2752_v37 = vrot.slane %v2750_v38, 4  ;;  %v2538_v10 = vshll.u32 %v907_v60, 16 }
 0x119   : > { %9303 = vmatmul.mubr.msk.bf16.gmra.mxu1 %vm1365_vm14, %v10687_v4 }
 0x11a   : > { %9265 = vmatmul.mubr.msk.bf16.gmra.mxu0 %vm1365_vm14, %v13932_v49  ;;  %9306 = vmatprep.mubr.msk.bf16.mxu1 %vm1365_vm14, %v10703_v24  ;;  %v8436_v24 = vrot.slane %v925_v1, 9  ;;  %v9161_v29 = vpop.f32.mrf.mxu1  ;;  %v13942_v1 = vld [vmem:[#allocation29_spill] sm:$0xff] }
 0x11b   : > { %9268 = vmatprep.mubr.msk.bf16.mxu0 %vm1365_vm14, %v13935_v43 }
 0x11f   : > { %v9126_v45 = vpop.f32.mrf.mxu0 }
 0x120   : > { %v10933_v7 = vadd.f32 %v9160_v58, %v9126_v45  ;;  %v2525_v58 = vor.u32 %v2524_v30, %v2521_v51 }
 0x121   : > { %9307 = vmatmul.mubr.msk.bf16.gmra.mxu1 %vm1365_vm14, %v10710_v42  ;;  %v2534_v42 = vrot.slane %v2532_v23, 4  ;;  %v1484_v4 = vpop.f32.mrf.mxu0 }
 0x122   : > { %9269 = vmatmul.mubr.msk.bf16.gmra.mxu0 %vm1365_vm14, %v13938_v57  ;;  %9310 = vmatprep.mubr.msk.bf16.mxu1 %vm1365_vm14, %v10721_v22  ;;  %v10935_v61 = vadd.f32 %v1776_v46, %v1484_v4  ;;  %v2751_v4 = vsel %vm10555_vm10, %v8436_v24, %v2750_v38  ;;  %v2526_v27 = vrot.slane %v2525_v58, 4  ;;  %v2540_v46 = vrot.slane %v2538_v10, 5 }
 0x123   : > { %9272 = vmatprep.mubr.msk.bf16.mxu0 %vm1365_vm14, %v13939_v32  ;;  %v9127_v6 = vpop.f32.mrf.mxu0  ;;  %v2535_v45 = vor.u32 %v2534_v42, %v2530_v0 }
 0x124   : > { %v10937_v22 = vadd.f32 %v9161_v29, %v9127_v6  ;;  %v2754_v29 = vsel %vm10555_vm10, %v2752_v37, %v2753_v36  ;;  %v10951_v6 = vpop.f32.mrf.mxu1  ;;  %v2531_v24 = vsel %vm10095_vm15, %v2526_v27, %v2530_v0 }
 0x125   : > { %v10953_v23 = vcombine.low %v2751_v4, %v2754_v29  ;;  %v2536_v42 = vrot.slane %v2535_v45, 4  ;;  %v10967_v37 = vpop.f32.mrf.mxu0 }
 0x127   : > { %v2541_v36 = vsel %vm10095_vm15, %v2536_v42, %v2540_v46 }
 0x128   : > { %v10969_v51 = vcombine.low %v2531_v24, %v2541_v36 }
 0x129   : > { %9311 = vmatmul.mubr.msk.bf16.gmra.mxu1 %vm1365_vm14, %v10729_v41 }
 0x12a   : > { %9273 = vmatmul.mubr.msk.bf16.gmra.mxu0 %vm1365_vm14, %v13940_v56  ;;  %9314 = vmatprep.mubr.msk.bf16.mxu1 %vm1365_vm14, %v10754_v62 }
 0x12b   : > { %9276 = vmatprep.mubr.msk.bf16.mxu0 %vm1365_vm14, %v13941_v28  ;;  %v9164_v44 = vpop.f32.mrf.mxu1 }
 0x12d   : > { %v1792_v60 = vpop.f32.mrf.mxu1 }
 0x12f   : > { %v9165_v38 = vpop.f32.mrf.mxu1 }
 0x131   : > { %9315 = vmatmul.mubr.msk.bf16.gmra.mxu1 %vm1365_vm14, %v10953_v23  ;;  %v1795_v0 = vpop.f32.mrf.mxu1 }
 0x132   : > { %9277 = vmatmul.mubr.msk.bf16.gmra.mxu0 %vm1365_vm14, %v13942_v1  ;;  %9354 = vmatprep.mubr.msk.bf16.mxu1 %vm1365_vm14, %v13924_v63 }
 0x133   : > { %9280 = vmatprep.mubr.msk.bf16.mxu0 %vm1365_vm14, %v10618_v8 }
 0x135   : > { %v9130_v30 = vpop.f32.mrf.mxu0 }
 0x136   : > { %v10975_v45 = vadd.f32 %v9164_v44, %v9130_v30 }
 0x137   : > { %v1500_v63 = vpop.f32.mrf.mxu0 }
 0x138   : > { %v10981_v58 = vadd.f32 %v1792_v60, %v1500_v63  ;;  %v9168_v29 = vpop.f32.mrf.mxu1 }
 0x139   : > { %9355 = vmatmul.mubr.msk.bf16.vlgmr.msra.gmra.mxu1 %vm1365_vm14, %v13925_v50  ;;  %v9131_v10 = vpop.f32.mrf.mxu0  ;;  %v3411_v50 = vsel %vm1414_vm0, %v10864_v19, 0  ;;  %vm4884_vm0 = vcmask 1043456  }
 0x13a   : > { %9281 = vmatmul.mubr.msk.bf16.gmra.mxu0 %vm1365_vm14, %v10969_v51  ;;  %9358 = vmatprep.mubr.msk.bf16.mxu1 %vm1365_vm14, %v13926_v21  ;;  %v10983_v4 = vadd.f32 %v9165_v38, %v9131_v10 }
 0x13b   : > { %9320 = vmatprep.mubr.msk.bf16.mxu0 %vm1365_vm14, %v10152_v15  ;;  %v1503_v27 = vpop.f32.mrf.mxu0  ;;  %v1808_v15 = vpop.f32.mrf.mxu1 }
 0x13c   : > { %v10987_v42 = vadd.f32 %v1795_v0, %v1503_v27 }
 0x13d   : > { %v9169_v44 = vpop.f32.mrf.mxu1 }
 0x141   : > { %9359 = vmatmul.mubr.msk.bf16.gmra.mxu1 %vm1365_vm14, %v13928_v25  ;;  %v9134_v21 = vpop.f32.mrf.mxu0 }
 0x142   : > { %9321 = vmatmul.mubr.msk.bf16.vlgmr.msra.gmra.mxu0 %vm1365_vm14, %v10206_v13  ;;  %9362 = vmatprep.mubr.msk.bf16.mxu1 %vm1365_vm14, %v13929_v31  ;;  %v10997_v46 = vadd.f32 %v9168_v29, %v9134_v21  ;;  %v889_v31 = vld [vmem:[#allocation2 + $0xcc] sm:$0xf] }
 0x143   : > { %9387 = vmatpush3.bf16.msra.mxu0 %v3411_v50  ;;  %9324 = vmatprep.mubr.msk.bf16.mxu0 %vm1365_vm14, %v10223_v17  ;;  %v1516_v19 = vpop.f32.mrf.mxu0  ;;  %v11011_v17 = vpop.f32.mrf.mxu1  ;;  %v11043_v50 = vld [vmem:[#allocation2 + $0xd4] sm:$0x1] }
 0x144   : > { %v10999_v60 = vadd.f32 %v1808_v15, %v1516_v19 }
 0x145   : > { %v9135_v24 = vpop.f32.mrf.mxu0 }
 0x146   : > { %v11001_v13 = vadd.f32 %v9169_v44, %v9135_v24  ;;  %v3185_v44 = vshll.u32 %v11043_v50, 16 }
 0x149   : > { %9363 = vmatmul.mubr.msk.bf16.gmra.mxu1 %vm1365_vm14, %v13930_v16  ;;  %v11023_v16 = vld [vmem:[#allocation2 + $0xd0] sm:$0xf] }
 0x14a   : > { %9325 = vmatmul.mubr.msk.bf16.gmra.mxu0 %vm1365_vm14, %v10244_v34  ;;  %9366 = vmatprep.mubr.msk.bf16.mxu1 %vm1365_vm14, %v13932_v49  ;;  %v3179_v36 = vshrl.u32 %v11023_v16, 16  ;;  %v3175_v38 = vshll.u32 %v11023_v16, 16 }
 0x14b   : > { %9328 = vmatprep.mubr.msk.bf16.mxu0 %vm1365_vm14, %v10273_v20  ;;  %v11021_v20 = vpop.f32.mrf.mxu0 }
 0x14c   : > { %v3177_v29 = vrot.slane %v3175_v38, 5  ;;  %v3181_v27 = vrot.slane %v3179_v36, 4 }
 0x14e   : > { %v3182_v19 = vor.u32 %v3181_v27, %v3177_v29 }
 0x14f   : > { %v9172_v25 = vpop.f32.mrf.mxu1 }
 0x151   : > { %9367 = vmatmul.mubr.msk.bf16.gmra.mxu1 %vm1365_vm14, %v13935_v43  ;;  %v1824_v34 = vpop.f32.mrf.mxu1  ;;  %v3166_v43 = vshrl.u32 %v889_v31, 16 }
 0x152   : > { %9329 = vmatmul.mubr.msk.bf16.gmra.mxu0 %vm1365_vm14, %v10335_v47  ;;  %9370 = vmatprep.mubr.msk.bf16.mxu1 %vm1365_vm14, %v13938_v57  ;;  %v3169_v57 = vshll.u32 %v889_v31, 16 }
 0x153   : > { %9332 = vmatprep.mubr.msk.bf16.mxu0 %vm1365_vm14, %v10360_v33  ;;  %v9173_v49 = vpop.f32.mrf.mxu1  ;;  %v3168_v63 = vrot.slane %v3166_v43, 4 }
 0x155   : > { %v11039_v0 = vpop.f32.mrf.mxu1 }
 0x158   : > { %v9138_v47 = vpop.f32.mrf.mxu0 }
 0x159   : > { %9371 = vmatmul.mubr.msk.bf16.gmra.mxu1 %vm1365_vm14, %v13939_v32  ;;  %v11031_v33 = vadd.f32 %v9172_v25, %v9138_v47 }
 0x15a   : > { %9333 = vmatmul.mubr.msk.bf16.gmra.mxu0 %vm1365_vm14, %v10376_v2  ;;  %9374 = vmatprep.mubr.msk.bf16.mxu1 %vm1365_vm14, %v13940_v56  ;;  %v1532_v30 = vpop.f32.mrf.mxu0 }
 0x15b   : > { %9336 = vmatprep.mubr.msk.bf16.mxu0 %vm1365_vm14, %v13916_v48  ;;  %v11037_v2 = vadd.f32 %v1824_v34, %v1532_v30  ;;  %v3171_v48 = vrot.slane %v3169_v57, 5 }
 0x15c   : > { %v9139_v32 = vpop.f32.mrf.mxu0 }
 0x15d   : > { %v11041_v10 = vadd.f32 %v9173_v49, %v9139_v32  ;;  %v9176_v56 = vpop.f32.mrf.mxu1  ;;  %v3172_v21 = vor.u32 %v3171_v48, %v3168_v63  ;;  %v3183_v49 = vrot.slane %v3182_v19, 4  ;;  %v8456_v32 = vcombine.low %v889_v31, %v11023_v16 }
 0x15e   : > { %v11051_v15 = vpop.f32.mrf.mxu0 }
 0x15f   : > { %v1840_v24 = vpop.f32.mrf.mxu1  ;;  %v3173_v34 = vrot.slane %v3172_v21, 4 }
 0x161   : > { %9375 = vmatmul.mubr.msk.bf16.gmra.mxu1 %vm1365_vm14, %v13941_v28  ;;  %v9177_v43 = vpop.f32.mrf.mxu1  ;;  %v3178_v57 = vsel %vm10095_vm15, %v3173_v34, %v3177_v29 }
 0x162   : > { %9337 = vmatmul.mubr.msk.bf16.gmra.mxu0 %vm1365_vm14, %v13917_v26  ;;  %9378 = vmatprep.mubr.msk.bf16.mxu1 %vm1365_vm14, %v13942_v1  ;;  %v3187_v26 = vrot.slane %v3185_v44, 5 }
 0x163   : > { %9340 = vmatprep.mubr.msk.bf16.mxu0 %vm1365_vm14, %v13919_v55 }
 0x164   : > { %v3188_v36 = vsel %vm10095_vm15, %v3183_v49, %v3187_v26 }
 0x165   : > { %v8474_v30 = vcombine.low %v3178_v57, %v3188_v36 }
 0x166   : > { %v9142_v25 = vpop.f32.mrf.mxu0 }
 0x167   : > { %v11056_v47 = vadd.f32 %v9176_v56, %v9142_v25 }
 0x168   : > { %v1548_v28 = vpop.f32.mrf.mxu0 }
 0x169   : > { %v11060_v55 = vadd.f32 %v1840_v24, %v1548_v28  ;;  %9379 = vmatmul.mubr.msk.bf16.gmra.mxu1 %vm1365_vm14, %v10618_v8 }
 0x16a   : > { %9341 = vmatmul.mubr.msk.bf16.gmra.mxu0 %vm1365_vm14, %v13920_v9  ;;  %v9143_v1 = vpop.f32.mrf.mxu0  ;;  %9382 = vmatprep.mubr.msk.bf16.mxu1 %vm1365_vm14, %v10969_v51  ;;  %v11074_v9 = vpop.f32.mrf.mxu1 }
 0x16b   : > { %9344 = vmatprep.mubr.msk.bf16.mxu0 %vm1365_vm14, %v13921_v53  ;;  %v11072_v38 = vadd.f32 %v9177_v43, %v9143_v1 }
 0x16c   : > { %v11081_v51 = vpop.f32.mrf.mxu0 }
 0x171   : > { %v9180_v8 = vpop.f32.mrf.mxu1  ;;  %9383 = vmatmul.mubr.msk.bf16.gmra.mxu1 %vm1365_vm14, %v8474_v30 }
 0x172   : > { %9345 = vmatmul.mubr.msk.bf16.gmra.mxu0 %vm1365_vm14, %v13922_v14 }
 0x173   : > { %9348 = vmatprep.mubr.msk.bf16.mxu0 %vm1365_vm14, %v10839_v40  ;;  %v1856_v53 = vpop.f32.mrf.mxu1 }
 0x175   : > { %v9181_v63 = vpop.f32.mrf.mxu1 }
 0x177   : > { %v11084_v48 = vpop.f32.mrf.mxu1 }
 0x179   : > { %v9220_v27 = vpop.f32.mrf.mxu1 }
 0x17a   : > { %v9146_v29 = vpop.f32.mrf.mxu0  ;;  %9349 = vmatmul.mubr.msk.bf16.gmra.mxu0 %vm1365_vm14, %v8456_v32 }
 0x17b   : > { %v11087_v56 = vadd.f32 %v9180_v8, %v9146_v29  ;;  %9388 = vmatprep.mubr.msk.bf16.mxu0 %vm1365_vm14, %v10642_v59  ;;  %v2359_v21 = vpop.f32.mrf.mxu1 }
 0x17c   : > { %v1564_v14 = vpop.f32.mrf.mxu0 }
 0x17d   : > { %v11091_v40 = vadd.f32 %v1856_v53, %v1564_v14  ;;  %v9221_v44 = vpop.f32.mrf.mxu1 }
 0x17e   : > { %v9147_v19 = vpop.f32.mrf.mxu0 }
 0x17f   : > { %v11093_v24 = vadd.f32 %v9181_v63, %v9147_v19  ;;  %v11097_v25 = vpop.f32.mrf.mxu1  ;;  %v13943_v63 = vld [vmem:[#allocation34_spill] sm:$0xff] }
 0x180   : > { %v11095_v31 = vpop.f32.mrf.mxu0 }
 0x181   : > { %v9224_v49 = vpop.f32.mrf.mxu1 }
 0x182   : > { %v9186_v34 = vpop.f32.mrf.mxu0  ;;  %9389 = vmatmul.mubr.msk.bf16.vlgmr.msra.gmra.mxu0 %vm1365_vm14, %v10644_v11 }
 0x183   : > { %v2282_v26 = vadd.f32 %v9186_v34, %v10876_v52  ;;  %9392 = vmatprep.mubr.msk.bf16.mxu0 %vm1365_vm14, %v10648_v3  ;;  %v2375_v28 = vpop.f32.mrf.mxu1 }
 0x184   : > { %v2153_v59 = vpop.f32.mrf.mxu0 }
 0x185   : > { %v2280_v43 = vadd.f32 %v2153_v59, %v10882_v39  ;;  %v11105_v1 = vadd.f32 %v9220_v27, %v2282_v26  ;;  %v9225_v36 = vpop.f32.mrf.mxu1  ;;  %v13944_v27 = vld [vmem:[#allocation23_spill] sm:$0xff] }
 0x186   : > { %v9187_v57 = vpop.f32.mrf.mxu0 }
 0x187   : > { %v2283_v30 = vadd.f32 %v9187_v57, %v10890_v35  ;;  %v11108_v8 = vadd.f32 %v2359_v21, %v2280_v43  ;;  %v11112_v11 = vpop.f32.mrf.mxu1 }
 0x188   : > { %v11110_v53 = vpop.f32.mrf.mxu0 }
 0x189   : > { %v11114_v52 = vadd.f32 %v9221_v44, %v2283_v30  ;;  %v9228_v3 = vpop.f32.mrf.mxu1  ;;  %v13945_v44 = vld [vmem:[#allocation28_spill] sm:$0xff]  ;;  %v13947_v30 = vld [vmem:[#allocation35_spill] sm:$0xff] }
 0x18a   : > { %v9190_v32 = vpop.f32.mrf.mxu0  ;;  %9393 = vmatmul.mubr.msk.bf16.gmra.mxu0 %vm1365_vm14, %v10760_v18 }
 0x18b   : > { %v2286_v39 = vadd.f32 %v9190_v32, %v10902_v54  ;;  %9396 = vmatprep.mubr.msk.bf16.mxu0 %vm1365_vm14, %v13943_v63  ;;  %v2391_v35 = vpop.f32.mrf.mxu1 }
 0x18c   : > { %v2169_v29 = vpop.f32.mrf.mxu0 }
 0x18d   : > { %v2284_v14 = vadd.f32 %v2169_v29, %v13944_v27  ;;  %v11122_v21 = vadd.f32 %v9224_v49, %v2286_v39  ;;  %v9229_v34 = vpop.f32.mrf.mxu1  ;;  %v13948_v39 = vld [vmem:[#allocation36_spill] sm:$0xff] }
 0x18e   : > { %v9191_v19 = vpop.f32.mrf.mxu0 }
 0x18f   : > { %v2287_v26 = vadd.f32 %v9191_v19, %v13945_v44  ;;  %v11125_v59 = vadd.f32 %v2375_v28, %v2284_v14  ;;  %v11129_v18 = vpop.f32.mrf.mxu1 }
 0x190   : > { %v11127_v43 = vpop.f32.mrf.mxu0  ;;  %13946 = vst [vmem:[#allocation10_spill] sm:$0xff] %v11129_v18 }
 0x191   : > { %v11131_v54 = vadd.f32 %v9225_v36, %v2287_v26  ;;  %v9232_v32 = vpop.f32.mrf.mxu1  ;;  %v1780_v36 = vadd.f32 %v10951_v6, %v10967_v37 }
 0x192   : > { %v9194_v57 = vpop.f32.mrf.mxu0  ;;  %9397 = vmatmul.mubr.msk.bf16.gmra.mxu0 %vm1365_vm14, %v13947_v30 }
 0x193   : > { %v2290_v49 = vadd.f32 %v9194_v57, %v10933_v7  ;;  %9400 = vmatprep.mubr.msk.bf16.mxu0 %vm1365_vm14, %v13948_v39  ;;  %v2407_v29 = vpop.f32.mrf.mxu1 }
 0x194   : > { %v2185_v63 = vpop.f32.mrf.mxu0 }
 0x195   : > { %v2288_v28 = vadd.f32 %v2185_v63, %v10935_v61  ;;  %v11139_v27 = vadd.f32 %v9228_v3, %v2290_v49  ;;  %v9233_v19 = vpop.f32.mrf.mxu1  ;;  %v13950_v61 = vld [vmem:[#allocation18_spill] sm:$0xff] }
 0x196   : > { %v9195_v14 = vpop.f32.mrf.mxu0  ;;  %v13951_v63 = vld [vmem:[#allocation30_spill] sm:$0xff] }
 0x197   : > { %v2291_v44 = vadd.f32 %v9195_v14, %v10937_v22  ;;  %v11144_v26 = vadd.f32 %v2391_v35, %v2288_v28  ;;  %v11146_v7 = vpop.f32.mrf.mxu1 }
 0x198   : > { %v2188_v30 = vpop.f32.mrf.mxu0  ;;  %13949 = vst [vmem:[#allocation11_spill] sm:$0xff] %v11146_v7 }
 0x199   : > { %v11148_v57 = vadd.f32 %v2188_v30, %v1780_v36  ;;  %v11150_v39 = vadd.f32 %v9229_v34, %v2291_v44  ;;  %v9236_v3 = vpop.f32.mrf.mxu1 }
 0x19a   : > { %v9198_v18 = vpop.f32.mrf.mxu0  ;;  %9401 = vmatmul.mubr.msk.bf16.gmra.mxu0 %vm1365_vm14, %v13950_v61 }
 0x19b   : > { %v2294_v49 = vadd.f32 %v9198_v18, %v10975_v45  ;;  %9404 = vmatprep.mubr.msk.bf16.mxu0 %vm1365_vm14, %v13951_v63  ;;  %v2423_v6 = vpop.f32.mrf.mxu1  ;;  %v13954_v63 = vld [vmem:[#allocation31_spill] sm:$0xff] }
 0x19c   : > { %v2201_v22 = vpop.f32.mrf.mxu0 }
 0x19d   : > { %v2292_v37 = vadd.f32 %v2201_v22, %v10981_v58  ;;  %v11158_v35 = vadd.f32 %v9232_v32, %v2294_v49  ;;  %v9237_v14 = vpop.f32.mrf.mxu1  ;;  %v13955_v49 = vld [vmem:[#allocation32_spill] sm:$0xff] }
 0x19e   : > { %v9199_v28 = vpop.f32.mrf.mxu0 }
 0x19f   : > { %v2295_v34 = vadd.f32 %v9199_v28, %v10983_v4  ;;  %v11161_v36 = vadd.f32 %v2407_v29, %v2292_v37  ;;  %v11163_v30 = vpop.f32.mrf.mxu1 }
 0x1a0   : > { %v2204_v44 = vpop.f32.mrf.mxu0  ;;  %13952 = vst [vmem:[#allocation12_spill] sm:$0xff] %v11163_v30 }
 0x1a1   : > { %v11166_v45 = vadd.f32 %v2204_v44, %v10987_v42  ;;  %v11168_v18 = vadd.f32 %v9233_v19, %v2295_v34  ;;  %v9240_v58 = vpop.f32.mrf.mxu1 }
 0x1a2   : > { %v9202_v61 = vpop.f32.mrf.mxu0  ;;  %9405 = vmatmul.mubr.msk.bf16.gmra.mxu0 %vm1365_vm14, %v13954_v63 }
 0x1a3   : > { %13953 = vst [vmem:[#allocation13_spill] sm:$0xff] %v11166_v45  ;;  %v2298_v32 = vadd.f32 %v9202_v61, %v10997_v46  ;;  %9408 = vmatprep.mubr.msk.bf16.mxu0 %vm1365_vm14, %v13955_v49  ;;  %v2439_v29 = vpop.f32.mrf.mxu1  ;;  %v13957_v49 = vld [vmem:[#allocation33_spill] sm:$0xff] }
 0x1a4   : > { %v2217_v4 = vpop.f32.mrf.mxu0 }
 0x1a5   : > { %v2296_v22 = vadd.f32 %v2217_v4, %v10999_v60  ;;  %v11176_v37 = vadd.f32 %v9236_v3, %v2298_v32  ;;  %v9241_v28 = vpop.f32.mrf.mxu1  ;;  %v926_v3 = vld [vmem:[#allocation2 + $0xcc] sm:$0xe] }
 0x1a6   : > { %v9203_v42 = vpop.f32.mrf.mxu0 }
 0x1a7   : > { %v2299_v19 = vadd.f32 %v9203_v42, %v11001_v13  ;;  %v11179_v34 = vadd.f32 %v2423_v6, %v2296_v22  ;;  %v11183_v63 = vpop.f32.mrf.mxu1  ;;  %v3397_v13 = vrot.slane %v11023_v16, 5  ;;  %v8543_v6 = vld [vmem:[%s13774_s3 + $0x4] sm:$0xf] }
 0x1a8   : > { %v11181_v44 = vpop.f32.mrf.mxu0  ;;  %13956 = vst [vmem:[#allocation14_spill] sm:$0xff] %v11183_v63  ;;  %9735 = vmatprep.subr.msk.bf16.mxu1 %vm4884_vm0, %v8543_v6  ;;  %v4886_v4 = vsel %vm4884_vm0, %v8543_v6, 0  ;;  %v3400_v63 = vrot.slane %v11043_v50, 5 }
 0x1a9   : > { %v11185_v46 = vadd.f32 %v9237_v14, %v2299_v19  ;;  %v9244_v30 = vpop.f32.mrf.mxu1  ;;  %9421 = vmatpush3.bf16.msra.mxu1 %v4886_v4  ;;  %v8491_v19 = vrot.slane %v926_v3, 9 }
 0x1aa   : > { %v9206_v61 = vpop.f32.mrf.mxu0  ;;  %9409 = vmatmul.mubr.msk.bf16.gmra.mxu0 %vm1365_vm14, %v13957_v49  ;;  %v3399_v49 = vrot.slane %v3397_v13, 4 }
 0x1ab   : > { %v2302_v60 = vadd.f32 %v9206_v61, %v11031_v33  ;;  %9412 = vmatprep.mubr.msk.bf16.mxu0 %vm1365_vm14, %v10729_v41  ;;  %v2455_v32 = vpop.f32.mrf.mxu1 }
 0x1ac   : > { %v2233_v14 = vpop.f32.mrf.mxu0  ;;  %v3401_v50 = vsel %vm10555_vm10, %v3399_v49, %v3400_v63 }
 0x1ad   : > { %v2300_v22 = vadd.f32 %v2233_v14, %v11037_v2  ;;  %v11199_v33 = vadd.f32 %v9240_v58, %v2302_v60  ;;  %v9245_v42 = vpop.f32.mrf.mxu1 }
 0x1ae   : > { %v9207_v41 = vpop.f32.mrf.mxu0 }
 0x1af   : > { %v2303_v16 = vadd.f32 %v9207_v41, %v11041_v10  ;;  %v11202_v61 = vadd.f32 %v2439_v29, %v2300_v22  ;;  %v11207_v45 = vpop.f32.mrf.mxu1  ;;  %v3398_v10 = vsel %vm10555_vm10, %v8491_v19, %v3397_v13 }
 0x1b0   : > { %v11205_v7 = vpop.f32.mrf.mxu0 }
 0x1b1   : > { %v11209_v6 = vadd.f32 %v9241_v28, %v2303_v16  ;;  %v9248_v58 = vpop.f32.mrf.mxu1 }
 0x1b2   : > { %v9210_v2 = vpop.f32.mrf.mxu0  ;;  %9413 = vmatmul.mubr.msk.bf16.gmra.mxu0 %vm1365_vm14, %v10754_v62  ;;  %v8493_v62 = vcombine.low %v3398_v10, %v3401_v50 }
 0x1b3   : > { %v2306_v60 = vadd.f32 %v9210_v2, %v11056_v47  ;;  %9416 = vmatprep.mubr.msk.bf16.mxu0 %vm1365_vm14, %v10953_v23  ;;  %v2471_v3 = vpop.f32.mrf.mxu1 }
 0x1b4   : > { %v2249_v29 = vpop.f32.mrf.mxu0 }
 0x1b5   : > { %v2304_v28 = vadd.f32 %v2249_v29, %v11060_v55  ;;  %v11221_v14 = vadd.f32 %v9244_v30, %v2306_v60  ;;  %v9249_v22 = vpop.f32.mrf.mxu1 }
 0x1b6   : > { %v9211_v4 = vpop.f32.mrf.mxu0 }
 0x1b7   : > { %v2307_v47 = vadd.f32 %v9211_v4, %v11072_v38  ;;  %v11224_v41 = vadd.f32 %v2455_v32, %v2304_v28  ;;  %v11228_v16 = vpop.f32.mrf.mxu1 }
 0x1b8   : > { %v11226_v23 = vpop.f32.mrf.mxu0  ;;  %13958 = vst [vmem:[#allocation15_spill] sm:$0xff] %v11228_v16 }
 0x1b9   : > { %v11230_v13 = vadd.f32 %v9245_v42, %v2307_v47  ;;  %v11233_v19 = vpop.f32.mrf.mxu1 }
 0x1ba   : > { %v9214_v63 = vpop.f32.mrf.mxu0  ;;  %9417 = vmatmul.mubr.msk.bf16.gmra.mxu0 %vm1365_vm14, %v8493_v62  ;;  %13959 = vst [vmem:[#allocation16_spill] sm:$0xff] %v11233_v19  ;;  %vm8099_vm14 = vcmask 1046534  }
 0x1bb   : > { %v2310_v55 = vadd.f32 %v9214_v63, %v11087_v56  ;;  %v11236_v49 = vpop.f32.mrf.mxu1 }
 0x1bc   : > { %v2265_v30 = vpop.f32.mrf.mxu0  ;;  %13960 = vst [vmem:[#allocation17_spill] sm:$0xff] %v11236_v49 }
 0x1bd   : > { %v2308_v38 = vadd.f32 %v2265_v30, %v11091_v40  ;;  %v11239_v32 = vadd.f32 %v9248_v58, %v2310_v55  ;;  %v11241_v60 = vpop.f32.mrf.mxu1  ;;  %v3710_v55 = vld [vmem:[#allocation3 + $0x18] sm:$0x1] }
 0x1be   : > { %v9215_v2 = vpop.f32.mrf.mxu0  ;;  %13961 = vst [vmem:[#allocation19_spill] sm:$0xff] %v11241_v60 }
 0x1bf   : > { %v2311_v42 = vadd.f32 %v9215_v2, %v11093_v24  ;;  %v11244_v10 = vadd.f32 %v2471_v3, %v2308_v38  ;;  %v11248_v29 = vpop.f32.mrf.mxu1  ;;  %v13972_v38 = vmov 0 }
 0x1c0   : > { %v11246_v50 = vpop.f32.mrf.mxu0  ;;  %13962 = vst [vmem:[#allocation22_spill] sm:$0xff] %v11248_v29  ;;  %v13973_v38 = vsel %vm11279_vm5, 4294967295, %v13972_v38  ;;  %v3762_v29 = vld [vmem:[#allocation3 + $0x14] sm:$0x1] }
 0x1c1   : > { %v11250_v28 = vadd.f32 %v9249_v22, %v2311_v42  ;;  %v11252_v4 = vpop.f32.mrf.mxu1  ;;  %v13968_v22 = vmov 0  ;;  %13974 = vst [vmem:[#allocation36_spill] sm:$0xff] %v13973_v38 }
 0x1c2   : > { %v9254_v56 = vpop.f32.mrf.mxu0  ;;  %13963 = vst [vmem:[#allocation24_spill] sm:$0xff] %v11252_v4  ;;  %v13969_v22 = vsel %vm11267_vm1, 4294967295, %v13968_v22 }
 0x1c3   : > { %v11255_v40 = vadd.f32 %v9254_v56, %v11105_v1  ;;  %v11257_v62 = vpop.f32.mrf.mxu1  ;;  %13970 = vst [vmem:[#allocation28_spill] sm:$0xff] %v13969_v22 }
 0x1c4   : > { %v2587_v58 = vpop.f32.mrf.mxu0  ;;  %13965 = vst [vmem:[#allocation29_spill] sm:$0xff] %v11257_v62 }
 0x1c5   : > { %13964 = vst [vmem:[#allocation25_spill] sm:$0xff] %v11255_v40  ;;  %v11260_v47 = vadd.f32 %v2587_v58, %v11108_v8  ;;  %v9293_v3 = vpop.f32.mrf.mxu1  ;;  %v3711_v8 = vsel %vm11267_vm1, 0, %v3710_v55 }
 0x1c6   : > { %v9255_v24 = vpop.f32.mrf.mxu0  ;;  %3712 = vst [vmem:[#allocation3 + $0x18] sm:$0x1] %v3711_v8 }
 0x1c7   : > { %13966 = vst [vmem:[#allocation34_spill] sm:$0xff] %v11260_v47  ;;  %v11263_v63 = vadd.f32 %v9255_v24, %v11114_v52  ;;  %v11273_v30 = vpop.f32.mrf.mxu1  ;;  %v3707_v52 = vld [vmem:[#allocation3 + $0xc] sm:$0x1]  ;;  %v3765_v24 = vld [vmem:[#allocation3 + $0x20] sm:$0x1] }
 0x1c8   : > { %v11271_v1 = vpop.f32.mrf.mxu0  ;;  %13971 = vst [vmem:[#allocation35_spill] sm:$0xff] %v11273_v30  ;;  %v3708_v56 = vsel %vm11267_vm1, 0, %v3707_v52  ;;  %v3766_v30 = vsel %vm11279_vm5, 0, %v3765_v24  ;;  %v3713_v24 = vld [vmem:[#allocation3 + $0x24] sm:$0x1] }
 0x1c9   : > { %13967 = vst [vmem:[#allocation23_spill] sm:$0xff] %v11263_v63  ;;  %v9296_v42 = vpop.f32.mrf.mxu1  ;;  %3709 = vst [vmem:[#allocation3 + $0xc] sm:$0x1] %v3708_v56  ;;  %v3716_v56 = vld [vmem:[#allocation3 + $0x30] sm:$0x1] }
 0x1ca   : > { %v9258_v2 = vpop.f32.mrf.mxu0  ;;  %3767 = vst [vmem:[#allocation3 + $0x20] sm:$0x1] %v3766_v30 }
 0x1cb   : > { %v11286_v58 = vadd.f32 %v9258_v2, %v11122_v21  ;;  %v2832_v55 = vpop.f32.mrf.mxu1  ;;  %v3763_v21 = vsel %vm11279_vm5, 0, %v3762_v29  ;;  %v3714_v29 = vsel %vm11267_vm1, 0, %v3713_v24 }
 0x1cc   : > { %v2603_v5 = vpop.f32.mrf.mxu0  ;;  %3764 = vst [vmem:[#allocation3 + $0x14] sm:$0x1] %v3763_v21  ;;  %3715 = vst [vmem:[#allocation3 + $0x24] sm:$0x1] %v3714_v29 }
 0x1cd   : > { %13975 = vst [vmem:[#allocation18_spill] sm:$0xff] %v11286_v58  ;;  %v11291_v62 = vadd.f32 %v2603_v5, %v11125_v59  ;;  %v9297_v4 = vpop.f32.mrf.mxu1  ;;  %v3717_v5 = vsel %vm11267_vm1, 0, %v3716_v56 }
 0x1ce   : > { %v9259_v8 = vpop.f32.mrf.mxu0  ;;  %3718 = vst [vmem:[#allocation3 + $0x30] sm:$0x1] %v3717_v5  ;;  %v3771_v5 = vld [vmem:[#allocation3 + $0x38] sm:$0x1] }
 0x1cf   : > { %13976 = vst [vmem:[#allocation30_spill] sm:$0xff] %v11291_v62  ;;  %v2721_v60 = vadd.f32 %v9259_v8, %v11131_v54  ;;  %v11298_v2 = vpop.f32.mrf.mxu1 }
 0x1d0   : > { %v11296_v52 = vpop.f32.mrf.mxu0  ;;  %13977 = vst [vmem:[#allocation31_spill] sm:$0xff] %v11298_v2 }
 0x1d1   : > { %v11300_v58 = vadd.f32 %v9293_v3, %v2721_v60  ;;  %v9300_v30 = vpop.f32.mrf.mxu1 }
 0x1d2   : > { %v9262_v59 = vpop.f32.mrf.mxu0 }
 0x1d3   : > { %v2724_v54 = vadd.f32 %v9262_v59, %v11139_v27  ;;  %v2848_v62 = vpop.f32.mrf.mxu1  ;;  %v3772_v59 = vsel %vm11279_vm5, 0, %v3771_v5 }
 0x1d4   : > { %v2619_v8 = vpop.f32.mrf.mxu0  ;;  %3773 = vst [vmem:[#allocation3 + $0x38] sm:$0x1] %v3772_v59  ;;  %v3719_v59 = vld [vmem:[#allocation3 + $0x3c] sm:$0x1] }
 0x1d5   : > { %v2722_v21 = vadd.f32 %v2619_v8, %v11144_v26  ;;  %v11308_v2 = vadd.f32 %v9296_v42, %v2724_v54  ;;  %v9301_v3 = vpop.f32.mrf.mxu1  ;;  %v3768_v26 = vld [vmem:[#allocation3 + $0x2c] sm:$0x1] }
 0x1d6   : > { %v9263_v60 = vpop.f32.mrf.mxu0  ;;  %v3769_v29 = vsel %vm11279_vm5, 0, %v3768_v26 }
 0x1d7   : > { %v2725_v56 = vadd.f32 %v9263_v60, %v11150_v39  ;;  %v11311_v63 = vadd.f32 %v2832_v55, %v2722_v21  ;;  %v11315_v27 = vpop.f32.mrf.mxu1  ;;  %3770 = vst [vmem:[#allocation3 + $0x2c] sm:$0x1] %v3769_v29  ;;  %v3722_v21 = vld [vmem:[#allocation3 + $0x48] sm:$0x1] }
 0x1d8   : > { %v11313_v49 = vpop.f32.mrf.mxu0  ;;  %13979 = vst [vmem:[#allocation33_spill] sm:$0xff] %v11315_v27 }
 0x1d9   : > { %13978 = vst [vmem:[#allocation32_spill] sm:$0xff] %v11313_v49  ;;  %v11319_v24 = vadd.f32 %v9297_v4, %v2725_v56  ;;  %v9304_v54 = vpop.f32.mrf.mxu1  ;;  %v3723_v4 = vsel %vm11267_vm1, 0, %v3722_v21 }
 0x1da   : > { %v9266_v42 = vpop.f32.mrf.mxu0  ;;  %3724 = vst [vmem:[#allocation3 + $0x48] sm:$0x1] %v3723_v4  ;;  %v3774_v4 = vld [vmem:[#allocation3 + $0x44] sm:$0x1] }
 0x1db   : > { %v2728_v39 = vadd.f32 %v9266_v42, %v11158_v35  ;;  %v2864_v8 = vpop.f32.mrf.mxu1  ;;  %v3720_v35 = vsel %vm11267_vm1, 0, %v3719_v59  ;;  %v3704_v42 = vld [vmem:[#allocation3] sm:$0x1] }
 0x1dc   : > { %v2635_v55 = vpop.f32.mrf.mxu0  ;;  %3721 = vst [vmem:[#allocation3 + $0x3c] sm:$0x1] %v3720_v35  ;;  %v3775_v35 = vsel %vm11279_vm5, 0, %v3774_v4 }
 0x1dd   : > { %v2726_v60 = vadd.f32 %v2635_v55, %v11161_v36  ;;  %v11325_v27 = vadd.f32 %v9300_v30, %v2728_v39  ;;  %v9305_v5 = vpop.f32.mrf.mxu1  ;;  %v3705_v30 = vsel %vm11267_vm1, 0, %v3704_v42  ;;  %v3777_v55 = vld [vmem:[#allocation3 + $0x50] sm:$0x1]  ;;  %3776 = vst [vmem:[#allocation3 + $0x44] sm:$0x1] %v3775_v35 }
 0x1de   : > { %v9267_v56 = vpop.f32.mrf.mxu0  ;;  %3706 = vst [vmem:[#allocation3] sm:$0x1] %v3705_v30 }
 0x1df   : > { %v2729_v47 = vadd.f32 %v9267_v56, %v11168_v18  ;;  %v11330_v26 = vadd.f32 %v2848_v62, %v2726_v60  ;;  %v11336_v36 = vpop.f32.mrf.mxu1  ;;  %v3778_v62 = vsel %vm11279_vm5, 0, %v3777_v55  ;;  %v4400_v55 = vld [vmem:[%s13774_s3] sm:$0xf] }
 0x1e0   : > { %v11334_v29 = vpop.f32.mrf.mxu0  ;;  %13981 = vst [vmem:[#allocation38_spill] sm:$0xff] %v11336_v36  ;;  %3779 = vst [vmem:[#allocation3 + $0x50] sm:$0x1] %v3778_v62  ;;  %9736 = vmatprep.subr.msk.bf16.mxu0 %vm4884_vm0, %v4400_v55  ;;  %v5178_v62 = vsel %vm4884_vm0, %v4400_v55, 0 }
 0x1e1   : > { %13980 = vst [vmem:[#allocation37_spill] sm:$0xff] %v11334_v29  ;;  %v11340_v39 = vadd.f32 %v9301_v3, %v2729_v47  ;;  %v9308_v18 = vpop.f32.mrf.mxu1  ;;  %9455 = vmatpush3.bf16.msra.mxu0 %v5178_v62  ;;  %v3783_v29 = vld [vmem:[#allocation3 + $0x68] sm:$0x1] }
 0x1e2   : > { %v9270_v21 = vpop.f32.mrf.mxu0 }
 0x1e3   : > { %v2732_v60 = vadd.f32 %v9270_v21, %v11176_v37  ;;  %v2880_v59 = vpop.f32.mrf.mxu1 }
 0x1e4   : > { %v2651_v56 = vpop.f32.mrf.mxu0 }
 0x1e5   : > { %v2730_v42 = vadd.f32 %v2651_v56, %v11179_v34  ;;  %v11348_v47 = vadd.f32 %v9304_v54, %v2732_v60  ;;  %v9309_v30 = vpop.f32.mrf.mxu1  ;;  %v3728_v54 = vld [vmem:[#allocation3 + $0x60] sm:$0x1]  ;;  %v11362_v56 = vld [vmem:[#allocation3 + $0x4] sm:$0xf] }
 0x1e6   : > { %v9271_v3 = vpop.f32.mrf.mxu0  ;;  %v4328_v60 = vld [vmem:[#allocation3] sm:$0xf] }
 0x1e7   : > { %v2733_v37 = vadd.f32 %v9271_v3, %v11185_v46  ;;  %v11354_v21 = vadd.f32 %v2864_v8, %v2730_v42  ;;  %v11360_v34 = vpop.f32.mrf.mxu1  ;;  %v3729_v46 = vsel %vm11267_vm1, 0, %v3728_v54  ;;  %v3725_v3 = vld [vmem:[#allocation3 + $0x54] sm:$0x1]  ;;  %v8576_v55 = vcombine.low %v4328_v60, %v11362_v56 }
 0x1e8   : > { %v11358_v4 = vpop.f32.mrf.mxu0  ;;  %13983 = vst [vmem:[#allocation40_spill] sm:$0xff] %v11360_v34  ;;  %3730 = vst [vmem:[#allocation3 + $0x60] sm:$0x1] %v3729_v46  ;;  %v3726_v34 = vsel %vm11267_vm1, 0, %v3725_v3  ;;  %v3784_v54 = vsel %vm11279_vm5, 0, %v3783_v29 }
 0x1e9   : > { %13982 = vst [vmem:[#allocation39_spill] sm:$0xff] %v11358_v4  ;;  %v11364_v35 = vadd.f32 %v9305_v5, %v2733_v37  ;;  %v9312_v42 = vpop.f32.mrf.mxu1  ;;  %3727 = vst [vmem:[#allocation3 + $0x54] sm:$0x1] %v3726_v34  ;;  %9456 = vmatprep.mubr.msk.bf16.mxu0 %vm4835_vm3, %v8576_v55  ;;  %v3780_v3 = vld [vmem:[#allocation3 + $0x5c] sm:$0x1] }
 0x1ea   : > { %v9274_v8 = vpop.f32.mrf.mxu0  ;;  %3785 = vst [vmem:[#allocation3 + $0x68] sm:$0x1] %v3784_v54  ;;  %v3734_v29 = vld [vmem:[#allocation3 + $0x78] sm:$0x1]  ;;  %v3759_v54 = vld [vmem:[#allocation3 + $0x8] sm:$0x1] }
 0x1eb   : > { %v2736_v36 = vadd.f32 %v9274_v8, %v11199_v33  ;;  %v2896_v4 = vpop.f32.mrf.mxu1 }
 0x1ec   : > { %v2667_v62 = vpop.f32.mrf.mxu0 }
 0x1ed   : > { %v2734_v5 = vadd.f32 %v2667_v62, %v11202_v61  ;;  %v11373_v37 = vadd.f32 %v9308_v18, %v2736_v36  ;;  %v9313_v19 = vpop.f32.mrf.mxu1  ;;  %v3781_v61 = vsel %vm11279_vm5, 0, %v3780_v3  ;;  %v3735_v62 = vsel %vm11267_vm1, 0, %v3734_v29 }
 0x1ee   : > { %v9275_v46 = vpop.f32.mrf.mxu0  ;;  %3782 = vst [vmem:[#allocation3 + $0x5c] sm:$0x1] %v3781_v61  ;;  %3736 = vst [vmem:[#allocation3 + $0x78] sm:$0x1] %v3735_v62  ;;  %v4402_v61 = vshrl.u32 %v4328_v60, 16 }
 0x1ef   : > { %v2737_v33 = vadd.f32 %v9275_v46, %v11209_v6  ;;  %v11379_v8 = vadd.f32 %v2880_v59, %v2734_v5  ;;  %v11383_v40 = vpop.f32.mrf.mxu1 }
 0x1f0   : > { %v11381_v34 = vpop.f32.mrf.mxu0  ;;  %13985 = vst [vmem:[#allocation42_spill] sm:$0xff] %v11383_v40 }
 0x1f1   : > { %13984 = vst [vmem:[#allocation41_spill] sm:$0xff] %v11381_v34  ;;  %v11387_v36 = vadd.f32 %v9309_v30, %v2737_v33  ;;  %v9316_v55 = vpop.f32.mrf.mxu1  ;;  %v3760_v30 = vsel %vm11279_vm5, 0, %v3759_v54  ;;  %v4405_v34 = vshll.u32 %v4328_v60, 16  ;;  %v4411_v60 = vshll.u32 %v11362_v56, 16 }
 0x1f2   : > { %v9278_v18 = vpop.f32.mrf.mxu0  ;;  %3761 = vst [vmem:[#allocation3 + $0x8] sm:$0x1] %v3760_v30 }
 0x1f3   : > { %v2740_v6 = vadd.f32 %v9278_v18, %v11221_v14  ;;  %v2912_v5 = vpop.f32.mrf.mxu1  ;;  %v4407_v54 = vrot.slane %v4405_v34, 5 }
 0x1f4   : > { %v2683_v59 = vpop.f32.mrf.mxu0 }
 0x1f5   : > { %v2738_v46 = vadd.f32 %v2683_v59, %v11224_v41  ;;  %v11393_v40 = vadd.f32 %v9312_v42, %v2740_v6  ;;  %v9317_v3 = vpop.f32.mrf.mxu1  ;;  %v4415_v41 = vshrl.u32 %v11362_v56, 16  ;;  %v4404_v59 = vrot.slane %v4402_v61, 4 }
 0x1f6   : > { %v9279_v33 = vpop.f32.mrf.mxu0 }
 0x1f7   : > { %v2741_v29 = vadd.f32 %v9279_v33, %v11230_v13  ;;  %v11398_v16 = vadd.f32 %v2896_v4, %v2738_v46  ;;  %v11402_v18 = vpop.f32.mrf.mxu1  ;;  %v3731_v13 = vld [vmem:[#allocation3 + $0x6c] sm:$0x1]  ;;  %v4408_v56 = vor.u32 %v4407_v54, %v4404_v59 }
 0x1f8   : > { %v11400_v14 = vpop.f32.mrf.mxu0  ;;  %13987 = vst [vmem:[#allocation44_spill] sm:$0xff] %v11402_v18  ;;  %v3732_v33 = vsel %vm11267_vm1, 0, %v3731_v13  ;;  %v4413_v18 = vrot.slane %v4411_v60, 5 }
 0x1f9   : > { %13986 = vst [vmem:[#allocation43_spill] sm:$0xff] %v11400_v14  ;;  %v11405_v42 = vadd.f32 %v9313_v19, %v2741_v29  ;;  %v11407_v6 = vpop.f32.mrf.mxu1  ;;  %v4417_v14 = vrot.slane %v4415_v41, 4  ;;  %3733 = vst [vmem:[#allocation3 + $0x6c] sm:$0x1] %v3732_v33  ;;  %v4364_v61 = vld [vmem:[#allocation3 + $0x8] sm:$0x1] }
 0x1fa   : > { %v9282_v62 = vpop.f32.mrf.mxu0  ;;  %13989 = vst [vmem:[#allocation46_spill] sm:$0xff] %v11407_v6  ;;  %v4409_v41 = vrot.slane %v4408_v56, 4  ;;  %v3789_v33 = vld [vmem:[#allocation3 + $0x80] sm:$0x1] }
 0x1fb   : > { %13988 = vst [vmem:[#allocation45_spill] sm:$0xff] %v11405_v42  ;;  %v2744_v30 = vadd.f32 %v9282_v62, %v11239_v32  ;;  %v11411_v46 = vpop.f32.mrf.mxu1  ;;  %v4418_v32 = vor.u32 %v4417_v14, %v4413_v18  ;;  %v4421_v62 = vshll.u32 %v4364_v61, 16  ;;  %v3786_v61 = vld [vmem:[#allocation3 + $0x74] sm:$0x1] }
 0x1fc   : > { %v2699_v4 = vpop.f32.mrf.mxu0  ;;  %13990 = vst [vmem:[#allocation47_spill] sm:$0xff] %v11411_v46  ;;  %v4414_v14 = vsel %vm10095_vm15, %v4409_v41, %v4413_v18  ;;  %v3787_v18 = vsel %vm11279_vm5, 0, %v3786_v61  ;;  %v11459_v41 = vld [vmem:[%s13774_s3 + $0x8] sm:$0xf] }
 0x1fd   : > { %v2742_v19 = vadd.f32 %v2699_v4, %v11244_v10  ;;  %v11416_v29 = vadd.f32 %v9316_v55, %v2744_v30  ;;  %v11418_v6 = vpop.f32.mrf.mxu1  ;;  %v4419_v10 = vrot.slane %v4418_v32, 4  ;;  %v4423_v55 = vrot.slane %v4421_v62, 5  ;;  %3788 = vst [vmem:[#allocation3 + $0x74] sm:$0x1] %v3787_v18  ;;  %9737 = vmatprep.subr.msk.bf16.mxu1 %vm4884_vm0, %v11459_v41 }
 0x1fe   : > { %v9283_v34 = vpop.f32.mrf.mxu0 }
 0x1ff   : > { %v2745_v42 = vadd.f32 %v9283_v34, %v11250_v28  ;;  %v11421_v46 = vadd.f32 %v2912_v5, %v2742_v19  ;;  %v11425_v60 = vpop.f32.mrf.mxu1  ;;  %v4424_v28 = vsel %vm10095_vm15, %v4419_v10, %v4423_v55  ;;  %v3790_v19 = vsel %vm11279_vm5, 0, %v3789_v33  ;;  %v3740_v34 = vld [vmem:[#allocation3 + $0x90] sm:$0x1] }
 0x200   : > { %v11423_v49 = vpop.f32.mrf.mxu0  ;;  %v8544_v5 = vcombine.low %v4414_v14, %v4424_v28  ;;  %3791 = vst [vmem:[#allocation3 + $0x80] sm:$0x1] %v3790_v19  ;;  %v3741_v62 = vsel %vm11267_vm1, 0, %v3740_v34 }
 0x201   : > { %v11427_v30 = vadd.f32 %v9317_v3, %v2745_v42  ;;  %v11431_v4 = vpop.f32.mrf.mxu1  ;;  %3742 = vst [vmem:[#allocation3 + $0x90] sm:$0x1] %v3741_v62 }
 0x202   : > { %v11429_v13 = vpop.f32.mrf.mxu0  ;;  %9422 = vmatprep.mubr.msk.bf16.mxu1 %vm4835_vm3, %v8544_v5  ;;  %v3737_v5 = vld [vmem:[#allocation3 + $0x84] sm:$0x1] }
 0x203   : > { %v11439_v54 = vpop.f32.mrf.mxu1  ;;  %v3738_v33 = vsel %vm11267_vm1, 0, %v3737_v5 }
 0x204   : > { %v11437_v59 = vpop.f32.mrf.mxu0  ;;  %3739 = vst [vmem:[#allocation3 + $0x84] sm:$0x1] %v3738_v33 }
 0x205   : > { %v11444_v42 = vpop.f32.mrf.mxu1 }
 0x206   : > { %v11442_v3 = vpop.f32.mrf.mxu0  ;;  %13991 = vst [vmem:[#allocation48_spill] sm:$0xff] %v11444_v42 }
 0x207   : > { %v11452_v32 = vpop.f32.mrf.mxu1 }
 0x208   : > { %v11450_v56 = vpop.f32.mrf.mxu0  ;;  %13992 = vst [vmem:[#allocation49_spill] sm:$0xff] %v11452_v32 }
 0x209   : > { %v11465_v55 = vpop.f32.mrf.mxu1 }
 0x20a   : > { %v11463_v10 = vpop.f32.mrf.mxu0  ;;  %13993 = vst [vmem:[#allocation50_spill] sm:$0xff] %v11465_v55 }
 0x20b   : > { %v11469_v28 = vpop.f32.mrf.mxu1 }
 0x20c   : > { %v11467_v14 = vpop.f32.mrf.mxu0  ;;  %13994 = vst [vmem:[#allocation51_spill] sm:$0xff] %v11469_v28 }
 0x20d   : > { %v11473_v61 = vpop.f32.mrf.mxu1 }
 0x20e   : > { %v9327_v19 = vpop.f32.mrf.mxu0  ;;  %13995 = vst [vmem:[#allocation52_spill] sm:$0xff] %v11473_v61 }
 0x20f   : > { %v11476_v18 = vadd.f32 %v9327_v19, %v11300_v58  ;;  %v11480_v62 = vpop.f32.mrf.mxu1  ;;  %v3795_v19 = vld [vmem:[#allocation3 + $0x98] sm:$0x1] }
 0x210   : > { %v11478_v34 = vpop.f32.mrf.mxu0  ;;  %13997 = vst [vmem:[#allocation54_spill] sm:$0xff] %v11480_v62 }
 0x211   : > { %13996 = vst [vmem:[#allocation53_spill] sm:$0xff] %v11476_v18  ;;  %v11482_v55 = vpop.f32.mrf.mxu1 }
 0x212   : > { %v9330_v12 = vpop.f32.mrf.mxu0  ;;  %13998 = vst [vmem:[#allocation55_spill] sm:$0xff] %v11482_v55 }
 0x213   : > { %v11485_v28 = vadd.f32 %v9330_v12, %v11308_v2  ;;  %v11487_v42 = vpop.f32.mrf.mxu1  ;;  %v3796_v12 = vsel %vm11279_vm5, 0, %v3795_v19 }
 0x214   : > { %v3038_v32 = vpop.f32.mrf.mxu0  ;;  %13999 = vst [vmem:[#allocation56_spill] sm:$0xff] %v11487_v42  ;;  %3797 = vst [vmem:[#allocation3 + $0x98] sm:$0x1] %v3796_v12 }
 0x215   : > { %v11490_v5 = vadd.f32 %v3038_v32, %v11311_v63  ;;  %v11492_v61 = vpop.f32.mrf.mxu1  ;;  %v3792_v63 = vld [vmem:[#allocation3 + $0x8c] sm:$0x1]  ;;  %v3746_v32 = vld [vmem:[#allocation3 + $0xa8] sm:$0x1] }
 0x216   : > { %v9331_v33 = vpop.f32.mrf.mxu0  ;;  %14000 = vst [vmem:[#allocation57_spill] sm:$0xff] %v11492_v61 }
 0x217   : > { %v11495_v58 = vadd.f32 %v9331_v33, %v11319_v24  ;;  %v11499_v18 = vpop.f32.mrf.mxu1  ;;  %v3793_v24 = vsel %vm11279_vm5, 0, %v3792_v63  ;;  %v3747_v33 = vsel %vm11267_vm1, 0, %v3746_v32 }
 0x218   : > { %v11497_v62 = vpop.f32.mrf.mxu0  ;;  %14001 = vst [vmem:[#allocation58_spill] sm:$0xff] %v11499_v18  ;;  %3794 = vst [vmem:[#allocation3 + $0x8c] sm:$0x1] %v3793_v24 }
 0x219   : > { %v11503_v42 = vpop.f32.mrf.mxu1  ;;  %3748 = vst [vmem:[#allocation3 + $0xa8] sm:$0x1] %v3747_v33 }
 0x21a   : > { %v9334_v2 = vpop.f32.mrf.mxu0  ;;  %14002 = vst [vmem:[#allocation59_spill] sm:$0xff] %v11503_v42 }
 0x21b   : > { %v11506_v55 = vadd.f32 %v9334_v2, %v11325_v27  ;;  %v11512_v18 = vpop.f32.mrf.mxu1  ;;  %v3743_v2 = vld [vmem:[#allocation3 + $0x9c] sm:$0x1] }
 0x21c   : > { %v3054_v61 = vpop.f32.mrf.mxu0  ;;  %14004 = vst [vmem:[#allocation61_spill] sm:$0xff] %v11512_v18  ;;  %v3744_v32 = vsel %vm11267_vm1, 0, %v3743_v2 }
 0x21d   : > { %14003 = vst [vmem:[#allocation60_spill] sm:$0xff] %v11506_v55  ;;  %v11515_v19 = vadd.f32 %v3054_v61, %v11330_v26  ;;  %v11517_v42 = vpop.f32.mrf.mxu1  ;;  %3745 = vst [vmem:[#allocation3 + $0x9c] sm:$0x1] %v3744_v32 }
 0x21e   : > { %v9335_v12 = vpop.f32.mrf.mxu0  ;;  %14005 = vst [vmem:[#allocation62_spill] sm:$0xff] %v11517_v42 }
 0x21f   : > { %v11520_v27 = vadd.f32 %v9335_v12, %v11340_v39  ;;  %v11524_v63 = vpop.f32.mrf.mxu1 }
 0x220   : > { %v11522_v55 = vpop.f32.mrf.mxu0  ;;  %14007 = vst [vmem:[#allocation64_spill] sm:$0xff] %v11524_v63 }
 0x221   : > { %14006 = vst [vmem:[#allocation63_spill] sm:$0xff] %v11520_v27  ;;  %v11528_v33 = vpop.f32.mrf.mxu1  ;;  %v3801_v27 = vld [vmem:[#allocation3 + $0xb0] sm:$0x1] }
 0x222   : > { %v9338_v24 = vpop.f32.mrf.mxu0  ;;  %14008 = vst [vmem:[#allocation65_spill] sm:$0xff] %v11528_v33 }
 0x223   : > { %v11531_v26 = vadd.f32 %v9338_v24, %v11348_v47  ;;  %v11536_v39 = vpop.f32.mrf.mxu1  ;;  %v3802_v47 = vsel %vm11279_vm5, 0, %v3801_v27  ;;  %v14015_v24 = vld [vmem:[#allocation21_spill] sm:$0xff] }
 0x224   : > { %v3070_v61 = vpop.f32.mrf.mxu0  ;;  %14011 = vst [vmem:[#allocation68_spill] sm:$0xff] %v11536_v39  ;;  %3803 = vst [vmem:[#allocation3 + $0xb0] sm:$0x1] %v3802_v47 }
 0x225   : > { %14009 = vst [vmem:[#allocation66_spill] sm:$0xff] %v11531_v26  ;;  %v11534_v42 = vadd.f32 %v3070_v61, %v11354_v21  ;;  %v11543_v2 = vpop.f32.mrf.mxu1  ;;  %v14016_v61 = vld [vmem:[#allocation20_spill] sm:$0xff] }
 0x226   : > { %v9339_v12 = vpop.f32.mrf.mxu0  ;;  %14013 = vst [vmem:[#allocation70_spill] sm:$0xff] %v11543_v2  ;;  %v1748_v39 = vadd.f32 %v14016_v61, %v14015_v24  ;;  %v1828_v24 = vadd.f32 %v11039_v0, %v11051_v15  ;;  %v14021_v61 = vld [vmem:[#allocation11_spill] sm:$0xff] }
 0x227   : > { %14010 = vst [vmem:[#allocation67_spill] sm:$0xff] %v11534_v42  ;;  %v11539_v18 = vadd.f32 %v9339_v12, %v11364_v35  ;;  %v11555_v12 = vpop.f32.mrf.mxu1 }
 0x228   : > { %v11541_v63 = vpop.f32.mrf.mxu0  ;;  %v2281_v27 = vadd.f32 %v11110_v53, %v1748_v39 }
 0x229   : > { %14012 = vst [vmem:[#allocation69_spill] sm:$0xff] %v11539_v18  ;;  %v3798_v18 = vld [vmem:[#allocation3 + $0xa4] sm:$0x1] }
 0x22a   : > { %v9342_v32 = vpop.f32.mrf.mxu0  ;;  %v3799_v42 = vsel %vm11279_vm5, 0, %v3798_v18  ;;  %v2487_v0 = vadd.f32 %v11097_v25, %v2281_v27  ;;  %v14023_v27 = vld [vmem:[#allocation14_spill] sm:$0xff] }
 0x22b   : > { %v11546_v33 = vadd.f32 %v9342_v32, %v11373_v37  ;;  %v3752_v37 = vld [vmem:[#allocation3 + $0xc0] sm:$0x1]  ;;  %v14017_v32 = vld [vmem:[#allocation9_spill] sm:$0xff]  ;;  %3800 = vst [vmem:[#allocation3 + $0xa4] sm:$0x1] %v3799_v42  ;;  %v1860_v42 = vadd.f32 %v11084_v48, %v11095_v31  ;;  %v14019_v31 = vld [vmem:[#allocation10_spill] sm:$0xff] }
 0x22c   : > { %v3086_v21 = vpop.f32.mrf.mxu0 }
 0x22d   : > { %14014 = vst [vmem:[#allocation71_spill] sm:$0xff] %v11546_v33  ;;  %v11553_v35 = vadd.f32 %v3086_v21, %v11379_v8  ;;  %v14018_v33 = vld [vmem:[#allocation27_spill] sm:$0xff]  ;;  %v3753_v8 = vsel %vm11267_vm1, 0, %v3752_v37  ;;  %v1812_v21 = vadd.f32 %v11011_v17, %v11021_v20  ;;  %v2301_v17 = vadd.f32 %v11205_v7, %v1828_v24  ;;  %v14022_v37 = vld [vmem:[#allocation12_spill] sm:$0xff] }
 0x22e   : > { %v9343_v2 = vpop.f32.mrf.mxu0  ;;  %v1764_v26 = vadd.f32 %v14018_v33, %v14017_v32  ;;  %3754 = vst [vmem:[#allocation3 + $0xc0] sm:$0x1] %v3753_v8  ;;  %v1844_v33 = vadd.f32 %v11074_v9, %v11081_v51  ;;  %v3749_v9 = vld [vmem:[#allocation3 + $0xb4] sm:$0x1]  ;;  %v2309_v51 = vadd.f32 %v11246_v50, %v1860_v42  ;;  %v2495_v7 = vadd.f32 %v14019_v31, %v11148_v57  ;;  %v14024_v24 = vld [vmem:[#allocation32_spill] sm:$0xff]  ;;  %v14031_v31 = vld [vmem:[#allocation37_spill] sm:$0xff] }
 0x22f   : > { %v11563_v47 = vadd.f32 %v9343_v2, %v11387_v36  ;;  %v11576_v36 = vpop.f32.mrf.mxu1  ;;  %v2297_v39 = vadd.f32 %v11181_v44, %v1812_v21  ;;  %v2715_v44 = vadd.f32 %v11271_v1, %v2487_v0  ;;  %v2507_v8 = vadd.f32 %v14023_v27, %v2301_v17  ;;  %v14028_v0 = vld [vmem:[#allocation16_spill] sm:$0xff] }
 0x230   : > { %v11571_v18 = vpop.f32.mrf.mxu0  ;;  %v2285_v53 = vadd.f32 %v11127_v43, %v1764_v26  ;;  %v2305_v15 = vadd.f32 %v11226_v23, %v1844_v33  ;;  %v3750_v26 = vsel %vm11267_vm1, 0, %v3749_v9  ;;  %v2723_v1 = vadd.f32 %v14024_v24, %v2495_v7  ;;  %v14025_v33 = vld [vmem:[#allocation45_spill] sm:$0xff] }
 0x231   : > { %v11597_v23 = vpop.f32.mrf.mxu1  ;;  %3751 = vst [vmem:[#allocation3 + $0xb4] sm:$0x1] %v3750_v26  ;;  %v2503_v32 = vadd.f32 %v14022_v37, %v2297_v39  ;;  %v14030_v26 = vld [vmem:[#allocation17_spill] sm:$0xff]  ;;  %v14036_v37 = vld [vmem:[#allocation24_spill] sm:$0xff] }
 0x232   : > { %v9346_v20 = vpop.f32.mrf.mxu0  ;;  %v2491_v48 = vadd.f32 %v11112_v11, %v2285_v53  ;;  %v2511_v11 = vadd.f32 %v11207_v45, %v2305_v15  ;;  %v14026_v53 = vld [vmem:[#allocation15_spill] sm:$0xff] }
 0x233   : > { %v11585_v2 = vadd.f32 %v9346_v20, %v11393_v40  ;;  %v14020_v40 = vld [vmem:[#allocation13_spill] sm:$0xff]  ;;  %v2515_v42 = vadd.f32 %v14026_v53, %v2309_v51  ;;  %v14032_v45 = vld [vmem:[#allocation23_spill] sm:$0xff]  ;;  %v11623_v24 = vpop.f32.mrf.mxu1 }
 0x234   : > { %v3102_v43 = vpop.f32.mrf.mxu0  ;;  %v2499_v50 = vadd.f32 %v14021_v61, %v14020_v40  ;;  %v2719_v57 = vadd.f32 %v11296_v52, %v2491_v48  ;;  %v14027_v20 = vld [vmem:[#allocation25_spill] sm:$0xff]  ;;  %v14033_v15 = vld [vmem:[#allocation19_spill] sm:$0xff]  ;;  %v14034_v48 = vld [vmem:[#allocation22_spill] sm:$0xff] }
 0x235   : > { %v11595_v25 = vadd.f32 %v3102_v43, %v11398_v16  ;;  %v2929_v9 = vadd.f32 %v14028_v0, %v14027_v20  ;;  %v14029_v43 = vld [vmem:[#allocation34_spill] sm:$0xff]  ;;  %v2930_v52 = vadd.f32 %v14033_v15, %v14032_v45  ;;  %v2928_v7 = vadd.f32 %v14034_v48, %v2715_v44  ;;  %v14039_v53 = vld [vmem:[#allocation29_spill] sm:$0xff]  ;;  %v14042_v45 = vld [vmem:[#allocation35_spill] sm:$0xff] }
 0x236   : > { %v9347_v21 = vpop.f32.mrf.mxu0  ;;  %v2927_v39 = vadd.f32 %v14030_v26, %v14029_v43  ;;  %v2727_v17 = vadd.f32 %v14031_v31, %v2499_v50  ;;  %v14035_v61 = vld [vmem:[#allocation18_spill] sm:$0xff]  ;;  %v14040_v0 = vld [vmem:[#allocation41_spill] sm:$0xff]  ;;  %v14041_v50 = vld [vmem:[#allocation43_spill] sm:$0xff]  ;;  %v2743_v31 = vadd.f32 %v11423_v49, %v2515_v42  ;;  %v2932_v15 = vadd.f32 %v14042_v45, %v2719_v57 }
 0x237   : > { %v11607_v16 = vadd.f32 %v9347_v21, %v14025_v33  ;;  %v2933_v27 = vadd.f32 %v14036_v37, %v14035_v61  ;;  %v14037_v21 = vld [vmem:[#allocation39_spill] sm:$0xff]  ;;  %v14038_v33 = vld [vmem:[#allocation30_spill] sm:$0xff]  ;;  %v2735_v43 = vadd.f32 %v14040_v0, %v2507_v8  ;;  %v2739_v26 = vadd.f32 %v14041_v50, %v2511_v11  ;;  %v14044_v37 = vld [vmem:[#allocation33_spill] sm:$0xff]  ;;  %v11643_v0 = vpop.f32.mrf.mxu1 }
 0x238   : > { %v11615_v40 = vpop.f32.mrf.mxu0  ;;  %v2731_v51 = vadd.f32 %v14037_v21, %v2503_v32  ;;  %v2931_v20 = vadd.f32 %v14039_v53, %v14038_v33  ;;  %v14043_v44 = vld [vmem:[#allocation31_spill] sm:$0xff]  ;;  %v3135_v61 = vadd.f32 %v11429_v13, %v2929_v9  ;;  %v2940_v21 = vadd.f32 %v14044_v37, %v2727_v17  ;;  %v14045_v49 = vld [vmem:[#allocation38_spill] sm:$0xff]  ;;  %v14052_v45 = vld [vmem:[#allocation48_spill] sm:$0xff] }
 0x239   : > { %v2936_v48 = vadd.f32 %v14043_v44, %v2723_v1  ;;  %v3133_v33 = vadd.f32 %v11437_v59, %v2927_v39  ;;  %v3136_v8 = vadd.f32 %v11442_v3, %v2930_v52  ;;  %v3134_v11 = vadd.f32 %v11450_v56, %v2928_v7  ;;  %v14047_v9 = vld [vmem:[#allocation42_spill] sm:$0xff]  ;;  %v14048_v39 = vld [vmem:[#allocation44_spill] sm:$0xff]  ;;  %v3807_v52 = vld [vmem:[#allocation3 + $0xc8] sm:$0x1] }
 0x23a   : > { %v9350_v22 = vpop.f32.mrf.mxu0  ;;  %v2944_v42 = vadd.f32 %v14045_v49, %v2731_v51  ;;  %v3139_v57 = vadd.f32 %v11463_v10, %v2933_v27  ;;  %v3137_v1 = vadd.f32 %v11467_v14, %v2931_v20  ;;  %v2952_v59 = vadd.f32 %v14047_v9, %v2739_v26  ;;  %v14049_v7 = vld [vmem:[#allocation46_spill] sm:$0xff]  ;;  %v14050_v51 = vld [vmem:[#allocation47_spill] sm:$0xff] }
 0x23b   : > { %v11634_v32 = vadd.f32 %v9350_v22, %v11416_v29  ;;  %v14046_v29 = vld [vmem:[#allocation40_spill] sm:$0xff]  ;;  %v11651_v3 = vadd.f32 %v14048_v39, %v2743_v31  ;;  %v3138_v56 = vadd.f32 %v11478_v34, %v2932_v15  ;;  %v3363_v10 = vadd.f32 %v14049_v7, %v3135_v61  ;;  %v14051_v31 = vld [vmem:[#allocation53_spill] sm:$0xff]  ;;  %v14061_v39 = vld [vmem:[#allocation63_spill] sm:$0xff] }
 0x23c   : > { %v3118_v53 = vpop.f32.mrf.mxu0  ;;  %v2948_v13 = vadd.f32 %v14046_v29, %v2735_v43  ;;  %v3142_v14 = vadd.f32 %v11497_v62, %v2936_v48  ;;  %v3361_v20 = vadd.f32 %v14050_v51, %v3133_v33  ;;  %v3364_v43 = vadd.f32 %v11418_v6, %v3136_v8  ;;  %v9384_v6 = vpop.f32.mrf.mxu1  ;;  %v3804_v48 = vld [vmem:[#allocation3 + $0xbc] sm:$0x1]  ;;  %v14060_v29 = vld [vmem:[#allocation56_spill] sm:$0xff] }
 0x23d   : > { %v11646_v22 = vadd.f32 %v3118_v53, %v11421_v46  ;;  %v3808_v46 = vsel %vm11279_vm5, 0, %v3807_v52  ;;  %v3362_v50 = vadd.f32 %v11425_v60, %v3134_v11  ;;  %v11666_v34 = vsel %vm4884_vm0, %v11459_v41, 0  ;;  %v14053_v60 = vld [vmem:[#allocation49_spill] sm:$0xff]  ;;  %v14054_v41 = vld [vmem:[#allocation50_spill] sm:$0xff]  ;;  %v14056_v11 = vld [vmem:[#allocation52_spill] sm:$0xff] }
 0x23e   : > { %v9351_v17 = vpop.f32.mrf.mxu0  ;;  %3809 = vst [vmem:[#allocation3 + $0xc8] sm:$0x1] %v3808_v46  ;;  %v3367_v62 = vadd.f32 %v11431_v4, %v3139_v57  ;;  %v11674_v15 = vadd.f32 %v14052_v45, %v14051_v31  ;;  %v3146_v44 = vadd.f32 %v11522_v55, %v2940_v21  ;;  %v11678_v61 = vadd.f32 %v14053_v60, %v3138_v56  ;;  %v14055_v21 = vld [vmem:[#allocation51_spill] sm:$0xff]  ;;  %v14063_v52 = vld [vmem:[#allocation58_spill] sm:$0xff]  ;;  %v3346_v51 = vpop.f32.mrf.mxu1 }
 0x23f   : > { %v11657_v27 = vadd.f32 %v9351_v17, %v11427_v30  ;;  %v11670_v30 = vadd.f32 %v11439_v54, %v3137_v1  ;;  %v11682_v37 = vadd.f32 %v14054_v41, %v11485_v28  ;;  %v3150_v4 = vadd.f32 %v11541_v63, %v2944_v42  ;;  %v11688_v54 = vld [vmem:[%s13773_s2] ss:$0 sm:$0xff]  ;;  %v14057_v28 = vld [vmem:[#allocation54_spill] sm:$0xff]  ;;  %v14058_v42 = vld [vmem:[#allocation60_spill] sm:$0xff] }
 0x240   : > { %v3121_v26 = vpop.f32.mrf.mxu0  ;;  %v3805_v55 = vsel %vm11279_vm5, 0, %v3804_v48  ;;  %v11694_v8 = vadd.f32 %v14055_v21, %v11490_v5  ;;  %v11698_v53 = vadd.f32 %v14056_v11, %v11495_v58  ;;  %v11701_v49 = vadd.f32 %v14057_v28, %v3142_v14  ;;  %v14059_v57 = vld [vmem:[#allocation55_spill] sm:$0xff]  ;;  %v14062_v5 = vld [vmem:[#allocation57_spill] sm:$0xff] }
 0x241   : > { %3806 = vst [vmem:[#allocation3 + $0xbc] sm:$0x1] %v3805_v55  ;;  %v11705_v1 = vadd.f32 %v14059_v57, %v14058_v42  ;;  %v11709_v9 = vadd.f32 %v14060_v29, %v11515_v19  ;;  %v11713_v56 = vadd.f32 %v14062_v5, %v14061_v39  ;;  %v3154_v58 = vadd.f32 %v11571_v18, %v2948_v13  ;;  %v14065_v14 = vld [vmem:[#allocation59_spill] sm:$0xff]  ;;  %v14067_v48 = vld [vmem:[#allocation61_spill] sm:$0xff]  ;;  %v14070_v18 = vld [vmem:[#allocation64_spill] sm:$0xff] }
 0x242   : > { %v9390_v33 = vpop.f32.mrf.mxu0  ;;  %v11717_v7 = vadd.f32 %v14063_v52, %v3146_v44  ;;  %v14066_v19 = vld [vmem:[#allocation67_spill] sm:$0xff]  ;;  %v14068_v41 = vld [vmem:[#allocation69_spill] sm:$0xff]  ;;  %v11733_v13 = vadd.f32 %v14070_v18, %v3150_v4  ;;  %v3158_v44 = vadd.f32 %v11615_v40, %v2952_v59  ;;  %v14073_v29 = vld [vmem:[#allocation68_spill] sm:$0xff]  ;;  %v11754_v40 = vadd.f32 %v11576_v36, %v11585_v2  ;;  %v9385_v52 = vpop.f32.mrf.mxu1 }
 0x243   : > { %v3576_v63 = vadd.f32 %v9390_v33, %v3363_v10  ;;  %v14064_v10 = vld [vmem:[#allocation66_spill] sm:$0xff]  ;;  %v11726_v60 = vadd.f32 %v14067_v48, %v14066_v19  ;;  %v14071_v11 = vld [vmem:[#allocation71_spill] sm:$0xff]  ;;  %v14072_v28 = vld [vmem:[#allocation65_spill] sm:$0xff]  ;;  %v11743_v39 = vadd.f32 %v14073_v29, %v11553_v35  ;;  %v11750_v4 = vadd.f32 %v11555_v12, %v3154_v58 }
 0x244   : > { %v3447_v17 = vpop.f32.mrf.mxu0  ;;  %v11721_v46 = vadd.f32 %v14065_v14, %v14064_v10  ;;  %v14069_v33 = vld [vmem:[#allocation62_spill] sm:$0xff]  ;;  %v11738_v42 = vadd.f32 %v14072_v28, %v14071_v11  ;;  %v11759_v35 = vadd.f32 %v11597_v23, %v11595_v25  ;;  %v11766_v12 = vadd.f32 %v11643_v0, %v3158_v44  ;;  %v4216_v28 = vld [vmem:[#allocation3 + $0xc] sm:$0xf] }
 0x245   : > { %v3615_v31 = vadd.f32 %v11688_v54, %v3576_v63  ;;  %v3574_v45 = vadd.f32 %v3447_v17, %v3361_v20  ;;  %v11730_v55 = vadd.f32 %v14069_v33, %v14068_v41  ;;  %v14074_v5 = vld [vmem:[#allocation70_spill] sm:$0xff]  ;;  %v11769_v36 = vadd.f32 %v9384_v6, %v11634_v32 }
 0x246   : > { %v9391_v21 = vpop.f32.mrf.mxu0  ;;  %v11747_v17 = vadd.f32 %v14074_v5, %v11563_v47  ;;  %v11763_v47 = vadd.f32 %v11623_v24, %v11607_v16  ;;  %v11772_v58 = vadd.f32 %v3346_v51, %v11646_v22  ;;  %v11775_v25 = vadd.f32 %v3121_v26, %v11651_v3  ;;  %v4223_v51 = vld [vmem:[#allocation3 + $0x18] sm:$0xf] }
 0x247   : > { %v3647_v63 = vmax.f32 %v3615_v31, 0.0  ;;  %v3613_v20 = vadd.f32 %v11688_v54, %v3574_v45  ;;  %v3577_v57 = vadd.f32 %v9391_v21, %v3364_v43  ;;  %v11778_v23 = vadd.f32 %v9385_v52, %v11657_v27 }
 0x248   : > { %v3450_v59 = vpop.f32.mrf.mxu0 }
 0x249   : > { %v8777_v10 = vpack.c.bf16 %v3647_v63, %v3647_v63  ;;  %v3645_v14 = vmax.f32 %v3613_v20, 0.0  ;;  %v3616_v43 = vadd.f32 %v11688_v54, %v3577_v57  ;;  %v3575_v31 = vadd.f32 %v3450_v59, %v3362_v50 }
 0x24a   : > { %v9394_v2 = vpop.f32.mrf.mxu0 }
 0x24b   : > { %v3911_v45 = vshrl.u32 %v8777_v10, 16  ;;  %v8775_v50 = vpack.c.bf16 %v3645_v14, %v3645_v14  ;;  %v3648_v19 = vmax.f32 %v3616_v43, 0.0  ;;  %v3614_v16 = vadd.f32 %v11688_v54, %v3575_v31 }
 0x24c   : > { %v3580_v24 = vadd.f32 %v9394_v2, %v3367_v62  ;;  %v3463_v0 = vpop.f32.mrf.mxu0  ;;  %v3914_v32 = vshll.u32 %v8777_v10, 16 }
 0x24d   : > { %v3913_v48 = vrot.slane %v3911_v45, 7  ;;  %v3894_v6 = vshrl.u32 %v8775_v50, 16  ;;  %v8778_v41 = vpack.c.bf16 %v3648_v19, %v3648_v19  ;;  %v3897_v3 = vshll.u32 %v8775_v50, 16 }
 0x24e   : > { %v3646_v26 = vmax.f32 %v3614_v16, 0.0  ;;  %v3619_v27 = vadd.f32 %v11688_v54, %v3580_v24  ;;  %v3578_v33 = vadd.f32 %v3463_v0, %v11670_v30  ;;  %v9395_v18 = vpop.f32.mrf.mxu0  ;;  %v4227_v30 = vld [vmem:[#allocation3 + $0x20] sm:$0x1] }
 0x24f   : > { %v3916_v62 = vor.u32 %v3914_v32, %v3913_v48  ;;  %v3917_v44 = vrot.slane %v3913_v48, 4  ;;  %v3896_v21 = vrot.slane %v3894_v6, 7  ;;  %v3919_v11 = vshrl.u32 %v8778_v41, 16 }
 0x250   : > { %v3922_v63 = vshll.u32 %v8778_v41, 16  ;;  %v8776_v20 = vpack.c.bf16 %v3646_v26, %v3646_v26  ;;  %v3651_v57 = vmax.f32 %v3619_v27, 0.0  ;;  %v3617_v29 = vadd.f32 %v11688_v54, %v3578_v33  ;;  %v3466_v5 = vpop.f32.mrf.mxu0 }
 0x251   : > { %v4224_v59 = vsel %vm11783_vm7, %v3916_v62, %v4223_v51  ;;  %v3899_v52 = vor.u32 %v3897_v3, %v3896_v21  ;;  %v3900_v10 = vrot.slane %v3896_v21, 4  ;;  %v3921_v14 = vrot.slane %v3919_v11, 7  ;;  %v4220_v62 = vld [vmem:[#allocation3 + $0x14] sm:$0x1] }
 0x252   : > { %4225 = vst [vmem:[#allocation3 + $0x18] sm:$0xf] %v4224_v59  ;;  %v3902_v43 = vshrl.u32 %v8776_v20, 16  ;;  %v3905_v31 = vshll.u32 %v8776_v20, 16  ;;  %v8781_v2 = vpack.c.bf16 %v3651_v57, %v3651_v57  ;;  %v3649_v45 = vmax.f32 %v3617_v29, 0.0  ;;  %v9398_v50 = vpop.f32.mrf.mxu0 }
 0x253   : > { %v4217_v19 = vsel %vm11783_vm7, %v3899_v52, %v4216_v28  ;;  %v3924_v16 = vor.u32 %v3922_v63, %v3921_v14  ;;  %v3926_v24 = vrot.slane %v3921_v14, 4  ;;  %v3581_v0 = vadd.f32 %v9395_v18, %v11674_v15  ;;  %v4237_v57 = vld [vmem:[#allocation3 + $0x30] sm:$0xf] }
 0x254   : > { %4218 = vst [vmem:[#allocation3 + $0xc] sm:$0xf] %v4217_v19  ;;  %v3904_v48 = vrot.slane %v3902_v43, 7  ;;  %v3945_v32 = vshrl.u32 %v8781_v2, 16  ;;  %v3948_v6 = vshll.u32 %v8781_v2, 16  ;;  %v8779_v41 = vpack.c.bf16 %v3649_v45, %v3649_v45  ;;  %v3479_v51 = vpop.f32.mrf.mxu0 }
 0x255   : > { %v3925_v26 = vsel %vm10080_vm13, %v3917_v44, %v3924_v16  ;;  %v4228_v33 = vsel %vm11267_vm1, %v3926_v24, %v4227_v30  ;;  %v3620_v21 = vadd.f32 %v11688_v54, %v3581_v0  ;;  %v3579_v11 = vadd.f32 %v3466_v5, %v11678_v61 }
 0x256   : > { %4226 = vst.msk [vmem:[#allocation3 + $0x1c] sm:$0xf] %vm3693_vm6, %v3925_v26  ;;  %4229 = vst [vmem:[#allocation3 + $0x20] sm:$0x1] %v4228_v33  ;;  %v3907_v15 = vor.u32 %v3905_v31, %v3904_v48  ;;  %v3909_v18 = vrot.slane %v3904_v48, 4  ;;  %v3947_v28 = vrot.slane %v3945_v32, 7  ;;  %v9399_v20 = vpop.f32.mrf.mxu0  ;;  %v3584_v52 = vadd.f32 %v9398_v50, %v11682_v37 }
 0x257   : > { %v3928_v63 = vshrl.u32 %v8779_v41, 16  ;;  %v3931_v29 = vshll.u32 %v8779_v41, 16  ;;  %v3652_v59 = vmax.f32 %v3620_v21, 0.0  ;;  %v3618_v44 = vadd.f32 %v11688_v54, %v3579_v11  ;;  %v4230_v50 = vld [vmem:[#allocation3 + $0x24] sm:$0xf] }
 0x258   : > { %v3908_v14 = vsel %vm10080_vm13, %v3900_v10, %v3907_v15  ;;  %v4221_v61 = vsel %vm11267_vm1, %v3909_v18, %v4220_v62  ;;  %v3950_v5 = vor.u32 %v3948_v6, %v3947_v28  ;;  %v3951_v30 = vrot.slane %v3947_v28, 4  ;;  %v3482_v43 = vpop.f32.mrf.mxu0  ;;  %v4241_v15 = vld [vmem:[#allocation3 + $0x38] sm:$0x1] }
 0x259   : > { %4219 = vst.msk [vmem:[#allocation3 + $0x10] sm:$0xf] %vm3693_vm6, %v3908_v14  ;;  %4222 = vst [vmem:[#allocation3 + $0x14] sm:$0x1] %v4221_v61  ;;  %v3930_v31 = vrot.slane %v3928_v63, 7  ;;  %v8782_v2 = vpack.c.bf16 %v3652_v59, %v3652_v59  ;;  %v3650_v45 = vmax.f32 %v3618_v44, 0.0  ;;  %v3623_v19 = vadd.f32 %v11688_v54, %v3584_v52 }
 0x25a   : > { %v4238_v37 = vsel %vm11783_vm7, %v3950_v5, %v4237_v57  ;;  %v3582_v10 = vadd.f32 %v3479_v51, %v11694_v8  ;;  %v3585_v16 = vadd.f32 %v9399_v20, %v11698_v53  ;;  %v3583_v24 = vadd.f32 %v3482_v43, %v11701_v49  ;;  %v9402_v0 = vpop.f32.mrf.mxu0 }
 0x25b   : > { %4239 = vst [vmem:[#allocation3 + $0x30] sm:$0xf] %v4238_v37  ;;  %v3933_v48 = vor.u32 %v3931_v29, %v3930_v31  ;;  %v3934_v32 = vrot.slane %v3930_v31, 4  ;;  %v3953_v6 = vshrl.u32 %v8782_v2, 16  ;;  %v3956_v41 = vshll.u32 %v8782_v2, 16 }
 0x25c   : > { %v8780_v26 = vpack.c.bf16 %v3650_v45, %v3650_v45  ;;  %v3655_v33 = vmax.f32 %v3623_v19, 0.0  ;;  %v3621_v62 = vadd.f32 %v11688_v54, %v3582_v10  ;;  %v3624_v21 = vadd.f32 %v11688_v54, %v3585_v16  ;;  %v3495_v11 = vpop.f32.mrf.mxu0  ;;  %v4234_v2 = vld [vmem:[#allocation3 + $0x2c] sm:$0x1] }
 0x25d   : > { %v4231_v8 = vsel %vm11783_vm7, %v3933_v48, %v4230_v50  ;;  %v3955_v51 = vrot.slane %v3953_v6, 7  ;;  %v3622_v53 = vadd.f32 %v11688_v54, %v3583_v24  ;;  %v3588_v49 = vadd.f32 %v9402_v0, %v11705_v1  ;;  %v4251_v0 = vld [vmem:[#allocation3 + $0x48] sm:$0xf] }
 0x25e   : > { %4232 = vst [vmem:[#allocation3 + $0x24] sm:$0xf] %v4231_v8  ;;  %v3936_v18 = vshrl.u32 %v8780_v26, 16  ;;  %v3939_v28 = vshll.u32 %v8780_v26, 16  ;;  %v8785_v63 = vpack.c.bf16 %v3655_v33, %v3655_v33  ;;  %v3653_v20 = vmax.f32 %v3621_v62, 0.0  ;;  %v9403_v57 = vpop.f32.mrf.mxu0 }
 0x25f   : > { %v3958_v29 = vor.u32 %v3956_v41, %v3955_v51  ;;  %v3960_v59 = vrot.slane %v3955_v51, 4  ;;  %v3656_v44 = vmax.f32 %v3624_v21, 0.0  ;;  %v3654_v52 = vmax.f32 %v3622_v53, 0.0  ;;  %v8657_v8 = vld [vmem:[%s13774_s3 + $0xc] sm:$0xf] }
 0x260   : > { %v3938_v14 = vrot.slane %v3936_v18, 7  ;;  %v3979_v61 = vshrl.u32 %v8785_v63, 16  ;;  %v3982_v5 = vshll.u32 %v8785_v63, 16  ;;  %v8783_v43 = vpack.c.bf16 %v3653_v20, %v3653_v20  ;;  %v3498_v24 = vpop.f32.mrf.mxu0  ;;  %9738 = vmatprep.subr.msk.bf16.mxu0 %vm4884_vm0, %v8657_v8  ;;  %v4255_v63 = vld [vmem:[#allocation3 + $0x50] sm:$0x1] }
 0x261   : > { %v3959_v31 = vsel %vm10080_vm13, %v3951_v30, %v3958_v29  ;;  %v4242_v1 = vsel %vm11267_vm1, %v3960_v59, %v4241_v15  ;;  %v8786_v45 = vpack.c.bf16 %v3656_v44, %v3656_v44  ;;  %v8784_v19 = vpack.c.bf16 %v3654_v52, %v3654_v52 }
 0x262   : > { %4240 = vst.msk [vmem:[#allocation3 + $0x34] sm:$0xf] %vm3693_vm6, %v3959_v31  ;;  %4243 = vst [vmem:[#allocation3 + $0x38] sm:$0x1] %v4242_v1  ;;  %v3941_v37 = vor.u32 %v3939_v28, %v3938_v14  ;;  %v3943_v50 = vrot.slane %v3938_v14, 4  ;;  %v3981_v10 = vrot.slane %v3979_v61, 7  ;;  %v3627_v20 = vadd.f32 %v11688_v54, %v3588_v49  ;;  %v9406_v44 = vpop.f32.mrf.mxu0 }
 0x263   : > { %v3962_v16 = vshrl.u32 %v8783_v43, 16  ;;  %v3965_v48 = vshll.u32 %v8783_v43, 16  ;;  %v3987_v6 = vshrl.u32 %v8786_v45, 16  ;;  %v3990_v41 = vshll.u32 %v8786_v45, 16  ;;  %v4244_v28 = vld [vmem:[#allocation3 + $0x3c] sm:$0xf] }
 0x264   : > { %v3970_v26 = vshrl.u32 %v8784_v19, 16  ;;  %v3942_v30 = vsel %vm10080_vm13, %v3934_v32, %v3941_v37  ;;  %v4235_v33 = vsel %vm11267_vm1, %v3943_v50, %v4234_v2  ;;  %v3984_v62 = vor.u32 %v3982_v5, %v3981_v10  ;;  %v4248_v43 = vld [vmem:[#allocation3 + $0x44] sm:$0x1]  ;;  %v3349_v37 = vpop.f32.mrf.mxu1 }
 0x265   : > { %v3985_v21 = vrot.slane %v3981_v10, 4  ;;  %4233 = vst.msk [vmem:[#allocation3 + $0x28] sm:$0xf] %vm3693_vm6, %v3942_v30  ;;  %4236 = vst [vmem:[#allocation3 + $0x2c] sm:$0x1] %v4235_v33  ;;  %v3964_v51 = vrot.slane %v3962_v16, 7  ;;  %v3586_v29 = vadd.f32 %v3495_v11, %v11709_v9  ;;  %v3589_v59 = vadd.f32 %v9403_v57, %v11713_v56 }
 0x266   : > { %v3989_v53 = vrot.slane %v3987_v6, 7  ;;  %v3972_v15 = vrot.slane %v3970_v26, 7  ;;  %v3973_v18 = vshll.u32 %v8784_v19, 16  ;;  %v4252_v32 = vsel %vm11783_vm7, %v3984_v62, %v4251_v0  ;;  %v4330_v19 = vld [vmem:[#allocation3 + $0xc] sm:$0xf]  ;;  %v11853_v0 = vpop.f32.mrf.mxu0 }
 0x267   : > { %4253 = vst [vmem:[#allocation3 + $0x48] sm:$0xf] %v4252_v32  ;;  %v3967_v52 = vor.u32 %v3965_v48, %v3964_v51  ;;  %v3968_v14 = vrot.slane %v3964_v51, 4  ;;  %v3659_v2 = vmax.f32 %v3627_v20, 0.0  ;;  %v3625_v45 = vadd.f32 %v11688_v54, %v3586_v29  ;;  %v4265_v51 = vld [vmem:[#allocation3 + $0x60] sm:$0xf] }
 0x268   : > { %v3992_v61 = vor.u32 %v3990_v41, %v3989_v53  ;;  %v3994_v5 = vrot.slane %v3989_v53, 4  ;;  %v3975_v31 = vor.u32 %v3973_v18, %v3972_v15  ;;  %v3977_v1 = vrot.slane %v3972_v15, 4 }
 0x269   : > { %v4245_v49 = vsel %vm11783_vm7, %v3967_v52, %v4244_v28  ;;  %v3628_v11 = vadd.f32 %v11688_v54, %v3589_v59  ;;  %v8789_v10 = vpack.c.bf16 %v3659_v2, %v3659_v2  ;;  %v3657_v16 = vmax.f32 %v3625_v45, 0.0 }
 0x26a   : > { %v3993_v9 = vsel %vm10080_vm13, %v3985_v21, %v3992_v61  ;;  %v4256_v56 = vsel %vm11267_vm1, %v3994_v5, %v4255_v63  ;;  %4246 = vst [vmem:[#allocation3 + $0x3c] sm:$0xf] %v4245_v49  ;;  %v3976_v57 = vsel %vm10080_vm13, %v3968_v14, %v3975_v31  ;;  %v4249_v50 = vsel %vm11267_vm1, %v3977_v1, %v4248_v43  ;;  %v4258_v43 = vld [vmem:[#allocation3 + $0x54] sm:$0xf] }
 0x26b   : > { %4254 = vst.msk [vmem:[#allocation3 + $0x4c] sm:$0xf] %vm3693_vm6, %v3993_v9  ;;  %4257 = vst [vmem:[#allocation3 + $0x50] sm:$0x1] %v4256_v56  ;;  %v3660_v48 = vmax.f32 %v3628_v11, 0.0  ;;  %v3587_v6 = vadd.f32 %v3498_v24, %v11717_v7  ;;  %v3592_v41 = vadd.f32 %v9406_v44, %v11721_v46  ;;  %v4426_v26 = vshrl.u32 %v4330_v19, 16  ;;  %v9407_v24 = vpop.f32.mrf.mxu0 }
 0x26c   : > { %4247 = vst.msk [vmem:[#allocation3 + $0x40] sm:$0xf] %vm3693_vm6, %v3976_v57  ;;  %4250 = vst [vmem:[#allocation3 + $0x44] sm:$0x1] %v4249_v50  ;;  %v11859_v30 = vadd.f32 %v3349_v37, %v11775_v25  ;;  %v4013_v33 = vshrl.u32 %v8789_v10, 16  ;;  %v8787_v62 = vpack.c.bf16 %v3657_v16, %v3657_v16  ;;  %v4429_v21 = vshll.u32 %v4330_v19, 16 }
 0x26d   : > { %v4016_v8 = vshll.u32 %v8789_v10, 16  ;;  %v8790_v53 = vpack.c.bf16 %v3660_v48, %v3660_v48  ;;  %v3626_v15 = vadd.f32 %v11688_v54, %v3587_v6  ;;  %v3631_v18 = vadd.f32 %v11688_v54, %v3592_v41  ;;  %v11863_v7 = vld [vmem:[#allocation3 + $0x10] sm:$0xf]  ;;  %v4332_v44 = vld [vmem:[#allocation3 + $0x18] sm:$0xf]  ;;  %v3514_v57 = vpop.f32.mrf.mxu0 }
 0x26e   : > { %v4015_v32 = vrot.slane %v4013_v33, 7  ;;  %v3996_v28 = vshrl.u32 %v8787_v62, 16  ;;  %v3999_v63 = vshll.u32 %v8787_v62, 16  ;;  %v11865_v46 = vrot.slane %v4426_v26, 4  ;;  %v4269_v9 = vld [vmem:[#allocation3 + $0x68] sm:$0x1] }
 0x26f   : > { %v4021_v25 = vshrl.u32 %v8790_v53, 16  ;;  %v3658_v20 = vmax.f32 %v3626_v15, 0.0  ;;  %v3663_v29 = vmax.f32 %v3631_v18, 0.0  ;;  %v11867_v59 = vrot.slane %v4429_v21, 5  ;;  %v11877_v6 = vld [vmem:[#allocation3 + $0x1c] sm:$0xf] }
 0x270   : > { %v4018_v52 = vor.u32 %v4016_v8, %v4015_v32  ;;  %v4019_v14 = vrot.slane %v4015_v32, 4  ;;  %v3998_v61 = vrot.slane %v3996_v28, 7  ;;  %v4024_v5 = vshll.u32 %v8790_v53, 16  ;;  %v4262_v53 = vld [vmem:[#allocation3 + $0x5c] sm:$0x1] }
 0x271   : > { %v4023_v31 = vrot.slane %v4021_v25, 7  ;;  %v8788_v1 = vpack.c.bf16 %v3658_v20, %v3658_v20  ;;  %v8793_v2 = vpack.c.bf16 %v3663_v29, %v3663_v29  ;;  %v11870_v45 = vcombine.low %v4330_v19, %v11863_v7  ;;  %v4279_v29 = vld [vmem:[#allocation3 + $0x78] sm:$0xf] }
 0x272   : > { %v4266_v37 = vsel %vm11783_vm7, %v4018_v52, %v4265_v51  ;;  %v4001_v49 = vor.u32 %v3999_v63, %v3998_v61  ;;  %v4439_v56 = vshrl.u32 %v11863_v7, 16  ;;  %v4450_v11 = vshrl.u32 %v4332_v44, 16  ;;  %v9410_v63 = vpop.f32.mrf.mxu0 }
 0x273   : > { %4267 = vst [vmem:[#allocation3 + $0x60] sm:$0xf] %v4266_v37  ;;  %v4002_v50 = vrot.slane %v3998_v61, 4  ;;  %v4026_v10 = vor.u32 %v4024_v5, %v4023_v31  ;;  %v4028_v16 = vrot.slane %v4023_v31, 4  ;;  %v4004_v48 = vshrl.u32 %v8788_v1, 16  ;;  %9457 = vmatmul.mubr.msk.bf16.vlgmr.msra.gmra.mxu0 %vm4835_vm3, %v11870_v45 }
 0x274   : > { %v4259_v19 = vsel %vm11783_vm7, %v4001_v49, %v4258_v43  ;;  %v4007_v41 = vshll.u32 %v8788_v1, 16  ;;  %v4047_v26 = vshrl.u32 %v8793_v2, 16  ;;  %v4050_v33 = vshll.u32 %v8793_v2, 16  ;;  %v4334_v61 = vld [vmem:[#allocation3 + $0x24] sm:$0xf] }
 0x275   : > { %4260 = vst [vmem:[#allocation3 + $0x54] sm:$0xf] %v4259_v19  ;;  %v4027_v62 = vsel %vm10080_vm13, %v4019_v14, %v4026_v10  ;;  %v4270_v21 = vsel %vm11267_vm1, %v4028_v16, %v4269_v9  ;;  %v4006_v8 = vrot.slane %v4004_v48, 7  ;;  %v4453_v51 = vshll.u32 %v4332_v44, 16  ;;  %v11910_v1 = vld [vmem:[#allocation3 + $0x28] sm:$0xf]  ;;  %v11922_v19 = vpop.f32.mrf.mxu0 }
 0x276   : > { %4268 = vst.msk [vmem:[#allocation3 + $0x64] sm:$0xf] %vm3693_vm6, %v4027_v62  ;;  %4271 = vst [vmem:[#allocation3 + $0x68] sm:$0x1] %v4270_v21  ;;  %v11886_v15 = vrot.slane %v4047_v26, 7  ;;  %v11888_v18 = vrot.slane %v4450_v11, 4  ;;  %v11891_v32 = vcombine.low %v4332_v44, %v11877_v6  ;;  %v3590_v28 = vadd.f32 %v11853_v0, %v11726_v60 }
 0x277   : > { %v4009_v25 = vor.u32 %v4007_v41, %v4006_v8  ;;  %v4011_v20 = vrot.slane %v4006_v8, 4  ;;  %v4463_v52 = vshrl.u32 %v11877_v6, 16  ;;  %v3593_v14 = vadd.f32 %v9407_v24, %v11730_v55 }
 0x278   : > { %v4052_v5 = vor.u32 %v4050_v33, %v11886_v15  ;;  %v11898_v43 = vrot.slane %v4453_v51, 5  ;;  %9460 = vmatprep.mubr.msk.bf16.mxu0 %vm4835_vm3, %v11891_v32  ;;  %v3629_v44 = vadd.f32 %v11688_v54, %v3590_v28  ;;  %v3591_v60 = vadd.f32 %v3514_v57, %v11733_v13 }
 0x279   : > { %v4010_v0 = vsel %vm10080_vm13, %v4002_v50, %v4009_v25  ;;  %v4263_v31 = vsel %vm11267_vm1, %v4011_v20, %v4262_v53  ;;  %v3632_v55 = vadd.f32 %v11688_v54, %v3593_v14  ;;  %v3596_v24 = vadd.f32 %v9410_v63, %v11738_v42 }
 0x27a   : > { %4261 = vst.msk [vmem:[#allocation3 + $0x58] sm:$0xf] %vm3693_vm6, %v4010_v0  ;;  %4264 = vst [vmem:[#allocation3 + $0x5c] sm:$0x1] %v4263_v31  ;;  %v4280_v2 = vsel %vm11783_vm7, %v4052_v5, %v4279_v29  ;;  %v3661_v37 = vmax.f32 %v3629_v44, 0.0  ;;  %v3630_v13 = vadd.f32 %v11688_v54, %v3591_v60  ;;  %v4474_v49 = vshrl.u32 %v4334_v61, 16  ;;  %v9411_v44 = vpop.f32.mrf.mxu0 }
 0x27b   : > { %v4053_v9 = vrot.slane %v11886_v15, 4  ;;  %4281 = vst [vmem:[#allocation3 + $0x78] sm:$0xf] %v4280_v2  ;;  %v3664_v11 = vmax.f32 %v3632_v55, 0.0  ;;  %v3635_v57 = vadd.f32 %v11688_v54, %v3596_v24  ;;  %v4477_v50 = vshll.u32 %v4334_v61, 16 }
 0x27c   : > { %v8791_v42 = vpack.c.bf16 %v3661_v37, %v3661_v37  ;;  %v3662_v10 = vmax.f32 %v3630_v13, 0.0  ;;  %v4487_v16 = vshrl.u32 %v11910_v1, 16  ;;  %v11920_v48 = vcombine.low %v4334_v61, %v11910_v1  ;;  %v4272_v29 = vld [vmem:[#allocation3 + $0x6c] sm:$0xf]  ;;  %v4365_v0 = vld [vmem:[#allocation3 + $0x14] sm:$0x1] }
 0x27d   : > { %v8794_v41 = vpack.c.bf16 %v3664_v11, %v3664_v11  ;;  %v3667_v26 = vmax.f32 %v3635_v57, 0.0  ;;  %v11924_v33 = vrot.slane %v4474_v49, 4  ;;  %v4432_v62 = vor.u32 %v11867_v59, %v11865_v46  ;;  %v4283_v2 = vld [vmem:[#allocation3 + $0x80] sm:$0x1]  ;;  %v4276_v57 = vld [vmem:[#allocation3 + $0x74] sm:$0x1] }
 0x27e   : > { %v4030_v21 = vshrl.u32 %v8791_v42, 16  ;;  %v8792_v8 = vpack.c.bf16 %v3662_v10, %v3662_v10  ;;  %v11928_v51 = vrot.slane %v4477_v50, 5  ;;  %9461 = vmatmul.mubr.msk.bf16.gmra.mxu0 %vm4835_vm3, %v11920_v48  ;;  %v4435_v53 = vshll.u32 %v11863_v7, 16  ;;  %v4336_v7 = vld [vmem:[#allocation3 + $0x30] sm:$0xf] }
 0x27f   : > { %v4033_v15 = vshll.u32 %v8791_v42, 16  ;;  %v4055_v28 = vshrl.u32 %v8794_v41, 16  ;;  %v4058_v63 = vshll.u32 %v8794_v41, 16  ;;  %v8797_v25 = vpack.c.bf16 %v3667_v26, %v3667_v26  ;;  %v12202_v22 = vld [vmem:[#allocation3 + $0x68] sm:$0x1] }
 0x280   : > { %v4032_v20 = vrot.slane %v4030_v21, 7  ;;  %v4038_v14 = vshrl.u32 %v8792_v8, 16  ;;  %v4433_v61 = vrot.slane %v4432_v62, 4  ;;  %v4437_v5 = vrot.slane %v4435_v53, 5  ;;  %v4293_v62 = vld [vmem:[#allocation3 + $0x90] sm:$0xf] }
 0x281   : > { %v4057_v46 = vrot.slane %v4055_v28, 7  ;;  %v4041_v59 = vshll.u32 %v8792_v8, 16  ;;  %v4081_v60 = vshrl.u32 %v8797_v25, 16  ;;  %v4441_v31 = vrot.slane %v4439_v56, 4  ;;  %v3530_v56 = vpop.f32.mrf.mxu0 }
 0x282   : > { %v4035_v55 = vor.u32 %v4033_v15, %v4032_v20  ;;  %v4036_v24 = vrot.slane %v4032_v20, 4  ;;  %v4040_v37 = vrot.slane %v4038_v14, 7  ;;  %v4084_v13 = vshll.u32 %v8797_v25, 16  ;;  %v11946_v25 = vld [vmem:[#allocation3 + $0x34] sm:$0xf] }
 0x283   : > { %v4060_v49 = vor.u32 %v4058_v63, %v4057_v46  ;;  %v4062_v11 = vrot.slane %v4057_v46, 4  ;;  %v11935_v50 = vrot.slane %v4081_v60, 7  ;;  %v4442_v42 = vor.u32 %v4441_v31, %v4437_v5  ;;  %v11957_v60 = vld [vmem:[#allocation3 + $0x20] sm:$0x1] }
 0x284   : > { %v4273_v10 = vsel %vm11783_vm7, %v4035_v55, %v4272_v29  ;;  %v4043_v41 = vor.u32 %v4041_v59, %v4040_v37  ;;  %v4045_v26 = vrot.slane %v4040_v37, 4  ;;  %v4445_v21 = vshll.u32 %v4365_v0, 16 }
 0x285   : > { %4274 = vst [vmem:[#allocation3 + $0x6c] sm:$0xf] %v4273_v10  ;;  %v4061_v8 = vsel %vm10080_vm13, %v4053_v9, %v4060_v49  ;;  %v4284_v53 = vsel %vm11267_vm1, %v4062_v11, %v4283_v2  ;;  %v4086_v15 = vor.u32 %v4084_v13, %v11935_v50  ;;  %v4438_v63 = vsel %vm10095_vm15, %v4433_v61, %v4437_v5  ;;  %v9414_v2 = vpop.f32.mrf.mxu0 }
 0x286   : > { %4282 = vst.msk [vmem:[#allocation3 + $0x7c] sm:$0xf] %vm3693_vm6, %v4061_v8  ;;  %4285 = vst [vmem:[#allocation3 + $0x80] sm:$0x1] %v4284_v53  ;;  %v4044_v20 = vsel %vm10080_vm13, %v4036_v24, %v4043_v41  ;;  %v4277_v29 = vsel %vm11267_vm1, %v4045_v26, %v4276_v57  ;;  %v4443_v9 = vrot.slane %v4442_v42, 4  ;;  %v4447_v14 = vrot.slane %v4445_v21, 5 }
 0x287   : > { %4275 = vst.msk [vmem:[#allocation3 + $0x70] sm:$0xf] %vm3693_vm6, %v4044_v20  ;;  %4278 = vst [vmem:[#allocation3 + $0x74] sm:$0x1] %v4277_v29  ;;  %v4087_v46 = vrot.slane %v11935_v50, 4  ;;  %v4294_v61 = vsel %vm11783_vm7, %v4086_v15, %v4293_v62  ;;  %v4498_v5 = vshrl.u32 %v4336_v7, 16  ;;  %v11962_v31 = vcombine.low %v4336_v7, %v11946_v25 }
 0x288   : > { %v4501_v59 = vshll.u32 %v4336_v7, 16  ;;  %4295 = vst [vmem:[#allocation3 + $0x90] sm:$0xf] %v4294_v61  ;;  %v4448_v0 = vsel %vm10095_vm15, %v4443_v9, %v4447_v14  ;;  %v3594_v55 = vadd.f32 %v11922_v19, %v11743_v39  ;;  %v4456_v24 = vor.u32 %v11898_v43, %v11888_v18  ;;  %v4338_v57 = vld [vmem:[#allocation3 + $0x3c] sm:$0xf] }
 0x289   : > { %v11968_v37 = vcombine.low %v4438_v63, %v4448_v0  ;;  %v11970_v13 = vrot.slane %v4498_v5, 4  ;;  %v4511_v49 = vshrl.u32 %v11946_v25, 16  ;;  %v4459_v11 = vshll.u32 %v11877_v6, 16  ;;  %9464 = vmatprep.mubr.msk.bf16.mxu0 %vm4835_vm3, %v11962_v31  ;;  %v11983_v43 = vld [vmem:[%s13774_s3 + $0x10] sm:$0xf]  ;;  %v3543_v0 = vpop.f32.mrf.mxu0 }
 0x28a   : > { %v3633_v42 = vadd.f32 %v11688_v54, %v3594_v55  ;;  %v4457_v10 = vrot.slane %v4456_v24, 4  ;;  %v4465_v39 = vrot.slane %v4463_v52, 4  ;;  %v4469_v18 = vshll.u32 %v11957_v60, 16  ;;  %v11995_v20 = vld [vmem:[#allocation3 + $0x40] sm:$0xf] }
 0x28b   : > { %14080 = vst [vmem:[#allocation21_spill] sm:$0xff] %v11968_v37  ;;  %9423 = vmatmul.mubr.msk.bf16.vlgmr.msra.gmra.mxu1 %vm4835_vm3, %v11968_v37  ;;  %v4461_v19 = vrot.slane %v4459_v11, 5  ;;  %v3597_v41 = vadd.f32 %v9411_v44, %v11747_v17  ;;  %v3595_v26 = vadd.f32 %v3530_v56, %v11750_v4  ;;  %v3600_v62 = vadd.f32 %v9414_v2, %v11754_v40 }
 0x28c   : > { %v11990_v21 = vrot.slane %v4501_v59, 5  ;;  %9489 = vmatpush3.bf16.msra.mxu1 %v11666_v34  ;;  %v3665_v6 = vmax.f32 %v3633_v42, 0.0  ;;  %v4522_v52 = vshrl.u32 %v4338_v57, 16  ;;  %v4525_v7 = vshll.u32 %v4338_v57, 16 }
 0x28d   : > { %v4466_v8 = vor.u32 %v4465_v39, %v4461_v19  ;;  %v4471_v53 = vrot.slane %v4469_v18, 5  ;;  %v3636_v15 = vadd.f32 %v11688_v54, %v3597_v41  ;;  %v3634_v63 = vadd.f32 %v11688_v54, %v3595_v26  ;;  %9739 = vmatprep.subr.msk.bf16.mxu1 %vm4884_vm0, %v11983_v43 }
 0x28e   : > { %v8795_v17 = vpack.c.bf16 %v3665_v6, %v3665_v6  ;;  %v4462_v4 = vsel %vm10095_vm15, %v4457_v10, %v4461_v19  ;;  %v3639_v34 = vadd.f32 %v11688_v54, %v3600_v62  ;;  %v12002_v40 = vrot.slane %v4522_v52, 4  ;;  %v4286_v10 = vld [vmem:[#allocation3 + $0x84] sm:$0xf]  ;;  %v12018_v6 = vld [vmem:[#allocation3 + $0x2c] sm:$0x1] }
 0x28f   : > { %v4467_v44 = vrot.slane %v4466_v8, 4  ;;  %v3668_v56 = vmax.f32 %v3636_v15, 0.0  ;;  %v3666_v29 = vmax.f32 %v3634_v63, 0.0  ;;  %v12004_v9 = vrot.slane %v4525_v7, 5  ;;  %v9415_v8 = vpop.f32.mrf.mxu0  ;;  %v4297_v15 = vld [vmem:[#allocation3 + $0x98] sm:$0x1] }
 0x290   : > { %v4064_v14 = vshrl.u32 %v8795_v17, 16  ;;  %v4067_v61 = vshll.u32 %v8795_v17, 16  ;;  %v3671_v5 = vmax.f32 %v3639_v34, 0.0  ;;  %v12007_v59 = vcombine.low %v4338_v57, %v11995_v20 }
 0x291   : > { %v4472_v55 = vsel %vm10095_vm15, %v4467_v44, %v4471_v53  ;;  %v8798_v24 = vpack.c.bf16 %v3668_v56, %v3668_v56  ;;  %v8796_v2 = vpack.c.bf16 %v3666_v29, %v3666_v29  ;;  %v4480_v11 = vor.u32 %v11928_v51, %v11924_v33  ;;  %v4290_v44 = vld [vmem:[#allocation3 + $0x8c] sm:$0x1] }
 0x292   : > { %v4066_v42 = vrot.slane %v4064_v14, 7  ;;  %v12013_v39 = vcombine.low %v4462_v4, %v4472_v55  ;;  %v8801_v18 = vpack.c.bf16 %v3671_v5, %v3671_v5  ;;  %9465 = vmatmul.mubr.msk.bf16.gmra.mxu0 %vm4835_vm3, %v12007_v59  ;;  %v4483_v57 = vshll.u32 %v11910_v1, 16  ;;  %v3546_v1 = vpop.f32.mrf.mxu0 }
 0x293   : > { %v4089_v19 = vshrl.u32 %v8798_v24, 16  ;;  %v4092_v41 = vshll.u32 %v8798_v24, 16  ;;  %v4072_v26 = vshrl.u32 %v8796_v2, 16  ;;  %v4075_v62 = vshll.u32 %v8796_v2, 16  ;;  %v4307_v2 = vld [vmem:[#allocation3 + $0xa8] sm:$0xf] }
 0x294   : > { %14081 = vst [vmem:[#allocation20_spill] sm:$0xff] %v12013_v39  ;;  %v4069_v52 = vor.u32 %v4067_v61, %v4066_v42  ;;  %v4070_v7 = vrot.slane %v4066_v42, 4  ;;  %9426 = vmatprep.mubr.msk.bf16.mxu1 %vm4835_vm3, %v12013_v39  ;;  %v4115_v33 = vshrl.u32 %v8801_v18, 16  ;;  %v4118_v51 = vshll.u32 %v8801_v18, 16  ;;  %v4340_v42 = vld [vmem:[#allocation3 + $0x48] sm:$0xf] }
 0x295   : > { %v4091_v53 = vrot.slane %v4089_v19, 7  ;;  %v4074_v63 = vrot.slane %v4072_v26, 7  ;;  %v4481_v17 = vrot.slane %v4480_v11, 4  ;;  %v4485_v4 = vrot.slane %v4483_v57, 5  ;;  %v12032_v19 = vld [vmem:[#allocation3 + $0x4c] sm:$0xf] }
 0x296   : > { %v4287_v34 = vsel %vm11783_vm7, %v4069_v52, %v4286_v10  ;;  %v12024_v56 = vrot.slane %v4115_v33, 7  ;;  %v4489_v29 = vrot.slane %v4487_v16, 4  ;;  %v4493_v14 = vshll.u32 %v12018_v6, 16 }
 0x297   : > { %4288 = vst [vmem:[#allocation3 + $0x84] sm:$0xf] %v4287_v34  ;;  %v4094_v61 = vor.u32 %v4092_v41, %v4091_v53  ;;  %v4096_v5 = vrot.slane %v4091_v53, 4  ;;  %v4077_v55 = vor.u32 %v4075_v62, %v4074_v63  ;;  %v4079_v24 = vrot.slane %v4074_v63, 4  ;;  %v12054_v63 = vld [vmem:[#allocation3 + $0x38] sm:$0x1] }
 0x298   : > { %v4120_v11 = vor.u32 %v4118_v51, %v12024_v56  ;;  %v4121_v18 = vrot.slane %v12024_v56, 4  ;;  %v4535_v10 = vshrl.u32 %v11995_v20, 16  ;;  %v4490_v57 = vor.u32 %v4489_v29, %v4485_v4 }
 0x299   : > { %v4095_v16 = vsel %vm10080_vm13, %v4087_v46, %v4094_v61  ;;  %v4298_v41 = vsel %vm11267_vm1, %v4096_v5, %v4297_v15  ;;  %v4078_v26 = vsel %vm10080_vm13, %v4070_v7, %v4077_v55  ;;  %v4291_v62 = vsel %vm11267_vm1, %v4079_v24, %v4290_v44  ;;  %v9418_v61 = vpop.f32.mrf.mxu0 }
 0x29a   : > { %4296 = vst.msk [vmem:[#allocation3 + $0x94] sm:$0xf] %vm3693_vm6, %v4095_v16  ;;  %4299 = vst [vmem:[#allocation3 + $0x98] sm:$0x1] %v4298_v41  ;;  %v4308_v50 = vsel %vm11783_vm7, %v4120_v11, %v4307_v2  ;;  %v4491_v52 = vrot.slane %v4490_v57, 4  ;;  %v4495_v46 = vrot.slane %v4493_v14, 5  ;;  %v4486_v51 = vsel %vm10095_vm15, %v4481_v17, %v4485_v4 }
 0x29b   : > { %4289 = vst.msk [vmem:[#allocation3 + $0x88] sm:$0xf] %vm3693_vm6, %v4078_v26  ;;  %4292 = vst [vmem:[#allocation3 + $0x8c] sm:$0x1] %v4291_v62  ;;  %v4546_v33 = vshrl.u32 %v4340_v42, 16  ;;  %v4549_v7 = vshll.u32 %v4340_v42, 16  ;;  %v12051_v53 = vcombine.low %v4340_v42, %v12032_v19  ;;  %v3598_v15 = vadd.f32 %v3543_v0, %v11759_v35 }
 0x29c   : > { %4309 = vst [vmem:[#allocation3 + $0xa8] sm:$0xf] %v4308_v50  ;;  %v4496_v34 = vsel %vm10095_vm15, %v4491_v52, %v4495_v46  ;;  %v4559_v44 = vshrl.u32 %v12032_v19, 16  ;;  %v4504_v29 = vor.u32 %v11990_v21, %v11970_v13  ;;  %v4507_v14 = vshll.u32 %v11946_v25, 16  ;;  %v4342_v17 = vld [vmem:[#allocation3 + $0x54] sm:$0xf] }
 0x29d   : > { %v12062_v4 = vcombine.low %v4486_v51, %v4496_v34  ;;  %v12064_v5 = vrot.slane %v4546_v33, 4  ;;  %9468 = vmatprep.mubr.msk.bf16.mxu0 %vm4835_vm3, %v12051_v53  ;;  %v3637_v35 = vadd.f32 %v11688_v54, %v3598_v15  ;;  %v4513_v0 = vrot.slane %v4511_v49, 4  ;;  %v12082_v62 = vld [vmem:[#allocation3 + $0x58] sm:$0xf] }
 0x29e   : > { %v4505_v55 = vrot.slane %v4504_v29, 4  ;;  %v4509_v24 = vrot.slane %v4507_v14, 5  ;;  %v4517_v13 = vshll.u32 %v12054_v63, 16  ;;  %v3601_v21 = vadd.f32 %v9415_v8, %v11763_v47 }
 0x29f   : > { %14082 = vst [vmem:[#allocation9_spill] sm:$0xff] %v12062_v4  ;;  %9427 = vmatmul.mubr.msk.bf16.gmra.mxu1 %vm4835_vm3, %v12062_v4  ;;  %v3669_v2 = vmax.f32 %v3637_v35, 0.0  ;;  %v3599_v42 = vadd.f32 %v3546_v1, %v11766_v12  ;;  %v3604_v11 = vadd.f32 %v9418_v61, %v11769_v36  ;;  %v4570_v57 = vshrl.u32 %v4342_v17, 16 }
 0x2a0   : > { %v12077_v16 = vrot.slane %v4549_v7, 5  ;;  %v4510_v49 = vsel %vm10095_vm15, %v4505_v55, %v4509_v24  ;;  %v4514_v41 = vor.u32 %v4513_v0, %v4509_v24  ;;  %v3640_v26 = vadd.f32 %v11688_v54, %v3601_v21  ;;  %v4300_v24 = vld [vmem:[#allocation3 + $0x9c] sm:$0xf] }
 0x2a1   : > { %v8799_v47 = vpack.c.bf16 %v3669_v2, %v3669_v2  ;;  %v4519_v8 = vrot.slane %v4517_v13, 5  ;;  %v3638_v50 = vadd.f32 %v11688_v54, %v3599_v42  ;;  %v3643_v52 = vadd.f32 %v11688_v54, %v3604_v11 }
 0x2a2   : > { %v4515_v12 = vrot.slane %v4514_v41, 4  ;;  %v3672_v1 = vmax.f32 %v3640_v26, 0.0  ;;  %v12086_v36 = vrot.slane %v4570_v57, 4  ;;  %v4573_v46 = vshll.u32 %v4342_v17, 16  ;;  %v12105_v41 = vld [vmem:[#allocation3 + $0x44] sm:$0x1]  ;;  %v3559_v26 = vpop.f32.mrf.mxu0 }
 0x2a3   : > { %v4098_v33 = vshrl.u32 %v8799_v47, 16  ;;  %v3670_v51 = vmax.f32 %v3638_v50, 0.0  ;;  %v3675_v7 = vmax.f32 %v3643_v52, 0.0  ;;  %v4583_v15 = vshrl.u32 %v12082_v62, 16 }
 0x2a4   : > { %v4101_v34 = vshll.u32 %v8799_v47, 16  ;;  %v4520_v29 = vsel %vm10095_vm15, %v4515_v12, %v4519_v8  ;;  %v8802_v14 = vpack.c.bf16 %v3672_v1, %v3672_v1  ;;  %v12092_v61 = vcombine.low %v4342_v17, %v12082_v62 }
 0x2a5   : > { %v4100_v35 = vrot.slane %v4098_v33, 7  ;;  %v12094_v54 = vcombine.low %v4510_v49, %v4520_v29  ;;  %v8800_v0 = vpack.c.bf16 %v3670_v51, %v3670_v51  ;;  %v8805_v55 = vpack.c.bf16 %v3675_v7, %v3675_v7  ;;  %v4304_v7 = vld [vmem:[#allocation3 + $0xa4] sm:$0x1] }
 0x2a6   : > { %v4123_v13 = vshrl.u32 %v8802_v14, 16  ;;  %v12096_v21 = vrot.slane %v4573_v46, 5  ;;  %9469 = vmatmul.mubr.msk.bf16.gmra.mxu0 %vm4835_vm3, %v12092_v61  ;;  %v4528_v2 = vor.u32 %v12004_v9, %v12002_v40  ;;  %v4531_v42 = vshll.u32 %v11995_v20, 16  ;;  %v4311_v40 = vld [vmem:[#allocation3 + $0xb0] sm:$0x1] }
 0x2a7   : > { %14083 = vst [vmem:[#allocation27_spill] sm:$0xff] %v12094_v54  ;;  %v4103_v11 = vor.u32 %v4101_v34, %v4100_v35  ;;  %9430 = vmatprep.mubr.msk.bf16.mxu1 %vm4835_vm3, %v12094_v54  ;;  %v4126_v17 = vshll.u32 %v8802_v14, 16  ;;  %v4106_v57 = vshrl.u32 %v8800_v0, 16  ;;  %v4109_v49 = vshll.u32 %v8800_v0, 16 }
 0x2a8   : > { %v4125_v47 = vrot.slane %v4123_v13, 7  ;;  %v4149_v8 = vshrl.u32 %v8805_v55, 16  ;;  %v4152_v50 = vshll.u32 %v8805_v55, 16  ;;  %v4529_v52 = vrot.slane %v4528_v2, 4  ;;  %v4321_v13 = vld [vmem:[#allocation3 + $0xc0] sm:$0xf] }
 0x2a9   : > { %v4301_v12 = vsel %vm11783_vm7, %v4103_v11, %v4300_v24  ;;  %v4108_v9 = vrot.slane %v4106_v57, 7  ;;  %v4533_v1 = vrot.slane %v4531_v42, 5  ;;  %v4537_v46 = vrot.slane %v4535_v10, 4  ;;  %v4344_v24 = vld [vmem:[#allocation3 + $0x60] sm:$0xf]  ;;  %v9419_v11 = vpop.f32.mrf.mxu0 }
 0x2aa   : > { %4302 = vst [vmem:[#allocation3 + $0x9c] sm:$0xf] %v4301_v12  ;;  %v4128_v33 = vor.u32 %v4126_v17, %v4125_v47  ;;  %v4130_v51 = vrot.slane %v4125_v47, 4  ;;  %v12111_v34 = vrot.slane %v4149_v8, 7  ;;  %v4541_v29 = vshll.u32 %v12105_v41, 16 }
 0x2ab   : > { %v4104_v14 = vrot.slane %v4100_v35, 4  ;;  %v4111_v0 = vor.u32 %v4109_v49, %v4108_v9  ;;  %v4113_v55 = vrot.slane %v4108_v9, 4  ;;  %v4538_v2 = vor.u32 %v4537_v46, %v4533_v1  ;;  %v12123_v35 = vld [vmem:[#allocation3 + $0x64] sm:$0xf] }
 0x2ac   : > { %v4129_v10 = vsel %vm10080_vm13, %v4121_v18, %v4128_v33  ;;  %v4312_v42 = vsel %vm11267_vm1, %v4130_v51, %v4311_v40  ;;  %v4154_v17 = vor.u32 %v4152_v50, %v12111_v34  ;;  %v4534_v57 = vsel %vm10095_vm15, %v4529_v52, %v4533_v1  ;;  %v12134_v40 = vld [vmem:[#allocation3 + $0x50] sm:$0x1]  ;;  %v3562_v51 = vpop.f32.mrf.mxu0 }
 0x2ad   : > { %4310 = vst.msk [vmem:[#allocation3 + $0xac] sm:$0xf] %vm3693_vm6, %v4129_v10  ;;  %4313 = vst [vmem:[#allocation3 + $0xb0] sm:$0x1] %v4312_v42  ;;  %v4112_v49 = vsel %vm10080_vm13, %v4104_v14, %v4111_v0  ;;  %v4305_v56 = vsel %vm11267_vm1, %v4113_v55, %v4304_v7  ;;  %v4539_v18 = vrot.slane %v4538_v2, 4  ;;  %v4543_v47 = vrot.slane %v4541_v29, 5 }
 0x2ae   : > { %4303 = vst.msk [vmem:[#allocation3 + $0xa0] sm:$0xf] %vm3693_vm6, %v4112_v49  ;;  %4306 = vst [vmem:[#allocation3 + $0xa4] sm:$0x1] %v4305_v56  ;;  %v4322_v50 = vsel %vm11783_vm7, %v4154_v17, %v4321_v13  ;;  %v4594_v52 = vshrl.u32 %v4344_v24, 16  ;;  %v4597_v12 = vshll.u32 %v4344_v24, 16  ;;  %v12139_v1 = vcombine.low %v4344_v24, %v12123_v35 }
 0x2af   : > { %4323 = vst [vmem:[#allocation3 + $0xc0] sm:$0xf] %v4322_v50  ;;  %v4544_v9 = vsel %vm10095_vm15, %v4539_v18, %v4543_v47  ;;  %v3602_v46 = vadd.f32 %v3559_v26, %v11772_v58  ;;  %v4552_v33 = vor.u32 %v12077_v16, %v12064_v5  ;;  %v4346_v7 = vld [vmem:[#allocation3 + $0x6c] sm:$0xf]  ;;  %v4555_v55 = vshll.u32 %v12032_v19, 16 }
 0x2b0   : > { %v12144_v29 = vcombine.low %v4534_v57, %v4544_v9  ;;  %v12146_v14 = vrot.slane %v4594_v52, 4  ;;  %9472 = vmatprep.mubr.msk.bf16.mxu0 %vm4835_vm3, %v12139_v1  ;;  %v9835_v58 = vld [vmem:[%s13773_s2] ss:$0 sm:$0xff]  ;;  %v4561_v5 = vrot.slane %v4559_v44, 4  ;;  %v4565_v16 = vshll.u32 %v12134_v40, 16 }
 0x2b1   : > { %v3641_v26 = vadd.f32 %v9835_v58, %v3602_v46  ;;  %v4553_v13 = vrot.slane %v4552_v33, 4  ;;  %v12158_v2 = vld [vmem:[#allocation3 + $0x70] sm:$0xf]  ;;  %v4557_v24 = vrot.slane %v4555_v55, 5  ;;  %v3605_v10 = vadd.f32 %v9419_v11, %v11778_v23 }
 0x2b2   : > { %14084 = vst [vmem:[#allocation10_spill] sm:$0xff] %v12144_v29  ;;  %9431 = vmatmul.mubr.msk.bf16.gmra.mxu1 %vm4835_vm3, %v12144_v29  ;;  %v3603_v42 = vadd.f32 %v3562_v51, %v11859_v30  ;;  %v4618_v17 = vshrl.u32 %v4346_v7, 16  ;;  %v12164_v57 = vrot.slane %v4597_v12, 5  ;;  %v4567_v56 = vrot.slane %v4565_v16, 5  ;;  %v12174_v51 = vld [vmem:[#allocation3 + $0x5c] sm:$0x1] }
 0x2b3   : > { %v3673_v49 = vmax.f32 %v3641_v26, 0.0  ;;  %v4621_v18 = vshll.u32 %v4346_v7, 16  ;;  %v4562_v47 = vor.u32 %v4561_v5, %v4557_v24  ;;  %v3644_v44 = vadd.f32 %v9835_v58, %v3605_v10 }
 0x2b4   : > { %v3642_v50 = vadd.f32 %v9835_v58, %v3603_v42  ;;  %v4558_v46 = vsel %vm10095_vm15, %v4553_v13, %v4557_v24  ;;  %v12169_v33 = vrot.slane %v4618_v17, 4  ;;  %v12172_v23 = vcombine.low %v4346_v7, %v12158_v2 }
 0x2b5   : > { %v8803_v9 = vpack.c.bf16 %v3673_v49, %v3673_v49  ;;  %v4563_v30 = vrot.slane %v4562_v47, 4  ;;  %v3676_v11 = vmax.f32 %v3644_v44, 0.0  ;;  %v4576_v55 = vor.u32 %v12096_v21, %v12086_v36  ;;  %v4348_v49 = vld [vmem:[#allocation3 + $0x78] sm:$0xf]  ;;  %v4314_v47 = vld [vmem:[#allocation3 + $0xb4] sm:$0xf] }
 0x2b6   : > { %v3674_v12 = vmax.f32 %v3642_v50, 0.0  ;;  %9473 = vmatmul.mubr.msk.bf16.gmra.mxu0 %vm4835_vm3, %v12172_v23  ;;  %v4579_v13 = vshll.u32 %v12082_v62, 16  ;;  %v4585_v5 = vrot.slane %v4583_v15, 4  ;;  %v4589_v21 = vshll.u32 %v12174_v51, 16  ;;  %v12260_v29 = vld [vmem:[#allocation3 + $0xa0] sm:$0xf] }
 0x2b7   : > { %v4132_v58 = vshrl.u32 %v8803_v9, 16  ;;  %v4135_v26 = vshll.u32 %v8803_v9, 16  ;;  %v4568_v7 = vsel %vm10095_vm15, %v4563_v30, %v4567_v56  ;;  %v8806_v16 = vpack.c.bf16 %v3676_v11, %v3676_v11  ;;  %v4325_v56 = vld [vmem:[#allocation3 + $0xc8] sm:$0x1] }
 0x2b8   : > { %v8804_v24 = vpack.c.bf16 %v3674_v12, %v3674_v12  ;;  %v4577_v10 = vrot.slane %v4576_v55, 4  ;;  %v12185_v17 = vcombine.low %v4558_v46, %v4568_v7  ;;  %v4581_v36 = vrot.slane %v4579_v13, 5 }
 0x2b9   : > { %v4134_v42 = vrot.slane %v4132_v58, 7  ;;  %v4157_v44 = vshrl.u32 %v8806_v16, 16  ;;  %v4160_v50 = vshll.u32 %v8806_v16, 16  ;;  %v4623_v52 = vrot.slane %v4621_v18, 5  ;;  %v12192_v58 = vld [vmem:[#allocation3 + $0x7c] sm:$0xf] }
 0x2ba   : > { %14085 = vst [vmem:[#allocation13_spill] sm:$0xff] %v12185_v17  ;;  %v4140_v9 = vshrl.u32 %v8804_v24, 16  ;;  %9434 = vmatprep.mubr.msk.bf16.mxu1 %vm4835_vm3, %v12185_v17  ;;  %v4143_v30 = vshll.u32 %v8804_v24, 16  ;;  %v4586_v11 = vor.u32 %v4585_v5, %v4581_v36  ;;  %v4582_v55 = vsel %vm10095_vm15, %v4577_v10, %v4581_v36  ;;  %v4318_v18 = vld [vmem:[#allocation3 + $0xbc] sm:$0x1] }
 0x2bb   : > { %v4137_v0 = vor.u32 %v4135_v26, %v4134_v42  ;;  %v4138_v15 = vrot.slane %v4134_v42, 4  ;;  %v4159_v12 = vrot.slane %v4157_v44, 7  ;;  %v4642_v13 = vshrl.u32 %v4348_v49, 16 }
 0x2bc   : > { %v4142_v46 = vrot.slane %v4140_v9, 7  ;;  %v4587_v26 = vrot.slane %v4586_v11, 4  ;;  %v4591_v16 = vrot.slane %v4589_v21, 5  ;;  %v4645_v42 = vshll.u32 %v4348_v49, 16 }
 0x2bd   : > { %v4315_v7 = vsel %vm11783_vm7, %v4137_v0, %v4314_v47  ;;  %v4162_v8 = vor.u32 %v4160_v50, %v4159_v12  ;;  %v4164_v17 = vrot.slane %v4159_v12, 4  ;;  %v4644_v9 = vrot.slane %v4642_v13, 4  ;;  %v4350_v0 = vld [vmem:[#allocation3 + $0x84] sm:$0xf]  ;;  %v12214_v12 = vld [vmem:[#allocation3 + $0x88] sm:$0xf] }
 0x2be   : > { %4316 = vst [vmem:[#allocation3 + $0xb4] sm:$0xf] %v4315_v7  ;;  %v4145_v24 = vor.u32 %v4143_v30, %v4142_v46  ;;  %v4147_v5 = vrot.slane %v4142_v46, 4  ;;  %v4592_v44 = vsel %vm10095_vm15, %v4587_v26, %v4591_v16  ;;  %v4655_v10 = vshrl.u32 %v12192_v58, 16  ;;  %v12233_v26 = vld [vmem:[#allocation3 + $0x74] sm:$0x1] }
 0x2bf   : > { %v12200_v36 = vcombine.low %v4348_v49, %v12192_v58  ;;  %v14086_v21 = vrot.slane %v12111_v34, 4  ;;  %v4326_v50 = vsel %vm11267_vm1, %v4164_v17, %v4325_v56  ;;  %v12218_v34 = vcombine.low %v4582_v55, %v4592_v44  ;;  %v12238_v44 = vld [vmem:[#allocation3 + $0x94] sm:$0xf] }
 0x2c0   : > { %v4146_v30 = vsel %vm10080_vm13, %v4138_v15, %v4145_v24  ;;  %v4319_v11 = vsel %vm11267_vm1, %v4147_v5, %v4318_v18  ;;  %4327 = vst [vmem:[#allocation3 + $0xc8] sm:$0x1] %v4326_v50  ;;  %v4600_v3 = vor.u32 %v12164_v57, %v12146_v14  ;;  %v14088_v17 = vshrl.u32 %v12123_v35, 16  ;;  %v4352_v57 = vld [vmem:[#allocation3 + $0x90] sm:$0xf]  ;;  %14089 = vst [vmem:[#allocation12_spill] sm:$0xff] %v12238_v44 }
 0x2c1   : > { %v4163_v47 = vsel %vm10080_vm13, %v14086_v21, %v4162_v8  ;;  %4317 = vst.msk [vmem:[#allocation3 + $0xb8] sm:$0xf] %vm3693_vm6, %v4146_v30  ;;  %4320 = vst [vmem:[#allocation3 + $0xbc] sm:$0x1] %v4319_v11  ;;  %9476 = vmatprep.mubr.msk.bf16.mxu0 %vm4835_vm3, %v12200_v36  ;;  %v4603_v8 = vshll.u32 %v12123_v35, 16  ;;  %v4647_v15 = vrot.slane %v4645_v42, 5  ;;  %9435 = vmatmul.mubr.msk.bf16.gmra.mxu1 %vm4835_vm3, %v12218_v34 }
 0x2c2   : > { %4324 = vst.msk [vmem:[#allocation3 + $0xc4] sm:$0xf] %vm3693_vm6, %v4163_v47  ;;  %14087 = vst [vmem:[#allocation11_spill] sm:$0xff] %v12218_v34  ;;  %v4609_v49 = vrot.slane %v14088_v17, 4  ;;  %v4613_v56 = vshll.u32 %v12202_v22, 16  ;;  %v4666_v46 = vshrl.u32 %v4350_v0, 16  ;;  %v12231_v18 = vcombine.low %v4350_v0, %v12214_v12 }
 0x2c3   : > { %v4669_v13 = vshll.u32 %v4350_v0, 16  ;;  %v4601_v55 = vrot.slane %v4600_v3, 4  ;;  %v4605_v7 = vrot.slane %v4603_v8, 5  ;;  %v4624_v14 = vor.u32 %v4623_v52, %v12169_v33 }
 0x2c4   : > { %v4615_v16 = vrot.slane %v4613_v56, 5  ;;  %v4668_v24 = vrot.slane %v4666_v46, 4  ;;  %v4679_v42 = vshrl.u32 %v12214_v12, 16  ;;  %v4627_v5 = vshll.u32 %v12158_v2, 16  ;;  %9477 = vmatmul.mubr.msk.bf16.gmra.mxu0 %vm4835_vm3, %v12231_v18 }
 0x2c5   : > { %v4610_v21 = vor.u32 %v4609_v49, %v4605_v7  ;;  %v4671_v47 = vrot.slane %v4669_v13, 5  ;;  %v4625_v0 = vrot.slane %v4624_v14, 4  ;;  %v14090_v50 = vshrl.u32 %v12158_v2, 16  ;;  %v12250_v49 = vld [vmem:[#allocation3 + $0x80] sm:$0x1] }
 0x2c6   : > { %v4606_v52 = vsel %vm10095_vm15, %v4601_v55, %v4605_v7  ;;  %v4629_v33 = vrot.slane %v4627_v5, 5  ;;  %v4637_v11 = vshll.u32 %v12233_v26, 16  ;;  %v4690_v3 = vshrl.u32 %v4352_v57, 16  ;;  %v4354_v55 = vld [vmem:[#allocation3 + $0x9c] sm:$0xf] }
 0x2c7   : > { %v4633_v30 = vrot.slane %v14090_v50, 4  ;;  %v4611_v8 = vrot.slane %v4610_v21, 4  ;;  %v4693_v17 = vshll.u32 %v4352_v57, 16  ;;  %v12248_v56 = vcombine.low %v4352_v57, %v12238_v44 }
 0x2c8   : > { %v4648_v46 = vor.u32 %v4647_v15, %v4644_v9  ;;  %v4630_v13 = vsel %vm10095_vm15, %v4625_v0, %v4629_v33  ;;  %v4639_v50 = vrot.slane %v4637_v11, 5  ;;  %v4703_v34 = vshrl.u32 %v12238_v44, 16 }
 0x2c9   : > { %v4634_v14 = vor.u32 %v4633_v30, %v4629_v33  ;;  %v4616_v7 = vsel %vm10095_vm15, %v4611_v8, %v4615_v16  ;;  %v4692_v5 = vrot.slane %v4690_v3, 4  ;;  %9480 = vmatprep.mubr.msk.bf16.mxu0 %vm4835_vm3, %v12248_v56  ;;  %v4651_v21 = vshll.u32 %v12192_v58, 16 }
 0x2ca   : > { %v4649_v57 = vrot.slane %v4648_v46, 4  ;;  %v12262_v9 = vcombine.low %v4606_v52, %v4616_v7  ;;  %v4657_v0 = vrot.slane %v4655_v10, 4  ;;  %v4661_v30 = vshll.u32 %v12250_v49, 16  ;;  %v12273_v52 = vld [vmem:[#allocation3 + $0x8c] sm:$0x1] }
 0x2cb   : > { %v4635_v15 = vrot.slane %v4634_v14, 4  ;;  %v4695_v33 = vrot.slane %v4693_v17, 5  ;;  %v4653_v11 = vrot.slane %v4651_v21, 5  ;;  %v4714_v54 = vshrl.u32 %v4354_v55, 16  ;;  %v4356_v46 = vld [vmem:[#allocation3 + $0xa8] sm:$0xf] }
 0x2cc   : > { %14091 = vst [vmem:[#allocation14_spill] sm:$0xff] %v12262_v9  ;;  %v4717_v4 = vshll.u32 %v4354_v55, 16  ;;  %9438 = vmatprep.mubr.msk.bf16.mxu1 %vm4835_vm3, %v12262_v9  ;;  %v4727_v3 = vshrl.u32 %v12260_v29, 16  ;;  %v12271_v8 = vcombine.low %v4354_v55, %v12260_v29  ;;  %v4672_v10 = vor.u32 %v4671_v47, %v4668_v24  ;;  %v12279_v9 = vld [vmem:[#allocation3 + $0xac] sm:$0xf] }
 0x2cd   : > { %v4640_v16 = vsel %vm10095_vm15, %v4635_v15, %v4639_v50  ;;  %v4654_v17 = vsel %vm10095_vm15, %v4649_v57, %v4653_v11  ;;  %v4658_v7 = vor.u32 %v4657_v0, %v4653_v11  ;;  %v4663_v21 = vrot.slane %v4661_v30, 5 }
 0x2ce   : > { %14092 = vst [vmem:[#allocation32_spill] sm:$0xff] %v12271_v8  ;;  %v12275_v14 = vcombine.low %v4630_v13, %v4640_v16  ;;  %v4716_v39 = vrot.slane %v4714_v54, 4  ;;  %9481 = vmatmul.mubr.msk.bf16.gmra.mxu0 %vm4835_vm3, %v12271_v8  ;;  %v4673_v50 = vrot.slane %v4672_v10, 4  ;;  %v4675_v55 = vshll.u32 %v12214_v12, 16  ;;  %v12290_v54 = vld [vmem:[#allocation3 + $0x98] sm:$0x1] }
 0x2cf   : > { %v4681_v15 = vrot.slane %v4679_v42, 4  ;;  %v4659_v24 = vrot.slane %v4658_v7, 4  ;;  %v4685_v47 = vshll.u32 %v12273_v52, 16  ;;  %v4738_v13 = vshrl.u32 %v4356_v46, 16  ;;  %14095 = vst [vmem:[#allocation25_spill] sm:$0xff] %v12290_v54 }
 0x2d0   : > { %14093 = vst [vmem:[#allocation45_spill] sm:$0xff] %v12275_v14  ;;  %9439 = vmatmul.mubr.msk.bf16.gmra.mxu1 %vm4835_vm3, %v12275_v14  ;;  %v4741_v57 = vshll.u32 %v4356_v46, 16  ;;  %v4719_v0 = vrot.slane %v4717_v4, 5  ;;  %v4677_v30 = vrot.slane %v4675_v55, 5  ;;  %v12288_v11 = vcombine.low %v4356_v46, %v12279_v9  ;;  %v4358_v10 = vld [vmem:[#allocation3 + $0xb4] sm:$0xf] }
 0x2d1   : > { %v4696_v16 = vor.u32 %v4695_v33, %v4692_v5  ;;  %v4664_v42 = vsel %vm10095_vm15, %v4659_v24, %v4663_v21  ;;  %v4687_v38 = vrot.slane %v4685_v47, 5  ;;  %v4740_v27 = vrot.slane %v4738_v13, 4  ;;  %v12295_v14 = vld [vmem:[#allocation3 + $0xb8] sm:$0xf] }
 0x2d2   : > { %14094 = vst [vmem:[#allocation15_spill] sm:$0xff] %v12288_v11  ;;  %v4751_v7 = vshrl.u32 %v12279_v9, 16  ;;  %v12297_v37 = vcombine.low %v4654_v17, %v4664_v42  ;;  %v4678_v4 = vsel %vm10095_vm15, %v4673_v50, %v4677_v30  ;;  %v4682_v46 = vor.u32 %v4681_v15, %v4677_v30  ;;  %9484 = vmatprep.mubr.msk.bf16.mxu0 %vm4835_vm3, %v12288_v11  ;;  %v12311_v30 = vld [vmem:[#allocation3 + $0xa4] sm:$0x1] }
 0x2d3   : > { %v4743_v55 = vrot.slane %v4741_v57, 5  ;;  %v4699_v5 = vshll.u32 %v12238_v44, 16  ;;  %v4705_v33 = vrot.slane %v4703_v34, 4  ;;  %v4709_v21 = vshll.u32 %v12290_v54, 16 }
 0x2d4   : > { %14096 = vst [vmem:[#allocation16_spill] sm:$0xff] %v12297_v37  ;;  %v4762_v24 = vshrl.u32 %v4358_v10, 16  ;;  %9442 = vmatprep.mubr.msk.bf16.mxu1 %vm4835_vm3, %v12297_v37  ;;  %v4683_v47 = vrot.slane %v4682_v46, 4  ;;  %v4697_v17 = vrot.slane %v4696_v16, 4  ;;  %v4765_v13 = vshll.u32 %v4358_v10, 16 }
 0x2d5   : > { %v12308_v42 = vcombine.low %v4358_v10, %v12295_v14  ;;  %v4701_v50 = vrot.slane %v4699_v5, 5  ;;  %v4711_v15 = vrot.slane %v4709_v21, 5  ;;  %v4775_v57 = vshrl.u32 %v12295_v14, 16  ;;  %v12318_v37 = vld [vmem:[#allocation3 + $0xb0] sm:$0x1] }
 0x2d6   : > { %v4720_v11 = vor.u32 %v4719_v0, %v4716_v39  ;;  %v4688_v34 = vsel %vm10095_vm15, %v4683_v47, %v4687_v38  ;;  %v4764_v54 = vrot.slane %v4762_v24, 4  ;;  %v4723_v16 = vshll.u32 %v12260_v29, 16 }
 0x2d7   : > { %14097 = vst [vmem:[#allocation34_spill] sm:$0xff] %v12308_v42  ;;  %9485 = vmatmul.mubr.msk.bf16.gmra.mxu0 %vm4835_vm3, %v12308_v42  ;;  %v4729_v46 = vrot.slane %v4727_v3, 4  ;;  %v12320_v10 = vcombine.low %v4678_v4, %v4688_v34  ;;  %v4706_v5 = vor.u32 %v4705_v33, %v4701_v50  ;;  %v4767_v21 = vrot.slane %v4765_v13, 5  ;;  %v12329_v3 = vld [vmem:[%s13774_s3 + $0x14] sm:$0xf] }
 0x2d8   : > { %v4721_v44 = vrot.slane %v4720_v11, 4  ;;  %9524 = vmatprep.mubr.msk.bf16.mxu0 %vm4835_vm3, %v11870_v45  ;;  %v4725_v39 = vrot.slane %v4723_v16, 5  ;;  %v4733_v38 = vshll.u32 %v12311_v30, 16  ;;  %v4744_v0 = vor.u32 %v4743_v55, %v4740_v27  ;;  %v9836_v45 = vld [vmem:[%s13774_s3 + $0xc] sm:$0xf] }
 0x2d9   : > { %14098 = vst [vmem:[#allocation17_spill] sm:$0xff] %v12320_v10  ;;  %v4747_v24 = vshll.u32 %v12279_v9, 16  ;;  %9443 = vmatmul.mubr.msk.bf16.gmra.mxu1 %vm4835_vm3, %v12320_v10  ;;  %v4707_v4 = vrot.slane %v4706_v5, 4  ;;  %v4753_v33 = vrot.slane %v4751_v7, 4  ;;  %v4757_v11 = vshll.u32 %v12318_v37, 16 }
 0x2da   : > { %v5790_v27 = vsel %vm4884_vm0, %v9836_v45, 0  ;;  %v4702_v55 = vsel %vm10095_vm15, %v4697_v17, %v4701_v50  ;;  %v4730_v47 = vor.u32 %v4729_v46, %v4725_v39  ;;  %v4735_v34 = vrot.slane %v4733_v38, 5  ;;  %v12342_v5 = vld [vmem:[#allocation3 + $0xbc] sm:$0x1]  ;;  %v4382_v17 = vld [vmem:[#allocation3] sm:$0xe] }
 0x2db   : > { %9523 = vmatpush3.bf16.msra.mxu0 %v5790_v27  ;;  %v4712_v13 = vsel %vm10095_vm15, %v4707_v4, %v4711_v15  ;;  %v4749_v16 = vrot.slane %v4747_v24, 5  ;;  %v4768_v7 = vor.u32 %v4767_v21, %v4764_v54  ;;  %v4771_v45 = vshll.u32 %v12295_v14, 16 }
 0x2dc   : > { %9740 = vmatprep.subr.msk.bf16.mxu0 %vm4884_vm0, %v12329_v3  ;;  %v12346_v10 = vcombine.low %v4702_v55, %v4712_v13  ;;  %v4731_v42 = vrot.slane %v4730_v47, 4  ;;  %v4777_v8 = vrot.slane %v4775_v57, 4  ;;  %v4726_v50 = vsel %vm10095_vm15, %v4721_v44, %v4725_v39  ;;  %v9837_v57 = vld [vmem:[#allocation3 + $0x4] sm:$0xf] }
 0x2dd   : > { %v4745_v46 = vrot.slane %v4744_v0, 4  ;;  %v4754_v15 = vor.u32 %v4753_v33, %v4749_v16  ;;  %v4759_v38 = vrot.slane %v4757_v11, 5  ;;  %v4773_v21 = vrot.slane %v4771_v45, 5  ;;  %v9838_v0 = vld [vmem:[#allocation3 + $0x8] sm:$0x1] }
 0x2de   : > { %9446 = vmatprep.mubr.msk.bf16.mxu1 %vm4835_vm3, %v12346_v10  ;;  %v4736_v54 = vsel %vm10095_vm15, %v4731_v42, %v4735_v34  ;;  %v4781_v24 = vshll.u32 %v12342_v5, 16  ;;  %v5375_v4 = vrot.slane %v9837_v57, 5  ;;  %v8608_v39 = vrot.slane %v4382_v17, 9  ;;  %v9839_v34 = vld [vmem:[#allocation3 + $0x10] sm:$0xf] }
 0x2df   : > { %9525 = vmatmul.mubr.msk.bf16.vlgmr.msra.gmra.mxu0 %vm4835_vm3, %v11891_v32  ;;  %v12358_v27 = vcombine.low %v4726_v50, %v4736_v54  ;;  %v4755_v44 = vrot.slane %v4754_v15, 4  ;;  %v5378_v33 = vrot.slane %v9838_v0, 5  ;;  %v4769_v11 = vrot.slane %v4768_v7, 4  ;;  %v9841_v0 = vld [vmem:[#allocation3 + $0x28] sm:$0xf] }
 0x2e0   : > { %9528 = vmatprep.mubr.msk.bf16.mxu0 %vm4835_vm3, %v11920_v48  ;;  %v4778_v55 = vor.u32 %v4777_v8, %v4773_v21  ;;  %v5377_v42 = vrot.slane %v5375_v4, 4  ;;  %v4750_v47 = vsel %vm10095_vm15, %v4745_v46, %v4749_v16  ;;  %v5382_v45 = vrot.slane %v9839_v34, 5 }
 0x2e1   : > { %9447 = vmatmul.mubr.msk.bf16.gmra.mxu1 %vm4835_vm3, %v12358_v27  ;;  %v4760_v13 = vsel %vm10095_vm15, %v4755_v44, %v4759_v38  ;;  %v4783_v17 = vrot.slane %v4781_v24, 5  ;;  %v5376_v7 = vsel %vm10555_vm10, %v8608_v39, %v5375_v4  ;;  %v4774_v16 = vsel %vm10095_vm15, %v4769_v11, %v4773_v21  ;;  %v9840_v38 = vld [vmem:[#allocation3 + $0x1c] sm:$0xf]  ;;  %v4383_v39 = vld [vmem:[#allocation3 + $0xc] sm:$0xe] }
 0x2e2   : > { %v12368_v50 = vcombine.low %v4750_v47, %v4760_v13  ;;  %v4779_v15 = vrot.slane %v4778_v55, 4  ;;  %v5379_v8 = vsel %vm10555_vm10, %v5377_v42, %v5378_v33  ;;  %v5389_v57 = vrot.slane %v9840_v38, 5  ;;  %v9842_v33 = vld [vmem:[#allocation3 + $0x14] sm:$0x1]  ;;  %v4384_v21 = vld [vmem:[#allocation3 + $0x18] sm:$0xe] }
 0x2e3   : > { %v5384_v24 = vrot.slane %v5382_v45, 4  ;;  %v5396_v55 = vrot.slane %v9841_v0, 5  ;;  %v8625_v4 = vcombine.low %v5376_v7, %v5379_v8  ;;  %v5385_v42 = vrot.slane %v9842_v33, 5  ;;  %v4385_v47 = vld [vmem:[#allocation3 + $0x24] sm:$0xe] }
 0x2e4   : > { %9450 = vmatprep.mubr.msk.bf16.mxu1 %vm4835_vm3, %v12368_v50  ;;  %v4784_v46 = vsel %vm10095_vm15, %v4779_v15, %v4783_v17  ;;  %v5391_v11 = vrot.slane %v5389_v57, 4  ;;  %v8609_v34 = vrot.slane %v4383_v39, 9  ;;  %v5392_v17 = vrot.slane %v11957_v60, 5  ;;  %v4386_v7 = vld [vmem:[#allocation3 + $0x30] sm:$0xe] }
 0x2e5   : > { %v12380_v44 = vcombine.low %v4774_v16, %v4784_v46  ;;  %v5398_v13 = vrot.slane %v5396_v55, 4  ;;  %v5386_v15 = vsel %vm10555_vm10, %v5384_v24, %v5385_v42  ;;  %v8610_v8 = vrot.slane %v4384_v21, 9  ;;  %v12394_v38 = vld [vmem:[#allocation3 + $0x3c] sm:$0xe]  ;;  %v12409_v42 = vld [vmem:[#allocation3 + $0x48] sm:$0xe] }
 0x2e6   : > { %v5399_v16 = vrot.slane %v12018_v6, 5  ;;  %v5403_v46 = vrot.slane %v11946_v25, 5  ;;  %v5383_v0 = vsel %vm10555_vm10, %v8609_v34, %v5382_v45  ;;  %v5393_v39 = vsel %vm10555_vm10, %v5391_v11, %v5392_v17  ;;  %v4390_v34 = vld [vmem:[#allocation3 + $0x60] sm:$0xe]  ;;  %v4391_v17 = vld [vmem:[#allocation3 + $0x6c] sm:$0xe] }
 0x2e7   : > { %9529 = vmatmul.mubr.msk.bf16.gmra.mxu0 %vm4835_vm3, %v11962_v31  ;;  %v8611_v33 = vrot.slane %v4385_v47, 9  ;;  %v5410_v24 = vrot.slane %v11995_v20, 5  ;;  %v12401_v60 = vcombine.low %v5383_v0, %v5386_v15  ;;  %v5390_v6 = vsel %vm10555_vm10, %v8610_v8, %v5389_v57  ;;  %v12435_v0 = vld [vmem:[%s13774_s3 + $0x18] sm:$0xf] }
 0x2e8   : > { %9532 = vmatprep.mubr.msk.bf16.mxu0 %vm4835_vm3, %v12007_v59  ;;  %v5400_v25 = vsel %vm10555_vm10, %v5398_v13, %v5399_v16  ;;  %v8612_v21 = vrot.slane %v4386_v7, 9  ;;  %v5406_v11 = vrot.slane %v12054_v63, 5  ;;  %v8613_v47 = vrot.slane %v12394_v38, 9 }
 0x2e9   : > { %9451 = vmatmul.mubr.msk.bf16.gmra.mxu1 %vm4835_vm3, %v12380_v44  ;;  %v5397_v45 = vsel %vm10555_vm10, %v8611_v33, %v5396_v55  ;;  %v12415_v15 = vcombine.low %v5390_v6, %v5393_v39  ;;  %v5413_v57 = vrot.slane %v12105_v41, 5  ;;  %v5431_v13 = vrot.slane %v12123_v35, 5  ;;  %v4392_v6 = vld [vmem:[#allocation3 + $0x78] sm:$0xe] }
 0x2ea   : > { %9490 = vmatprep.mubr.msk.bf16.mxu1 %vm4835_vm3, %v8625_v4  ;;  %v6018_v4 = vsel %vm4884_vm0, %v11983_v43, 0  ;;  %v5405_v43 = vrot.slane %v5403_v46, 4  ;;  %v12421_v8 = vcombine.low %v5397_v45, %v5400_v25  ;;  %v5404_v63 = vsel %vm10555_vm10, %v8612_v21, %v5403_v46  ;;  %v4393_v45 = vld [vmem:[#allocation3 + $0x84] sm:$0xe] }
 0x2eb   : > { %v5412_v55 = vrot.slane %v5410_v24, 4  ;;  %v5438_v7 = vrot.slane %v12158_v2, 5  ;;  %v8614_v16 = vrot.slane %v12409_v42, 9  ;;  %v8616_v38 = vrot.slane %v4390_v34, 9 }
 0x2ec   : > { %v5433_v41 = vrot.slane %v5431_v13, 4  ;;  %v5434_v35 = vrot.slane %v12202_v22, 5  ;;  %v5417_v46 = vrot.slane %v12032_v19, 5  ;;  %v8617_v39 = vrot.slane %v4391_v17, 9 }
 0x2ed   : > { %v5440_v33 = vrot.slane %v5438_v7, 4  ;;  %v5441_v2 = vrot.slane %v12233_v26, 5  ;;  %v5407_v22 = vsel %vm10555_vm10, %v5405_v43, %v5406_v11  ;;  %v5432_v25 = vsel %vm10555_vm10, %v8616_v38, %v5431_v13  ;;  %v12457_v11 = vld [vmem:[#allocation3 + $0xc0] sm:$0xf] }
 0x2ee   : > { %v5435_v42 = vsel %vm10555_vm10, %v5433_v41, %v5434_v35  ;;  %v5445_v19 = vrot.slane %v12192_v58, 5  ;;  %v5439_v26 = vsel %vm10555_vm10, %v8617_v39, %v5438_v7  ;;  %v5452_v34 = vrot.slane %v12214_v12, 5 }
 0x2ef   : > { %9533 = vmatmul.mubr.msk.bf16.gmra.mxu0 %vm4835_vm3, %v12051_v53  ;;  %v12450_v21 = vcombine.low %v5432_v25, %v5435_v42  ;;  %v8618_v13 = vrot.slane %v4392_v6, 9  ;;  %v5448_v17 = vrot.slane %v12250_v49, 5  ;;  %v5419_v38 = vrot.slane %v5417_v46, 4  ;;  %v4395_v42 = vld [vmem:[#allocation3 + $0x9c] sm:$0xe] }
 0x2f0   : > { %9536 = vmatprep.mubr.msk.bf16.mxu0 %vm4835_vm3, %v12092_v61  ;;  %v5447_v58 = vrot.slane %v5445_v19, 4  ;;  %v8619_v41 = vrot.slane %v4393_v45, 9  ;;  %v5454_v35 = vrot.slane %v5452_v34, 4  ;;  %v5455_v7 = vrot.slane %v12273_v52, 5 }
 0x2f1   : > { %9491 = vmatmul.mubr.msk.bf16.vlgmr.msra.gmra.mxu1 %vm4835_vm3, %v12401_v60  ;;  %v5446_v12 = vsel %vm10555_vm10, %v8618_v13, %v5445_v19  ;;  %v5420_v49 = vrot.slane %v12134_v40, 5  ;;  %v12482_v19 = vcombine.low %v5404_v63, %v5407_v22  ;;  %v5411_v45 = vsel %vm10555_vm10, %v8613_v47, %v5410_v24  ;;  %v12499_v22 = vld [vmem:[#allocation3 + $0xc4] sm:$0xf]  ;;  %v4397_v47 = vld [vmem:[#allocation3 + $0xb4] sm:$0xe] }
 0x2f2   : > { %9557 = vmatpush3.bf16.msra.mxu1 %v6018_v4  ;;  %9494 = vmatprep.mubr.msk.bf16.mxu1 %vm4835_vm3, %v12415_v15  ;;  %v5442_v4 = vsel %vm10555_vm10, %v5440_v33, %v5441_v2  ;;  %v5449_v39 = vsel %vm10555_vm10, %v5447_v58, %v5448_v17  ;;  %v5986_v33 = vshrl.u32 %v12457_v11, 16  ;;  %v5989_v2 = vshll.u32 %v12457_v11, 16 }
 0x2f3   : > { %9741 = vmatprep.subr.msk.bf16.mxu1 %vm4884_vm0, %v12435_v0  ;;  %v12461_v43 = vcombine.low %v5439_v26, %v5442_v4  ;;  %v12476_v6 = vcombine.low %v5446_v12, %v5449_v39  ;;  %v5453_v52 = vsel %vm10555_vm10, %v8619_v41, %v5452_v34  ;;  %v5456_v25 = vsel %vm10555_vm10, %v5454_v35, %v5455_v7  ;;  %v4396_v4 = vld [vmem:[#allocation3 + $0xa8] sm:$0xe] }
 0x2f4   : > { %v5414_v26 = vsel %vm10555_vm10, %v5412_v55, %v5413_v57  ;;  %v12490_v40 = vcombine.low %v5453_v52, %v5456_v25  ;;  %v5418_v34 = vsel %vm10555_vm10, %v8614_v16, %v5417_v46  ;;  %v5421_v63 = vsel %vm10555_vm10, %v5419_v38, %v5420_v49  ;;  %v12508_v16 = vld [vmem:[%s13774_s3 + $0x1c] sm:$0xf] }
 0x2f5   : > { %v5424_v20 = vrot.slane %v12082_v62, 5  ;;  %v5466_v24 = vrot.slane %v12260_v29, 5  ;;  %v5988_v57 = vrot.slane %v5986_v33, 4  ;;  %v5991_v55 = vrot.slane %v5989_v2, 5 }
 0x2f6   : > { %v8621_v13 = vrot.slane %v4395_v42, 9  ;;  %v5473_v58 = vrot.slane %v12279_v9, 5  ;;  %v5469_v62 = vrot.slane %v12311_v30, 5  ;;  %v8622_v17 = vrot.slane %v4396_v4, 9  ;;  %v12539_v42 = vld [vmem:[#allocation3 + $0xc8] sm:$0x1] }
 0x2f7   : > { %9537 = vmatmul.mubr.msk.bf16.gmra.mxu0 %vm4835_vm3, %v12139_v1  ;;  %v5468_v46 = vrot.slane %v5466_v24, 4  ;;  %v6231_v29 = vsel %vm4884_vm0, %v12329_v3, 0  ;;  %v5999_v38 = vshrl.u32 %v12499_v22, 16  ;;  %v5476_v35 = vrot.slane %v12318_v37, 5 }
 0x2f8   : > { %9540 = vmatprep.mubr.msk.bf16.mxu0 %vm4835_vm3, %v12172_v23  ;;  %v5475_v41 = vrot.slane %v5473_v58, 4  ;;  %9591 = vmatpush3.bf16.msra.mxu0 %v6231_v29  ;;  %v5480_v9 = vrot.slane %v12295_v14, 5  ;;  %v5467_v7 = vsel %vm10555_vm10, %v8621_v13, %v5466_v24  ;;  %v5474_v30 = vsel %vm10555_vm10, %v8622_v17, %v5473_v58 }
 0x2f9   : > { %9495 = vmatmul.mubr.msk.bf16.gmra.mxu1 %vm4835_vm3, %v12421_v8  ;;  %v5470_v12 = vsel %vm10555_vm10, %v5468_v46, %v5469_v62  ;;  %v8623_v39 = vrot.slane %v4397_v47, 9  ;;  %9742 = vmatprep.subr.msk.bf16.mxu0 %vm4884_vm0, %v12508_v16  ;;  %v5483_v33 = vrot.slane %v12342_v5, 5  ;;  %v12531_v2 = vcombine.low %v5411_v45, %v5414_v26  ;;  %v4389_v45 = vld [vmem:[#allocation3 + $0x54] sm:$0xe] }
 0x2fa   : > { %9498 = vmatprep.mubr.msk.bf16.mxu1 %vm4835_vm3, %v12482_v19  ;;  %v12526_v37 = vcombine.low %v5467_v7, %v5470_v12  ;;  %v5477_v14 = vsel %vm10555_vm10, %v5475_v41, %v5476_v35  ;;  %v5482_v3 = vrot.slane %v5480_v9, 4  ;;  %v12533_v49 = vcombine.low %v5418_v34, %v5421_v63  ;;  %v14103_v35 = vld [vmem:[#allocation32_spill] sm:$0xff] }
 0x2fb   : > { %v5426_v52 = vrot.slane %v5424_v20, 4  ;;  %v12537_v25 = vcombine.low %v5474_v30, %v5477_v14  ;;  %v5481_v4 = vsel %vm10555_vm10, %v8623_v39, %v5480_v9  ;;  %v5992_v47 = vor.u32 %v5991_v55, %v5988_v57  ;;  %v14105_v30 = vld [vmem:[#allocation15_spill] sm:$0xff]  ;;  %v14106_v39 = vld [vmem:[#allocation34_spill] sm:$0xff] }
 0x2fc   : > { %14100 = vst [vmem:[#allocation37_spill] sm:$0xff] %v12526_v37  ;;  %v5484_v24 = vsel %vm10555_vm10, %v5482_v3, %v5483_v33  ;;  %v5995_v5 = vshll.u32 %v12499_v22, 16  ;;  %v6001_v34 = vrot.slane %v5999_v38, 4  ;;  %v5427_v63 = vrot.slane %v12174_v51, 5  ;;  %v4394_v3 = vld [vmem:[#allocation3 + $0x90] sm:$0xe] }
 0x2fd   : > { %14101 = vst [vmem:[#allocation23_spill] sm:$0xff] %v12537_v25  ;;  %v12548_v26 = vcombine.low %v5481_v4, %v5484_v24  ;;  %v5993_v13 = vrot.slane %v5992_v47, 4  ;;  %v6005_v46 = vshll.u32 %v12539_v42, 16  ;;  %v8615_v62 = vrot.slane %v4389_v45, 9  ;;  %v14107_v33 = vld [vmem:[#allocation25_spill] sm:$0xff] }
 0x2fe   : > { %v5997_v58 = vrot.slane %v5995_v5, 5  ;;  %v5428_v57 = vsel %vm10555_vm10, %v5426_v52, %v5427_v63  ;;  %v5462_v52 = vrot.slane %v14107_v33, 5  ;;  %v12586_v4 = vcombine.low %v12457_v11, %v12499_v22  ;;  %v14117_v33 = vld [vmem:[#allocation14_spill] sm:$0xff] }
 0x2ff   : > { %9541 = vmatmul.mubr.msk.bf16.gmra.mxu0 %vm4835_vm3, %v12200_v36  ;;  %14102 = vst [vmem:[#allocation19_spill] sm:$0xff] %v12548_v26  ;;  %v5425_v29 = vsel %vm10555_vm10, %v8615_v62, %v5424_v20  ;;  %v6007_v51 = vrot.slane %v6005_v46, 5  ;;  %v14104_v20 = vld [vmem:[#allocation12_spill] sm:$0xff]  ;;  %v8620_v24 = vrot.slane %v4394_v3, 9  ;;  %v6665_v11 = vsel %vm4884_vm0, %v12508_v16, 0 }
 0x300   : > { %9544 = vmatprep.mubr.msk.bf16.mxu0 %vm4835_vm3, %v12231_v18  ;;  %v5998_v55 = vsel %vm10095_vm15, %v5993_v13, %v5997_v58  ;;  %v6002_v17 = vor.u32 %v6001_v34, %v5997_v58  ;;  %v12562_v41 = vcombine.low %v5425_v29, %v5428_v57  ;;  %v5459_v12 = vrot.slane %v14104_v20, 5  ;;  %v3755_v16 = vld [vmem:[#allocation3 + $0xcc] sm:$0x1]  ;;  %v3810_v13 = vld [vmem:[#allocation3 + $0xd4] sm:$0x1]  ;;  %v14113_v29 = vld [vmem:[#allocation27_spill] sm:$0xff] }
 0x301   : > { %9499 = vmatmul.mubr.msk.bf16.gmra.mxu1 %vm4835_vm3, %v12531_v2  ;;  %v3756_v63 = vsel %vm11267_vm1, 0, %v3755_v16  ;;  %v3811_v46 = vsel %vm11279_vm5, 0, %v3810_v13  ;;  %v6437_v62 = vsel %vm4884_vm0, %v12435_v0, 0  ;;  %v12633_v57 = vld [vmem:[%s13774_s3 + $0x20] sm:$0xf]  ;;  %vm8089_vm6 = vcmask 1041409  }
 0x302   : > { %9502 = vmatprep.mubr.msk.bf16.mxu1 %vm4835_vm3, %v12533_v49  ;;  %v6003_v38 = vrot.slane %v6002_v17, 4  ;;  %v5461_v14 = vrot.slane %v5459_v12, 4  ;;  %v5460_v5 = vsel %vm10555_vm10, %v8620_v24, %v5459_v12  ;;  %3757 = vst [vmem:[#allocation3 + $0xcc] sm:$0x1] %v3756_v63  ;;  %3812 = vst [vmem:[#allocation3 + $0xd4] sm:$0x1] %v3811_v46 }
 0x303   : > { %v14112_v17 = vld [vmem:[#allocation9_spill] sm:$0xff]  ;;  %v14116_v12 = vld [vmem:[#allocation11_spill] sm:$0xff]  ;;  %v4398_v34 = vld [vmem:[#allocation3 + $0xc0] sm:$0xe]  ;;  %vm8097_vm13 = vcmask 1045509  }
 0x304   : > { %v6008_v9 = vsel %vm10095_vm15, %v6003_v38, %v6007_v51  ;;  %v5463_v47 = vsel %vm10555_vm10, %v5461_v14, %v5462_v52  ;;  %v14114_v38 = vld [vmem:[#allocation10_spill] sm:$0xff]  ;;  %v14115_v20 = vld [vmem:[#allocation13_spill] sm:$0xff]  ;;  %v6217_v52 = vrot.slane %v12499_v22, 5  ;;  %v6220_v22 = vrot.slane %v12539_v42, 5 }
 0x305   : > { %v12570_v7 = vcombine.low %v5998_v55, %v6008_v9  ;;  %v12596_v45 = vcombine.low %v5460_v5, %v5463_v47  ;;  %v14111_v55 = vld [vmem:[#allocation20_spill] sm:$0xff]  ;;  %v14118_v24 = vld [vmem:[#allocation45_spill] sm:$0xff] }
 0x307   : > { %9545 = vmatmul.mubr.msk.bf16.gmra.mxu0 %vm4835_vm3, %v12248_v56 }
 0x308   : > { %9548 = vmatprep.mubr.msk.bf16.mxu0 %vm4835_vm3, %v14103_v35 }
 0x309   : > { %9503 = vmatmul.mubr.msk.bf16.gmra.mxu1 %vm4835_vm3, %v12562_v41 }
 0x30a   : > { %9506 = vmatprep.mubr.msk.bf16.mxu1 %vm4835_vm3, %v12450_v21 }
 0x30f   : > { %9549 = vmatmul.mubr.msk.bf16.gmra.mxu0 %vm4835_vm3, %v14105_v30 }
 0x310   : > { %9552 = vmatprep.mubr.msk.bf16.mxu0 %vm4835_vm3, %v14106_v39 }
 0x311   : > { %9507 = vmatmul.mubr.msk.bf16.gmra.mxu1 %vm4835_vm3, %v12461_v43 }
 0x312   : > { %9510 = vmatprep.mubr.msk.bf16.mxu1 %vm4835_vm3, %v12476_v6 }
 0x317   : > { %9553 = vmatmul.mubr.msk.bf16.gmra.mxu0 %vm4835_vm3, %v12586_v4 }
 0x318   : > { %9592 = vmatprep.mubr.msk.bf16.mxu0 %vm4835_vm3, %v12401_v60  ;;  %v14108_v60 = vld [vmem:[#allocation21_spill] sm:$0xff] }
 0x319   : > { %9511 = vmatmul.mubr.msk.bf16.gmra.mxu1 %vm4835_vm3, %v12490_v40 }
 0x31a   : > { %9514 = vmatprep.mubr.msk.bf16.mxu1 %vm4835_vm3, %v12596_v45 }
 0x31f   : > { %9593 = vmatmul.mubr.msk.bf16.vlgmr.msra.gmra.mxu0 %vm4835_vm3, %v12415_v15 }
 0x320   : > { %9596 = vmatprep.mubr.msk.bf16.mxu0 %vm4835_vm3, %v12421_v8  ;;  %9659 = vmatpush3.bf16.msra.mxu0 %v6665_v11 }
 0x321   : > { %9515 = vmatmul.mubr.msk.bf16.gmra.mxu1 %vm4835_vm3, %v12526_v37 }
 0x322   : > { %9518 = vmatprep.mubr.msk.bf16.mxu1 %vm4835_vm3, %v12537_v25 }
 0x327   : > { %9597 = vmatmul.mubr.msk.bf16.gmra.mxu0 %vm4835_vm3, %v12482_v19 }
 0x328   : > { %9600 = vmatprep.mubr.msk.bf16.mxu0 %vm4835_vm3, %v12531_v2 }
 0x329   : > { %9519 = vmatmul.mubr.msk.bf16.gmra.mxu1 %vm4835_vm3, %v12548_v26 }
 0x32a   : > { %9558 = vmatprep.mubr.msk.bf16.mxu1 %vm4835_vm3, %v14108_v60  ;;  %v6219_v60 = vrot.slane %v6217_v52, 4 }
 0x32f   : > { %9601 = vmatmul.mubr.msk.bf16.gmra.mxu0 %vm4835_vm3, %v12533_v49 }
 0x330   : > { %9604 = vmatprep.mubr.msk.bf16.mxu0 %vm4835_vm3, %v12562_v41 }
 0x331   : > { %9559 = vmatmul.mubr.msk.bf16.vlgmr.msra.gmra.mxu1 %vm4835_vm3, %v14111_v55 }
 0x332   : > { %9625 = vmatpush3.bf16.msra.mxu1 %v6437_v62  ;;  %9562 = vmatprep.mubr.msk.bf16.mxu1 %vm4835_vm3, %v14112_v17  ;;  %v14119_v62 = vld [vmem:[#allocation16_spill] sm:$0xff] }
 0x333   : > { %9743 = vmatprep.subr.msk.bf16.mxu1 %vm4884_vm0, %v12633_v57  ;;  %v9458_v0 = vpop.f32.mrf.mxu0 }
 0x335   : > { %v5214_v51 = vpop.f32.mrf.mxu0 }
 0x337   : > { %9605 = vmatmul.mubr.msk.bf16.gmra.mxu0 %vm4835_vm3, %v12450_v21  ;;  %v9459_v9 = vpop.f32.mrf.mxu0 }
 0x338   : > { %9608 = vmatprep.mubr.msk.bf16.mxu0 %vm4835_vm3, %v12461_v43 }
 0x339   : > { %9563 = vmatmul.mubr.msk.bf16.gmra.mxu1 %vm4835_vm3, %v14113_v29  ;;  %v5217_v14 = vpop.f32.mrf.mxu0 }
 0x33a   : > { %9566 = vmatprep.mubr.msk.bf16.mxu1 %vm4835_vm3, %v14114_v38 }
 0x33e   : > { %v9462_v3 = vpop.f32.mrf.mxu0 }
 0x33f   : > { %9609 = vmatmul.mubr.msk.bf16.gmra.mxu0 %vm4835_vm3, %v12476_v6 }
 0x340   : > { %9612 = vmatprep.mubr.msk.bf16.mxu0 %vm4835_vm3, %v12490_v40  ;;  %v5230_v5 = vpop.f32.mrf.mxu0 }
 0x341   : > { %9567 = vmatmul.mubr.msk.bf16.gmra.mxu1 %vm4835_vm3, %v14115_v20 }
 0x342   : > { %9570 = vmatprep.mubr.msk.bf16.mxu1 %vm4835_vm3, %v14116_v12  ;;  %v9463_v13 = vpop.f32.mrf.mxu0 }
 0x347   : > { %9613 = vmatmul.mubr.msk.bf16.gmra.mxu0 %vm4835_vm3, %v12596_v45 }
 0x348   : > { %9616 = vmatprep.mubr.msk.bf16.mxu0 %vm4835_vm3, %v12526_v37  ;;  %v14120_v37 = vld [vmem:[#allocation17_spill] sm:$0xff] }
 0x349   : > { %9571 = vmatmul.mubr.msk.bf16.gmra.mxu1 %vm4835_vm3, %v14117_v33 }
 0x34a   : > { %9574 = vmatprep.mubr.msk.bf16.mxu1 %vm4835_vm3, %v14118_v24 }
 0x34b   : > { %v9424_v47 = vpop.f32.mrf.mxu1 }
 0x34c   : > { %v12666_v11 = vadd.f32 %v9458_v0, %v9424_v47  ;;  %v8693_v0 = vrot.slane %v4398_v34, 9  ;;  %v6221_v47 = vsel %vm10555_vm10, %v6219_v60, %v6220_v22 }
 0x34d   : > { %v4922_v16 = vpop.f32.mrf.mxu1 }
 0x34e   : > { %v12670_v63 = vadd.f32 %v5214_v51, %v4922_v16  ;;  %v6218_v42 = vsel %vm10555_vm10, %v8693_v0, %v6217_v52  ;;  %v5233_v16 = vpop.f32.mrf.mxu0 }
 0x34f   : > { %9617 = vmatmul.mubr.msk.bf16.gmra.mxu0 %vm4835_vm3, %v12537_v25  ;;  %v9425_v58 = vpop.f32.mrf.mxu1 }
 0x350   : > { %9620 = vmatprep.mubr.msk.bf16.mxu0 %vm4835_vm3, %v12548_v26  ;;  %v12675_v46 = vadd.f32 %v9459_v9, %v9425_v58  ;;  %v12687_v26 = vcombine.low %v6218_v42, %v6221_v47  ;;  %v12719_v47 = vld [vmem:[#allocation3 + $0xd0] sm:$0xf] }
 0x351   : > { %9575 = vmatmul.mubr.msk.bf16.gmra.mxu1 %vm4835_vm3, %v14119_v62  ;;  %v4925_v25 = vpop.f32.mrf.mxu1  ;;  %v6864_v42 = vrot.slane %v12719_v47, 5 }
 0x352   : > { %9578 = vmatprep.mubr.msk.bf16.mxu1 %vm4835_vm3, %v14120_v37  ;;  %v12683_v51 = vadd.f32 %v5217_v14, %v4925_v25  ;;  %14121 = vst [vmem:[#allocation22_spill] sm:$0xff] %v12687_v26  ;;  %v9466_v9 = vpop.f32.mrf.mxu0 }
 0x354   : > { %v5246_v25 = vpop.f32.mrf.mxu0 }
 0x356   : > { %v9467_v52 = vpop.f32.mrf.mxu0 }
 0x357   : > { %9621 = vmatmul.mubr.msk.bf16.gmra.mxu0 %vm4835_vm3, %v12687_v26 }
 0x358   : > { %9660 = vmatprep.mubr.msk.bf16.mxu0 %vm4835_vm3, %v14111_v55  ;;  %v5249_v58 = vpop.f32.mrf.mxu0 }
 0x359   : > { %9579 = vmatmul.mubr.msk.bf16.gmra.mxu1 %vm4835_vm3, %v12346_v10 }
 0x35a   : > { %9582 = vmatprep.mubr.msk.bf16.mxu1 %vm4835_vm3, %v12358_v27 }
 0x35f   : > { %9661 = vmatmul.mubr.msk.bf16.vlgmr.msra.gmra.mxu0 %vm4835_vm3, %v14112_v17  ;;  %v9428_v14 = vpop.f32.mrf.mxu1 }
 0x360   : > { %9664 = vmatprep.mubr.msk.bf16.mxu0 %vm4835_vm3, %v14113_v29  ;;  %v12701_v60 = vadd.f32 %v9462_v3, %v9428_v14 }
 0x361   : > { %9583 = vmatmul.mubr.msk.bf16.gmra.mxu1 %vm4835_vm3, %v12368_v50  ;;  %v4938_v55 = vpop.f32.mrf.mxu1 }
 0x362   : > { %9586 = vmatprep.mubr.msk.bf16.mxu1 %vm4835_vm3, %v12380_v44  ;;  %v12707_v34 = vadd.f32 %v5230_v5, %v4938_v55  ;;  %v12721_v5 = vld [vmem:[#allocation3 + $0xd4] sm:$0x1]  ;;  %v6866_v55 = vrot.slane %v6864_v42, 4 }
 0x363   : > { %v9429_v22 = vpop.f32.mrf.mxu1 }
 0x364   : > { %v12709_v0 = vadd.f32 %v9463_v13, %v9429_v22  ;;  %v4399_v13 = vld [vmem:[#allocation3 + $0xcc] sm:$0xe] }
 0x365   : > { %v4941_v17 = vpop.f32.mrf.mxu1  ;;  %v8748_v14 = vrot.slane %v4399_v13, 9 }
 0x366   : > { %v12713_v29 = vadd.f32 %v5233_v16, %v4941_v17  ;;  %v9470_v3 = vpop.f32.mrf.mxu0 }
 0x367   : > { %9665 = vmatmul.mubr.msk.bf16.gmra.mxu0 %vm4835_vm3, %v14114_v38  ;;  %v6867_v38 = vrot.slane %v12721_v5, 5 }
 0x368   : > { %9668 = vmatprep.mubr.msk.bf16.mxu0 %vm4835_vm3, %v14115_v20  ;;  %v5262_v16 = vpop.f32.mrf.mxu0  ;;  %v12729_v20 = vsel %vm10555_vm10, %v8748_v14, %v6864_v42 }
 0x369   : > { %9587 = vmatmul.mubr.msk.bf16.gmra.mxu1 %vm4835_vm3, %v12570_v7  ;;  %14122 = vst [vmem:[#allocation18_spill] sm:$0xff] %v12729_v20  ;;  %v12735_v22 = vsel %vm10555_vm10, %v6866_v55, %v6867_v38 }
 0x36a   : > { %9626 = vmatprep.mubr.msk.bf16.mxu1 %vm4835_vm3, %v11891_v32  ;;  %14123 = vst [vmem:[#allocation24_spill] sm:$0xff] %v12735_v22  ;;  %v6878_v32 = vsel %vm4884_vm0, %v12633_v57, 0  ;;  %v9471_v17 = vpop.f32.mrf.mxu0 }
 0x36c   : > { %v5265_v42 = vpop.f32.mrf.mxu0 }
 0x36f   : > { %9669 = vmatmul.mubr.msk.bf16.gmra.mxu0 %vm4835_vm3, %v14116_v12 }
 0x370   : > { %9672 = vmatprep.mubr.msk.bf16.mxu0 %vm4835_vm3, %v14117_v33 }
 0x371   : > { %9627 = vmatmul.mubr.msk.bf16.vlgmr.msra.gmra.mxu1 %vm4835_vm3, %v11920_v48 }
 0x372   : > { %9693 = vmatpush3.bf16.msra.mxu1 %v6878_v32  ;;  %9630 = vmatprep.mubr.msk.bf16.mxu1 %vm4835_vm3, %v11962_v31  ;;  %v9432_v54 = vpop.f32.mrf.mxu1 }
 0x373   : > { %v12747_v12 = vadd.f32 %v9466_v9, %v9432_v54 }
 0x374   : > { %v4954_v38 = vpop.f32.mrf.mxu1 }
 0x375   : > { %v12749_v57 = vadd.f32 %v5246_v25, %v4954_v38  ;;  %v12763_v25 = vld [vmem:[#allocation3 + $0xcc] sm:$0xf] }
 0x376   : > { %v9433_v33 = vpop.f32.mrf.mxu1  ;;  %v9474_v48 = vpop.f32.mrf.mxu0 }
 0x377   : > { %9673 = vmatmul.mubr.msk.bf16.gmra.mxu0 %vm4835_vm3, %v14118_v24  ;;  %v12755_v14 = vadd.f32 %v9467_v52, %v9433_v33  ;;  %v6636_v52 = vshll.u32 %v12763_v25, 16 }
 0x378   : > { %9676 = vmatprep.mubr.msk.bf16.mxu0 %vm4835_vm3, %v14119_v62  ;;  %v4957_v55 = vpop.f32.mrf.mxu1  ;;  %v5278_v9 = vpop.f32.mrf.mxu0  ;;  %v6633_v62 = vshrl.u32 %v12763_v25, 16 }
 0x379   : > { %9631 = vmatmul.mubr.msk.bf16.gmra.mxu1 %vm4835_vm3, %v12007_v59  ;;  %v12759_v31 = vadd.f32 %v5249_v58, %v4957_v55  ;;  %v6646_v59 = vshrl.u32 %v12719_v47, 16  ;;  %v6642_v58 = vshll.u32 %v12719_v47, 16  ;;  %v6638_v54 = vrot.slane %v6636_v52, 5 }
 0x37a   : > { %9634 = vmatprep.mubr.msk.bf16.mxu1 %vm4835_vm3, %v12051_v53  ;;  %v9475_v24 = vpop.f32.mrf.mxu0 }
 0x37b   : > { %v6644_v38 = vrot.slane %v6642_v58, 5 }
 0x37c   : > { %v5281_v53 = vpop.f32.mrf.mxu0 }
 0x37f   : > { %9677 = vmatmul.mubr.msk.bf16.gmra.mxu0 %vm4835_vm3, %v14120_v37  ;;  %v6635_v37 = vrot.slane %v6633_v62, 4  ;;  %v6652_v62 = vshll.u32 %v12721_v5, 16 }
 0x380   : > { %9680 = vmatprep.mubr.msk.bf16.mxu0 %vm4835_vm3, %v12346_v10  ;;  %v6648_v10 = vrot.slane %v6646_v59, 4 }
 0x381   : > { %9635 = vmatmul.mubr.msk.bf16.gmra.mxu1 %vm4835_vm3, %v12092_v61  ;;  %v9436_v32 = vpop.f32.mrf.mxu1 }
 0x382   : > { %9638 = vmatprep.mubr.msk.bf16.mxu1 %vm4835_vm3, %v12139_v1  ;;  %v12777_v33 = vadd.f32 %v9470_v3, %v9436_v32  ;;  %v6639_v1 = vor.u32 %v6638_v54, %v6635_v37  ;;  %v6649_v26 = vor.u32 %v6648_v10, %v6644_v38  ;;  %v6654_v32 = vrot.slane %v6652_v62, 5 }
 0x383   : > { %v4970_v55 = vpop.f32.mrf.mxu1 }
 0x384   : > { %v9478_v13 = vpop.f32.mrf.mxu0  ;;  %v12779_v22 = vadd.f32 %v5262_v16, %v4970_v55  ;;  %v6640_v58 = vrot.slane %v6639_v1, 4 }
 0x385   : > { %v9437_v20 = vpop.f32.mrf.mxu1 }
 0x386   : > { %v5294_v61 = vpop.f32.mrf.mxu0  ;;  %v12786_v52 = vadd.f32 %v9471_v17, %v9437_v20 }
 0x387   : > { %9681 = vmatmul.mubr.msk.bf16.gmra.mxu0 %vm4835_vm3, %v12358_v27  ;;  %v4973_v3 = vpop.f32.mrf.mxu1 }
 0x388   : > { %9684 = vmatprep.mubr.msk.bf16.mxu0 %vm4835_vm3, %v12368_v50  ;;  %v9479_v16 = vpop.f32.mrf.mxu0  ;;  %v12792_v27 = vadd.f32 %v5265_v42, %v4973_v3  ;;  %v6650_v50 = vrot.slane %v6649_v26, 4 }
 0x389   : > { %9639 = vmatmul.mubr.msk.bf16.gmra.mxu1 %vm4835_vm3, %v12172_v23  ;;  %v6645_v23 = vsel %vm10095_vm15, %v6640_v58, %v6644_v38 }
 0x38a   : > { %9642 = vmatprep.mubr.msk.bf16.mxu1 %vm4835_vm3, %v12200_v36  ;;  %v5297_v59 = vpop.f32.mrf.mxu0  ;;  %v6655_v36 = vsel %vm10095_vm15, %v6650_v50, %v6654_v32  ;;  %vm8101_vm15 = vcmask 1047559  }
 0x38e   : > { %v9482_v37 = vpop.f32.mrf.mxu0 }
 0x38f   : > { %9685 = vmatmul.mubr.msk.bf16.gmra.mxu0 %vm4835_vm3, %v12380_v44 }
 0x390   : > { %v9440_v5 = vpop.f32.mrf.mxu1  ;;  %9688 = vmatprep.mubr.msk.bf16.mxu0 %vm4835_vm3, %v12570_v7  ;;  %v5310_v17 = vpop.f32.mrf.mxu0  ;;  %v8731_v7 = vcombine.low %v6645_v23, %v6655_v36 }
 0x391   : > { %v12802_v20 = vadd.f32 %v9474_v48, %v9440_v5  ;;  %9643 = vmatmul.mubr.msk.bf16.gmra.mxu1 %vm4835_vm3, %v12231_v18 }
 0x392   : > { %v4986_v26 = vpop.f32.mrf.mxu1  ;;  %9646 = vmatprep.mubr.msk.bf16.mxu1 %vm4835_vm3, %v12248_v56  ;;  %v9483_v42 = vpop.f32.mrf.mxu0 }
 0x393   : > { %v12808_v44 = vadd.f32 %v5278_v9, %v4986_v26 }
 0x394   : > { %v9441_v54 = vpop.f32.mrf.mxu1  ;;  %v5313_v38 = vpop.f32.mrf.mxu0 }
 0x395   : > { %v12810_v10 = vadd.f32 %v9475_v24, %v9441_v54 }
 0x396   : > { %v4989_v28 = vpop.f32.mrf.mxu1 }
 0x397   : > { %v12812_v55 = vadd.f32 %v5281_v53, %v4989_v28  ;;  %v9486_v48 = vpop.f32.mrf.mxu0  ;;  %9689 = vmatmul.mubr.msk.bf16.gmra.mxu0 %vm4835_vm3, %v8731_v7 }
 0x399   : > { %v5326_v1 = vpop.f32.mrf.mxu0  ;;  %v9444_v18 = vpop.f32.mrf.mxu1  ;;  %9647 = vmatmul.mubr.msk.bf16.gmra.mxu1 %vm4835_vm3, %v14103_v35 }
 0x39a   : > { %v12817_v56 = vadd.f32 %v9478_v13, %v9444_v18  ;;  %9650 = vmatprep.mubr.msk.bf16.mxu1 %vm4835_vm3, %v14105_v30 }
 0x39b   : > { %v9487_v9 = vpop.f32.mrf.mxu0  ;;  %v5002_v24 = vpop.f32.mrf.mxu1 }
 0x39c   : > { %v12821_v62 = vadd.f32 %v5294_v61, %v5002_v24 }
 0x39d   : > { %v5329_v3 = vpop.f32.mrf.mxu0  ;;  %v9445_v53 = vpop.f32.mrf.mxu1 }
 0x39e   : > { %v12823_v58 = vadd.f32 %v9479_v16, %v9445_v53 }
 0x39f   : > { %v9526_v50 = vpop.f32.mrf.mxu0  ;;  %v5005_v32 = vpop.f32.mrf.mxu1 }
 0x3a0   : > { %v12825_v5 = vadd.f32 %v5297_v59, %v5005_v32  ;;  %v8713_v59 = vcombine.low %v12763_v25, %v12719_v47 }
 0x3a1   : > { %v5826_v23 = vpop.f32.mrf.mxu0  ;;  %v9448_v36 = vpop.f32.mrf.mxu1  ;;  %9651 = vmatmul.mubr.msk.bf16.gmra.mxu1 %vm4835_vm3, %v14106_v39 }
 0x3a2   : > { %v12829_v35 = vadd.f32 %v9482_v37, %v9448_v36  ;;  %9654 = vmatprep.mubr.msk.bf16.mxu1 %vm4835_vm3, %v12586_v4 }
 0x3a3   : > { %v9527_v30 = vpop.f32.mrf.mxu0  ;;  %v5018_v13 = vpop.f32.mrf.mxu1 }
 0x3a4   : > { %v12833_v61 = vadd.f32 %v5310_v17, %v5018_v13 }
 0x3a5   : > { %v5829_v16 = vpop.f32.mrf.mxu0  ;;  %v9449_v26 = vpop.f32.mrf.mxu1 }
 0x3a6   : > { %v12837_v7 = vadd.f32 %v9483_v42, %v9449_v26 }
 0x3a7   : > { %v9530_v54 = vpop.f32.mrf.mxu0  ;;  %v5021_v28 = vpop.f32.mrf.mxu1 }
 0x3a8   : > { %v12839_v18 = vadd.f32 %v5313_v38, %v5021_v28 }
 0x3a9   : > { %v5842_v39 = vpop.f32.mrf.mxu0  ;;  %v9452_v37 = vpop.f32.mrf.mxu1  ;;  %9655 = vmatmul.mubr.msk.bf16.gmra.mxu1 %vm4835_vm3, %v8713_v59 }
 0x3aa   : > { %v12842_v4 = vadd.f32 %v9486_v48, %v9452_v37  ;;  %9694 = vmatprep.mubr.msk.bf16.mxu1 %vm4835_vm3, %v12415_v15 }
 0x3ab   : > { %v9531_v17 = vpop.f32.mrf.mxu0  ;;  %v5034_v24 = vpop.f32.mrf.mxu1 }
 0x3ac   : > { %v12846_v53 = vadd.f32 %v5326_v1, %v5034_v24 }
 0x3ad   : > { %v5845_v47 = vpop.f32.mrf.mxu0  ;;  %v9453_v25 = vpop.f32.mrf.mxu1 }
 0x3ae   : > { %v12848_v42 = vadd.f32 %v9487_v9, %v9453_v25 }
 0x3af   : > { %v9534_v32 = vpop.f32.mrf.mxu0  ;;  %v5037_v38 = vpop.f32.mrf.mxu1 }
 0x3b0   : > { %v12850_v36 = vadd.f32 %v5329_v3, %v5037_v38 }
 0x3b1   : > { %v5858_v13 = vpop.f32.mrf.mxu0  ;;  %v9492_v26 = vpop.f32.mrf.mxu1  ;;  %9695 = vmatmul.mubr.msk.bf16.vlgmr.msra.gmra.mxu1 %vm4835_vm3, %v12421_v8 }
 0x3b2   : > { %v5749_v48 = vadd.f32 %v9492_v26, %v12666_v11  ;;  %9698 = vmatprep.mubr.msk.bf16.mxu1 %vm4835_vm3, %v12482_v19 }
 0x3b3   : > { %v9535_v15 = vpop.f32.mrf.mxu0  ;;  %v5620_v1 = vpop.f32.mrf.mxu1 }
 0x3b4   : > { %v5747_v59 = vadd.f32 %v5620_v1, %v12670_v63  ;;  %v12858_v28 = vadd.f32 %v9526_v50, %v5749_v48 }
 0x3b5   : > { %v5861_v9 = vpop.f32.mrf.mxu0  ;;  %v9493_v37 = vpop.f32.mrf.mxu1 }
 0x3b6   : > { %v5750_v3 = vadd.f32 %v9493_v37, %v12675_v46  ;;  %v12861_v25 = vadd.f32 %v5826_v23, %v5747_v59 }
 0x3b7   : > { %v9538_v24 = vpop.f32.mrf.mxu0  ;;  %v5623_v38 = vpop.f32.mrf.mxu1 }
 0x3b8   : > { %v5748_v8 = vadd.f32 %v5623_v38, %v12683_v51  ;;  %v12864_v26 = vadd.f32 %v9527_v30, %v5750_v3 }
 0x3b9   : > { %v5874_v11 = vpop.f32.mrf.mxu0  ;;  %v9496_v19 = vpop.f32.mrf.mxu1  ;;  %9699 = vmatmul.mubr.msk.bf16.gmra.mxu1 %vm4835_vm3, %v12531_v2 }
 0x3ba   : > { %v5753_v63 = vadd.f32 %v9496_v19, %v12701_v60  ;;  %9702 = vmatprep.mubr.msk.bf16.mxu1 %vm4835_vm3, %v12533_v49  ;;  %v12871_v46 = vadd.f32 %v5829_v16, %v5748_v8 }
 0x3bb   : > { %v9539_v50 = vpop.f32.mrf.mxu0  ;;  %v5636_v23 = vpop.f32.mrf.mxu1 }
 0x3bc   : > { %v5751_v48 = vadd.f32 %v5636_v23, %v12707_v34  ;;  %v12874_v51 = vadd.f32 %v9530_v54, %v5753_v63 }
 0x3bd   : > { %v5877_v1 = vpop.f32.mrf.mxu0  ;;  %v9497_v30 = vpop.f32.mrf.mxu1 }
 0x3be   : > { %v5754_v59 = vadd.f32 %v9497_v30, %v12709_v0  ;;  %v12877_v3 = vadd.f32 %v5842_v39, %v5751_v48 }
 0x3bf   : > { %v9542_v37 = vpop.f32.mrf.mxu0  ;;  %v5639_v2 = vpop.f32.mrf.mxu1 }
 0x3c0   : > { %v5752_v60 = vadd.f32 %v5639_v2, %v12713_v29  ;;  %v12880_v49 = vadd.f32 %v9531_v17, %v5754_v59 }
 0x3c1   : > { %v5890_v38 = vpop.f32.mrf.mxu0  ;;  %v9500_v16 = vpop.f32.mrf.mxu1  ;;  %9703 = vmatmul.mubr.msk.bf16.gmra.mxu1 %vm4835_vm3, %v12562_v41 }
 0x3c2   : > { %v5757_v34 = vadd.f32 %v9500_v16, %v12747_v12  ;;  %9706 = vmatprep.mubr.msk.bf16.mxu1 %vm4835_vm3, %v12450_v21  ;;  %v12887_v0 = vadd.f32 %v5845_v47, %v5752_v60 }
 0x3c3   : > { %v9543_v54 = vpop.f32.mrf.mxu0  ;;  %v5652_v39 = vpop.f32.mrf.mxu1 }
 0x3c4   : > { %v5755_v8 = vadd.f32 %v5652_v39, %v12749_v57  ;;  %v12890_v29 = vadd.f32 %v9534_v32, %v5757_v34 }
 0x3c5   : > { %v5893_v19 = vpop.f32.mrf.mxu0  ;;  %v9501_v17 = vpop.f32.mrf.mxu1 }
 0x3c6   : > { %v5758_v63 = vadd.f32 %v9501_v17, %v12755_v14  ;;  %v12893_v48 = vadd.f32 %v5858_v13, %v5755_v8 }
 0x3c7   : > { %v9546_v23 = vpop.f32.mrf.mxu0  ;;  %v5655_v41 = vpop.f32.mrf.mxu1 }
 0x3c8   : > { %v5756_v12 = vadd.f32 %v5655_v41, %v12759_v31  ;;  %v12896_v21 = vadd.f32 %v9535_v15, %v5758_v63 }
 0x3c9   : > { %v5906_v30 = vpop.f32.mrf.mxu0  ;;  %v9504_v47 = vpop.f32.mrf.mxu1  ;;  %9707 = vmatmul.mubr.msk.bf16.gmra.mxu1 %vm4835_vm3, %v12461_v43 }
 0x3ca   : > { %v5761_v57 = vadd.f32 %v9504_v47, %v12777_v33  ;;  %9710 = vmatprep.mubr.msk.bf16.mxu1 %vm4835_vm3, %v12476_v6  ;;  %v12903_v14 = vadd.f32 %v5861_v9, %v5756_v12 }
 0x3cb   : > { %v9547_v32 = vpop.f32.mrf.mxu0  ;;  %v5668_v13 = vpop.f32.mrf.mxu1 }
 0x3cc   : > { %v5759_v59 = vadd.f32 %v5668_v13, %v12779_v22  ;;  %v12906_v31 = vadd.f32 %v9538_v24, %v5761_v57  ;;  %v14124_v57 = vld [vmem:[#allocation37_spill] sm:$0xff] }
 0x3cd   : > { %v5909_v2 = vpop.f32.mrf.mxu0  ;;  %v9505_v15 = vpop.f32.mrf.mxu1 }
 0x3ce   : > { %v5762_v60 = vadd.f32 %v9505_v15, %v12786_v52  ;;  %v12909_v34 = vadd.f32 %v5874_v11, %v5759_v59 }
 0x3cf   : > { %v9550_v16 = vpop.f32.mrf.mxu0  ;;  %v5671_v43 = vpop.f32.mrf.mxu1 }
 0x3d0   : > { %v5760_v33 = vadd.f32 %v5671_v43, %v12792_v27  ;;  %v12912_v6 = vadd.f32 %v9539_v50, %v5762_v60 }
 0x3d1   : > { %v5922_v39 = vpop.f32.mrf.mxu0  ;;  %v9508_v9 = vpop.f32.mrf.mxu1  ;;  %9711 = vmatmul.mubr.msk.bf16.gmra.mxu1 %vm4835_vm3, %v12490_v40 }
 0x3d2   : > { %v5765_v22 = vadd.f32 %v9508_v9, %v12802_v20  ;;  %9714 = vmatprep.mubr.msk.bf16.mxu1 %vm4835_vm3, %v12596_v45  ;;  %v12919_v52 = vadd.f32 %v5877_v1, %v5760_v33 }
 0x3d3   : > { %v9551_v24 = vpop.f32.mrf.mxu0  ;;  %v5684_v11 = vpop.f32.mrf.mxu1 }
 0x3d4   : > { %v5763_v8 = vadd.f32 %v5684_v11, %v12808_v44  ;;  %v12922_v27 = vadd.f32 %v9542_v37, %v5765_v22  ;;  %v14125_v37 = vld [vmem:[#allocation23_spill] sm:$0xff] }
 0x3d5   : > { %v5925_v17 = vpop.f32.mrf.mxu0  ;;  %v9509_v50 = vpop.f32.mrf.mxu1 }
 0x3d6   : > { %v5766_v63 = vadd.f32 %v9509_v50, %v12810_v10  ;;  %v12925_v12 = vadd.f32 %v5890_v38, %v5763_v8  ;;  %v14126_v8 = vld [vmem:[#allocation19_spill] sm:$0xff] }
 0x3d7   : > { %v9554_v41 = vpop.f32.mrf.mxu0  ;;  %v5687_v40 = vpop.f32.mrf.mxu1 }
 0x3d8   : > { %v5764_v20 = vadd.f32 %v5687_v40, %v12812_v55  ;;  %v12928_v45 = vadd.f32 %v9543_v54, %v5766_v63 }
 0x3d9   : > { %v5938_v47 = vpop.f32.mrf.mxu0  ;;  %v9512_v1 = vpop.f32.mrf.mxu1  ;;  %9715 = vmatmul.mubr.msk.bf16.gmra.mxu1 %vm4835_vm3, %v14124_v57 }
 0x3da   : > { %v5769_v44 = vadd.f32 %v9512_v1, %v12817_v56  ;;  %9718 = vmatprep.mubr.msk.bf16.mxu1 %vm4835_vm3, %v14125_v37  ;;  %v12935_v10 = vadd.f32 %v5893_v19, %v5764_v20 }
 0x3db   : > { %v9555_v13 = vpop.f32.mrf.mxu0  ;;  %v5700_v38 = vpop.f32.mrf.mxu1 }
 0x3dc   : > { %v5767_v59 = vadd.f32 %v5700_v38, %v12821_v62  ;;  %v12938_v55 = vadd.f32 %v9546_v23, %v5769_v44  ;;  %v14127_v23 = vld [vmem:[#allocation22_spill] sm:$0xff] }
 0x3dd   : > { %v5941_v15 = vpop.f32.mrf.mxu0  ;;  %v9513_v54 = vpop.f32.mrf.mxu1 }
 0x3de   : > { %v5770_v60 = vadd.f32 %v9513_v54, %v12823_v58  ;;  %v12943_v33 = vadd.f32 %v5906_v30, %v5767_v59  ;;  %v14129_v59 = vld [vmem:[#allocation24_spill] sm:$0xff] }
 0x3df   : > { %v12941_v43 = vpop.f32.mrf.mxu0  ;;  %v5703_v56 = vpop.f32.mrf.mxu1 }
 0x3e0   : > { %v5768_v9 = vadd.f32 %v5703_v56, %v12825_v5  ;;  %v12948_v19 = vadd.f32 %v9547_v32, %v5770_v60 }
 0x3e1   : > { %v12946_v22 = vpop.f32.mrf.mxu0  ;;  %v9516_v11 = vpop.f32.mrf.mxu1  ;;  %9719 = vmatmul.mubr.msk.bf16.gmra.mxu1 %vm4835_vm3, %v14126_v8 }
 0x3e2   : > { %v5773_v62 = vadd.f32 %v9516_v11, %v12829_v35  ;;  %9722 = vmatprep.mubr.msk.bf16.mxu1 %vm4835_vm3, %v14127_v23  ;;  %v12957_v30 = vadd.f32 %v5909_v2, %v5768_v9 }
 0x3e3   : > { %v12955_v58 = vpop.f32.mrf.mxu0  ;;  %v5716_v50 = vpop.f32.mrf.mxu1 }
 0x3e4   : > { %v5771_v5 = vadd.f32 %v5716_v50, %v12833_v61  ;;  %v12962_v32 = vadd.f32 %v9550_v16, %v5773_v62  ;;  %v14128_v61 = vld [vmem:[#allocation18_spill] sm:$0xff] }
 0x3e5   : > { %v12960_v63 = vpop.f32.mrf.mxu0  ;;  %v9517_v40 = vpop.f32.mrf.mxu1  ;;  %v14130_v54 = vcombine.low %v14128_v61, %v14129_v59 }
 0x3e6   : > { %v5774_v20 = vadd.f32 %v9517_v40, %v12837_v7  ;;  %v12967_v35 = vadd.f32 %v5922_v39, %v5771_v5 }
 0x3e7   : > { %v12965_v1 = vpop.f32.mrf.mxu0  ;;  %v5719_v57 = vpop.f32.mrf.mxu1 }
 0x3e8   : > { %v5772_v44 = vadd.f32 %v5719_v57, %v12839_v18  ;;  %v12972_v2 = vadd.f32 %v9551_v24, %v5774_v20 }
 0x3e9   : > { %v12970_v37 = vpop.f32.mrf.mxu0  ;;  %v9520_v38 = vpop.f32.mrf.mxu1  ;;  %9723 = vmatmul.mubr.msk.bf16.gmra.mxu1 %vm4835_vm3, %v14130_v54 }
 0x3ea   : > { %v5777_v16 = vadd.f32 %v9520_v38, %v12842_v4  ;;  %v12981_v60 = vadd.f32 %v5925_v17, %v5772_v44 }
 0x3eb   : > { %v12979_v7 = vpop.f32.mrf.mxu0  ;;  %v5732_v39 = vpop.f32.mrf.mxu1 }
 0x3ec   : > { %14131 = vst [vmem:[#allocation39_spill] sm:$0xff] %v12979_v7  ;;  %v5775_v56 = vadd.f32 %v5732_v39, %v12846_v53  ;;  %v12984_v9 = vadd.f32 %v9554_v41, %v5777_v16 }
 0x3ed   : > { %v6286_v18 = vpop.f32.mrf.mxu0  ;;  %v9521_v24 = vpop.f32.mrf.mxu1 }
 0x3ee   : > { %v5778_v11 = vadd.f32 %v9521_v24, %v12848_v42  ;;  %v12987_v62 = vadd.f32 %v5938_v47, %v5775_v56 }
 0x3ef   : > { %v9602_v8 = vpop.f32.mrf.mxu0  ;;  %v5735_v23 = vpop.f32.mrf.mxu1 }
 0x3f0   : > { %v5776_v50 = vadd.f32 %v5735_v23, %v12850_v36  ;;  %v12990_v5 = vadd.f32 %v9555_v13, %v5778_v11 }
 0x3f1   : > { %v6299_v4 = vpop.f32.mrf.mxu0  ;;  %v9560_v17 = vpop.f32.mrf.mxu1 }
 0x3f2   : > { %v12993_v40 = vadd.f32 %v9560_v17, %v12858_v28  ;;  %v12995_v20 = vadd.f32 %v5941_v15, %v5776_v50 }
 0x3f3   : > { %v9603_v53 = vpop.f32.mrf.mxu0  ;;  %v6054_v41 = vpop.f32.mrf.mxu1 }
 0x3f4   : > { %v12998_v57 = vadd.f32 %v6054_v41, %v12861_v25 }
 0x3f5   : > { %v6302_v42 = vpop.f32.mrf.mxu0  ;;  %v9561_v47 = vpop.f32.mrf.mxu1 }
 0x3f6   : > { %v13001_v44 = vadd.f32 %v9561_v47, %v12864_v26 }
 0x3f7   : > { %v9606_v36 = vpop.f32.mrf.mxu0  ;;  %v6057_v38 = vpop.f32.mrf.mxu1 }
 0x3f8   : > { %v13004_v13 = vadd.f32 %v6057_v38, %v12871_v46 }
 0x3f9   : > { %v6315_v61 = vpop.f32.mrf.mxu0  ;;  %v9564_v28 = vpop.f32.mrf.mxu1 }
 0x3fa   : > { %v13007_v59 = vadd.f32 %v9564_v28, %v12874_v51 }
 0x3fb   : > { %v9607_v15 = vpop.f32.mrf.mxu0  ;;  %v6070_v54 = vpop.f32.mrf.mxu1 }
 0x3fc   : > { %v13010_v25 = vadd.f32 %v6070_v54, %v12877_v3 }
 0x3fd   : > { %v6318_v16 = vpop.f32.mrf.mxu0  ;;  %v9565_v39 = vpop.f32.mrf.mxu1 }
 0x3fe   : > { %v13013_v26 = vadd.f32 %v9565_v39, %v12880_v49 }
 0x3ff   : > { %v9610_v56 = vpop.f32.mrf.mxu0  ;;  %v6073_v24 = vpop.f32.mrf.mxu1 }
 0x400   : > { %v6186_v46 = vadd.f32 %v6073_v24, %v12887_v0 }
 0x401   : > { %v6331_v11 = vpop.f32.mrf.mxu0  ;;  %v9568_v23 = vpop.f32.mrf.mxu1 }
 0x402   : > { %v6191_v50 = vadd.f32 %v9568_v23, %v12890_v29  ;;  %v13017_v17 = vadd.f32 %v6286_v18, %v6186_v46 }
 0x403   : > { %v9611_v51 = vpop.f32.mrf.mxu0  ;;  %v6086_v41 = vpop.f32.mrf.mxu1 }
 0x404   : > { %v6189_v3 = vadd.f32 %v6086_v41, %v12893_v48  ;;  %v13020_v38 = vadd.f32 %v9602_v8, %v6191_v50 }
 0x405   : > { %v6334_v47 = vpop.f32.mrf.mxu0  ;;  %v9569_v28 = vpop.f32.mrf.mxu1 }
 0x406   : > { %v6192_v49 = vadd.f32 %v9569_v28, %v12896_v21  ;;  %v13023_v39 = vadd.f32 %v6299_v4, %v6189_v3 }
 0x407   : > { %v9614_v54 = vpop.f32.mrf.mxu0  ;;  %v6089_v0 = vpop.f32.mrf.mxu1 }
 0x408   : > { %v6190_v24 = vadd.f32 %v6089_v0, %v12903_v14  ;;  %v13026_v29 = vadd.f32 %v9603_v53, %v6192_v49 }
 0x409   : > { %v6347_v7 = vpop.f32.mrf.mxu0  ;;  %v9572_v18 = vpop.f32.mrf.mxu1 }
 0x40a   : > { %v6195_v46 = vadd.f32 %v9572_v18, %v12906_v31  ;;  %v13029_v48 = vadd.f32 %v6302_v42, %v6190_v24 }
 0x40b   : > { %v9615_v23 = vpop.f32.mrf.mxu0  ;;  %v6102_v8 = vpop.f32.mrf.mxu1 }
 0x40c   : > { %v6193_v50 = vadd.f32 %v6102_v8, %v12909_v34  ;;  %v13032_v21 = vadd.f32 %v9606_v36, %v6195_v46 }
 0x40d   : > { %v6350_v41 = vpop.f32.mrf.mxu0  ;;  %v9573_v4 = vpop.f32.mrf.mxu1 }
 0x40e   : > { %v6196_v3 = vadd.f32 %v9573_v4, %v12912_v6  ;;  %v13035_v14 = vadd.f32 %v6315_v61, %v6193_v50 }
 0x40f   : > { %v9618_v28 = vpop.f32.mrf.mxu0  ;;  %v6105_v53 = vpop.f32.mrf.mxu1 }
 0x410   : > { %v6194_v49 = vadd.f32 %v6105_v53, %v12919_v52  ;;  %v13038_v31 = vadd.f32 %v9607_v15, %v6196_v3 }
 0x411   : > { %v6363_v0 = vpop.f32.mrf.mxu0  ;;  %v9576_v42 = vpop.f32.mrf.mxu1 }
 0x412   : > { %v6199_v24 = vadd.f32 %v9576_v42, %v12922_v27  ;;  %v13041_v34 = vadd.f32 %v6318_v16, %v6194_v49 }
 0x413   : > { %v9619_v18 = vpop.f32.mrf.mxu0  ;;  %v6118_v36 = vpop.f32.mrf.mxu1 }
 0x414   : > { %v6197_v46 = vadd.f32 %v6118_v36, %v12925_v12  ;;  %v13044_v6 = vadd.f32 %v9610_v56, %v6199_v24 }
 0x415   : > { %v6366_v8 = vpop.f32.mrf.mxu0  ;;  %v9577_v61 = vpop.f32.mrf.mxu1 }
 0x416   : > { %v6200_v50 = vadd.f32 %v9577_v61, %v12928_v45  ;;  %v13047_v52 = vadd.f32 %v6331_v11, %v6197_v46 }
 0x417   : > { %v9622_v4 = vpop.f32.mrf.mxu0  ;;  %v6121_v15 = vpop.f32.mrf.mxu1 }
 0x418   : > { %v6198_v3 = vadd.f32 %v6121_v15, %v12935_v10  ;;  %v13050_v27 = vadd.f32 %v9611_v51, %v6200_v50 }
 0x419   : > { %v6379_v53 = vpop.f32.mrf.mxu0  ;;  %v9580_v16 = vpop.f32.mrf.mxu1 }
 0x41a   : > { %v6203_v49 = vadd.f32 %v9580_v16, %v12938_v55  ;;  %v13053_v12 = vadd.f32 %v6334_v47, %v6198_v3 }
 0x41b   : > { %v9623_v42 = vpop.f32.mrf.mxu0  ;;  %v6134_v56 = vpop.f32.mrf.mxu1 }
 0x41c   : > { %v6201_v24 = vadd.f32 %v6134_v56, %v12943_v33  ;;  %v13056_v45 = vadd.f32 %v9614_v54, %v6203_v49 }
 0x41d   : > { %v6382_v36 = vpop.f32.mrf.mxu0  ;;  %v9581_v11 = vpop.f32.mrf.mxu1 }
 0x41e   : > { %v6204_v46 = vadd.f32 %v9581_v11, %v12948_v19  ;;  %v13061_v10 = vadd.f32 %v6347_v7, %v6201_v24 }
 0x41f   : > { %v13059_v61 = vpop.f32.mrf.mxu0  ;;  %v6137_v51 = vpop.f32.mrf.mxu1 }
 0x420   : > { %v6202_v50 = vadd.f32 %v6137_v51, %v12957_v30  ;;  %v13066_v47 = vadd.f32 %v9615_v23, %v6204_v46 }
 0x421   : > { %v13064_v55 = vpop.f32.mrf.mxu0  ;;  %v9584_v15 = vpop.f32.mrf.mxu1 }
 0x422   : > { %v6207_v33 = vadd.f32 %v9584_v15, %v12962_v32  ;;  %v13071_v54 = vadd.f32 %v6350_v41, %v6202_v50 }
 0x423   : > { %v13069_v3 = vpop.f32.mrf.mxu0  ;;  %v6150_v16 = vpop.f32.mrf.mxu1 }
 0x424   : > { %v6205_v19 = vadd.f32 %v6150_v16, %v12967_v35  ;;  %v13076_v7 = vadd.f32 %v9618_v28, %v6207_v33 }
 0x425   : > { %v13074_v49 = vpop.f32.mrf.mxu0  ;;  %v9585_v56 = vpop.f32.mrf.mxu1 }
 0x426   : > { %v6208_v30 = vadd.f32 %v9585_v56, %v12972_v2  ;;  %v13081_v23 = vadd.f32 %v6363_v0, %v6205_v19 }
 0x427   : > { %v13079_v24 = vpop.f32.mrf.mxu0  ;;  %v6153_v11 = vpop.f32.mrf.mxu1 }
 0x428   : > { %v6206_v32 = vadd.f32 %v6153_v11, %v12981_v60  ;;  %v13086_v41 = vadd.f32 %v9619_v18, %v6208_v30 }
 0x429   : > { %v13084_v46 = vpop.f32.mrf.mxu0  ;;  %v9588_v51 = vpop.f32.mrf.mxu1 }
 0x42a   : > { %v6211_v35 = vadd.f32 %v9588_v51, %v12984_v9  ;;  %v13091_v28 = vadd.f32 %v6366_v8, %v6206_v32 }
 0x42b   : > { %v13089_v50 = vpop.f32.mrf.mxu0  ;;  %v6166_v15 = vpop.f32.mrf.mxu1 }
 0x42c   : > { %v6209_v2 = vadd.f32 %v6166_v15, %v12987_v62  ;;  %v13096_v0 = vadd.f32 %v9622_v4, %v6211_v35 }
 0x42d   : > { %v13094_v33 = vpop.f32.mrf.mxu0  ;;  %v9589_v16 = vpop.f32.mrf.mxu1 }
 0x42e   : > { %v6212_v60 = vadd.f32 %v9589_v16, %v12990_v5  ;;  %v13101_v18 = vadd.f32 %v6379_v53, %v6209_v2 }
 0x42f   : > { %v13099_v19 = vpop.f32.mrf.mxu0  ;;  %v6169_v56 = vpop.f32.mrf.mxu1 }
 0x430   : > { %14132 = vst [vmem:[#allocation30_spill] sm:$0xff] %v13099_v19  ;;  %v6210_v9 = vadd.f32 %v6169_v56, %v12995_v20  ;;  %v13106_v8 = vadd.f32 %v9623_v42, %v6212_v60 }
 0x431   : > { %v13104_v30 = vpop.f32.mrf.mxu0  ;;  %v13108_v11 = vpop.f32.mrf.mxu1 }
 0x432   : > { %14133 = vst [vmem:[#allocation29_spill] sm:$0xff] %v13104_v30  ;;  %v13112_v4 = vadd.f32 %v6382_v36, %v6210_v9 }
 0x433   : > { %v13110_v62 = vpop.f32.mrf.mxu0  ;;  %v13114_v32 = vpop.f32.mrf.mxu1 }
 0x434   : > { %14134 = vst [vmem:[#allocation41_spill] sm:$0xff] %v13110_v62 }
 0x435   : > { %v13116_v5 = vpop.f32.mrf.mxu0  ;;  %v13118_v51 = vpop.f32.mrf.mxu1 }
 0x436   : > { %14135 = vst [vmem:[#allocation43_spill] sm:$0xff] %v13116_v5 }
 0x437   : > { %v13120_v53 = vpop.f32.mrf.mxu1  ;;  %v13122_v35 = vpop.f32.mrf.mxu0 }
 0x438   : > { %14136 = vst [vmem:[#allocation35_spill] sm:$0xff] %v13122_v35 }
 0x439   : > { %v13124_v20 = vpop.f32.mrf.mxu1  ;;  %v13128_v15 = vpop.f32.mrf.mxu0 }
 0x43a   : > { %14137 = vst [vmem:[#allocation31_spill] sm:$0xff] %v13128_v15 }
 0x43b   : > { %v13126_v42 = vpop.f32.mrf.mxu1  ;;  %v13135_v60 = vpop.f32.mrf.mxu0 }
 0x43c   : > { %14138 = vst [vmem:[#allocation33_spill] sm:$0xff] %v13135_v60 }
 0x43d   : > { %v13130_v2 = vpop.f32.mrf.mxu1  ;;  %v13143_v62 = vpop.f32.mrf.mxu0 }
 0x43e   : > { %14140 = vst [vmem:[#allocation40_spill] sm:$0xff] %v13143_v62 }
 0x43f   : > { %v6492_v36 = vpop.f32.mrf.mxu1 }
 0x440   : > { %v13133_v16 = vadd.f32 %v6492_v36, %v13017_v17  ;;  %v13151_v36 = vpop.f32.mrf.mxu0 }
 0x441   : > { %v9636_v56 = vpop.f32.mrf.mxu1  ;;  %14141 = vst [vmem:[#allocation42_spill] sm:$0xff] %v13151_v36 }
 0x442   : > { %v13138_v9 = vadd.f32 %v9636_v56, %v13020_v38 }
 0x443   : > { %v6505_v5 = vpop.f32.mrf.mxu1 }
 0x444   : > { %14139 = vst [vmem:[#allocation38_spill] sm:$0xff] %v13138_v9  ;;  %v13141_v35 = vadd.f32 %v6505_v5, %v13023_v39  ;;  %v13156_v9 = vpop.f32.mrf.mxu0 }
 0x445   : > { %v9637_v30 = vpop.f32.mrf.mxu1  ;;  %14142 = vst [vmem:[#allocation44_spill] sm:$0xff] %v13156_v9 }
 0x446   : > { %v13146_v15 = vadd.f32 %v9637_v30, %v13026_v29  ;;  %v13164_v62 = vpop.f32.mrf.mxu0 }
 0x447   : > { %v6508_v19 = vpop.f32.mrf.mxu1  ;;  %14143 = vst [vmem:[#allocation46_spill] sm:$0xff] %v13164_v62 }
 0x448   : > { %v13149_v17 = vadd.f32 %v6508_v19, %v13029_v48  ;;  %v13172_v36 = vpop.f32.mrf.mxu0 }
 0x449   : > { %v9640_v60 = vpop.f32.mrf.mxu1  ;;  %14144 = vst [vmem:[#allocation47_spill] sm:$0xff] %v13172_v36 }
 0x44a   : > { %v13154_v38 = vadd.f32 %v9640_v60, %v13032_v21  ;;  %v13180_v9 = vpop.f32.mrf.mxu0 }
 0x44b   : > { %v6521_v56 = vpop.f32.mrf.mxu1  ;;  %14145 = vst [vmem:[#allocation53_spill] sm:$0xff] %v13180_v9 }
 0x44c   : > { %v13159_v39 = vadd.f32 %v6521_v56, %v13035_v14  ;;  %v13188_v62 = vpop.f32.mrf.mxu0 }
 0x44d   : > { %v9641_v5 = vpop.f32.mrf.mxu1 }
 0x44e   : > { %v13162_v29 = vadd.f32 %v9641_v5, %v13038_v31  ;;  %v13196_v36 = vpop.f32.mrf.mxu0 }
 0x44f   : > { %v6524_v30 = vpop.f32.mrf.mxu1 }
 0x450   : > { %v13167_v48 = vadd.f32 %v6524_v30, %v13041_v34  ;;  %v13204_v9 = vpop.f32.mrf.mxu0 }
 0x451   : > { %v9644_v19 = vpop.f32.mrf.mxu1 }
 0x452   : > { %v13170_v21 = vadd.f32 %v9644_v19, %v13044_v6 }
 0x453   : > { %v6537_v60 = vpop.f32.mrf.mxu1 }
 0x454   : > { %v13175_v14 = vadd.f32 %v6537_v60, %v13047_v52 }
 0x455   : > { %v9645_v56 = vpop.f32.mrf.mxu1 }
 0x456   : > { %v13178_v31 = vadd.f32 %v9645_v56, %v13050_v27 }
 0x457   : > { %v6540_v5 = vpop.f32.mrf.mxu1 }
 0x458   : > { %v13183_v34 = vadd.f32 %v6540_v5, %v13053_v12 }
 0x459   : > { %v9648_v30 = vpop.f32.mrf.mxu1 }
 0x45a   : > { %v13186_v6 = vadd.f32 %v9648_v30, %v13056_v45 }
 0x45b   : > { %v6553_v19 = vpop.f32.mrf.mxu1 }
 0x45c   : > { %v13191_v52 = vadd.f32 %v6553_v19, %v13061_v10 }
 0x45d   : > { %v9649_v60 = vpop.f32.mrf.mxu1 }
 0x45e   : > { %v13194_v27 = vadd.f32 %v9649_v60, %v13066_v47 }
 0x45f   : > { %v6556_v56 = vpop.f32.mrf.mxu1 }
 0x460   : > { %14146 = vst [vmem:[#allocation48_spill] sm:$0xff] %v13194_v27  ;;  %v13199_v12 = vadd.f32 %v6556_v56, %v13071_v54  ;;  %v13212_v27 = vpop.f32.mrf.mxu0  ;;  %v7244_v56 = vlaneseq }
 0x461   : > { %v9652_v5 = vpop.f32.mrf.mxu1 }
 0x462   : > { %14147 = vst [vmem:[#allocation49_spill] sm:$0xff] %v13199_v12  ;;  %v13202_v45 = vadd.f32 %v9652_v5, %v13076_v7  ;;  %v9907_v7 = vmov 1983009808  }
 0x463   : > { %v6569_v30 = vpop.f32.mrf.mxu1  ;;  %v7242_v5 = vunpack.c.l.s4 %v9907_v7 }
 0x464   : > { %14148 = vst [vmem:[#allocation50_spill] sm:$0xff] %v13202_v45  ;;  %v13207_v10 = vadd.f32 %v6569_v30, %v13081_v23  ;;  %v6396_v45 = vadd.f32 %v12941_v43, %v12993_v40  ;;  %v6397_v30 = vadd.f32 %v12955_v58, %v13001_v44  ;;  %v6398_v43 = vadd.f32 %v12970_v37, %v13010_v25  ;;  %v13233_v40 = vpop.f32.mrf.mxu0 }
 0x465   : > { %v9653_v19 = vpop.f32.mrf.mxu1 }
 0x466   : > { %v13210_v47 = vadd.f32 %v9653_v19, %v13086_v41  ;;  %v6394_v41 = vadd.f32 %v12946_v22, %v12998_v57  ;;  %v6400_v19 = vadd.f32 %v12965_v1, %v13007_v59  ;;  %v6602_v7 = vadd.f32 %v13108_v11, %v6396_v45 }
 0x467   : > { %v6572_v60 = vpop.f32.mrf.mxu1  ;;  %v7245_v22 = vshrl.u32 %v7244_v56, 7  ;;  %v6603_v57 = vadd.f32 %v13118_v51, %v6397_v30  ;;  %v6604_v25 = vadd.f32 %v13126_v42, %v6398_v43  ;;  %v13269_v30 = vadd.f32 %v13094_v33, %v13133_v16  ;;  %v14154_v33 = vld [vmem:[#allocation43_spill] sm:$0xff] }
 0x468   : > { %v13215_v54 = vadd.f32 %v6572_v60, %v13091_v28  ;;  %v6395_v28 = vadd.f32 %v12960_v63, %v13004_v13  ;;  %v6600_v58 = vadd.f32 %v13114_v32, %v6394_v41  ;;  %v14149_v63 = vld [vmem:[#allocation39_spill] sm:$0xff]  ;;  %v7243_v13 = vunpack.c.0.s8 %v7242_v5 }
 0x469   : > { %v9656_v12 = vpop.f32.mrf.mxu1  ;;  %v6401_v44 = vadd.f32 %v14149_v63, %v13013_v26  ;;  %v6606_v37 = vadd.f32 %v13124_v20, %v6400_v19  ;;  %v6830_v26 = vadd.f32 %v13059_v61, %v6602_v7  ;;  %v6832_v61 = vadd.f32 %v13084_v46, %v6604_v25  ;;  %v14153_v46 = vld [vmem:[#allocation41_spill] sm:$0xff]  ;;  %v14155_v43 = vld [vmem:[#allocation35_spill] sm:$0xff] }
 0x46a   : > { %v13220_v23 = vadd.f32 %v9656_v12, %v13096_v0  ;;  %v6601_v59 = vadd.f32 %v13120_v53, %v6395_v28  ;;  %v9687_v12 = vpop.f32.mrf.mxu0  ;;  %v13256_v53 = vld [vmem:[%s13775_s4] ss:$0 sm:$0xff]  ;;  %v6828_v20 = vadd.f32 %v13064_v55, %v6600_v58  ;;  %v13259_v42 = vsub.s32 %v7243_v13, %v7245_v22  ;;  %v14150_v55 = vld [vmem:[#allocation38_spill] sm:$0xff]  ;;  %v14156_v58 = vld [vmem:[#allocation31_spill] sm:$0xff] }
 0x46b   : > { %v6585_v60 = vpop.f32.mrf.mxu1  ;;  %v6607_v11 = vadd.f32 %v13130_v2, %v6401_v44  ;;  %v14151_v28 = vld [vmem:[#allocation30_spill] sm:$0xff]  ;;  %v13286_v16 = vadd.f32 %v14154_v33, %v13149_v17  ;;  %v13295_v22 = vadd.f32 %v14155_v43, %v13154_v38  ;;  %v14158_v17 = vld [vmem:[#allocation40_spill] sm:$0xff]  ;;  %v13359_v43 = vadd.f32 %v9687_v12, %v13210_v47 }
 0x46c   : > { %v13236_v0 = vadd.f32 %v6585_v60, %v13101_v18  ;;  %v6829_v56 = vadd.f32 %v13074_v49, %v6601_v59  ;;  %v13273_v19 = vadd.f32 %v14151_v28, %v14150_v55  ;;  %v6800_v49 = vpop.f32.mrf.mxu0  ;;  %v13307_v44 = vadd.f32 %v14158_v17, %v13167_v48  ;;  %v14159_v38 = vld [vmem:[#allocation42_spill] sm:$0xff]  ;;  %v14162_v48 = vld [vmem:[#allocation47_spill] sm:$0xff]  ;;  %v14164_v28 = vld [vmem:[#allocation48_spill] sm:$0xff] }
 0x46d   : > { %v9657_v1 = vpop.f32.mrf.mxu1  ;;  %v6835_v41 = vadd.f32 %v13089_v50, %v6607_v11  ;;  %v13282_v50 = vadd.f32 %v14153_v46, %v13146_v15  ;;  %v14157_v15 = vld [vmem:[#allocation33_spill] sm:$0xff]  ;;  %v13312_v25 = vadd.f32 %v14159_v38, %v13170_v21 }
 0x46e   : > { %v13246_v18 = vadd.f32 %v9657_v1, %v13106_v8  ;;  %v6831_v8 = vadd.f32 %v13069_v3, %v6603_v57  ;;  %v14152_v3 = vld [vmem:[#allocation29_spill] sm:$0xff]  ;;  %v13299_v57 = vadd.f32 %v14156_v58, %v13159_v39  ;;  %v13303_v63 = vadd.f32 %v14157_v15, %v13162_v29  ;;  %v9690_v1 = vpop.f32.mrf.mxu0  ;;  %v14160_v39 = vld [vmem:[#allocation44_spill] sm:$0xff]  ;;  %v14161_v29 = vld [vmem:[#allocation46_spill] sm:$0xff] }
 0x46f   : > { %v6588_v32 = vpop.f32.mrf.mxu1  ;;  %v13277_v60 = vadd.f32 %v14152_v3, %v13141_v35  ;;  %v13365_v58 = vadd.f32 %v9690_v1, %v13220_v23 }
 0x470   : > { %v13250_v51 = vadd.f32 %v6588_v32, %v13112_v4  ;;  %v6834_v4 = vadd.f32 %v13079_v24, %v6606_v37  ;;  %v13316_v32 = vadd.f32 %v14160_v39, %v13175_v14  ;;  %v13335_v14 = vadd.f32 %v13188_v62, %v13191_v52 }
 0x471   : > { %v9696_v45 = vpop.f32.mrf.mxu1 }
 0x472   : > { %v7043_v2 = vadd.f32 %v9696_v45, %v6830_v26  ;;  %v13320_v26 = vadd.f32 %v14161_v29, %v13178_v31  ;;  %v13324_v45 = vadd.f32 %v14162_v48, %v13183_v34  ;;  %v13340_v34 = vadd.f32 %v13196_v36, %v14164_v28 }
 0x473   : > { %v6914_v5 = vpop.f32.mrf.mxu1 }
 0x474   : > { %v7082_v24 = vadd.f32 %v13256_v53, %v7043_v2  ;;  %v7041_v7 = vadd.f32 %v6914_v5, %v6828_v20  ;;  %v14163_v20 = vld [vmem:[#allocation53_spill] sm:$0xff] }
 0x475   : > { %v9697_v35 = vpop.f32.mrf.mxu1 }
 0x476   : > { %v7114_v13 = vmax.f32 %v7082_v24, 0.0  ;;  %v7080_v59 = vadd.f32 %v13256_v53, %v7041_v7  ;;  %v7044_v37 = vadd.f32 %v9697_v35, %v6831_v8  ;;  %v13328_v8 = vadd.f32 %v14163_v20, %v13186_v6  ;;  %v14165_v6 = vld [vmem:[#allocation49_spill] sm:$0xff]  ;;  %v14166_v24 = vld [vmem:[#allocation50_spill] sm:$0xff] }
 0x477   : > { %v6917_v11 = vpop.f32.mrf.mxu1  ;;  %v13344_v3 = vadd.f32 %v13204_v9, %v14165_v6  ;;  %v13348_v7 = vadd.f32 %v13212_v27, %v14166_v24  ;;  %v13356_v9 = vadd.f32 %v13233_v40, %v13207_v10  ;;  %v13362_v27 = vadd.f32 %v6800_v49, %v13215_v54 }
 0x478   : > { %7146 = vst.msk [vmem:[%s13291_s18 + $0x10] sm:$0xff] %vm4835_vm3, %v7114_v13  ;;  %v7112_v21 = vmax.f32 %v7080_v59, 0.0  ;;  %v7083_v2 = vadd.f32 %v13256_v53, %v7044_v37  ;;  %v7042_v5 = vadd.f32 %v6917_v11, %v6829_v56  ;;  %v7177_v31 = vsel %vm4835_vm3, %v7114_v13, -inf  ;;  %v6813_v56 = vpop.f32.mrf.mxu0 }
 0x479   : > { %v9700_v55 = vpop.f32.mrf.mxu1  ;;  %v13371_v13 = vadd.f32 %v6813_v56, %v13236_v0 }
 0x47a   : > { %7144 = vst.msk [vmem:[%s13291_s18] sm:$0xff] %vm4835_vm3, %v7112_v21  ;;  %v7176_v62 = vsel %vm4835_vm3, %v7112_v21, -inf  ;;  %v7115_v52 = vmax.f32 %v7083_v2, 0.0  ;;  %v7081_v46 = vadd.f32 %v13256_v53, %v7042_v5  ;;  %v7047_v33 = vadd.f32 %v9700_v55, %v6834_v4 }
 0x47b   : > { %v7178_v36 = vmax.f32 %v7176_v62, %v7177_v31  ;;  %v6930_v35 = vpop.f32.mrf.mxu1 }
 0x47c   : > { %7147 = vst.msk [vmem:[%s13291_s18 + $0x18] sm:$0xff] %vm4835_vm3, %v7115_v52  ;;  %v7113_v15 = vmax.f32 %v7081_v46, 0.0  ;;  %v7086_v4 = vadd.f32 %v13256_v53, %v7047_v33  ;;  %v7045_v17 = vadd.f32 %v6930_v35, %v6832_v61  ;;  %v7180_v40 = vsel %vm4835_vm3, %v7115_v52, -inf }
 0x47d   : > { %v7240_v10 = vcombine.high %v7178_v36, %v7178_v36  ;;  %v7247_v47 = vrot.slane %v7178_v36, %v13259_v42  ;;  %v9701_v54 = vpop.f32.mrf.mxu1 }
 0x47e   : > { %7145 = vst.msk [vmem:[%s13291_s18 + $0x8] sm:$0xff] %vm4835_vm3, %v7113_v15  ;;  %v7179_v23 = vsel %vm4835_vm3, %v7113_v15, -inf  ;;  %v7118_v12 = vmax.f32 %v7086_v4, 0.0  ;;  %v7084_v49 = vadd.f32 %v13256_v53, %v7045_v17  ;;  %v7048_v1 = vadd.f32 %v9701_v54, %v6835_v41 }
 0x47f   : > { %v7254_v61 = vrot.slane %v7240_v10, %v13259_v42  ;;  %v7255_v59 = vcombine.high %v7247_v47, %v7247_v47  ;;  %v7577_v0 = vsel %vm7576_vm4, %v7247_v47, -inf  ;;  %v7181_v37 = vmax.f32 %v7179_v23, %v7180_v40 }
 0x480   : > { %v7578_v38 = vrot.slane %v7577_v0, 4  ;;  %7150 = vst.msk [vmem:[%s13291_s18 + $0x30] sm:$0xff] %vm4835_vm3, %v7118_v12  ;;  %v7183_v11 = vsel %vm4835_vm3, %v7118_v12, -inf  ;;  %v7116_v39 = vmax.f32 %v7084_v49, 0.0  ;;  %v13385_v29 = vadd.f32 %v13256_v53, %v7048_v1 }
 0x481   : > { %v7256_v48 = vcombine.high %v7254_v61, %v7254_v61  ;;  %v7584_v20 = vsel %vm7576_vm4, %v7255_v59, -inf  ;;  %v7591_v41 = vsel %vm7576_vm4, %v7254_v61, -inf  ;;  %v7257_v21 = vcombine.high %v7181_v37, %v7181_v37 }
 0x482   : > { %v7579_v2 = vmax.f32 %v7577_v0, %v7578_v38  ;;  %v7585_v5 = vrot.slane %v7584_v20, 4  ;;  %v7592_v31 = vrot.slane %v7591_v41, 4  ;;  %v7264_v55 = vrot.slane %v7181_v37, %v13259_v42  ;;  %7148 = vst.msk [vmem:[%s13291_s18 + $0x20] sm:$0xff] %vm4835_vm3, %v7116_v39 }
 0x483   : > { %v7598_v28 = vsel %vm7576_vm4, %v7256_v48, -inf  ;;  %v7271_v6 = vrot.slane %v7257_v21, %v13259_v42  ;;  %v7182_v24 = vsel %vm4835_vm3, %v7116_v39, -inf  ;;  %v7119_v56 = vmax.f32 %v13385_v29, 0.0 }
 0x484   : > { %v7580_v62 = vrot.slane %v7579_v2, 2  ;;  %v7586_v52 = vmax.f32 %v7584_v20, %v7585_v5  ;;  %v7593_v46 = vmax.f32 %v7591_v41, %v7592_v31  ;;  %v7599_v33 = vrot.slane %v7598_v28, 4  ;;  %v6933_v5 = vpop.f32.mrf.mxu1 }
 0x485   : > { %v7272_v36 = vcombine.high %v7264_v55, %v7264_v55  ;;  %v7273_v35 = vcombine.high %v7271_v6, %v7271_v6  ;;  %v7605_v15 = vsel %vm7576_vm4, %v7264_v55, -inf  ;;  %v7619_v4 = vsel %vm7576_vm4, %v7271_v6, -inf  ;;  %7151 = vst.msk [vmem:[%s13291_s18 + $0x38] sm:$0xff] %vm4835_vm3, %v7119_v56 }
 0x486   : > { %v7581_v17 = vmax.f32 %v7579_v2, %v7580_v62  ;;  %v7587_v10 = vrot.slane %v7586_v52, 2  ;;  %v7594_v47 = vrot.slane %v7593_v46, 2  ;;  %v7600_v40 = vmax.f32 %v7598_v28, %v7599_v33 }
 0x487   : > { %v7606_v54 = vrot.slane %v7605_v15, 4  ;;  %v7612_v23 = vsel %vm7576_vm4, %v7272_v36, -inf  ;;  %v7620_v12 = vrot.slane %v7619_v4, 4  ;;  %v7626_v49 = vsel %vm7576_vm4, %v7273_v35, -inf }
 0x488   : > { %v7582_v1 = vrot.slane %v7581_v17, 1  ;;  %v7588_v61 = vmax.f32 %v7586_v52, %v7587_v10  ;;  %v7595_v59 = vmax.f32 %v7593_v46, %v7594_v47  ;;  %v7601_v0 = vrot.slane %v7600_v40, 2 }
 0x489   : > { %v7607_v37 = vmax.f32 %v7605_v15, %v7606_v54  ;;  %v7613_v38 = vrot.slane %v7612_v23, 4  ;;  %v7621_v39 = vmax.f32 %v7619_v4, %v7620_v12  ;;  %v7627_v48 = vrot.slane %v7626_v49, 4  ;;  %v9704_v54 = vpop.f32.mrf.mxu1 }
 0x48a   : > { %v7583_v20 = vmax.f32 %v7581_v17, %v7582_v1  ;;  %v7589_v41 = vrot.slane %v7588_v61, 1  ;;  %v7596_v21 = vrot.slane %v7595_v59, 1  ;;  %v7602_v2 = vmax.f32 %v7600_v40, %v7601_v0 }
 0x48b   : > { %v7608_v31 = vrot.slane %v7607_v37, 2  ;;  %v7614_v55 = vmax.f32 %v7612_v23, %v7613_v38  ;;  %v7622_v28 = vrot.slane %v7621_v39, 2  ;;  %v7628_v6 = vmax.f32 %v7626_v49, %v7627_v48 }
 0x48c   : > { %v7590_v62 = vmax.f32 %v7588_v61, %v7589_v41  ;;  %v7597_v52 = vmax.f32 %v7595_v59, %v7596_v21  ;;  %v7603_v46 = vrot.slane %v7602_v2, 1  ;;  %v7184_v33 = vmax.f32 %v7182_v24, %v7183_v11 }
 0x48d   : > { %v7609_v36 = vmax.f32 %v7607_v37, %v7608_v31  ;;  %v7615_v35 = vrot.slane %v7614_v55, 2  ;;  %v7623_v15 = vmax.f32 %v7621_v39, %v7622_v28  ;;  %v7629_v4 = vrot.slane %v7628_v6, 2 }
 0x48e   : > { %v7604_v17 = vmax.f32 %v7602_v2, %v7603_v46  ;;  %v8090_v10 = vsel %vm8089_vm6, %v7590_v62, %v7583_v20  ;;  %v7274_v47 = vcombine.high %v7184_v33, %v7184_v33  ;;  %v7281_v40 = vrot.slane %v7184_v33, %v13259_v42  ;;  %v6946_v2 = vpop.f32.mrf.mxu1 }
 0x48f   : > { %v8092_v23 = vsel %vm8091_vm8, %v7597_v52, %v8090_v10  ;;  %v7610_v12 = vrot.slane %v7609_v36, 1  ;;  %v7616_v49 = vmax.f32 %v7614_v55, %v7615_v35  ;;  %v7624_v1 = vrot.slane %v7623_v15, 1 }
 0x490   : > { %v7630_v61 = vmax.f32 %v7628_v6, %v7629_v4  ;;  %v8094_v11 = vsel %vm8093_vm11, %v7604_v17, %v8092_v23  ;;  %v7288_v24 = vrot.slane %v7274_v47, %v13259_v42  ;;  %v7289_v59 = vcombine.high %v7281_v40, %v7281_v40  ;;  %v9705_v23 = vpop.f32.mrf.mxu1 }
 0x491   : > { %v7611_v0 = vmax.f32 %v7609_v36, %v7610_v12  ;;  %v7617_v37 = vrot.slane %v7616_v49, 1  ;;  %v7625_v38 = vmax.f32 %v7623_v15, %v7624_v1  ;;  %v7633_v39 = vsel %vm7576_vm4, %v7281_v40, -inf }
 0x492   : > { %v7631_v48 = vrot.slane %v7630_v61, 1  ;;  %v7290_v20 = vcombine.high %v7288_v24, %v7288_v24  ;;  %v7634_v41 = vrot.slane %v7633_v39, 4  ;;  %v7640_v21 = vsel %vm7576_vm4, %v7289_v59, -inf }
 0x493   : > { %v7618_v31 = vmax.f32 %v7616_v49, %v7617_v37  ;;  %v8096_v55 = vsel %vm8095_vm12, %v7611_v0, %v8094_v11  ;;  %v7641_v28 = vrot.slane %v7640_v21, 4  ;;  %v7647_v6 = vsel %vm7576_vm4, %v7288_v24, -inf }
 0x494   : > { %v7632_v62 = vmax.f32 %v7630_v61, %v7631_v48  ;;  %v7635_v52 = vmax.f32 %v7633_v39, %v7634_v41  ;;  %v7648_v46 = vrot.slane %v7647_v6, 4  ;;  %v7654_v33 = vsel %vm7576_vm4, %v7290_v20, -inf }
 0x495   : > { %v8098_v36 = vsel %vm8097_vm13, %v7618_v31, %v8096_v55  ;;  %v7642_v35 = vmax.f32 %v7640_v21, %v7641_v28  ;;  %v7655_v15 = vrot.slane %v7654_v33, 4  ;;  %v7186_v4 = vsel %vm4835_vm3, %v7119_v56, -inf }
 0x496   : > { %v8100_v17 = vsel %vm8099_vm14, %v7625_v38, %v8098_v36  ;;  %v7636_v10 = vrot.slane %v7635_v52, 2  ;;  %v7649_v47 = vmax.f32 %v7647_v6, %v7648_v46  ;;  %v7046_v40 = vadd.f32 %v6933_v5, %v13269_v30 }
 0x497   : > { %v8102_v12 = vsel %vm8101_vm15, %v7632_v62, %v8100_v17  ;;  %v7643_v49 = vrot.slane %v7642_v35, 2  ;;  %v7656_v1 = vmax.f32 %v7654_v33, %v7655_v15  ;;  %v7051_v61 = vadd.f32 %v9704_v54, %v13273_v19 }
 0x498   : > { %8160 = vst.msk [vmem:[%s13425_s26] sm:$0xff] %vm4835_vm3, %v8102_v12  ;;  %v7637_v29 = vmax.f32 %v7635_v52, %v7636_v10  ;;  %v7650_v56 = vrot.slane %v7649_v47, 2  ;;  %v7085_v11 = vadd.f32 %v13256_v53, %v7046_v40  ;;  %v7049_v24 = vadd.f32 %v6946_v2, %v13277_v60  ;;  %v6949_v60 = vpop.f32.mrf.mxu1 }
 0x499   : > { %v7644_v30 = vmax.f32 %v7642_v35, %v7643_v49  ;;  %v7657_v5 = vrot.slane %v7656_v1, 2  ;;  %v7090_v59 = vadd.f32 %v13256_v53, %v7051_v61  ;;  %v7052_v0 = vadd.f32 %v9705_v23, %v13282_v50 }
 0x49a   : > { %v7638_v37 = vrot.slane %v7637_v29, 1  ;;  %v7651_v19 = vmax.f32 %v7649_v47, %v7650_v56  ;;  %v7117_v54 = vmax.f32 %v7085_v11, 0.0  ;;  %v7088_v38 = vadd.f32 %v13256_v53, %v7049_v24  ;;  %v9708_v12 = vpop.f32.mrf.mxu1 }
 0x49b   : > { %v7645_v39 = vrot.slane %v7644_v30, 1  ;;  %v7658_v48 = vmax.f32 %v7656_v1, %v7657_v5  ;;  %v7122_v20 = vmax.f32 %v7090_v59, 0.0  ;;  %v7091_v41 = vadd.f32 %v13256_v53, %v7052_v0 }
 0x49c   : > { %v7639_v21 = vmax.f32 %v7637_v29, %v7638_v37  ;;  %v7652_v2 = vrot.slane %v7651_v19, 1  ;;  %7149 = vst.msk [vmem:[%s13291_s18 + $0x28] sm:$0xff] %vm4835_vm3, %v7117_v54  ;;  %v7185_v31 = vsel %vm4835_vm3, %v7117_v54, -inf  ;;  %v7120_v50 = vmax.f32 %v7088_v38, 0.0 }
 0x49d   : > { %v7646_v55 = vmax.f32 %v7644_v30, %v7645_v39  ;;  %v7659_v28 = vrot.slane %v7658_v48, 1  ;;  %v7187_v6 = vmax.f32 %v7185_v31, %v7186_v4  ;;  %7154 = vst.msk [vmem:[%s13291_s18 + $0x50] sm:$0xff] %vm4835_vm3, %v7122_v20  ;;  %v7189_v62 = vsel %vm4835_vm3, %v7122_v20, -inf }
 0x49e   : > { %v7653_v52 = vmax.f32 %v7651_v19, %v7652_v2  ;;  %7152 = vst.msk [vmem:[%s13291_s18 + $0x40] sm:$0xff] %vm4835_vm3, %v7120_v50  ;;  %v7188_v46 = vsel %vm4835_vm3, %v7120_v50, -inf  ;;  %v7123_v33 = vmax.f32 %v7091_v41, 0.0  ;;  %v7050_v36 = vadd.f32 %v6949_v60, %v13286_v16 }
 0x49f   : > { %v7660_v35 = vmax.f32 %v7658_v48, %v7659_v28  ;;  %v8103_v15 = vsel %vm8089_vm6, %v7646_v55, %v7639_v21  ;;  %v7291_v17 = vcombine.high %v7187_v6, %v7187_v6  ;;  %v7298_v10 = vrot.slane %v7187_v6, %v13259_v42 }
 0x4a0   : > { %v8104_v4 = vsel %vm8091_vm8, %v7653_v52, %v8103_v15  ;;  %v7190_v47 = vmax.f32 %v7188_v46, %v7189_v62  ;;  %7155 = vst.msk [vmem:[%s13291_s18 + $0x58] sm:$0xff] %vm4835_vm3, %v7123_v33  ;;  %v13451_v40 = vsel %vm4835_vm3, %v7123_v33, -inf  ;;  %v7089_v23 = vadd.f32 %v13256_v53, %v7050_v36 }
 0x4a1   : > { %v7305_v49 = vrot.slane %v7291_v17, %v13259_v42  ;;  %v7306_v16 = vcombine.high %v7298_v10, %v7298_v10  ;;  %v7661_v1 = vsel %vm7576_vm4, %v7298_v10, -inf  ;;  %v8105_v61 = vsel %vm8093_vm11, %v7660_v35, %v8104_v4 }
 0x4a2   : > { %v7662_v29 = vrot.slane %v7661_v1, 4  ;;  %v7308_v56 = vcombine.high %v7190_v47, %v7190_v47  ;;  %v7315_v11 = vrot.slane %v7190_v47, %v13259_v42  ;;  %v7121_v24 = vmax.f32 %v7089_v23, 0.0 }
 0x4a3   : > { %v7307_v30 = vcombine.high %v7305_v49, %v7305_v49  ;;  %v7668_v5 = vsel %vm7576_vm4, %v7306_v16, -inf  ;;  %v7675_v59 = vsel %vm7576_vm4, %v7305_v49, -inf  ;;  %v7055_v0 = vadd.f32 %v9708_v12, %v13295_v22 }
 0x4a4   : > { %v7663_v37 = vmax.f32 %v7661_v1, %v7662_v29  ;;  %v7669_v19 = vrot.slane %v7668_v5, 4  ;;  %v7676_v54 = vrot.slane %v7675_v59, 4  ;;  %v7322_v38 = vrot.slane %v7308_v56, %v13259_v42  ;;  %7153 = vst.msk [vmem:[%s13291_s18 + $0x48] sm:$0xff] %vm4835_vm3, %v7121_v24 }
 0x4a5   : > { %v7682_v39 = vsel %vm7576_vm4, %v7307_v30, -inf  ;;  %v7323_v48 = vcombine.high %v7315_v11, %v7315_v11  ;;  %v7689_v20 = vsel %vm7576_vm4, %v7315_v11, -inf  ;;  %v7191_v41 = vsel %vm4835_vm3, %v7121_v24, -inf  ;;  %v6962_v24 = vpop.f32.mrf.mxu1 }
 0x4a6   : > { %v7664_v60 = vrot.slane %v7663_v37, 2  ;;  %v7670_v21 = vmax.f32 %v7668_v5, %v7669_v19  ;;  %v7677_v2 = vmax.f32 %v7675_v59, %v7676_v54  ;;  %v7683_v31 = vrot.slane %v7682_v39, 4 }
 0x4a7   : > { %v7324_v50 = vcombine.high %v7322_v38, %v7322_v38  ;;  %v7690_v22 = vrot.slane %v7689_v20, 4  ;;  %v7696_v55 = vsel %vm7576_vm4, %v7323_v48, -inf  ;;  %v7703_v28 = vsel %vm7576_vm4, %v7322_v38, -inf }
 0x4a8   : > { %v7665_v6 = vmax.f32 %v7663_v37, %v7664_v60  ;;  %v7671_v62 = vrot.slane %v7670_v21, 2  ;;  %v7678_v52 = vrot.slane %v7677_v2, 2  ;;  %v7684_v46 = vmax.f32 %v7682_v39, %v7683_v31 }
 0x4a9   : > { %v7691_v33 = vmax.f32 %v7689_v20, %v7690_v22  ;;  %v7697_v36 = vrot.slane %v7696_v55, 4  ;;  %v7704_v35 = vrot.slane %v7703_v28, 4  ;;  %v7710_v15 = vsel %vm7576_vm4, %v7324_v50, -inf }
 0x4aa   : > { %v7666_v17 = vrot.slane %v7665_v6, 1  ;;  %v7672_v10 = vmax.f32 %v7670_v21, %v7671_v62  ;;  %v7679_v4 = vmax.f32 %v7677_v2, %v7678_v52  ;;  %v7685_v47 = vrot.slane %v7684_v46, 2 }
 0x4ab   : > { %v7692_v23 = vrot.slane %v7691_v33, 2  ;;  %v7698_v12 = vmax.f32 %v7696_v55, %v7697_v36  ;;  %v7705_v49 = vmax.f32 %v7703_v28, %v7704_v35  ;;  %v7711_v16 = vrot.slane %v7710_v15, 4  ;;  %v9709_v55 = vpop.f32.mrf.mxu1 }
 0x4ac   : > { %v7667_v1 = vmax.f32 %v7665_v6, %v7666_v17  ;;  %v7673_v29 = vrot.slane %v7672_v10, 1  ;;  %v7680_v56 = vrot.slane %v7679_v4, 1  ;;  %v7686_v11 = vmax.f32 %v7684_v46, %v7685_v47 }
 0x4ad   : > { %v7693_v30 = vmax.f32 %v7691_v33, %v7692_v23  ;;  %v7699_v5 = vrot.slane %v7698_v12, 2  ;;  %v7706_v59 = vrot.slane %v7705_v49, 2  ;;  %v7712_v37 = vmax.f32 %v7710_v15, %v7711_v16  ;;  %v6965_v47 = vpop.f32.mrf.mxu1 }
 0x4ae   : > { %v7674_v19 = vmax.f32 %v7672_v10, %v7673_v29  ;;  %v7681_v54 = vmax.f32 %v7679_v4, %v7680_v56  ;;  %v7687_v38 = vrot.slane %v7686_v11, 1  ;;  %v8106_v39 = vsel %vm8095_vm12, %v7667_v1, %v8105_v61 }
 0x4af   : > { %v7694_v48 = vrot.slane %v7693_v30, 1  ;;  %v7700_v20 = vmax.f32 %v7698_v12, %v7699_v5  ;;  %v7707_v60 = vmax.f32 %v7705_v49, %v7706_v59  ;;  %v7713_v21 = vrot.slane %v7712_v37, 2 }
 0x4b0   : > { %v7688_v2 = vmax.f32 %v7686_v11, %v7687_v38  ;;  %v8107_v31 = vsel %vm8097_vm13, %v7674_v19, %v8106_v39  ;;  %v7193_v50 = vmax.f32 %v7191_v41, %v13451_v40  ;;  %v7094_v22 = vadd.f32 %v13256_v53, %v7055_v0  ;;  %v9712_v38 = vpop.f32.mrf.mxu1 }
 0x4b1   : > { %v8108_v28 = vsel %vm8099_vm14, %v7681_v54, %v8107_v31  ;;  %v7695_v6 = vmax.f32 %v7693_v30, %v7694_v48  ;;  %v7701_v62 = vrot.slane %v7700_v20, 1  ;;  %v7708_v52 = vrot.slane %v7707_v60, 1 }
 0x4b2   : > { %v8109_v61 = vsel %vm8101_vm15, %v7688_v2, %v8108_v28  ;;  %v7714_v46 = vmax.f32 %v7712_v37, %v7713_v21  ;;  %v7325_v33 = vcombine.high %v7193_v50, %v7193_v50  ;;  %v7332_v36 = vrot.slane %v7193_v50, %v13259_v42 }
 0x4b3   : > { %8161 = vst.msk [vmem:[%s13425_s26 + $0x8] sm:$0xff] %vm4835_vm3, %v8109_v61  ;;  %v7702_v35 = vmax.f32 %v7700_v20, %v7701_v62  ;;  %v7709_v15 = vmax.f32 %v7707_v60, %v7708_v52  ;;  %v7126_v40 = vmax.f32 %v7094_v22, 0.0  ;;  %v7053_v0 = vadd.f32 %v6962_v24, %v13299_v57 }
 0x4b4   : > { %v7715_v41 = vrot.slane %v7714_v46, 1  ;;  %v7339_v17 = vrot.slane %v7325_v33, %v13259_v42  ;;  %v7340_v10 = vcombine.high %v7332_v36, %v7332_v36  ;;  %v7717_v4 = vsel %vm7576_vm4, %v7332_v36, -inf }
 0x4b5   : > { %v8110_v23 = vsel %vm8089_vm6, %v7702_v35, %v7695_v6  ;;  %v7718_v12 = vrot.slane %v7717_v4, 4  ;;  %7158 = vst.msk [vmem:[%s13291_s18 + $0x70] sm:$0xff] %vm4835_vm3, %v7126_v40  ;;  %v7195_v49 = vsel %vm4835_vm3, %v7126_v40, -inf  ;;  %v7092_v16 = vadd.f32 %v13256_v53, %v7053_v0 }
 0x4b6   : > { %v7716_v1 = vmax.f32 %v7714_v46, %v7715_v41  ;;  %v8111_v57 = vsel %vm8091_vm8, %v7709_v15, %v8110_v23  ;;  %v7341_v29 = vcombine.high %v7339_v17, %v7339_v17  ;;  %v7724_v56 = vsel %vm7576_vm4, %v7340_v10, -inf }
 0x4b7   : > { %v7719_v11 = vmax.f32 %v7717_v4, %v7718_v12  ;;  %v7725_v24 = vrot.slane %v7724_v56, 4  ;;  %v7731_v30 = vsel %vm7576_vm4, %v7339_v17, -inf  ;;  %v7124_v5 = vmax.f32 %v7092_v16, 0.0 }
 0x4b8   : > { %v7732_v59 = vrot.slane %v7731_v30, 4  ;;  %v7738_v37 = vsel %vm7576_vm4, %v7341_v29, -inf  ;;  %v8112_v19 = vsel %vm8093_vm11, %v7716_v1, %v8111_v57  ;;  %v7056_v54 = vadd.f32 %v9709_v55, %v13303_v63 }
 0x4b9   : > { %v7720_v39 = vrot.slane %v7719_v11, 2  ;;  %v7726_v48 = vmax.f32 %v7724_v56, %v7725_v24  ;;  %v7739_v20 = vrot.slane %v7738_v37, 4  ;;  %7156 = vst.msk [vmem:[%s13291_s18 + $0x60] sm:$0xff] %vm4835_vm3, %v7124_v5  ;;  %v7194_v60 = vsel %vm4835_vm3, %v7124_v5, -inf }
 0x4ba   : > { %v7733_v21 = vmax.f32 %v7731_v30, %v7732_v59  ;;  %v7196_v2 = vmax.f32 %v7194_v60, %v7195_v49  ;;  %v7095_v31 = vadd.f32 %v13256_v53, %v7056_v54  ;;  %v7054_v50 = vadd.f32 %v6965_v47, %v13307_v44  ;;  %v6978_v49 = vpop.f32.mrf.mxu1 }
 0x4bb   : > { %v7721_v22 = vmax.f32 %v7719_v11, %v7720_v39  ;;  %v7727_v28 = vrot.slane %v7726_v48, 2  ;;  %v7740_v6 = vmax.f32 %v7738_v37, %v7739_v20  ;;  %v7059_v63 = vadd.f32 %v9712_v38, %v13312_v25 }
 0x4bc   : > { %v7734_v55 = vrot.slane %v7733_v21, 2  ;;  %v7342_v62 = vcombine.high %v7196_v2, %v7196_v2  ;;  %v7349_v52 = vrot.slane %v7196_v2, %v13259_v42  ;;  %v7127_v61 = vmax.f32 %v7095_v31, 0.0 }
 0x4bd   : > { %v7722_v46 = vrot.slane %v7721_v22, 1  ;;  %v7728_v33 = vmax.f32 %v7726_v48, %v7727_v28  ;;  %v7741_v36 = vrot.slane %v7740_v6, 2  ;;  %v7093_v35 = vadd.f32 %v13256_v53, %v7054_v50 }
 0x4be   : > { %v7735_v15 = vmax.f32 %v7733_v21, %v7734_v55  ;;  %v7356_v40 = vrot.slane %v7342_v62, %v13259_v42  ;;  %v7357_v44 = vcombine.high %v7349_v52, %v7349_v52  ;;  %v7745_v0 = vsel %vm7576_vm4, %v7349_v52, -inf  ;;  %7159 = vst.msk [vmem:[%s13291_s18 + $0x78] sm:$0xff] %vm4835_vm3, %v7127_v61 }
 0x4bf   : > { %v7723_v41 = vmax.f32 %v7721_v22, %v7722_v46  ;;  %v7729_v25 = vrot.slane %v7728_v33, 1  ;;  %v7742_v17 = vmax.f32 %v7740_v6, %v7741_v36  ;;  %v7746_v10 = vrot.slane %v7745_v0, 4 }
 0x4c0   : > { %v7736_v4 = vrot.slane %v7735_v15, 1  ;;  %v7358_v47 = vcombine.high %v7356_v40, %v7356_v40  ;;  %v7752_v23 = vsel %vm7576_vm4, %v7357_v44, -inf  ;;  %v7759_v12 = vsel %vm7576_vm4, %v7356_v40, -inf }
 0x4c1   : > { %v7730_v16 = vmax.f32 %v7728_v33, %v7729_v25  ;;  %v7743_v1 = vrot.slane %v7742_v17, 1  ;;  %v8113_v57 = vsel %vm8095_vm12, %v7723_v41, %v8112_v19  ;;  %v7747_v29 = vmax.f32 %v7745_v0, %v7746_v10  ;;  %v9713_v19 = vpop.f32.mrf.mxu1 }
 0x4c2   : > { %v7737_v56 = vmax.f32 %v7735_v15, %v7736_v4  ;;  %v7753_v11 = vrot.slane %v7752_v23, 4  ;;  %v7760_v24 = vrot.slane %v7759_v12, 4  ;;  %v7766_v30 = vsel %vm7576_vm4, %v7358_v47, -inf }
 0x4c3   : > { %v7744_v5 = vmax.f32 %v7742_v17, %v7743_v1  ;;  %v8114_v59 = vsel %vm8097_vm13, %v7730_v16, %v8113_v57  ;;  %v7748_v37 = vrot.slane %v7747_v29, 2  ;;  %v7767_v54 = vrot.slane %v7766_v30, 4  ;;  %v6981_v47 = vpop.f32.mrf.mxu1 }
 0x4c4   : > { %v8115_v38 = vsel %vm8099_vm14, %v7737_v56, %v8114_v59  ;;  %v7754_v39 = vmax.f32 %v7752_v23, %v7753_v11  ;;  %v7761_v48 = vmax.f32 %v7759_v12, %v7760_v24  ;;  %v7198_v20 = vsel %vm4835_vm3, %v7127_v61, -inf }
 0x4c5   : > { %v8116_v60 = vsel %vm8101_vm15, %v7744_v5, %v8115_v38  ;;  %v7749_v21 = vmax.f32 %v7747_v29, %v7748_v37  ;;  %v7768_v2 = vmax.f32 %v7766_v30, %v7767_v54  ;;  %v7125_v31 = vmax.f32 %v7093_v35, 0.0 }
 0x4c6   : > { %8162 = vst.msk [vmem:[%s13425_s26 + $0x10] sm:$0xff] %vm4835_vm3, %v8116_v60  ;;  %v7755_v50 = vrot.slane %v7754_v39, 2  ;;  %v7762_v22 = vrot.slane %v7761_v48, 2  ;;  %v7098_v28 = vadd.f32 %v13256_v53, %v7059_v63  ;;  %v7057_v6 = vadd.f32 %v6978_v49, %v13316_v32 }
 0x4c7   : > { %v7750_v55 = vrot.slane %v7749_v21, 1  ;;  %v7769_v62 = vrot.slane %v7768_v2, 2  ;;  %7157 = vst.msk [vmem:[%s13291_s18 + $0x68] sm:$0xff] %vm4835_vm3, %v7125_v31  ;;  %v7197_v52 = vsel %vm4835_vm3, %v7125_v31, -inf  ;;  %v7060_v61 = vadd.f32 %v9713_v19, %v13320_v26 }
 0x4c8   : > { %v7756_v46 = vmax.f32 %v7754_v39, %v7755_v50  ;;  %v7763_v33 = vmax.f32 %v7761_v48, %v7762_v22  ;;  %v7199_v36 = vmax.f32 %v7197_v52, %v7198_v20  ;;  %v7130_v35 = vmax.f32 %v7098_v28, 0.0  ;;  %v9716_v39 = vpop.f32.mrf.mxu1 }
 0x4c9   : > { %v7751_v15 = vmax.f32 %v7749_v21, %v7750_v55  ;;  %v7770_v40 = vmax.f32 %v7768_v2, %v7769_v62  ;;  %v7096_v44 = vadd.f32 %v13256_v53, %v7057_v6  ;;  %v7099_v63 = vadd.f32 %v13256_v53, %v7060_v61 }
 0x4ca   : > { %v7757_v32 = vrot.slane %v7756_v46, 1  ;;  %v7764_v0 = vrot.slane %v7763_v33, 1  ;;  %v7359_v41 = vcombine.high %v7199_v36, %v7199_v36  ;;  %v7366_v25 = vrot.slane %v7199_v36, %v13259_v42  ;;  %7162 = vst.msk [vmem:[%s13291_s18 + $0x90] sm:$0xff] %vm4835_vm3, %v7130_v35 }
 0x4cb   : > { %v7771_v26 = vrot.slane %v7770_v40, 1  ;;  %v7201_v17 = vsel %vm4835_vm3, %v7130_v35, -inf  ;;  %v7128_v10 = vmax.f32 %v7096_v44, 0.0  ;;  %v7131_v4 = vmax.f32 %v7099_v63, 0.0 }
 0x4cc   : > { %v7758_v23 = vmax.f32 %v7756_v46, %v7757_v32  ;;  %v7765_v12 = vmax.f32 %v7763_v33, %v7764_v0  ;;  %v7373_v49 = vrot.slane %v7359_v41, %v13259_v42  ;;  %v7374_v16 = vcombine.high %v7366_v25, %v7366_v25 }
 0x4cd   : > { %v7772_v1 = vmax.f32 %v7770_v40, %v7771_v26  ;;  %v7773_v57 = vsel %vm7576_vm4, %v7366_v25, -inf  ;;  %7160 = vst.msk [vmem:[%s13291_s18 + $0x80] sm:$0xff] %vm4835_vm3, %v7128_v10  ;;  %v7200_v29 = vsel %vm4835_vm3, %v7128_v10, -inf  ;;  %7163 = vst.msk [vmem:[%s13291_s18 + $0x98] sm:$0xff] %vm4835_vm3, %v7131_v4  ;;  %v13535_v56 = vsel %vm4835_vm3, %v7131_v4, -inf }
 0x4ce   : > { %v8117_v11 = vsel %vm8089_vm6, %v7758_v23, %v7751_v15  ;;  %v7375_v24 = vcombine.high %v7373_v49, %v7373_v49  ;;  %v7774_v30 = vrot.slane %v7773_v57, 4  ;;  %v7780_v5 = vsel %vm7576_vm4, %v7374_v16, -inf }
 0x4cf   : > { %v8118_v59 = vsel %vm8091_vm8, %v7765_v12, %v8117_v11  ;;  %v7781_v37 = vrot.slane %v7780_v5, 4  ;;  %v7787_v54 = vsel %vm7576_vm4, %v7373_v49, -inf  ;;  %v7202_v38 = vmax.f32 %v7200_v29, %v7201_v17  ;;  %v6994_v29 = vpop.f32.mrf.mxu1 }
 0x4d0   : > { %v7775_v48 = vmax.f32 %v7773_v57, %v7774_v30  ;;  %v7788_v20 = vrot.slane %v7787_v54, 4  ;;  %v7794_v19 = vsel %vm7576_vm4, %v7375_v24, -inf  ;;  %v8119_v60 = vsel %vm8093_vm11, %v7772_v1, %v8118_v59 }
 0x4d1   : > { %v7782_v21 = vmax.f32 %v7780_v5, %v7781_v37  ;;  %v7795_v2 = vrot.slane %v7794_v19, 4  ;;  %v7376_v31 = vcombine.high %v7202_v38, %v7202_v38  ;;  %v7383_v50 = vrot.slane %v7202_v38, %v13259_v42 }
 0x4d2   : > { %v7776_v22 = vrot.slane %v7775_v48, 2  ;;  %v7789_v28 = vmax.f32 %v7787_v54, %v7788_v20  ;;  %v7058_v6 = vadd.f32 %v6981_v47, %v13324_v45  ;;  %v7063_v55 = vadd.f32 %v9716_v39, %v13328_v8 }
 0x4d3   : > { %v7783_v62 = vrot.slane %v7782_v21, 2  ;;  %v7796_v52 = vmax.f32 %v7794_v19, %v7795_v2  ;;  %v7390_v61 = vrot.slane %v7376_v31, %v13259_v42  ;;  %v7391_v46 = vcombine.high %v7383_v50, %v7383_v50 }
 0x4d4   : > { %v7777_v33 = vmax.f32 %v7775_v48, %v7776_v22  ;;  %v7790_v36 = vrot.slane %v7789_v28, 2  ;;  %v7801_v35 = vsel %vm7576_vm4, %v7383_v50, -inf  ;;  %v7097_v15 = vadd.f32 %v13256_v53, %v7058_v6  ;;  %v9717_v50 = vpop.f32.mrf.mxu1 }
 0x4d5   : > { %v7784_v40 = vmax.f32 %v7782_v21, %v7783_v62  ;;  %v7797_v44 = vrot.slane %v7796_v52, 2  ;;  %v7392_v63 = vcombine.high %v7390_v61, %v7390_v61  ;;  %v7802_v32 = vrot.slane %v7801_v35, 4 }
 0x4d6   : > { %v7778_v0 = vrot.slane %v7777_v33, 1  ;;  %v7791_v41 = vmax.f32 %v7789_v28, %v7790_v36  ;;  %v7808_v45 = vsel %vm7576_vm4, %v7391_v46, -inf  ;;  %v7815_v8 = vsel %vm7576_vm4, %v7390_v61, -inf }
 0x4d7   : > { %v7785_v25 = vrot.slane %v7784_v40, 1  ;;  %v7798_v26 = vmax.f32 %v7796_v52, %v7797_v44  ;;  %v7803_v17 = vmax.f32 %v7801_v35, %v7802_v32  ;;  %v7809_v10 = vrot.slane %v7808_v45, 4 }
 0x4d8   : > { %v7779_v4 = vmax.f32 %v7777_v33, %v7778_v0  ;;  %v7792_v47 = vrot.slane %v7791_v41, 1  ;;  %v7816_v23 = vrot.slane %v7815_v8, 4  ;;  %v7822_v12 = vsel %vm7576_vm4, %v7392_v63, -inf }
 0x4d9   : > { %v7786_v49 = vmax.f32 %v7784_v40, %v7785_v25  ;;  %v7799_v16 = vrot.slane %v7798_v26, 1  ;;  %v7804_v1 = vrot.slane %v7803_v17, 2  ;;  %v7810_v57 = vmax.f32 %v7808_v45, %v7809_v10 }
 0x4da   : > { %v7793_v11 = vmax.f32 %v7791_v41, %v7792_v47  ;;  %v8120_v24 = vsel %vm8095_vm12, %v7779_v4, %v8119_v60  ;;  %v7817_v30 = vmax.f32 %v7815_v8, %v7816_v23  ;;  %v7823_v5 = vrot.slane %v7822_v12, 4 }
 0x4db   : > { %v7800_v59 = vmax.f32 %v7798_v26, %v7799_v16  ;;  %v8121_v37 = vsel %vm8097_vm13, %v7786_v49, %v8120_v24  ;;  %v7805_v54 = vmax.f32 %v7803_v17, %v7804_v1  ;;  %v7811_v38 = vrot.slane %v7810_v57, 2  ;;  %v13579_v26 = vpop.f32.mrf.mxu1 }
 0x4dc   : > { %v8122_v39 = vsel %vm8099_vm14, %v7793_v11, %v8121_v37  ;;  %v7818_v48 = vrot.slane %v7817_v30, 2  ;;  %v7824_v20 = vmax.f32 %v7822_v12, %v7823_v5  ;;  %v7129_v19 = vmax.f32 %v7097_v15, 0.0 }
 0x4dd   : > { %v8123_v21 = vsel %vm8101_vm15, %v7800_v59, %v8122_v39  ;;  %v7806_v2 = vrot.slane %v7805_v54, 1  ;;  %v7812_v31 = vmax.f32 %v7810_v57, %v7811_v38  ;;  %v7102_v60 = vadd.f32 %v13256_v53, %v7063_v55  ;;  %v9720_v37 = vpop.f32.mrf.mxu1 }
 0x4de   : > { %8163 = vst.msk [vmem:[%s13425_s26 + $0x18] sm:$0xff] %vm4835_vm3, %v8123_v21  ;;  %v7819_v22 = vmax.f32 %v7817_v30, %v7818_v48  ;;  %v7825_v28 = vrot.slane %v7824_v20, 2  ;;  %7161 = vst.msk [vmem:[%s13291_s18 + $0x88] sm:$0xff] %vm4835_vm3, %v7129_v19  ;;  %v7203_v6 = vsel %vm4835_vm3, %v7129_v19, -inf  ;;  %v7061_v62 = vadd.f32 %v6994_v29, %v13335_v14 }
 0x4df   : > { %v7807_v52 = vmax.f32 %v7805_v54, %v7806_v2  ;;  %v7813_v61 = vrot.slane %v7812_v31, 1  ;;  %v7205_v46 = vmax.f32 %v7203_v6, %v13535_v56  ;;  %v7134_v33 = vmax.f32 %v7102_v60, 0.0  ;;  %v13573_v56 = vld [vmem:[%s13775_s4] ss:$0 sm:$0xff] }
 0x4e0   : > { %v7820_v36 = vrot.slane %v7819_v22, 1  ;;  %v7826_v35 = vmax.f32 %v7824_v20, %v7825_v28  ;;  %v7100_v55 = vadd.f32 %v13256_v53, %v7061_v62  ;;  %v7064_v15 = vadd.f32 %v9717_v50, %v13340_v34 }
 0x4e1   : > { %v7814_v40 = vmax.f32 %v7812_v31, %v7813_v61  ;;  %v7393_v44 = vcombine.high %v7205_v46, %v7205_v46  ;;  %v7400_v63 = vrot.slane %v7205_v46, %v13259_v42  ;;  %7166 = vst.msk [vmem:[%s13291_s18 + $0xb0] sm:$0xff] %vm4835_vm3, %v7134_v33  ;;  %v7207_v14 = vsel %vm4835_vm3, %v7134_v33, -inf  ;;  %v7010_v61 = vpop.f32.mrf.mxu1 }
 0x4e2   : > { %v7821_v32 = vmax.f32 %v7819_v22, %v7820_v36  ;;  %v7827_v0 = vrot.slane %v7826_v35, 1  ;;  %v7132_v41 = vmax.f32 %v7100_v55, 0.0  ;;  %v7103_v53 = vadd.f32 %v13573_v56, %v7064_v15 }
 0x4e3   : > { %v8124_v34 = vsel %vm8089_vm6, %v7814_v40, %v7807_v52  ;;  %v7407_v45 = vrot.slane %v7393_v44, %v13259_v42  ;;  %v7408_v8 = vcombine.high %v7400_v63, %v7400_v63  ;;  %v7829_v25 = vsel %vm7576_vm4, %v7400_v63, -inf }
 0x4e4   : > { %v7828_v17 = vmax.f32 %v7826_v35, %v7827_v0  ;;  %v8125_v10 = vsel %vm8091_vm8, %v7821_v32, %v8124_v34  ;;  %v7830_v4 = vrot.slane %v7829_v25, 4  ;;  %7164 = vst.msk [vmem:[%s13291_s18 + $0xa0] sm:$0xff] %vm4835_vm3, %v7132_v41  ;;  %v7206_v47 = vsel %vm4835_vm3, %v7132_v41, -inf }
 0x4e5   : > { %v7409_v23 = vcombine.high %v7407_v45, %v7407_v45  ;;  %v7836_v12 = vsel %vm7576_vm4, %v7408_v8, -inf  ;;  %v7843_v49 = vsel %vm7576_vm4, %v7407_v45, -inf  ;;  %v7208_v16 = vmax.f32 %v7206_v47, %v7207_v14  ;;  %v9721_v8 = vpop.f32.mrf.mxu1 }
 0x4e6   : > { %v7831_v1 = vmax.f32 %v7829_v25, %v7830_v4  ;;  %v7837_v57 = vrot.slane %v7836_v12, 4  ;;  %v7844_v29 = vrot.slane %v7843_v49, 4  ;;  %v8126_v11 = vsel %vm8093_vm11, %v7828_v17, %v8125_v10 }
 0x4e7   : > { %v7850_v24 = vsel %vm7576_vm4, %v7409_v23, -inf  ;;  %v7410_v30 = vcombine.high %v7208_v16, %v7208_v16  ;;  %v7417_v5 = vrot.slane %v7208_v16, %v13259_v42  ;;  %v7135_v59 = vmax.f32 %v7103_v53, 0.0 }
 0x4e8   : > { %v7832_v54 = vrot.slane %v7831_v1, 2  ;;  %v7838_v38 = vmax.f32 %v7836_v12, %v7837_v57  ;;  %v7845_v39 = vmax.f32 %v7843_v49, %v7844_v29  ;;  %v7851_v48 = vrot.slane %v7850_v24, 4 }
 0x4e9   : > { %v7424_v20 = vrot.slane %v7410_v30, %v13259_v42  ;;  %v7425_v19 = vcombine.high %v7417_v5, %v7417_v5  ;;  %v7857_v21 = vsel %vm7576_vm4, %v7417_v5, -inf  ;;  %7167 = vst.msk [vmem:[%s13291_s18 + $0xb8] sm:$0xff] %vm4835_vm3, %v7135_v59  ;;  %v13595_v2 = vsel %vm4835_vm3, %v7135_v59, -inf }
 0x4ea   : > { %v7833_v31 = vmax.f32 %v7831_v1, %v7832_v54  ;;  %v7839_v60 = vrot.slane %v7838_v38, 2  ;;  %v7846_v50 = vrot.slane %v7845_v39, 2  ;;  %v7852_v22 = vmax.f32 %v7850_v24, %v7851_v48  ;;  %v7013_v54 = vpop.f32.mrf.mxu1 }
 0x4eb   : > { %v7426_v28 = vcombine.high %v7424_v20, %v7424_v20  ;;  %v7858_v6 = vrot.slane %v7857_v21, 4  ;;  %v7864_v62 = vsel %vm7576_vm4, %v7425_v19, -inf  ;;  %v7871_v52 = vsel %vm7576_vm4, %v7424_v20, -inf }
 0x4ec   : > { %v7834_v46 = vrot.slane %v7833_v31, 1  ;;  %v7840_v33 = vmax.f32 %v7838_v38, %v7839_v60  ;;  %v7847_v36 = vmax.f32 %v7845_v39, %v7846_v50  ;;  %v7853_v35 = vrot.slane %v7852_v22, 2 }
 0x4ed   : > { %v7859_v55 = vmax.f32 %v7857_v21, %v7858_v6  ;;  %v7865_v15 = vrot.slane %v7864_v62, 4  ;;  %v7872_v40 = vrot.slane %v7871_v52, 4  ;;  %v7878_v44 = vsel %vm7576_vm4, %v7426_v28, -inf  ;;  %v9724_v6 = vpop.f32.mrf.mxu1 }
 0x4ee   : > { %v7835_v63 = vmax.f32 %v7833_v31, %v7834_v46  ;;  %v7841_v14 = vrot.slane %v7840_v33, 1  ;;  %v7848_v32 = vrot.slane %v7847_v36, 1  ;;  %v7854_v0 = vmax.f32 %v7852_v22, %v7853_v35 }
 0x4ef   : > { %v7860_v41 = vrot.slane %v7859_v55, 2  ;;  %v7866_v53 = vmax.f32 %v7864_v62, %v7865_v15  ;;  %v7873_v34 = vmax.f32 %v7871_v52, %v7872_v40  ;;  %v7879_v45 = vrot.slane %v7878_v44, 4 }
 0x4f0   : > { %v7842_v25 = vmax.f32 %v7840_v33, %v7841_v14  ;;  %v7849_v17 = vmax.f32 %v7847_v36, %v7848_v32  ;;  %v7855_v10 = vrot.slane %v7854_v0, 1  ;;  %v8127_v4 = vsel %vm8095_vm12, %v7835_v63, %v8126_v11 }
 0x4f1   : > { %v7861_v47 = vmax.f32 %v7859_v55, %v7860_v41  ;;  %v7867_v23 = vrot.slane %v7866_v53, 2  ;;  %v7874_v12 = vrot.slane %v7873_v34, 2  ;;  %v7880_v49 = vmax.f32 %v7878_v44, %v7879_v45 }
 0x4f2   : > { %v7856_v16 = vmax.f32 %v7854_v0, %v7855_v10  ;;  %v8128_v1 = vsel %vm8097_vm13, %v7842_v25, %v8127_v4  ;;  %v7062_v57 = vadd.f32 %v13579_v26, %v13344_v3  ;;  %v7067_v29 = vadd.f32 %v9720_v37, %v13348_v7 }
 0x4f3   : > { %v8129_v24 = vsel %vm8099_vm14, %v7849_v17, %v8128_v1  ;;  %v7862_v30 = vrot.slane %v7861_v47, 1  ;;  %v7868_v5 = vmax.f32 %v7866_v53, %v7867_v23  ;;  %v7875_v59 = vmax.f32 %v7873_v34, %v7874_v12 }
 0x4f4   : > { %v8130_v11 = vsel %vm8101_vm15, %v7856_v16, %v8129_v24  ;;  %v7881_v38 = vrot.slane %v7880_v49, 2  ;;  %v7101_v39 = vadd.f32 %v13573_v56, %v7062_v57  ;;  %v7106_v48 = vadd.f32 %v13573_v56, %v7067_v29 }
 0x4f5   : > { %8164 = vst.msk [vmem:[%s13425_s26 + $0x20] sm:$0xff] %vm4835_vm3, %v8130_v11  ;;  %v7863_v20 = vmax.f32 %v7861_v47, %v7862_v30  ;;  %v7869_v3 = vrot.slane %v7868_v5, 1  ;;  %v7876_v7 = vrot.slane %v7875_v59, 1  ;;  %v7065_v26 = vadd.f32 %v7010_v61, %v13356_v9 }
 0x4f6   : > { %v7882_v37 = vmax.f32 %v7880_v49, %v7881_v38  ;;  %v7133_v19 = vmax.f32 %v7101_v39, 0.0  ;;  %v7138_v21 = vmax.f32 %v7106_v48, 0.0  ;;  %v7068_v31 = vadd.f32 %v9721_v8, %v13359_v43 }
 0x4f7   : > { %v7870_v60 = vmax.f32 %v7868_v5, %v7869_v3  ;;  %v7877_v50 = vmax.f32 %v7875_v59, %v7876_v7  ;;  %v7104_v22 = vadd.f32 %v13573_v56, %v7065_v26  ;;  %v7066_v28 = vadd.f32 %v7013_v54, %v13362_v27 }
 0x4f8   : > { %v7883_v62 = vrot.slane %v7882_v37, 1  ;;  %7165 = vst.msk [vmem:[%s13291_s18 + $0xa8] sm:$0xff] %vm4835_vm3, %v7133_v19  ;;  %v7209_v52 = vsel %vm4835_vm3, %v7133_v19, -inf  ;;  %7170 = vst.msk [vmem:[%s13291_s18 + $0xd0] sm:$0xff] %vm4835_vm3, %v7138_v21  ;;  %v7213_v9 = vsel %vm4835_vm3, %v7138_v21, -inf  ;;  %v7107_v61 = vadd.f32 %v13573_v56, %v7068_v31 }
 0x4f9   : > { %v8131_v43 = vsel %vm8089_vm6, %v7870_v60, %v7863_v20  ;;  %v7211_v46 = vmax.f32 %v7209_v52, %v13595_v2  ;;  %v7136_v33 = vmax.f32 %v7104_v22, 0.0  ;;  %v7105_v27 = vadd.f32 %v13573_v56, %v7066_v28 }
 0x4fa   : > { %v7884_v36 = vmax.f32 %v7882_v37, %v7883_v62  ;;  %v8132_v35 = vsel %vm8091_vm8, %v7877_v50, %v8131_v43  ;;  %v7139_v55 = vmax.f32 %v7107_v61, 0.0  ;;  %v7071_v15 = vadd.f32 %v9724_v6, %v13365_v58 }
 0x4fb   : > { %v7427_v40 = vcombine.high %v7211_v46, %v7211_v46  ;;  %v7434_v44 = vrot.slane %v7211_v46, %v13259_v42  ;;  %7168 = vst.msk [vmem:[%s13291_s18 + $0xc0] sm:$0xff] %vm4835_vm3, %v7136_v33  ;;  %v7212_v63 = vsel %vm4835_vm3, %v7136_v33, -inf  ;;  %v7137_v14 = vmax.f32 %v7105_v27, 0.0 }
 0x4fc   : > { %v13632_v2 = vsel %vm8093_vm11, %v7884_v36, %v8132_v35  ;;  %v7214_v32 = vmax.f32 %v7212_v63, %v7213_v9  ;;  %7171 = vst.msk [vmem:[%s13291_s18 + $0xd8] sm:$0xff] %vm4835_vm3, %v7139_v55  ;;  %v7216_v0 = vsel %vm4835_vm3, %v7139_v55, -inf  ;;  %v13638_v41 = vadd.f32 %v13573_v56, %v7071_v15 }
 0x4fd   : > { %v7441_v58 = vrot.slane %v7427_v40, %v13259_v42  ;;  %v7442_v53 = vcombine.high %v7434_v44, %v7434_v44  ;;  %v7885_v34 = vsel %vm7576_vm4, %v7434_v44, -inf  ;;  %7169 = vst.msk [vmem:[%s13291_s18 + $0xc8] sm:$0xff] %vm4835_vm3, %v7137_v14  ;;  %v7215_v45 = vsel %vm4835_vm3, %v7137_v14, -inf  ;;  %v7026_v44 = vpop.f32.mrf.mxu1 }
 0x4fe   : > { %v7886_v8 = vrot.slane %v7885_v34, 4  ;;  %v7444_v25 = vcombine.high %v7214_v32, %v7214_v32  ;;  %v7451_v17 = vrot.slane %v7214_v32, %v13259_v42  ;;  %v7217_v10 = vmax.f32 %v7215_v45, %v7216_v0 }
 0x4ff   : > { %v7443_v4 = vcombine.high %v7441_v58, %v7441_v58  ;;  %v7892_v47 = vsel %vm7576_vm4, %v7442_v53, -inf  ;;  %v7899_v23 = vsel %vm7576_vm4, %v7441_v58, -inf  ;;  %v7142_v12 = vmax.f32 %v13638_v41, 0.0  ;;  %v9691_v58 = vpop.f32.mrf.mxu0 }
 0x500   : > { %v7887_v49 = vmax.f32 %v7885_v34, %v7886_v8  ;;  %v7893_v16 = vrot.slane %v7892_v47, 4  ;;  %v7900_v1 = vrot.slane %v7899_v23, 4  ;;  %v7458_v57 = vrot.slane %v7444_v25, %v13259_v42 }
 0x501   : > { %v7906_v29 = vsel %vm7576_vm4, %v7443_v4, -inf  ;;  %v7459_v24 = vcombine.high %v7451_v17, %v7451_v17  ;;  %v7913_v30 = vsel %vm7576_vm4, %v7451_v17, -inf  ;;  %v7461_v5 = vcombine.high %v7217_v10, %v7217_v10  ;;  %7174 = vst.msk [vmem:[%s13291_s18 + $0xf0] sm:$0xff] %vm4835_vm3, %v7142_v12 }
 0x502   : > { %v7888_v59 = vrot.slane %v7887_v49, 2  ;;  %v7894_v54 = vmax.f32 %v7892_v47, %v7893_v16  ;;  %v7901_v11 = vmax.f32 %v7899_v23, %v7900_v1  ;;  %v7907_v38 = vrot.slane %v7906_v29, 4 }
 0x503   : > { %v7460_v39 = vcombine.high %v7458_v57, %v7458_v57  ;;  %v7914_v48 = vrot.slane %v7913_v30, 4  ;;  %v7920_v20 = vsel %vm7576_vm4, %v7459_v24, -inf  ;;  %v7927_v3 = vsel %vm7576_vm4, %v7458_v57, -inf  ;;  %v9725_v57 = vpop.f32.mrf.mxu1 }
 0x504   : > { %v7889_v7 = vmax.f32 %v7887_v49, %v7888_v59  ;;  %v7895_v26 = vrot.slane %v7894_v54, 2  ;;  %v7902_v37 = vrot.slane %v7901_v11, 2  ;;  %v7908_v19 = vmax.f32 %v7906_v29, %v7907_v38  ;;  %v6816_v59 = vpop.f32.mrf.mxu0 }
 0x505   : > { %v7915_v21 = vmax.f32 %v7913_v30, %v7914_v48  ;;  %v7921_v31 = vrot.slane %v7920_v20, 4  ;;  %v7928_v60 = vrot.slane %v7927_v3, 4  ;;  %v7934_v50 = vsel %vm7576_vm4, %v7460_v39, -inf }
 0x506   : > { %v7890_v22 = vrot.slane %v7889_v7, 1  ;;  %v7896_v28 = vmax.f32 %v7894_v54, %v7895_v26  ;;  %v7903_v6 = vmax.f32 %v7901_v11, %v7902_v37  ;;  %v7909_v62 = vrot.slane %v7908_v19, 2 }
 0x507   : > { %v7916_v52 = vrot.slane %v7915_v21, 2  ;;  %v7922_v9 = vmax.f32 %v7920_v20, %v7921_v31  ;;  %v7929_v61 = vmax.f32 %v7927_v3, %v7928_v60  ;;  %v7935_v43 = vrot.slane %v7934_v50, 4 }
 0x508   : > { %v7891_v46 = vmax.f32 %v7889_v7, %v7890_v22  ;;  %v7897_v33 = vrot.slane %v7896_v28, 1  ;;  %v7904_v27 = vrot.slane %v7903_v6, 1  ;;  %v7910_v36 = vmax.f32 %v7908_v19, %v7909_v62  ;;  %v7029_v19 = vpop.f32.mrf.mxu1 }
 0x509   : > { %v7917_v35 = vmax.f32 %v7915_v21, %v7916_v52  ;;  %v7923_v55 = vrot.slane %v7922_v9, 2  ;;  %v7930_v15 = vrot.slane %v7929_v61, 2  ;;  %v7936_v40 = vmax.f32 %v7934_v50, %v7935_v43 }
 0x50a   : > { %v7898_v63 = vmax.f32 %v7896_v28, %v7897_v33  ;;  %v7905_v14 = vmax.f32 %v7903_v6, %v7904_v27  ;;  %v7911_v32 = vrot.slane %v7910_v36, 1  ;;  %v8134_v0 = vsel %vm8095_vm12, %v7891_v46, %v13632_v2 }
 0x50b   : > { %v7918_v53 = vrot.slane %v7917_v35, 1  ;;  %v7924_v34 = vmax.f32 %v7922_v9, %v7923_v55  ;;  %v7931_v45 = vmax.f32 %v7929_v61, %v7930_v15  ;;  %v7937_v8 = vrot.slane %v7936_v40, 2 }
 0x50c   : > { %v7912_v25 = vmax.f32 %v7910_v36, %v7911_v32  ;;  %v8135_v17 = vsel %vm8097_vm13, %v7898_v63, %v8134_v0  ;;  %v7468_v4 = vrot.slane %v7217_v10, %v13259_v42  ;;  %v7475_v47 = vrot.slane %v7461_v5, %v13259_v42 }
 0x50d   : > { %v8136_v23 = vsel %vm8099_vm14, %v7905_v14, %v8135_v17  ;;  %v7919_v49 = vmax.f32 %v7917_v35, %v7918_v53  ;;  %v7925_v16 = vrot.slane %v7924_v34, 1  ;;  %v7932_v1 = vrot.slane %v7931_v45, 1 }
 0x50e   : > { %v8137_v2 = vsel %vm8101_vm15, %v7912_v25, %v8136_v23  ;;  %v7938_v29 = vmax.f32 %v7936_v40, %v7937_v8  ;;  %v7476_v24 = vcombine.high %v7468_v4, %v7468_v4  ;;  %v7477_v30 = vcombine.high %v7475_v47, %v7475_v47 }
 0x50f   : > { %8165 = vst.msk [vmem:[%s13425_s26 + $0x28] sm:$0xff] %vm4835_vm3, %v8137_v2  ;;  %v7926_v54 = vmax.f32 %v7924_v34, %v7925_v16  ;;  %v7933_v11 = vmax.f32 %v7931_v45, %v7932_v1  ;;  %v7941_v10 = vsel %vm7576_vm4, %v7468_v4, -inf  ;;  %v7955_v5 = vsel %vm7576_vm4, %v7475_v47, -inf }
 0x510   : > { %v7939_v38 = vrot.slane %v7938_v29, 1  ;;  %v7942_v39 = vrot.slane %v7941_v10, 4  ;;  %v7948_v48 = vsel %vm7576_vm4, %v7476_v24, -inf  ;;  %v7956_v20 = vrot.slane %v7955_v5, 4 }
 0x511   : > { %v6859_v3 = vadd.f32 %v9691_v58, %v13246_v18  ;;  %v8138_v7 = vsel %vm8089_vm6, %v7926_v54, %v7919_v49  ;;  %v7949_v26 = vrot.slane %v7948_v48, 4  ;;  %v7962_v37 = vsel %vm7576_vm4, %v7477_v30, -inf }
 0x512   : > { %v6857_v21 = vadd.f32 %v6816_v59, %v13250_v51  ;;  %v7940_v31 = vmax.f32 %v7938_v29, %v7939_v38  ;;  %v7943_v60 = vmax.f32 %v7941_v10, %v7942_v39  ;;  %v7957_v50 = vmax.f32 %v7955_v5, %v7956_v20 }
 0x513   : > { %v7950_v22 = vmax.f32 %v7948_v48, %v7949_v26  ;;  %v7963_v28 = vrot.slane %v7962_v37, 4  ;;  %v7069_v6 = vadd.f32 %v7026_v44, %v13371_v13  ;;  %v7072_v62 = vadd.f32 %v9725_v57, %v6859_v3 }
 0x514   : > { %v8139_v52 = vsel %vm8091_vm8, %v7933_v11, %v8138_v7  ;;  %v7944_v9 = vrot.slane %v7943_v60, 2  ;;  %v7958_v18 = vrot.slane %v7957_v50, 2  ;;  %v7070_v61 = vadd.f32 %v7029_v19, %v6857_v21 }
 0x515   : > { %v7951_v43 = vrot.slane %v7950_v22, 2  ;;  %v7964_v46 = vmax.f32 %v7962_v37, %v7963_v28  ;;  %v7108_v33 = vadd.f32 %v13573_v56, %v7069_v6  ;;  %v7111_v51 = vadd.f32 %v13573_v56, %v7072_v62 }
 0x516   : > { %v7945_v27 = vmax.f32 %v7943_v60, %v7944_v9  ;;  %v7959_v36 = vmax.f32 %v7957_v50, %v7958_v18  ;;  %v7219_v13 = vsel %vm4835_vm3, %v7142_v12, -inf  ;;  %v7109_v35 = vadd.f32 %v13573_v56, %v7070_v61 }
 0x517   : > { %v7952_v55 = vmax.f32 %v7950_v22, %v7951_v43  ;;  %v7965_v15 = vrot.slane %v7964_v46, 2  ;;  %v7140_v40 = vmax.f32 %v7108_v33, 0.0  ;;  %v7143_v44 = vmax.f32 %v7111_v51, 0.0 }
 0x518   : > { %v7946_v63 = vrot.slane %v7945_v27, 1  ;;  %v7960_v14 = vrot.slane %v7959_v36, 1  ;;  %v8140_v32 = vsel %vm8093_vm11, %v7940_v31, %v8139_v52  ;;  %v7141_v0 = vmax.f32 %v7109_v35, 0.0 }
 0x519   : > { %v7953_v58 = vrot.slane %v7952_v55, 1  ;;  %v7966_v53 = vmax.f32 %v7964_v46, %v7965_v15  ;;  %7172 = vst.msk [vmem:[%s13291_s18 + $0xe0] sm:$0xff] %vm4835_vm3, %v7140_v40  ;;  %v7218_v41 = vsel %vm4835_vm3, %v7140_v40, -inf  ;;  %7175 = vst.msk [vmem:[%s13291_s18 + $0xf8] sm:$0xff] %vm4835_vm3, %v7143_v44  ;;  %v7222_v56 = vsel %vm4835_vm3, %v7143_v44, -inf }
 0x51a   : > { %v7947_v12 = vmax.f32 %v7945_v27, %v7946_v63  ;;  %v7961_v34 = vmax.f32 %v7959_v36, %v7960_v14  ;;  %v7220_v45 = vmax.f32 %v7218_v41, %v7219_v13  ;;  %7173 = vst.msk [vmem:[%s13291_s18 + $0xe8] sm:$0xff] %vm4835_vm3, %v7141_v0  ;;  %v7221_v8 = vsel %vm4835_vm3, %v7141_v0, -inf }
 0x51b   : > { %v7954_v25 = vmax.f32 %v7952_v55, %v7953_v58  ;;  %v7967_v17 = vrot.slane %v7966_v53, 1  ;;  %v7223_v4 = vmax.f32 %v7221_v8, %v7222_v56 }
 0x51c   : > { %v8141_v47 = vsel %vm8095_vm12, %v7947_v12, %v8140_v32  ;;  %v7478_v23 = vcombine.high %v7220_v45, %v7220_v45  ;;  %v7485_v49 = vrot.slane %v7220_v45, %v13259_v42 }
 0x51d   : > { %v7968_v16 = vmax.f32 %v7966_v53, %v7967_v17  ;;  %v8142_v1 = vsel %vm8097_vm13, %v7954_v25, %v8141_v47  ;;  %v7495_v57 = vcombine.high %v7223_v4, %v7223_v4  ;;  %v7502_v2 = vrot.slane %v7223_v4, %v13259_v42 }
 0x51e   : > { %v8143_v29 = vsel %vm8099_vm14, %v7961_v34, %v8142_v1  ;;  %v7492_v24 = vrot.slane %v7478_v23, %v13259_v42  ;;  %v7493_v30 = vcombine.high %v7485_v49, %v7485_v49  ;;  %v7969_v59 = vsel %vm7576_vm4, %v7485_v49, -inf }
 0x51f   : > { %v8144_v54 = vsel %vm8101_vm15, %v7968_v16, %v8143_v29  ;;  %v7970_v11 = vrot.slane %v7969_v59, 4  ;;  %v7509_v10 = vrot.slane %v7495_v57, %v13259_v42  ;;  %v7510_v5 = vcombine.high %v7502_v2, %v7502_v2 }
 0x520   : > { %8166 = vst.msk [vmem:[%s13425_s26 + $0x30] sm:$0xff] %vm4835_vm3, %v8144_v54  ;;  %v7494_v38 = vcombine.high %v7492_v24, %v7492_v24  ;;  %v7976_v39 = vsel %vm7576_vm4, %v7493_v30, -inf  ;;  %v7983_v48 = vsel %vm7576_vm4, %v7492_v24, -inf  ;;  %v7997_v20 = vsel %vm7576_vm4, %v7502_v2, -inf }
 0x521   : > { %v7971_v3 = vmax.f32 %v7969_v59, %v7970_v11  ;;  %v7977_v7 = vrot.slane %v7976_v39, 4  ;;  %v7984_v26 = vrot.slane %v7983_v48, 4  ;;  %v7511_v37 = vcombine.high %v7509_v10, %v7509_v10 }
 0x522   : > { %v7990_v19 = vsel %vm7576_vm4, %v7494_v38, -inf  ;;  %v7998_v21 = vrot.slane %v7997_v20, 4  ;;  %v8004_v31 = vsel %vm7576_vm4, %v7510_v5, -inf  ;;  %v8011_v42 = vsel %vm7576_vm4, %v7509_v10, -inf }
 0x523   : > { %v7972_v60 = vrot.slane %v7971_v3, 2  ;;  %v7978_v50 = vmax.f32 %v7976_v39, %v7977_v7  ;;  %v7985_v22 = vmax.f32 %v7983_v48, %v7984_v26  ;;  %v7991_v28 = vrot.slane %v7990_v19, 4 }
 0x524   : > { %v7999_v6 = vmax.f32 %v7997_v20, %v7998_v21  ;;  %v8005_v62 = vrot.slane %v8004_v31, 4  ;;  %v8012_v52 = vrot.slane %v8011_v42, 4  ;;  %v8018_v9 = vsel %vm7576_vm4, %v7511_v37, -inf }
 0x525   : > { %v7973_v18 = vmax.f32 %v7971_v3, %v7972_v60  ;;  %v7979_v61 = vrot.slane %v7978_v50, 2  ;;  %v7986_v43 = vrot.slane %v7985_v22, 2  ;;  %v7992_v46 = vmax.f32 %v7990_v19, %v7991_v28 }
 0x526   : > { %v8000_v33 = vrot.slane %v7999_v6, 2  ;;  %v8006_v51 = vmax.f32 %v8004_v31, %v8005_v62  ;;  %v8013_v27 = vmax.f32 %v8011_v42, %v8012_v52  ;;  %v8019_v36 = vrot.slane %v8018_v9, 4 }
 0x527   : > { %v7974_v13 = vrot.slane %v7973_v18, 1  ;;  %v7980_v35 = vmax.f32 %v7978_v50, %v7979_v61  ;;  %v7987_v55 = vmax.f32 %v7985_v22, %v7986_v43  ;;  %v7993_v15 = vrot.slane %v7992_v46, 2 }
 0x528   : > { %v8001_v40 = vmax.f32 %v7999_v6, %v8000_v33  ;;  %v8007_v44 = vrot.slane %v8006_v51, 2  ;;  %v8014_v63 = vrot.slane %v8013_v27, 2  ;;  %v8020_v14 = vmax.f32 %v8018_v9, %v8019_v36 }
 0x529   : > { %v7981_v32 = vrot.slane %v7980_v35, 1  ;;  %v7988_v0 = vrot.slane %v7987_v55, 1  ;;  %v7994_v58 = vmax.f32 %v7992_v46, %v7993_v15  ;;  %v7975_v34 = vmax.f32 %v7973_v18, %v7974_v13 }
 0x52a   : > { %v8002_v53 = vrot.slane %v8001_v40, 1  ;;  %v8008_v41 = vmax.f32 %v8006_v51, %v8007_v44  ;;  %v8015_v56 = vmax.f32 %v8013_v27, %v8014_v63  ;;  %v8021_v12 = vrot.slane %v8020_v14, 2 }
 0x52b   : > { %v7982_v45 = vmax.f32 %v7980_v35, %v7981_v32  ;;  %v7989_v8 = vmax.f32 %v7987_v55, %v7988_v0  ;;  %v7995_v25 = vrot.slane %v7994_v58, 1 }
 0x52c   : > { %v8003_v17 = vmax.f32 %v8001_v40, %v8002_v53  ;;  %v8009_v4 = vrot.slane %v8008_v41, 1  ;;  %v8016_v47 = vrot.slane %v8015_v56, 1  ;;  %v8022_v23 = vmax.f32 %v8020_v14, %v8021_v12 }
 0x52d   : > { %v7996_v49 = vmax.f32 %v7994_v58, %v7995_v25  ;;  %v8145_v16 = vsel %vm8089_vm6, %v7982_v45, %v7975_v34 }
 0x52e   : > { %v8146_v1 = vsel %vm8091_vm8, %v7989_v8, %v8145_v16  ;;  %v8010_v57 = vmax.f32 %v8008_v41, %v8009_v4  ;;  %v8017_v2 = vmax.f32 %v8015_v56, %v8016_v47  ;;  %v8023_v29 = vrot.slane %v8022_v23, 1 }
 0x52f   : > { %v8147_v24 = vsel %vm8093_vm11, %v7996_v49, %v8146_v1 }
 0x530   : > { %v8024_v30 = vmax.f32 %v8022_v23, %v8023_v29  ;;  %v8148_v59 = vsel %vm8095_vm12, %v8003_v17, %v8147_v24 }
 0x531   : > { %v8149_v54 = vsel %vm8097_vm13, %v8010_v57, %v8148_v59 }
 0x532   : > { %v8150_v11 = vsel %vm8099_vm14, %v8017_v2, %v8149_v54 }
 0x533   : > { %v8151_v10 = vsel %vm8101_vm15, %v8024_v30, %v8150_v11 }
 0x534   : > { %8167 = vst.msk [vmem:[%s13425_s26 + $0x38] sm:$0xff] %vm4835_vm3, %v8151_v10 }
 0x535   : > { %9857 = shalt.err (!%p9854_p3)
}
 0x536   : > { %s9858_s18 = scalar_lea.hbm %s13721_s13, 1024  ;;  %s9862_s26 = scalar_lea.hbm %s13777_s6, 2048 }
 0x537   : > { %p9859_p4 = scmp.ne.s32.totalorder %s13721_s13, %s9858_s18  ;;  %p9863_p9 = scmp.lt.s32.totalorder %s13721_s13, %s13777_s6 }
 0x538   : > { %p9864_p10 = scmp.lt.s32.totalorder %s9862_s26, %s9858_s18 }
 0x539   : > { %p9860_p7 = pnand %p9859_p4, %p9984_p5 }
 0x53a   : > { %p9865_p11 = por %p9864_p10, %p9863_p9 }
 0x53b   : > { %p9861_p8 = pneg %p9860_p7 }
 0x53d   : > { %p9866_p12 = pnand %p9865_p11, %p9861_p8 }
 0x53f   : > { %9869 = shalt.err (!%p9866_p12)
}
 0x540   : > { %s9909_s9 = smov 128   ;;  %s9910_s11 = smov 8  }
 0x541   : > { %9744 = dma.vmem_to_hbm [thread:$0]  (%p9984_p5), %s13723_s10, 1024, %s13721_s13, %s13731_s25, %s9909_s9, %s9909_s9, %s9910_s11  }
 0x542 PF: > { %p9750_p13 = scmp.ge.s32.totalorder %s9904_s24, 2  ;;  %s8213_s12 = sand.u32 1, %s9892_s21  }
 0x543   : > { %s8214_s14 = scalar_lea.sflag [#allocation5], %s8213_s12 }
 0x544   : > { %p9747_p0 = pnand %p9750_p13, %p9988_p6 }
 0x546   : > { %p9748_p1 = pneg %p9747_p0 }
 0x548   : > { %9887 = dma.done.wait (%p9748_p1), %s8214_s14, 1024  }
 0x549   : > { %9889 = vsyncadd (%p9748_p1), %s8214_s14, 4294966272  ;;  %p17_p2 = scmp.ge.s32.totalorder %s9971_s27, 4   ;;  %s14167_s21 = smov %s9896_s22 }
 0x54a   : > { %s14168_s22 = smov %s9900_s23  ;;  %s14169_s23 = smov %s9982_s30 }
 0x54b   : > { %s14170_s24 = smov %s9971_s27  ;;  %19 = sbr.rel (!%p17_p2) target bundleno = 3 (0x3), region = 107 }
 0x550   :  { %8219 = vsyncpa [#allocation5], 1 }
 0x551   :  { %8221 = vsyncpa [#allocation5 + $0x1], 1 }

</bundles_post_ra>
